<compile_context>
chip_gen: v7x
topology: tpu7x:2x2x1
jax: 0.10.0
libtpu: 0.0.40
codegen_flags: <defaults>
</compile_context>

<pallas_src>
import jax
import jax.numpy as jnp
from jax.scipy.linalg import block_diag
from jax.experimental import pallas as pl
from jax.experimental.pallas import tpu as pltpu

# ----------------------------- KAN constants -------------------------------
GRID_SIZE = 5
SPLINE_ORDER = 3
GRID_RANGE = (-1.0, 1.0)
_H = (GRID_RANGE[1] - GRID_RANGE[0]) / GRID_SIZE
GRID_PTS = tuple(GRID_RANGE[0] + _H * i
                 for i in range(-SPLINE_ORDER, GRID_SIZE + SPLINE_ORDER + 1))
NUM_BASES = GRID_SIZE + SPLINE_ORDER          # 8 cubic B-spline bases / feature
_N_INTERVALS = len(GRID_PTS) - 1              # 11 order-0 intervals


# ----------------------- in-kernel spline machinery -------------------------
def _order2_spline_bases(x, bounded):
    """u0 and the order-(SPLINE_ORDER-1) B-spline bases on the uniform KAN grid.

    Order-0 indicators are differences of step functions (one compare + cast
    per knot).  When `bounded` is True the caller guarantees x in [-1, 1]
    (tanh output), i.e. u0 in [3, 8], so bases that are statically zero are
    represented as None and never materialised."""
    f32 = jnp.float32
    u0 = (x - GRID_PTS[0]) * (1.0 / _H)       # knot j sits at u0 == j
    if bounded:
        u_lo = float(SPLINE_ORDER)            # 3.0
        u_hi = float(SPLINE_ORDER + GRID_SIZE)  # 8.0
    else:
        u_lo, u_hi = float("-inf"), float("inf")

    # step_j = 1{u0 >= j}; statically 1 below the lower bound, 0 above the upper
    steps = []
    for j in range(_N_INTERVALS + 1):
        if j <= u_lo:
            steps.append(1.0)
        elif j > u_hi:
            steps.append(0.0)
        else:
            steps.append((u0 >= float(j)).astype(f32))

    # order-0: basis_j = step_j - step_{j+1}
    bases = []
    for j in range(_N_INTERVALS):
        sj, sj1 = steps[j], steps[j + 1]
        if isinstance(sj, float) and isinstance(sj1, float):
            v = sj - sj1
            bases.append(None if v == 0.0 else jnp.full_like(u0, v))
        elif isinstance(sj1, float) and sj1 == 0.0:
            bases.append(sj)
        else:
            bases.append(sj - sj1)

    # Cox-de Boor on the uniform grid, specialised (no divides), orders 1..2.
    for k in range(1, SPLINE_ORDER):
        inv_k = 1.0 / k
        nxt = []
        for j in range(len(bases) - 1):
            bj, bj1 = bases[j], bases[j + 1]
            terms = []
            if bj is not None:
                terms.append((u0 - float(j)) * bj)
            if bj1 is not None:
                terms.append((float(k + j + 1) - u0) * bj1)
            if not terms:
                nxt.append(None)
            elif len(terms) == 1:
                nxt.append(terms[0] * inv_k)
            else:
                nxt.append((terms[0] + terms[1]) * inv_k)
        bases = nxt
    return u0, bases


def _kan_layer(x, w_ref, bounded):
    """One KANLinear layer (SiLU base branch + cubic B-spline branch).

    x: f32 (tn, din_p).  w_ref: (1 + NUM_BASES, din_p, dout_p) bf16 resident
    weights (base weight first, then the 8 per-basis spline weights).  Each
    basis is consumed by its matmul as soon as it is produced."""
    f32, bf16 = jnp.float32, jnp.bfloat16
    acc = jnp.dot(jax.nn.silu(x).astype(bf16), w_ref[0],
                  preferred_element_type=f32)
    u0, b2 = _order2_spline_bases(x, bounded)
    inv_k = 1.0 / SPLINE_ORDER
    for j in range(NUM_BASES):
        bj, bj1 = b2[j], b2[j + 1]
        terms = []
        if bj is not None:
            terms.append((u0 - float(j)) * bj)
        if bj1 is not None:
            terms.append((float(SPLINE_ORDER + j + 1) - u0) * bj1)
        if not terms:
            continue
        b3 = terms[0] if len(terms) == 1 else terms[0] + terms[1]
        acc = acc + jnp.dot((b3 * inv_k).astype(bf16), w_ref[j + 1],
                            preferred_element_type=f32)
    return acc


# ------------------------------- Pallas kernel ------------------------------
def make_mixer_kernel(Hp, use_roll_scan, n_scan_steps):
    f32, bf16 = jnp.float32, jnp.bfloat16

    def kernel(qkv_ref, mem_ref, wq_ref, wk_ref, wv_ref, ug_ref, c1_ref, c2_ref,
               cs_ref, wkan1_ref, wkan2_ref, tok_ref, mem_out_ref):
        qkv = qkv_ref[...]                       # bf16 (tn, 3*Hp), 128-aligned segments
        qseg = qkv[:, :Hp]
        kseg = qkv[:, Hp:2 * Hp]
        vseg = qkv[:, 2 * Hp:]

        # Per-head q/k/v projections (block-diagonal weights); the q weight
        # already contains the per-head inclusive cumsum fold (Wq^T @ upper_tri).
        queries_ = jnp.dot(qseg, wq_ref[...], preferred_element_type=f32)
        keys_ = jnp.dot(kseg, wk_ref[...], preferred_element_type=f32)
        values_ = jnp.dot(vseg, wv_ref[...], preferred_element_type=f32)

        # MHBAMixerV2MemoryMixer with gate algebra folded on the host:
        #   (1-fg)*(k*v + fg*m) + fg*m == c1*(k*v) + c2*m
        cm_pre = c1_ref[...] * (keys_ * values_) + c2_ref[...] * mem_ref[...]

        if use_roll_scan:
            # Per-head inclusive prefix sum along lanes: masked Hillis-Steele
            # scan (XLU roll + VALU) instead of a (hidden, hidden) MXU matmul.
            masks = cs_ref[...]                  # (n_steps, Hp) f32 boundary masks
            cm = cm_pre
            for t in range(n_scan_steps):
                cm = cm + masks[t:t + 1, :] * pltpu.roll(cm, shift=1 << t, axis=1)
            current_memorys = cm
        else:
            current_memorys = jnp.dot(cm_pre.astype(bf16), cs_ref[...],
                                      preferred_element_type=f32)

        cell_values = jnp.tanh((queries_ + current_memorys) * ug_ref[...]
                               + qseg.astype(f32))

        # tokenMixingKAN = KAN([hd, 2*hd, hd]) applied per head (block-diag).
        h = _kan_layer(cell_values, wkan1_ref, bounded=True)   # tanh-bounded input
        h = _kan_layer(h, wkan2_ref, bounded=False)
        tok_ref[...] = jnp.tanh(h + cell_values)
        mem_out_ref[...] = current_memorys

    return kernel


# -------------------------------- wrapper -----------------------------------
def _round_up(x, m):
    return ((x + m - 1) // m) * m


def _bd(block, n):
    """Block-diagonal replication of a per-head (din, dout) matrix."""
    return block_diag(*([block] * n))


def _pad2(a, rows, cols):
    return jnp.pad(a, ((0, rows - a.shape[0]), (0, cols - a.shape[1])))


def _kan_weight_stack(bw, sw_scaled, n_heads, din_p, dout_p):
    """[base | 8 spline] per-head weights -> (9, din_p, dout_p) bf16 stack."""
    mats = [_pad2(_bd(bw.T, n_heads), din_p, dout_p)]
    for k in range(NUM_BASES):
        mats.append(_pad2(_bd(sw_scaled[:, :, k].T, n_heads), din_p, dout_p))
    return jnp.stack(mats).astype(jnp.bfloat16)


def mhba_mixer_v2_block(queries, keys, values, memorys, p, n_heads,
                        row_tile=512, vmem_limit_bytes=48 * 1024 * 1024):
    bsz, seq, hidden = queries.shape
    hd = hidden // n_heads
    f32, bf16 = jnp.float32, jnp.bfloat16

    Hp = _round_up(hidden, 128)            # lane-dense segment width
    H2p = _round_up(2 * hidden, 128)
    n_rows = bsz * seq

    # rows = bsz*seq, lanes = hidden (head-major).  One tile when the whole
    # problem fits; otherwise stream row_tile rows per grid step.
    tn = max(8, min(_round_up(row_tile, 8), _round_up(n_rows, 8)))
    n_pad = _round_up(n_rows, tn)

    def to_rows(x, dtype):                 # (bsz, seq, hidden) -> (n_pad, Hp)
        x = x.reshape(n_rows, hidden).astype(dtype)
        return jnp.pad(x, ((0, n_pad - n_rows), (0, Hp - hidden)))

    qkv = jnp.concatenate([to_rows(queries, bf16), to_rows(keys, bf16),
                           to_rows(values, bf16)], axis=-1)      # (n_pad, 3*Hp)
    memf = to_rows(memorys.transpose(0, 2, 1, 3).reshape(bsz, seq, hidden), f32)

    # ---- parameter plumbing (plain-JAX glue, done once outside the kernel) ----
    tri = jnp.triu(jnp.ones((hd, hd), f32))                # inclusive cumsum matrix
    wq_bd = _pad2(_bd(p["wq"].T.astype(f32) @ tri, n_heads), Hp, Hp).astype(bf16)
    wk_bd = _pad2(_bd(p["wk"].T, n_heads), Hp, Hp).astype(bf16)
    wv_bd = _pad2(_bd(p["wv"].T, n_heads), Hp, Hp).astype(bf16)

    fg = jnp.tile(p["fg"], n_heads).astype(f32)            # head-major (hidden,)
    ug = jnp.pad(jnp.tile(p["ug"], n_heads).astype(f32),
                 (0, Hp - hidden)).reshape(1, Hp)
    c1 = jnp.pad(1.0 - fg, (0, Hp - hidden)).reshape(1, Hp)
    c2 = jnp.pad(fg * (2.0 - fg), (0, Hp - hidden)).reshape(1, Hp)

    use_roll_scan = hidden < 256
    if use_roll_scan:
        n_scan_steps, s = 0, 1
        while s < hd:
            n_scan_steps += 1
            s *= 2
        pos = jnp.arange(Hp) % hd
        mask_rows = [(pos >= (1 << t)).astype(f32) for t in range(n_scan_steps)]
        if not mask_rows:                                   # hd == 1: unread dummy
            mask_rows = [jnp.zeros((Hp,), f32)]
        cs = jnp.stack(mask_rows)                           # (n_steps, Hp) f32
    else:
        n_scan_steps = 0
        cs = _pad2(_bd(tri, n_heads), Hp, Hp).astype(bf16)  # per-head cumsum matmul

    wkan1 = _kan_weight_stack(p["bw1"], p["sw1"], n_heads, Hp, H2p)
    wkan2 = _kan_weight_stack(p["bw2"], p["sw2"], n_heads, H2p, Hp)

    resident = (wq_bd, wk_bd, wv_bd, ug, c1, c2, cs, wkan1, wkan2)
    kernel = make_mixer_kernel(Hp, use_roll_scan, n_scan_steps)

    def row_spec(width):
        return pl.BlockSpec((tn, width), lambda i: (i, 0))

    def run(single_buffer_weights):
        def resident_spec(a):
            zeros = (0,) * a.ndim
            if single_buffer_weights:
                # grid-invariant inputs: single-buffer instead of the default
                # double-buffered pipeline (halves their VMEM footprint).
                return pl.BlockSpec(a.shape, lambda i: zeros,
                                    pipeline_mode=pl.Buffered(1))
            return pl.BlockSpec(a.shape, lambda i: zeros)

        return pl.pallas_call(
            kernel,
            out_shape=(jax.ShapeDtypeStruct((n_pad, Hp), f32),
                       jax.ShapeDtypeStruct((n_pad, Hp), f32)),
            grid_spec=pltpu.PrefetchScalarGridSpec(
                num_scalar_prefetch=0,
                grid=(n_pad // tn,),
                in_specs=[row_spec(3 * Hp), row_spec(Hp)]
                         + [resident_spec(a) for a in resident],
                out_specs=[row_spec(Hp), row_spec(Hp)],
            ),
            compiler_params=pltpu.CompilerParams(
                dimension_semantics=("parallel",),
                vmem_limit_bytes=vmem_limit_bytes),
        )(qkv, memf, *resident)

    try:
        tok_flat, mem_flat = run(True)
    except Exception:
        # Fallback for JAX versions without BlockSpec pipeline_mode / Buffered(1).
        tok_flat, mem_flat = run(False)

    token_mixing = tok_flat[:n_rows, :hidden].reshape(bsz, seq, hidden)
    current_memorys = (mem_flat[:n_rows, :hidden]
                       .reshape(bsz, seq, n_heads, hd)
                       .transpose(0, 2, 1, 3))
    return token_mixing, current_memorys


# ------------------------- pure-JAX reference (check) -----------------------
def ref_b_spline_bases(x):
    g = GRID_PTS
    bases = [jnp.logical_and(x >= g[j], x < g[j + 1]).astype(jnp.float32)
             for j in range(len(g) - 1)]
    for k in range(1, SPLINE_ORDER + 1):
        bases = [(x - g[j]) / (g[j + k] - g[j]) * bases[j]
                 + (g[j + k + 1] - x) / (g[j + k + 1] - g[j + 1]) * bases[j + 1]
                 for j in range(len(bases) - 1)]
    return bases


def ref_forward(queries, keys, values, memorys, p, n_heads):
    bsz, seq, hidden = queries.shape
    hd = hidden // n_heads

    def prep(x):
        return x.reshape(bsz, seq, n_heads, hd).transpose(0, 2, 1, 3)

    qp, kp, vp = prep(queries), prep(keys), prep(values)
    q_ = jnp.cumsum(qp @ p["wq"].T, axis=-1)
    k_ = kp @ p["wk"].T
    v_ = vp @ p["wv"].T
    cell = k_ * v_ + p["fg"] * memorys
    cm = (1.0 - p["fg"]) * cell + p["fg"] * memorys
    cm = jnp.cumsum(cm, axis=-1)
    cv = jnp.tanh((q_ + cm) * p["ug"] + qp)

    def kan_linear(x, bw, sw_scaled):
        out = jax.nn.silu(x) @ bw.T
        bases = ref_b_spline_bases(x)
        for k in range(NUM_BASES):
            out = out + bases[k] @ sw_scaled[:, :, k].T
        return out

    h = kan_linear(cv, p["bw1"], p["sw1"])
    h = kan_linear(h, p["bw2"], p["sw2"])
    tok = jnp.tanh(h + cv)
    tok = tok.transpose(0, 2, 1, 3).reshape(bsz, seq, hidden)
    return tok, cm


# ------------------------------ param init ----------------------------------
def init_params(key, hidden_dim, n_heads):
    hd = hidden_dim // n_heads
    ks = jax.random.split(key, 11)

    def nrm(k, shape, scale=1.0):
        return scale * jax.random.normal(k, shape, dtype=jnp.float32)

    lin_scale = 1.0 / float(hd) ** 0.5
    p = {
        "wq": nrm(ks[0], (hd, hd), lin_scale),
        "wk": nrm(ks[1], (hd, hd), lin_scale),
        "wv": nrm(ks[2], (hd, hd), lin_scale),
        "fg": nrm(ks[3], (hd,)),                 # forget_gate (torch.randn)
        "ug": nrm(ks[4], (hd,)),                 # update_gate (torch.randn)
        # KAN layer 1: hd -> 2*hd ; layer 2: 2*hd -> hd
        "bw1": nrm(ks[5], (2 * hd, hd), lin_scale),
        "bw2": nrm(ks[8], (hd, 2 * hd), 1.0 / float(2 * hd) ** 0.5),
    }
    sw1 = nrm(ks[6], (2 * hd, hd, NUM_BASES), 0.1)
    sc1 = nrm(ks[7], (2 * hd, hd))
    p["sw1"] = sw1 * sc1[..., None]              # scaled_spline_weight, layer 1
    sw2 = nrm(ks[9], (hd, 2 * hd, NUM_BASES), 0.1)
    sc2 = nrm(ks[10], (hd, 2 * hd))
    p["sw2"] = sw2 * sc2[..., None]              # scaled_spline_weight, layer 2
    return p


# --------------------------------- main --------------------------------------
if __name__ == "__main__":
    bsz, seq, n_heads, head_dim = 2, 8, 4, 8
    hidden = n_heads * head_dim

    key = jax.random.PRNGKey(0)
    k_in, k_p = jax.random.split(key)
    kq, kk, kv, km = jax.random.split(k_in, 4)
    queries = jax.random.normal(kq, (bsz, seq, hidden), dtype=jnp.float32)
    keys = jax.random.normal(kk, (bsz, seq, hidden), dtype=jnp.float32)
    values = jax.random.normal(kv, (bsz, seq, hidden), dtype=jnp.float32)
    memorys = jax.random.normal(km, (bsz, n_heads, seq, head_dim), dtype=jnp.float32)
    params = init_params(k_p, hidden, n_heads)

    tok, cm = mhba_mixer_v2_block(queries, keys, values, memorys, params, n_heads)
    jax.block_until_ready((tok, cm))

    tok_ref, cm_ref = ref_forward(queries, keys, values, memorys, params, n_heads)
    assert tok.shape == (bsz, seq, hidden)
    assert cm.shape == (bsz, n_heads, seq, head_dim)
    # bf16 weights / streamed q,k,v -> slightly looser tolerances than pure f32.
    assert jnp.allclose(tok, tok_ref, atol=3e-2, rtol=3e-2), "token_mixing mismatch"
    assert jnp.allclose(cm, cm_ref, atol=5e-2, rtol=5e-2), "current_memorys mismatch"

    print("KERNEL_OK")
</pallas_src>

<mosaic_0001>
module attributes {stable_mosaic.version = 11 : i64} {
  func.func @kernel(%arg0: i32, %arg1: memref<16x384xbf16, #tpu.memory_space<vmem>>, %arg2: memref<16x128xf32, #tpu.memory_space<vmem>>, %arg3: memref<128x128xbf16, #tpu.memory_space<vmem>>, %arg4: memref<128x128xbf16, #tpu.memory_space<vmem>>, %arg5: memref<128x128xbf16, #tpu.memory_space<vmem>>, %arg6: memref<1x128xf32, #tpu.memory_space<vmem>>, %arg7: memref<1x128xf32, #tpu.memory_space<vmem>>, %arg8: memref<1x128xf32, #tpu.memory_space<vmem>>, %arg9: memref<3x128xf32, #tpu.memory_space<vmem>>, %arg10: memref<9x128x128xbf16, #tpu.memory_space<vmem>>, %arg11: memref<9x128x128xbf16, #tpu.memory_space<vmem>>, %arg12: memref<16x128xf32, #tpu.memory_space<vmem>>, %arg13: memref<16x128xf32, #tpu.memory_space<vmem>>) attributes {dimension_semantics = [#tpu.dimension_semantics<parallel>], iteration_bounds = array<i64: 1>, scalar_prefetch = 0 : i64, scratch_operands = 0 : i64, tpu.core_type = #tpu.core_type<tc>, window_params = [{transform_indices = @transform_0, window_bounds = array<i64: 16, 384>}, {transform_indices = @transform_1, window_bounds = array<i64: 16, 128>}, {pipeline_mode = #tpu.pipeline_mode<synchronous>, transform_indices = @transform_2, window_bounds = array<i64: 128, 128>}, {pipeline_mode = #tpu.pipeline_mode<synchronous>, transform_indices = @transform_3, window_bounds = array<i64: 128, 128>}, {pipeline_mode = #tpu.pipeline_mode<synchronous>, transform_indices = @transform_4, window_bounds = array<i64: 128, 128>}, {pipeline_mode = #tpu.pipeline_mode<synchronous>, transform_indices = @transform_5, window_bounds = array<i64: 1, 128>}, {pipeline_mode = #tpu.pipeline_mode<synchronous>, transform_indices = @transform_6, window_bounds = array<i64: 1, 128>}, {pipeline_mode = #tpu.pipeline_mode<synchronous>, transform_indices = @transform_7, window_bounds = array<i64: 1, 128>}, {pipeline_mode = #tpu.pipeline_mode<synchronous>, transform_indices = @transform_8, window_bounds = array<i64: 3, 128>}, {pipeline_mode = #tpu.pipeline_mode<synchronous>, transform_indices = @transform_9, window_bounds = array<i64: 9, 128, 128>}, {pipeline_mode = #tpu.pipeline_mode<synchronous>, transform_indices = @transform_10, window_bounds = array<i64: 9, 128, 128>}, {transform_indices = @transform_11, window_bounds = array<i64: 16, 128>}, {transform_indices = @transform_12, window_bounds = array<i64: 16, 128>}]} {
    %c0 = arith.constant 0 : index
    %c0_0 = arith.constant 0 : index
    %0 = vector.load %arg1[%c0, %c0_0] : memref<16x384xbf16, #tpu.memory_space<vmem>>, vector<16x384xbf16>
    %1 = vector.extract_strided_slice %0 {offsets = [0, 0], sizes = [16, 128], strides = [1, 1]} : vector<16x384xbf16> to vector<16x128xbf16>
    %2 = vector.extract_strided_slice %0 {offsets = [0, 128], sizes = [16, 128], strides = [1, 1]} : vector<16x384xbf16> to vector<16x128xbf16>
    %3 = vector.extract_strided_slice %0 {offsets = [0, 256], sizes = [16, 128], strides = [1, 1]} : vector<16x384xbf16> to vector<16x128xbf16>
    %c0_1 = arith.constant 0 : index
    %c0_2 = arith.constant 0 : index
    %4 = vector.load %arg3[%c0_1, %c0_2] : memref<128x128xbf16, #tpu.memory_space<vmem>>, vector<128x128xbf16>
    %cst = arith.constant dense<0.000000e+00> : vector<16x128xf32>
    %5 = tpu.matmul %1, %4, %cst {dimension_numbers = #tpu.dot_dimension_numbers<[1], [0], [0], [1], [0, 0, 1, 1], [], []>} : vector<16x128xbf16>, vector<128x128xbf16>, vector<16x128xf32> -> vector<16x128xf32>
    %c0_3 = arith.constant 0 : index
    %c0_4 = arith.constant 0 : index
    %6 = vector.load %arg4[%c0_3, %c0_4] : memref<128x128xbf16, #tpu.memory_space<vmem>>, vector<128x128xbf16>
    %cst_5 = arith.constant dense<0.000000e+00> : vector<16x128xf32>
    %7 = tpu.matmul %2, %6, %cst_5 {dimension_numbers = #tpu.dot_dimension_numbers<[1], [0], [0], [1], [0, 0, 1, 1], [], []>} : vector<16x128xbf16>, vector<128x128xbf16>, vector<16x128xf32> -> vector<16x128xf32>
    %c0_6 = arith.constant 0 : index
    %c0_7 = arith.constant 0 : index
    %8 = vector.load %arg5[%c0_6, %c0_7] : memref<128x128xbf16, #tpu.memory_space<vmem>>, vector<128x128xbf16>
    %cst_8 = arith.constant dense<0.000000e+00> : vector<16x128xf32>
    %9 = tpu.matmul %3, %8, %cst_8 {dimension_numbers = #tpu.dot_dimension_numbers<[1], [0], [0], [1], [0, 0, 1, 1], [], []>} : vector<16x128xbf16>, vector<128x128xbf16>, vector<16x128xf32> -> vector<16x128xf32>
    %c0_9 = arith.constant 0 : index
    %c0_10 = arith.constant 0 : index
    %10 = vector.load %arg7[%c0_9, %c0_10] : memref<1x128xf32, #tpu.memory_space<vmem>>, vector<1x128xf32>
    %11 = arith.mulf %7, %9 : vector<16x128xf32>
    %12 = vector.broadcast %10 : vector<1x128xf32> to vector<16x128xf32>
    %13 = arith.mulf %12, %11 : vector<16x128xf32>
    %c0_11 = arith.constant 0 : index
    %c0_12 = arith.constant 0 : index
    %14 = vector.load %arg8[%c0_11, %c0_12] : memref<1x128xf32, #tpu.memory_space<vmem>>, vector<1x128xf32>
    %c0_13 = arith.constant 0 : index
    %c0_14 = arith.constant 0 : index
    %15 = vector.load %arg2[%c0_13, %c0_14] : memref<16x128xf32, #tpu.memory_space<vmem>>, vector<16x128xf32>
    %16 = vector.broadcast %14 : vector<1x128xf32> to vector<16x128xf32>
    %17 = arith.mulf %16, %15 : vector<16x128xf32>
    %18 = arith.addf %13, %17 : vector<16x128xf32>
    %c0_15 = arith.constant 0 : index
    %c0_16 = arith.constant 0 : index
    %19 = vector.load %arg9[%c0_15, %c0_16] : memref<3x128xf32, #tpu.memory_space<vmem>>, vector<3x128xf32>
    %20 = vector.extract_strided_slice %19 {offsets = [0, 0], sizes = [1, 128], strides = [1, 1]} : vector<3x128xf32> to vector<1x128xf32>
    %c1_i32 = arith.constant 1 : i32
    %21 = tpu.dynamic_rotate %18 by %c1_i32 dim 1 : vector<16x128xf32>, i32 -> vector<16x128xf32>
    %22 = vector.broadcast %20 : vector<1x128xf32> to vector<16x128xf32>
    %23 = arith.mulf %22, %21 : vector<16x128xf32>
    %24 = arith.addf %18, %23 : vector<16x128xf32>
    %25 = vector.extract_strided_slice %19 {offsets = [1, 0], sizes = [1, 128], strides = [1, 1]} : vector<3x128xf32> to vector<1x128xf32>
    %c2_i32 = arith.constant 2 : i32
    %26 = tpu.dynamic_rotate %24 by %c2_i32 dim 1 : vector<16x128xf32>, i32 -> vector<16x128xf32>
    %27 = vector.broadcast %25 : vector<1x128xf32> to vector<16x128xf32>
    %28 = arith.mulf %27, %26 : vector<16x128xf32>
    %29 = arith.addf %24, %28 : vector<16x128xf32>
    %30 = vector.extract_strided_slice %19 {offsets = [2, 0], sizes = [1, 128], strides = [1, 1]} : vector<3x128xf32> to vector<1x128xf32>
    %c4_i32 = arith.constant 4 : i32
    %31 = tpu.dynamic_rotate %29 by %c4_i32 dim 1 : vector<16x128xf32>, i32 -> vector<16x128xf32>
    %32 = vector.broadcast %30 : vector<1x128xf32> to vector<16x128xf32>
    %33 = arith.mulf %32, %31 : vector<16x128xf32>
    %34 = arith.addf %29, %33 : vector<16x128xf32>
    %35 = arith.addf %5, %34 : vector<16x128xf32>
    %c0_17 = arith.constant 0 : index
    %c0_18 = arith.constant 0 : index
    %36 = vector.load %arg6[%c0_17, %c0_18] : memref<1x128xf32, #tpu.memory_space<vmem>>, vector<1x128xf32>
    %37 = vector.broadcast %36 : vector<1x128xf32> to vector<16x128xf32>
    %38 = arith.mulf %35, %37 : vector<16x128xf32>
    %39 = arith.extf %1 : vector<16x128xbf16> to vector<16x128xf32>
    %40 = arith.addf %38, %39 : vector<16x128xf32>
    %41 = math.tanh %40 : vector<16x128xf32>
    %42 = arith.negf %41 : vector<16x128xf32>
    %43 = math.exp %42 : vector<16x128xf32>
    %cst_19 = arith.constant 1.000000e+00 : f32
    %44 = vector.broadcast %cst_19 : f32 to vector<16x128xf32>
    %45 = arith.addf %44, %43 : vector<16x128xf32>
    %46 = arith.divf %44, %45 : vector<16x128xf32>
    %47 = arith.mulf %41, %46 : vector<16x128xf32>
    %48 = arith.truncf %47 : vector<16x128xf32> to vector<16x128xbf16>
    %c0_20 = arith.constant 0 : index
    %c0_21 = arith.constant 0 : index
    %c0_22 = arith.constant 0 : index
    %49 = vector.load %arg10[%c0_20, %c0_21, %c0_22] : memref<9x128x128xbf16, #tpu.memory_space<vmem>>, vector<1x128x128xbf16>
    %50 = vector.shape_cast %49 : vector<1x128x128xbf16> to vector<128x128xbf16>
    %cst_23 = arith.constant dense<0.000000e+00> : vector<16x128xf32>
    %51 = tpu.matmul %48, %50, %cst_23 {dimension_numbers = #tpu.dot_dimension_numbers<[1], [0], [0], [1], [0, 0, 1, 1], [], []>} : vector<16x128xbf16>, vector<128x128xbf16>, vector<16x128xf32> -> vector<16x128xf32>
    %cst_24 = arith.constant -2.200000e+00 : f32
    %52 = vector.broadcast %cst_24 : f32 to vector<16x128xf32>
    %53 = arith.subf %41, %52 : vector<16x128xf32>
    %cst_25 = arith.constant 2.500000e+00 : f32
    %54 = vector.broadcast %cst_25 : f32 to vector<16x128xf32>
    %55 = arith.mulf %53, %54 : vector<16x128xf32>
    %cst_26 = arith.constant 4.000000e+00 : f32
    %56 = vector.broadcast %cst_26 : f32 to vector<16x128xf32>
    %57 = arith.cmpf oge, %55, %56 : vector<16x128xf32>
    %58 = arith.extui %57 : vector<16x128xi1> to vector<16x128xi32>
    %59 = arith.sitofp %58 : vector<16x128xi32> to vector<16x128xf32>
    %cst_27 = arith.constant 5.000000e+00 : f32
    %60 = vector.broadcast %cst_27 : f32 to vector<16x128xf32>
    %61 = arith.cmpf oge, %55, %60 : vector<16x128xf32>
    %62 = arith.extui %61 : vector<16x128xi1> to vector<16x128xi32>
    %63 = arith.sitofp %62 : vector<16x128xi32> to vector<16x128xf32>
    %cst_28 = arith.constant 6.000000e+00 : f32
    %64 = vector.broadcast %cst_28 : f32 to vector<16x128xf32>
    %65 = arith.cmpf oge, %55, %64 : vector<16x128xf32>
    %66 = arith.extui %65 : vector<16x128xi1> to vector<16x128xi32>
    %67 = arith.sitofp %66 : vector<16x128xi32> to vector<16x128xf32>
    %cst_29 = arith.constant 7.000000e+00 : f32
    %68 = vector.broadcast %cst_29 : f32 to vector<16x128xf32>
    %69 = arith.cmpf oge, %55, %68 : vector<16x128xf32>
    %70 = arith.extui %69 : vector<16x128xi1> to vector<16x128xi32>
    %71 = arith.sitofp %70 : vector<16x128xi32> to vector<16x128xf32>
    %cst_30 = arith.constant 8.000000e+00 : f32
    %72 = vector.broadcast %cst_30 : f32 to vector<16x128xf32>
    %73 = arith.cmpf oge, %55, %72 : vector<16x128xf32>
    %74 = arith.extui %73 : vector<16x128xi1> to vector<16x128xi32>
    %75 = arith.sitofp %74 : vector<16x128xi32> to vector<16x128xf32>
    %cst_31 = arith.constant 1.000000e+00 : f32
    %76 = vector.broadcast %cst_31 : f32 to vector<16x128xf32>
    %77 = arith.subf %76, %59 : vector<16x128xf32>
    %78 = arith.subf %59, %63 : vector<16x128xf32>
    %79 = arith.subf %63, %67 : vector<16x128xf32>
    %80 = arith.subf %67, %71 : vector<16x128xf32>
    %81 = arith.subf %71, %75 : vector<16x128xf32>
    %cst_32 = arith.constant 4.000000e+00 : f32
    %82 = vector.broadcast %cst_32 : f32 to vector<16x128xf32>
    %83 = arith.subf %82, %55 : vector<16x128xf32>
    %84 = arith.mulf %83, %77 : vector<16x128xf32>
    %cst_33 = arith.constant 1.000000e+00 : f32
    %85 = vector.broadcast %cst_33 : f32 to vector<16x128xf32>
    %86 = arith.mulf %84, %85 : vector<16x128xf32>
    %cst_34 = arith.constant 3.000000e+00 : f32
    %87 = vector.broadcast %cst_34 : f32 to vector<16x128xf32>
    %88 = arith.subf %55, %87 : vector<16x128xf32>
    %89 = arith.mulf %88, %77 : vector<16x128xf32>
    %cst_35 = arith.constant 5.000000e+00 : f32
    %90 = vector.broadcast %cst_35 : f32 to vector<16x128xf32>
    %91 = arith.subf %90, %55 : vector<16x128xf32>
    %92 = arith.mulf %91, %78 : vector<16x128xf32>
    %93 = arith.addf %89, %92 : vector<16x128xf32>
    %cst_36 = arith.constant 1.000000e+00 : f32
    %94 = vector.broadcast %cst_36 : f32 to vector<16x128xf32>
    %95 = arith.mulf %93, %94 : vector<16x128xf32>
    %cst_37 = arith.constant 4.000000e+00 : f32
    %96 = vector.broadcast %cst_37 : f32 to vector<16x128xf32>
    %97 = arith.subf %55, %96 : vector<16x128xf32>
    %98 = arith.mulf %97, %78 : vector<16x128xf32>
    %cst_38 = arith.constant 6.000000e+00 : f32
    %99 = vector.broadcast %cst_38 : f32 to vector<16x128xf32>
    %100 = arith.subf %99, %55 : vector<16x128xf32>
    %101 = arith.mulf %100, %79 : vector<16x128xf32>
    %102 = arith.addf %98, %101 : vector<16x128xf32>
    %cst_39 = arith.constant 1.000000e+00 : f32
    %103 = vector.broadcast %cst_39 : f32 to vector<16x128xf32>
    %104 = arith.mulf %102, %103 : vector<16x128xf32>
    %cst_40 = arith.constant 5.000000e+00 : f32
    %105 = vector.broadcast %cst_40 : f32 to vector<16x128xf32>
    %106 = arith.subf %55, %105 : vector<16x128xf32>
    %107 = arith.mulf %106, %79 : vector<16x128xf32>
    %cst_41 = arith.constant 7.000000e+00 : f32
    %108 = vector.broadcast %cst_41 : f32 to vector<16x128xf32>
    %109 = arith.subf %108, %55 : vector<16x128xf32>
    %110 = arith.mulf %109, %80 : vector<16x128xf32>
    %111 = arith.addf %107, %110 : vector<16x128xf32>
    %cst_42 = arith.constant 1.000000e+00 : f32
    %112 = vector.broadcast %cst_42 : f32 to vector<16x128xf32>
    %113 = arith.mulf %111, %112 : vector<16x128xf32>
    %cst_43 = arith.constant 6.000000e+00 : f32
    %114 = vector.broadcast %cst_43 : f32 to vector<16x128xf32>
    %115 = arith.subf %55, %114 : vector<16x128xf32>
    %116 = arith.mulf %115, %80 : vector<16x128xf32>
    %cst_44 = arith.constant 8.000000e+00 : f32
    %117 = vector.broadcast %cst_44 : f32 to vector<16x128xf32>
    %118 = arith.subf %117, %55 : vector<16x128xf32>
    %119 = arith.mulf %118, %81 : vector<16x128xf32>
    %120 = arith.addf %116, %119 : vector<16x128xf32>
    %cst_45 = arith.constant 1.000000e+00 : f32
    %121 = vector.broadcast %cst_45 : f32 to vector<16x128xf32>
    %122 = arith.mulf %120, %121 : vector<16x128xf32>
    %cst_46 = arith.constant 7.000000e+00 : f32
    %123 = vector.broadcast %cst_46 : f32 to vector<16x128xf32>
    %124 = arith.subf %55, %123 : vector<16x128xf32>
    %125 = arith.mulf %124, %81 : vector<16x128xf32>
    %cst_47 = arith.constant 9.000000e+00 : f32
    %126 = vector.broadcast %cst_47 : f32 to vector<16x128xf32>
    %127 = arith.subf %126, %55 : vector<16x128xf32>
    %128 = arith.mulf %127, %75 : vector<16x128xf32>
    %129 = arith.addf %125, %128 : vector<16x128xf32>
    %cst_48 = arith.constant 1.000000e+00 : f32
    %130 = vector.broadcast %cst_48 : f32 to vector<16x128xf32>
    %131 = arith.mulf %129, %130 : vector<16x128xf32>
    %cst_49 = arith.constant 8.000000e+00 : f32
    %132 = vector.broadcast %cst_49 : f32 to vector<16x128xf32>
    %133 = arith.subf %55, %132 : vector<16x128xf32>
    %134 = arith.mulf %133, %75 : vector<16x128xf32>
    %cst_50 = arith.constant 1.000000e+00 : f32
    %135 = vector.broadcast %cst_50 : f32 to vector<16x128xf32>
    %136 = arith.mulf %134, %135 : vector<16x128xf32>
    %cst_51 = arith.constant 4.000000e+00 : f32
    %137 = vector.broadcast %cst_51 : f32 to vector<16x128xf32>
    %138 = arith.subf %137, %55 : vector<16x128xf32>
    %139 = arith.mulf %138, %86 : vector<16x128xf32>
    %cst_52 = arith.constant 5.000000e-01 : f32
    %140 = vector.broadcast %cst_52 : f32 to vector<16x128xf32>
    %141 = arith.mulf %139, %140 : vector<16x128xf32>
    %cst_53 = arith.constant 2.000000e+00 : f32
    %142 = vector.broadcast %cst_53 : f32 to vector<16x128xf32>
    %143 = arith.subf %55, %142 : vector<16x128xf32>
    %144 = arith.mulf %143, %86 : vector<16x128xf32>
    %cst_54 = arith.constant 5.000000e+00 : f32
    %145 = vector.broadcast %cst_54 : f32 to vector<16x128xf32>
    %146 = arith.subf %145, %55 : vector<16x128xf32>
    %147 = arith.mulf %146, %95 : vector<16x128xf32>
    %148 = arith.addf %144, %147 : vector<16x128xf32>
    %cst_55 = arith.constant 5.000000e-01 : f32
    %149 = vector.broadcast %cst_55 : f32 to vector<16x128xf32>
    %150 = arith.mulf %148, %149 : vector<16x128xf32>
    %cst_56 = arith.constant 3.000000e+00 : f32
    %151 = vector.broadcast %cst_56 : f32 to vector<16x128xf32>
    %152 = arith.subf %55, %151 : vector<16x128xf32>
    %153 = arith.mulf %152, %95 : vector<16x128xf32>
    %cst_57 = arith.constant 6.000000e+00 : f32
    %154 = vector.broadcast %cst_57 : f32 to vector<16x128xf32>
    %155 = arith.subf %154, %55 : vector<16x128xf32>
    %156 = arith.mulf %155, %104 : vector<16x128xf32>
    %157 = arith.addf %153, %156 : vector<16x128xf32>
    %cst_58 = arith.constant 5.000000e-01 : f32
    %158 = vector.broadcast %cst_58 : f32 to vector<16x128xf32>
    %159 = arith.mulf %157, %158 : vector<16x128xf32>
    %cst_59 = arith.constant 4.000000e+00 : f32
    %160 = vector.broadcast %cst_59 : f32 to vector<16x128xf32>
    %161 = arith.subf %55, %160 : vector<16x128xf32>
    %162 = arith.mulf %161, %104 : vector<16x128xf32>
    %cst_60 = arith.constant 7.000000e+00 : f32
    %163 = vector.broadcast %cst_60 : f32 to vector<16x128xf32>
    %164 = arith.subf %163, %55 : vector<16x128xf32>
    %165 = arith.mulf %164, %113 : vector<16x128xf32>
    %166 = arith.addf %162, %165 : vector<16x128xf32>
    %cst_61 = arith.constant 5.000000e-01 : f32
    %167 = vector.broadcast %cst_61 : f32 to vector<16x128xf32>
    %168 = arith.mulf %166, %167 : vector<16x128xf32>
    %cst_62 = arith.constant 5.000000e+00 : f32
    %169 = vector.broadcast %cst_62 : f32 to vector<16x128xf32>
    %170 = arith.subf %55, %169 : vector<16x128xf32>
    %171 = arith.mulf %170, %113 : vector<16x128xf32>
    %cst_63 = arith.constant 8.000000e+00 : f32
    %172 = vector.broadcast %cst_63 : f32 to vector<16x128xf32>
    %173 = arith.subf %172, %55 : vector<16x128xf32>
    %174 = arith.mulf %173, %122 : vector<16x128xf32>
    %175 = arith.addf %171, %174 : vector<16x128xf32>
    %cst_64 = arith.constant 5.000000e-01 : f32
    %176 = vector.broadcast %cst_64 : f32 to vector<16x128xf32>
    %177 = arith.mulf %175, %176 : vector<16x128xf32>
    %cst_65 = arith.constant 6.000000e+00 : f32
    %178 = vector.broadcast %cst_65 : f32 to vector<16x128xf32>
    %179 = arith.subf %55, %178 : vector<16x128xf32>
    %180 = arith.mulf %179, %122 : vector<16x128xf32>
    %cst_66 = arith.constant 9.000000e+00 : f32
    %181 = vector.broadcast %cst_66 : f32 to vector<16x128xf32>
    %182 = arith.subf %181, %55 : vector<16x128xf32>
    %183 = arith.mulf %182, %131 : vector<16x128xf32>
    %184 = arith.addf %180, %183 : vector<16x128xf32>
    %cst_67 = arith.constant 5.000000e-01 : f32
    %185 = vector.broadcast %cst_67 : f32 to vector<16x128xf32>
    %186 = arith.mulf %184, %185 : vector<16x128xf32>
    %cst_68 = arith.constant 7.000000e+00 : f32
    %187 = vector.broadcast %cst_68 : f32 to vector<16x128xf32>
    %188 = arith.subf %55, %187 : vector<16x128xf32>
    %189 = arith.mulf %188, %131 : vector<16x128xf32>
    %cst_69 = arith.constant 1.000000e+01 : f32
    %190 = vector.broadcast %cst_69 : f32 to vector<16x128xf32>
    %191 = arith.subf %190, %55 : vector<16x128xf32>
    %192 = arith.mulf %191, %136 : vector<16x128xf32>
    %193 = arith.addf %189, %192 : vector<16x128xf32>
    %cst_70 = arith.constant 5.000000e-01 : f32
    %194 = vector.broadcast %cst_70 : f32 to vector<16x128xf32>
    %195 = arith.mulf %193, %194 : vector<16x128xf32>
    %cst_71 = arith.constant 8.000000e+00 : f32
    %196 = vector.broadcast %cst_71 : f32 to vector<16x128xf32>
    %197 = arith.subf %55, %196 : vector<16x128xf32>
    %198 = arith.mulf %197, %136 : vector<16x128xf32>
    %cst_72 = arith.constant 5.000000e-01 : f32
    %199 = vector.broadcast %cst_72 : f32 to vector<16x128xf32>
    %200 = arith.mulf %198, %199 : vector<16x128xf32>
    %cst_73 = arith.constant 4.000000e+00 : f32
    %201 = vector.broadcast %cst_73 : f32 to vector<16x128xf32>
    %202 = arith.subf %201, %55 : vector<16x128xf32>
    %203 = arith.mulf %202, %141 : vector<16x128xf32>
    %cst_74 = arith.constant 0.333333343 : f32
    %204 = vector.broadcast %cst_74 : f32 to vector<16x128xf32>
    %205 = arith.mulf %203, %204 : vector<16x128xf32>
    %206 = arith.truncf %205 : vector<16x128xf32> to vector<16x128xbf16>
    %c1 = arith.constant 1 : index
    %c0_75 = arith.constant 0 : index
    %c0_76 = arith.constant 0 : index
    %207 = vector.load %arg10[%c1, %c0_75, %c0_76] : memref<9x128x128xbf16, #tpu.memory_space<vmem>>, vector<1x128x128xbf16>
    %208 = vector.shape_cast %207 : vector<1x128x128xbf16> to vector<128x128xbf16>
    %cst_77 = arith.constant dense<0.000000e+00> : vector<16x128xf32>
    %209 = tpu.matmul %206, %208, %cst_77 {dimension_numbers = #tpu.dot_dimension_numbers<[1], [0], [0], [1], [0, 0, 1, 1], [], []>} : vector<16x128xbf16>, vector<128x128xbf16>, vector<16x128xf32> -> vector<16x128xf32>
    %210 = arith.addf %51, %209 : vector<16x128xf32>
    %cst_78 = arith.constant 1.000000e+00 : f32
    %211 = vector.broadcast %cst_78 : f32 to vector<16x128xf32>
    %212 = arith.subf %55, %211 : vector<16x128xf32>
    %213 = arith.mulf %212, %141 : vector<16x128xf32>
    %cst_79 = arith.constant 5.000000e+00 : f32
    %214 = vector.broadcast %cst_79 : f32 to vector<16x128xf32>
    %215 = arith.subf %214, %55 : vector<16x128xf32>
    %216 = arith.mulf %215, %150 : vector<16x128xf32>
    %217 = arith.addf %213, %216 : vector<16x128xf32>
    %cst_80 = arith.constant 0.333333343 : f32
    %218 = vector.broadcast %cst_80 : f32 to vector<16x128xf32>
    %219 = arith.mulf %217, %218 : vector<16x128xf32>
    %220 = arith.truncf %219 : vector<16x128xf32> to vector<16x128xbf16>
    %c2 = arith.constant 2 : index
    %c0_81 = arith.constant 0 : index
    %c0_82 = arith.constant 0 : index
    %221 = vector.load %arg10[%c2, %c0_81, %c0_82] : memref<9x128x128xbf16, #tpu.memory_space<vmem>>, vector<1x128x128xbf16>
    %222 = vector.shape_cast %221 : vector<1x128x128xbf16> to vector<128x128xbf16>
    %cst_83 = arith.constant dense<0.000000e+00> : vector<16x128xf32>
    %223 = tpu.matmul %220, %222, %cst_83 {dimension_numbers = #tpu.dot_dimension_numbers<[1], [0], [0], [1], [0, 0, 1, 1], [], []>} : vector<16x128xbf16>, vector<128x128xbf16>, vector<16x128xf32> -> vector<16x128xf32>
    %224 = arith.addf %210, %223 : vector<16x128xf32>
    %cst_84 = arith.constant 2.000000e+00 : f32
    %225 = vector.broadcast %cst_84 : f32 to vector<16x128xf32>
    %226 = arith.subf %55, %225 : vector<16x128xf32>
    %227 = arith.mulf %226, %150 : vector<16x128xf32>
    %cst_85 = arith.constant 6.000000e+00 : f32
    %228 = vector.broadcast %cst_85 : f32 to vector<16x128xf32>
    %229 = arith.subf %228, %55 : vector<16x128xf32>
    %230 = arith.mulf %229, %159 : vector<16x128xf32>
    %231 = arith.addf %227, %230 : vector<16x128xf32>
    %cst_86 = arith.constant 0.333333343 : f32
    %232 = vector.broadcast %cst_86 : f32 to vector<16x128xf32>
    %233 = arith.mulf %231, %232 : vector<16x128xf32>
    %234 = arith.truncf %233 : vector<16x128xf32> to vector<16x128xbf16>
    %c3 = arith.constant 3 : index
    %c0_87 = arith.constant 0 : index
    %c0_88 = arith.constant 0 : index
    %235 = vector.load %arg10[%c3, %c0_87, %c0_88] : memref<9x128x128xbf16, #tpu.memory_space<vmem>>, vector<1x128x128xbf16>
    %236 = vector.shape_cast %235 : vector<1x128x128xbf16> to vector<128x128xbf16>
    %cst_89 = arith.constant dense<0.000000e+00> : vector<16x128xf32>
    %237 = tpu.matmul %234, %236, %cst_89 {dimension_numbers = #tpu.dot_dimension_numbers<[1], [0], [0], [1], [0, 0, 1, 1], [], []>} : vector<16x128xbf16>, vector<128x128xbf16>, vector<16x128xf32> -> vector<16x128xf32>
    %238 = arith.addf %224, %237 : vector<16x128xf32>
    %cst_90 = arith.constant 3.000000e+00 : f32
    %239 = vector.broadcast %cst_90 : f32 to vector<16x128xf32>
    %240 = arith.subf %55, %239 : vector<16x128xf32>
    %241 = arith.mulf %240, %159 : vector<16x128xf32>
    %cst_91 = arith.constant 7.000000e+00 : f32
    %242 = vector.broadcast %cst_91 : f32 to vector<16x128xf32>
    %243 = arith.subf %242, %55 : vector<16x128xf32>
    %244 = arith.mulf %243, %168 : vector<16x128xf32>
    %245 = arith.addf %241, %244 : vector<16x128xf32>
    %cst_92 = arith.constant 0.333333343 : f32
    %246 = vector.broadcast %cst_92 : f32 to vector<16x128xf32>
    %247 = arith.mulf %245, %246 : vector<16x128xf32>
    %248 = arith.truncf %247 : vector<16x128xf32> to vector<16x128xbf16>
    %c4 = arith.constant 4 : index
    %c0_93 = arith.constant 0 : index
    %c0_94 = arith.constant 0 : index
    %249 = vector.load %arg10[%c4, %c0_93, %c0_94] : memref<9x128x128xbf16, #tpu.memory_space<vmem>>, vector<1x128x128xbf16>
    %250 = vector.shape_cast %249 : vector<1x128x128xbf16> to vector<128x128xbf16>
    %cst_95 = arith.constant dense<0.000000e+00> : vector<16x128xf32>
    %251 = tpu.matmul %248, %250, %cst_95 {dimension_numbers = #tpu.dot_dimension_numbers<[1], [0], [0], [1], [0, 0, 1, 1], [], []>} : vector<16x128xbf16>, vector<128x128xbf16>, vector<16x128xf32> -> vector<16x128xf32>
    %252 = arith.addf %238, %251 : vector<16x128xf32>
    %cst_96 = arith.constant 4.000000e+00 : f32
    %253 = vector.broadcast %cst_96 : f32 to vector<16x128xf32>
    %254 = arith.subf %55, %253 : vector<16x128xf32>
    %255 = arith.mulf %254, %168 : vector<16x128xf32>
    %cst_97 = arith.constant 8.000000e+00 : f32
    %256 = vector.broadcast %cst_97 : f32 to vector<16x128xf32>
    %257 = arith.subf %256, %55 : vector<16x128xf32>
    %258 = arith.mulf %257, %177 : vector<16x128xf32>
    %259 = arith.addf %255, %258 : vector<16x128xf32>
    %cst_98 = arith.constant 0.333333343 : f32
    %260 = vector.broadcast %cst_98 : f32 to vector<16x128xf32>
    %261 = arith.mulf %259, %260 : vector<16x128xf32>
    %262 = arith.truncf %261 : vector<16x128xf32> to vector<16x128xbf16>
    %c5 = arith.constant 5 : index
    %c0_99 = arith.constant 0 : index
    %c0_100 = arith.constant 0 : index
    %263 = vector.load %arg10[%c5, %c0_99, %c0_100] : memref<9x128x128xbf16, #tpu.memory_space<vmem>>, vector<1x128x128xbf16>
    %264 = vector.shape_cast %263 : vector<1x128x128xbf16> to vector<128x128xbf16>
    %cst_101 = arith.constant dense<0.000000e+00> : vector<16x128xf32>
    %265 = tpu.matmul %262, %264, %cst_101 {dimension_numbers = #tpu.dot_dimension_numbers<[1], [0], [0], [1], [0, 0, 1, 1], [], []>} : vector<16x128xbf16>, vector<128x128xbf16>, vector<16x128xf32> -> vector<16x128xf32>
    %266 = arith.addf %252, %265 : vector<16x128xf32>
    %cst_102 = arith.constant 5.000000e+00 : f32
    %267 = vector.broadcast %cst_102 : f32 to vector<16x128xf32>
    %268 = arith.subf %55, %267 : vector<16x128xf32>
    %269 = arith.mulf %268, %177 : vector<16x128xf32>
    %cst_103 = arith.constant 9.000000e+00 : f32
    %270 = vector.broadcast %cst_103 : f32 to vector<16x128xf32>
    %271 = arith.subf %270, %55 : vector<16x128xf32>
    %272 = arith.mulf %271, %186 : vector<16x128xf32>
    %273 = arith.addf %269, %272 : vector<16x128xf32>
    %cst_104 = arith.constant 0.333333343 : f32
    %274 = vector.broadcast %cst_104 : f32 to vector<16x128xf32>
    %275 = arith.mulf %273, %274 : vector<16x128xf32>
    %276 = arith.truncf %275 : vector<16x128xf32> to vector<16x128xbf16>
    %c6 = arith.constant 6 : index
    %c0_105 = arith.constant 0 : index
    %c0_106 = arith.constant 0 : index
    %277 = vector.load %arg10[%c6, %c0_105, %c0_106] : memref<9x128x128xbf16, #tpu.memory_space<vmem>>, vector<1x128x128xbf16>
    %278 = vector.shape_cast %277 : vector<1x128x128xbf16> to vector<128x128xbf16>
    %cst_107 = arith.constant dense<0.000000e+00> : vector<16x128xf32>
    %279 = tpu.matmul %276, %278, %cst_107 {dimension_numbers = #tpu.dot_dimension_numbers<[1], [0], [0], [1], [0, 0, 1, 1], [], []>} : vector<16x128xbf16>, vector<128x128xbf16>, vector<16x128xf32> -> vector<16x128xf32>
    %280 = arith.addf %266, %279 : vector<16x128xf32>
    %cst_108 = arith.constant 6.000000e+00 : f32
    %281 = vector.broadcast %cst_108 : f32 to vector<16x128xf32>
    %282 = arith.subf %55, %281 : vector<16x128xf32>
    %283 = arith.mulf %282, %186 : vector<16x128xf32>
    %cst_109 = arith.constant 1.000000e+01 : f32
    %284 = vector.broadcast %cst_109 : f32 to vector<16x128xf32>
    %285 = arith.subf %284, %55 : vector<16x128xf32>
    %286 = arith.mulf %285, %195 : vector<16x128xf32>
    %287 = arith.addf %283, %286 : vector<16x128xf32>
    %cst_110 = arith.constant 0.333333343 : f32
    %288 = vector.broadcast %cst_110 : f32 to vector<16x128xf32>
    %289 = arith.mulf %287, %288 : vector<16x128xf32>
    %290 = arith.truncf %289 : vector<16x128xf32> to vector<16x128xbf16>
    %c7 = arith.constant 7 : index
    %c0_111 = arith.constant 0 : index
    %c0_112 = arith.constant 0 : index
    %291 = vector.load %arg10[%c7, %c0_111, %c0_112] : memref<9x128x128xbf16, #tpu.memory_space<vmem>>, vector<1x128x128xbf16>
    %292 = vector.shape_cast %291 : vector<1x128x128xbf16> to vector<128x128xbf16>
    %cst_113 = arith.constant dense<0.000000e+00> : vector<16x128xf32>
    %293 = tpu.matmul %290, %292, %cst_113 {dimension_numbers = #tpu.dot_dimension_numbers<[1], [0], [0], [1], [0, 0, 1, 1], [], []>} : vector<16x128xbf16>, vector<128x128xbf16>, vector<16x128xf32> -> vector<16x128xf32>
    %294 = arith.addf %280, %293 : vector<16x128xf32>
    %cst_114 = arith.constant 7.000000e+00 : f32
    %295 = vector.broadcast %cst_114 : f32 to vector<16x128xf32>
    %296 = arith.subf %55, %295 : vector<16x128xf32>
    %297 = arith.mulf %296, %195 : vector<16x128xf32>
    %cst_115 = arith.constant 1.100000e+01 : f32
    %298 = vector.broadcast %cst_115 : f32 to vector<16x128xf32>
    %299 = arith.subf %298, %55 : vector<16x128xf32>
    %300 = arith.mulf %299, %200 : vector<16x128xf32>
    %301 = arith.addf %297, %300 : vector<16x128xf32>
    %cst_116 = arith.constant 0.333333343 : f32
    %302 = vector.broadcast %cst_116 : f32 to vector<16x128xf32>
    %303 = arith.mulf %301, %302 : vector<16x128xf32>
    %304 = arith.truncf %303 : vector<16x128xf32> to vector<16x128xbf16>
    %c8 = arith.constant 8 : index
    %c0_117 = arith.constant 0 : index
    %c0_118 = arith.constant 0 : index
    %305 = vector.load %arg10[%c8, %c0_117, %c0_118] : memref<9x128x128xbf16, #tpu.memory_space<vmem>>, vector<1x128x128xbf16>
    %306 = vector.shape_cast %305 : vector<1x128x128xbf16> to vector<128x128xbf16>
    %cst_119 = arith.constant dense<0.000000e+00> : vector<16x128xf32>
    %307 = tpu.matmul %304, %306, %cst_119 {dimension_numbers = #tpu.dot_dimension_numbers<[1], [0], [0], [1], [0, 0, 1, 1], [], []>} : vector<16x128xbf16>, vector<128x128xbf16>, vector<16x128xf32> -> vector<16x128xf32>
    %308 = arith.addf %294, %307 : vector<16x128xf32>
    %309 = arith.negf %308 : vector<16x128xf32>
    %310 = math.exp %309 : vector<16x128xf32>
    %cst_120 = arith.constant 1.000000e+00 : f32
    %311 = vector.broadcast %cst_120 : f32 to vector<16x128xf32>
    %312 = arith.addf %311, %310 : vector<16x128xf32>
    %313 = arith.divf %311, %312 : vector<16x128xf32>
    %314 = arith.mulf %308, %313 : vector<16x128xf32>
    %315 = arith.truncf %314 : vector<16x128xf32> to vector<16x128xbf16>
    %c0_121 = arith.constant 0 : index
    %c0_122 = arith.constant 0 : index
    %c0_123 = arith.constant 0 : index
    %316 = vector.load %arg11[%c0_121, %c0_122, %c0_123] : memref<9x128x128xbf16, #tpu.memory_space<vmem>>, vector<1x128x128xbf16>
    %317 = vector.shape_cast %316 : vector<1x128x128xbf16> to vector<128x128xbf16>
    %cst_124 = arith.constant dense<0.000000e+00> : vector<16x128xf32>
    %318 = tpu.matmul %315, %317, %cst_124 {dimension_numbers = #tpu.dot_dimension_numbers<[1], [0], [0], [1], [0, 0, 1, 1], [], []>} : vector<16x128xbf16>, vector<128x128xbf16>, vector<16x128xf32> -> vector<16x128xf32>
    %cst_125 = arith.constant -2.200000e+00 : f32
    %319 = vector.broadcast %cst_125 : f32 to vector<16x128xf32>
    %320 = arith.subf %308, %319 : vector<16x128xf32>
    %cst_126 = arith.constant 2.500000e+00 : f32
    %321 = vector.broadcast %cst_126 : f32 to vector<16x128xf32>
    %322 = arith.mulf %320, %321 : vector<16x128xf32>
    %cst_127 = arith.constant 0.000000e+00 : f32
    %323 = vector.broadcast %cst_127 : f32 to vector<16x128xf32>
    %324 = arith.cmpf oge, %322, %323 : vector<16x128xf32>
    %325 = arith.extui %324 : vector<16x128xi1> to vector<16x128xi32>
    %326 = arith.sitofp %325 : vector<16x128xi32> to vector<16x128xf32>
    %cst_128 = arith.constant 1.000000e+00 : f32
    %327 = vector.broadcast %cst_128 : f32 to vector<16x128xf32>
    %328 = arith.cmpf oge, %322, %327 : vector<16x128xf32>
    %329 = arith.extui %328 : vector<16x128xi1> to vector<16x128xi32>
    %330 = arith.sitofp %329 : vector<16x128xi32> to vector<16x128xf32>
    %cst_129 = arith.constant 2.000000e+00 : f32
    %331 = vector.broadcast %cst_129 : f32 to vector<16x128xf32>
    %332 = arith.cmpf oge, %322, %331 : vector<16x128xf32>
    %333 = arith.extui %332 : vector<16x128xi1> to vector<16x128xi32>
    %334 = arith.sitofp %333 : vector<16x128xi32> to vector<16x128xf32>
    %cst_130 = arith.constant 3.000000e+00 : f32
    %335 = vector.broadcast %cst_130 : f32 to vector<16x128xf32>
    %336 = arith.cmpf oge, %322, %335 : vector<16x128xf32>
    %337 = arith.extui %336 : vector<16x128xi1> to vector<16x128xi32>
    %338 = arith.sitofp %337 : vector<16x128xi32> to vector<16x128xf32>
    %cst_131 = arith.constant 4.000000e+00 : f32
    %339 = vector.broadcast %cst_131 : f32 to vector<16x128xf32>
    %340 = arith.cmpf oge, %322, %339 : vector<16x128xf32>
    %341 = arith.extui %340 : vector<16x128xi1> to vector<16x128xi32>
    %342 = arith.sitofp %341 : vector<16x128xi32> to vector<16x128xf32>
    %cst_132 = arith.constant 5.000000e+00 : f32
    %343 = vector.broadcast %cst_132 : f32 to vector<16x128xf32>
    %344 = arith.cmpf oge, %322, %343 : vector<16x128xf32>
    %345 = arith.extui %344 : vector<16x128xi1> to vector<16x128xi32>
    %346 = arith.sitofp %345 : vector<16x128xi32> to vector<16x128xf32>
    %cst_133 = arith.constant 6.000000e+00 : f32
    %347 = vector.broadcast %cst_133 : f32 to vector<16x128xf32>
    %348 = arith.cmpf oge, %322, %347 : vector<16x128xf32>
    %349 = arith.extui %348 : vector<16x128xi1> to vector<16x128xi32>
    %350 = arith.sitofp %349 : vector<16x128xi32> to vector<16x128xf32>
    %cst_134 = arith.constant 7.000000e+00 : f32
    %351 = vector.broadcast %cst_134 : f32 to vector<16x128xf32>
    %352 = arith.cmpf oge, %322, %351 : vector<16x128xf32>
    %353 = arith.extui %352 : vector<16x128xi1> to vector<16x128xi32>
    %354 = arith.sitofp %353 : vector<16x128xi32> to vector<16x128xf32>
    %cst_135 = arith.constant 8.000000e+00 : f32
    %355 = vector.broadcast %cst_135 : f32 to vector<16x128xf32>
    %356 = arith.cmpf oge, %322, %355 : vector<16x128xf32>
    %357 = arith.extui %356 : vector<16x128xi1> to vector<16x128xi32>
    %358 = arith.sitofp %357 : vector<16x128xi32> to vector<16x128xf32>
    %cst_136 = arith.constant 9.000000e+00 : f32
    %359 = vector.broadcast %cst_136 : f32 to vector<16x128xf32>
    %360 = arith.cmpf oge, %322, %359 : vector<16x128xf32>
    %361 = arith.extui %360 : vector<16x128xi1> to vector<16x128xi32>
    %362 = arith.sitofp %361 : vector<16x128xi32> to vector<16x128xf32>
    %cst_137 = arith.constant 1.000000e+01 : f32
    %363 = vector.broadcast %cst_137 : f32 to vector<16x128xf32>
    %364 = arith.cmpf oge, %322, %363 : vector<16x128xf32>
    %365 = arith.extui %364 : vector<16x128xi1> to vector<16x128xi32>
    %366 = arith.sitofp %365 : vector<16x128xi32> to vector<16x128xf32>
    %cst_138 = arith.constant 1.100000e+01 : f32
    %367 = vector.broadcast %cst_138 : f32 to vector<16x128xf32>
    %368 = arith.cmpf oge, %322, %367 : vector<16x128xf32>
    %369 = arith.extui %368 : vector<16x128xi1> to vector<16x128xi32>
    %370 = arith.sitofp %369 : vector<16x128xi32> to vector<16x128xf32>
    %371 = arith.subf %326, %330 : vector<16x128xf32>
    %372 = arith.subf %330, %334 : vector<16x128xf32>
    %373 = arith.subf %334, %338 : vector<16x128xf32>
    %374 = arith.subf %338, %342 : vector<16x128xf32>
    %375 = arith.subf %342, %346 : vector<16x128xf32>
    %376 = arith.subf %346, %350 : vector<16x128xf32>
    %377 = arith.subf %350, %354 : vector<16x128xf32>
    %378 = arith.subf %354, %358 : vector<16x128xf32>
    %379 = arith.subf %358, %362 : vector<16x128xf32>
    %380 = arith.subf %362, %366 : vector<16x128xf32>
    %381 = arith.subf %366, %370 : vector<16x128xf32>
    %cst_139 = arith.constant 0.000000e+00 : f32
    %382 = vector.broadcast %cst_139 : f32 to vector<16x128xf32>
    %383 = arith.subf %322, %382 : vector<16x128xf32>
    %384 = arith.mulf %383, %371 : vector<16x128xf32>
    %cst_140 = arith.constant 2.000000e+00 : f32
    %385 = vector.broadcast %cst_140 : f32 to vector<16x128xf32>
    %386 = arith.subf %385, %322 : vector<16x128xf32>
    %387 = arith.mulf %386, %372 : vector<16x128xf32>
    %388 = arith.addf %384, %387 : vector<16x128xf32>
    %cst_141 = arith.constant 1.000000e+00 : f32
    %389 = vector.broadcast %cst_141 : f32 to vector<16x128xf32>
    %390 = arith.mulf %388, %389 : vector<16x128xf32>
    %cst_142 = arith.constant 1.000000e+00 : f32
    %391 = vector.broadcast %cst_142 : f32 to vector<16x128xf32>
    %392 = arith.subf %322, %391 : vector<16x128xf32>
    %393 = arith.mulf %392, %372 : vector<16x128xf32>
    %cst_143 = arith.constant 3.000000e+00 : f32
    %394 = vector.broadcast %cst_143 : f32 to vector<16x128xf32>
    %395 = arith.subf %394, %322 : vector<16x128xf32>
    %396 = arith.mulf %395, %373 : vector<16x128xf32>
    %397 = arith.addf %393, %396 : vector<16x128xf32>
    %cst_144 = arith.constant 1.000000e+00 : f32
    %398 = vector.broadcast %cst_144 : f32 to vector<16x128xf32>
    %399 = arith.mulf %397, %398 : vector<16x128xf32>
    %cst_145 = arith.constant 2.000000e+00 : f32
    %400 = vector.broadcast %cst_145 : f32 to vector<16x128xf32>
    %401 = arith.subf %322, %400 : vector<16x128xf32>
    %402 = arith.mulf %401, %373 : vector<16x128xf32>
    %cst_146 = arith.constant 4.000000e+00 : f32
    %403 = vector.broadcast %cst_146 : f32 to vector<16x128xf32>
    %404 = arith.subf %403, %322 : vector<16x128xf32>
    %405 = arith.mulf %404, %374 : vector<16x128xf32>
    %406 = arith.addf %402, %405 : vector<16x128xf32>
    %cst_147 = arith.constant 1.000000e+00 : f32
    %407 = vector.broadcast %cst_147 : f32 to vector<16x128xf32>
    %408 = arith.mulf %406, %407 : vector<16x128xf32>
    %cst_148 = arith.constant 3.000000e+00 : f32
    %409 = vector.broadcast %cst_148 : f32 to vector<16x128xf32>
    %410 = arith.subf %322, %409 : vector<16x128xf32>
    %411 = arith.mulf %410, %374 : vector<16x128xf32>
    %cst_149 = arith.constant 5.000000e+00 : f32
    %412 = vector.broadcast %cst_149 : f32 to vector<16x128xf32>
    %413 = arith.subf %412, %322 : vector<16x128xf32>
    %414 = arith.mulf %413, %375 : vector<16x128xf32>
    %415 = arith.addf %411, %414 : vector<16x128xf32>
    %cst_150 = arith.constant 1.000000e+00 : f32
    %416 = vector.broadcast %cst_150 : f32 to vector<16x128xf32>
    %417 = arith.mulf %415, %416 : vector<16x128xf32>
    %cst_151 = arith.constant 4.000000e+00 : f32
    %418 = vector.broadcast %cst_151 : f32 to vector<16x128xf32>
    %419 = arith.subf %322, %418 : vector<16x128xf32>
    %420 = arith.mulf %419, %375 : vector<16x128xf32>
    %cst_152 = arith.constant 6.000000e+00 : f32
    %421 = vector.broadcast %cst_152 : f32 to vector<16x128xf32>
    %422 = arith.subf %421, %322 : vector<16x128xf32>
    %423 = arith.mulf %422, %376 : vector<16x128xf32>
    %424 = arith.addf %420, %423 : vector<16x128xf32>
    %cst_153 = arith.constant 1.000000e+00 : f32
    %425 = vector.broadcast %cst_153 : f32 to vector<16x128xf32>
    %426 = arith.mulf %424, %425 : vector<16x128xf32>
    %cst_154 = arith.constant 5.000000e+00 : f32
    %427 = vector.broadcast %cst_154 : f32 to vector<16x128xf32>
    %428 = arith.subf %322, %427 : vector<16x128xf32>
    %429 = arith.mulf %428, %376 : vector<16x128xf32>
    %cst_155 = arith.constant 7.000000e+00 : f32
    %430 = vector.broadcast %cst_155 : f32 to vector<16x128xf32>
    %431 = arith.subf %430, %322 : vector<16x128xf32>
    %432 = arith.mulf %431, %377 : vector<16x128xf32>
    %433 = arith.addf %429, %432 : vector<16x128xf32>
    %cst_156 = arith.constant 1.000000e+00 : f32
    %434 = vector.broadcast %cst_156 : f32 to vector<16x128xf32>
    %435 = arith.mulf %433, %434 : vector<16x128xf32>
    %cst_157 = arith.constant 6.000000e+00 : f32
    %436 = vector.broadcast %cst_157 : f32 to vector<16x128xf32>
    %437 = arith.subf %322, %436 : vector<16x128xf32>
    %438 = arith.mulf %437, %377 : vector<16x128xf32>
    %cst_158 = arith.constant 8.000000e+00 : f32
    %439 = vector.broadcast %cst_158 : f32 to vector<16x128xf32>
    %440 = arith.subf %439, %322 : vector<16x128xf32>
    %441 = arith.mulf %440, %378 : vector<16x128xf32>
    %442 = arith.addf %438, %441 : vector<16x128xf32>
    %cst_159 = arith.constant 1.000000e+00 : f32
    %443 = vector.broadcast %cst_159 : f32 to vector<16x128xf32>
    %444 = arith.mulf %442, %443 : vector<16x128xf32>
    %cst_160 = arith.constant 7.000000e+00 : f32
    %445 = vector.broadcast %cst_160 : f32 to vector<16x128xf32>
    %446 = arith.subf %322, %445 : vector<16x128xf32>
    %447 = arith.mulf %446, %378 : vector<16x128xf32>
    %cst_161 = arith.constant 9.000000e+00 : f32
    %448 = vector.broadcast %cst_161 : f32 to vector<16x128xf32>
    %449 = arith.subf %448, %322 : vector<16x128xf32>
    %450 = arith.mulf %449, %379 : vector<16x128xf32>
    %451 = arith.addf %447, %450 : vector<16x128xf32>
    %cst_162 = arith.constant 1.000000e+00 : f32
    %452 = vector.broadcast %cst_162 : f32 to vector<16x128xf32>
    %453 = arith.mulf %451, %452 : vector<16x128xf32>
    %cst_163 = arith.constant 8.000000e+00 : f32
    %454 = vector.broadcast %cst_163 : f32 to vector<16x128xf32>
    %455 = arith.subf %322, %454 : vector<16x128xf32>
    %456 = arith.mulf %455, %379 : vector<16x128xf32>
    %cst_164 = arith.constant 1.000000e+01 : f32
    %457 = vector.broadcast %cst_164 : f32 to vector<16x128xf32>
    %458 = arith.subf %457, %322 : vector<16x128xf32>
    %459 = arith.mulf %458, %380 : vector<16x128xf32>
    %460 = arith.addf %456, %459 : vector<16x128xf32>
    %cst_165 = arith.constant 1.000000e+00 : f32
    %461 = vector.broadcast %cst_165 : f32 to vector<16x128xf32>
    %462 = arith.mulf %460, %461 : vector<16x128xf32>
    %cst_166 = arith.constant 9.000000e+00 : f32
    %463 = vector.broadcast %cst_166 : f32 to vector<16x128xf32>
    %464 = arith.subf %322, %463 : vector<16x128xf32>
    %465 = arith.mulf %464, %380 : vector<16x128xf32>
    %cst_167 = arith.constant 1.100000e+01 : f32
    %466 = vector.broadcast %cst_167 : f32 to vector<16x128xf32>
    %467 = arith.subf %466, %322 : vector<16x128xf32>
    %468 = arith.mulf %467, %381 : vector<16x128xf32>
    %469 = arith.addf %465, %468 : vector<16x128xf32>
    %cst_168 = arith.constant 1.000000e+00 : f32
    %470 = vector.broadcast %cst_168 : f32 to vector<16x128xf32>
    %471 = arith.mulf %469, %470 : vector<16x128xf32>
    %cst_169 = arith.constant 0.000000e+00 : f32
    %472 = vector.broadcast %cst_169 : f32 to vector<16x128xf32>
    %473 = arith.subf %322, %472 : vector<16x128xf32>
    %474 = arith.mulf %473, %390 : vector<16x128xf32>
    %cst_170 = arith.constant 3.000000e+00 : f32
    %475 = vector.broadcast %cst_170 : f32 to vector<16x128xf32>
    %476 = arith.subf %475, %322 : vector<16x128xf32>
    %477 = arith.mulf %476, %399 : vector<16x128xf32>
    %478 = arith.addf %474, %477 : vector<16x128xf32>
    %cst_171 = arith.constant 5.000000e-01 : f32
    %479 = vector.broadcast %cst_171 : f32 to vector<16x128xf32>
    %480 = arith.mulf %478, %479 : vector<16x128xf32>
    %cst_172 = arith.constant 1.000000e+00 : f32
    %481 = vector.broadcast %cst_172 : f32 to vector<16x128xf32>
    %482 = arith.subf %322, %481 : vector<16x128xf32>
    %483 = arith.mulf %482, %399 : vector<16x128xf32>
    %cst_173 = arith.constant 4.000000e+00 : f32
    %484 = vector.broadcast %cst_173 : f32 to vector<16x128xf32>
    %485 = arith.subf %484, %322 : vector<16x128xf32>
    %486 = arith.mulf %485, %408 : vector<16x128xf32>
    %487 = arith.addf %483, %486 : vector<16x128xf32>
    %cst_174 = arith.constant 5.000000e-01 : f32
    %488 = vector.broadcast %cst_174 : f32 to vector<16x128xf32>
    %489 = arith.mulf %487, %488 : vector<16x128xf32>
    %cst_175 = arith.constant 2.000000e+00 : f32
    %490 = vector.broadcast %cst_175 : f32 to vector<16x128xf32>
    %491 = arith.subf %322, %490 : vector<16x128xf32>
    %492 = arith.mulf %491, %408 : vector<16x128xf32>
    %cst_176 = arith.constant 5.000000e+00 : f32
    %493 = vector.broadcast %cst_176 : f32 to vector<16x128xf32>
    %494 = arith.subf %493, %322 : vector<16x128xf32>
    %495 = arith.mulf %494, %417 : vector<16x128xf32>
    %496 = arith.addf %492, %495 : vector<16x128xf32>
    %cst_177 = arith.constant 5.000000e-01 : f32
    %497 = vector.broadcast %cst_177 : f32 to vector<16x128xf32>
    %498 = arith.mulf %496, %497 : vector<16x128xf32>
    %cst_178 = arith.constant 3.000000e+00 : f32
    %499 = vector.broadcast %cst_178 : f32 to vector<16x128xf32>
    %500 = arith.subf %322, %499 : vector<16x128xf32>
    %501 = arith.mulf %500, %417 : vector<16x128xf32>
    %cst_179 = arith.constant 6.000000e+00 : f32
    %502 = vector.broadcast %cst_179 : f32 to vector<16x128xf32>
    %503 = arith.subf %502, %322 : vector<16x128xf32>
    %504 = arith.mulf %503, %426 : vector<16x128xf32>
    %505 = arith.addf %501, %504 : vector<16x128xf32>
    %cst_180 = arith.constant 5.000000e-01 : f32
    %506 = vector.broadcast %cst_180 : f32 to vector<16x128xf32>
    %507 = arith.mulf %505, %506 : vector<16x128xf32>
    %cst_181 = arith.constant 4.000000e+00 : f32
    %508 = vector.broadcast %cst_181 : f32 to vector<16x128xf32>
    %509 = arith.subf %322, %508 : vector<16x128xf32>
    %510 = arith.mulf %509, %426 : vector<16x128xf32>
    %cst_182 = arith.constant 7.000000e+00 : f32
    %511 = vector.broadcast %cst_182 : f32 to vector<16x128xf32>
    %512 = arith.subf %511, %322 : vector<16x128xf32>
    %513 = arith.mulf %512, %435 : vector<16x128xf32>
    %514 = arith.addf %510, %513 : vector<16x128xf32>
    %cst_183 = arith.constant 5.000000e-01 : f32
    %515 = vector.broadcast %cst_183 : f32 to vector<16x128xf32>
    %516 = arith.mulf %514, %515 : vector<16x128xf32>
    %cst_184 = arith.constant 5.000000e+00 : f32
    %517 = vector.broadcast %cst_184 : f32 to vector<16x128xf32>
    %518 = arith.subf %322, %517 : vector<16x128xf32>
    %519 = arith.mulf %518, %435 : vector<16x128xf32>
    %cst_185 = arith.constant 8.000000e+00 : f32
    %520 = vector.broadcast %cst_185 : f32 to vector<16x128xf32>
    %521 = arith.subf %520, %322 : vector<16x128xf32>
    %522 = arith.mulf %521, %444 : vector<16x128xf32>
    %523 = arith.addf %519, %522 : vector<16x128xf32>
    %cst_186 = arith.constant 5.000000e-01 : f32
    %524 = vector.broadcast %cst_186 : f32 to vector<16x128xf32>
    %525 = arith.mulf %523, %524 : vector<16x128xf32>
    %cst_187 = arith.constant 6.000000e+00 : f32
    %526 = vector.broadcast %cst_187 : f32 to vector<16x128xf32>
    %527 = arith.subf %322, %526 : vector<16x128xf32>
    %528 = arith.mulf %527, %444 : vector<16x128xf32>
    %cst_188 = arith.constant 9.000000e+00 : f32
    %529 = vector.broadcast %cst_188 : f32 to vector<16x128xf32>
    %530 = arith.subf %529, %322 : vector<16x128xf32>
    %531 = arith.mulf %530, %453 : vector<16x128xf32>
    %532 = arith.addf %528, %531 : vector<16x128xf32>
    %cst_189 = arith.constant 5.000000e-01 : f32
    %533 = vector.broadcast %cst_189 : f32 to vector<16x128xf32>
    %534 = arith.mulf %532, %533 : vector<16x128xf32>
    %cst_190 = arith.constant 7.000000e+00 : f32
    %535 = vector.broadcast %cst_190 : f32 to vector<16x128xf32>
    %536 = arith.subf %322, %535 : vector<16x128xf32>
    %537 = arith.mulf %536, %453 : vector<16x128xf32>
    %cst_191 = arith.constant 1.000000e+01 : f32
    %538 = vector.broadcast %cst_191 : f32 to vector<16x128xf32>
    %539 = arith.subf %538, %322 : vector<16x128xf32>
    %540 = arith.mulf %539, %462 : vector<16x128xf32>
    %541 = arith.addf %537, %540 : vector<16x128xf32>
    %cst_192 = arith.constant 5.000000e-01 : f32
    %542 = vector.broadcast %cst_192 : f32 to vector<16x128xf32>
    %543 = arith.mulf %541, %542 : vector<16x128xf32>
    %cst_193 = arith.constant 8.000000e+00 : f32
    %544 = vector.broadcast %cst_193 : f32 to vector<16x128xf32>
    %545 = arith.subf %322, %544 : vector<16x128xf32>
    %546 = arith.mulf %545, %462 : vector<16x128xf32>
    %cst_194 = arith.constant 1.100000e+01 : f32
    %547 = vector.broadcast %cst_194 : f32 to vector<16x128xf32>
    %548 = arith.subf %547, %322 : vector<16x128xf32>
    %549 = arith.mulf %548, %471 : vector<16x128xf32>
    %550 = arith.addf %546, %549 : vector<16x128xf32>
    %cst_195 = arith.constant 5.000000e-01 : f32
    %551 = vector.broadcast %cst_195 : f32 to vector<16x128xf32>
    %552 = arith.mulf %550, %551 : vector<16x128xf32>
    %cst_196 = arith.constant 0.000000e+00 : f32
    %553 = vector.broadcast %cst_196 : f32 to vector<16x128xf32>
    %554 = arith.subf %322, %553 : vector<16x128xf32>
    %555 = arith.mulf %554, %480 : vector<16x128xf32>
    %cst_197 = arith.constant 4.000000e+00 : f32
    %556 = vector.broadcast %cst_197 : f32 to vector<16x128xf32>
    %557 = arith.subf %556, %322 : vector<16x128xf32>
    %558 = arith.mulf %557, %489 : vector<16x128xf32>
    %559 = arith.addf %555, %558 : vector<16x128xf32>
    %cst_198 = arith.constant 0.333333343 : f32
    %560 = vector.broadcast %cst_198 : f32 to vector<16x128xf32>
    %561 = arith.mulf %559, %560 : vector<16x128xf32>
    %562 = arith.truncf %561 : vector<16x128xf32> to vector<16x128xbf16>
    %c1_199 = arith.constant 1 : index
    %c0_200 = arith.constant 0 : index
    %c0_201 = arith.constant 0 : index
    %563 = vector.load %arg11[%c1_199, %c0_200, %c0_201] : memref<9x128x128xbf16, #tpu.memory_space<vmem>>, vector<1x128x128xbf16>
    %564 = vector.shape_cast %563 : vector<1x128x128xbf16> to vector<128x128xbf16>
    %cst_202 = arith.constant dense<0.000000e+00> : vector<16x128xf32>
    %565 = tpu.matmul %562, %564, %cst_202 {dimension_numbers = #tpu.dot_dimension_numbers<[1], [0], [0], [1], [0, 0, 1, 1], [], []>} : vector<16x128xbf16>, vector<128x128xbf16>, vector<16x128xf32> -> vector<16x128xf32>
    %566 = arith.addf %318, %565 : vector<16x128xf32>
    %cst_203 = arith.constant 1.000000e+00 : f32
    %567 = vector.broadcast %cst_203 : f32 to vector<16x128xf32>
    %568 = arith.subf %322, %567 : vector<16x128xf32>
    %569 = arith.mulf %568, %489 : vector<16x128xf32>
    %cst_204 = arith.constant 5.000000e+00 : f32
    %570 = vector.broadcast %cst_204 : f32 to vector<16x128xf32>
    %571 = arith.subf %570, %322 : vector<16x128xf32>
    %572 = arith.mulf %571, %498 : vector<16x128xf32>
    %573 = arith.addf %569, %572 : vector<16x128xf32>
    %cst_205 = arith.constant 0.333333343 : f32
    %574 = vector.broadcast %cst_205 : f32 to vector<16x128xf32>
    %575 = arith.mulf %573, %574 : vector<16x128xf32>
    %576 = arith.truncf %575 : vector<16x128xf32> to vector<16x128xbf16>
    %c2_206 = arith.constant 2 : index
    %c0_207 = arith.constant 0 : index
    %c0_208 = arith.constant 0 : index
    %577 = vector.load %arg11[%c2_206, %c0_207, %c0_208] : memref<9x128x128xbf16, #tpu.memory_space<vmem>>, vector<1x128x128xbf16>
    %578 = vector.shape_cast %577 : vector<1x128x128xbf16> to vector<128x128xbf16>
    %cst_209 = arith.constant dense<0.000000e+00> : vector<16x128xf32>
    %579 = tpu.matmul %576, %578, %cst_209 {dimension_numbers = #tpu.dot_dimension_numbers<[1], [0], [0], [1], [0, 0, 1, 1], [], []>} : vector<16x128xbf16>, vector<128x128xbf16>, vector<16x128xf32> -> vector<16x128xf32>
    %580 = arith.addf %566, %579 : vector<16x128xf32>
    %cst_210 = arith.constant 2.000000e+00 : f32
    %581 = vector.broadcast %cst_210 : f32 to vector<16x128xf32>
    %582 = arith.subf %322, %581 : vector<16x128xf32>
    %583 = arith.mulf %582, %498 : vector<16x128xf32>
    %cst_211 = arith.constant 6.000000e+00 : f32
    %584 = vector.broadcast %cst_211 : f32 to vector<16x128xf32>
    %585 = arith.subf %584, %322 : vector<16x128xf32>
    %586 = arith.mulf %585, %507 : vector<16x128xf32>
    %587 = arith.addf %583, %586 : vector<16x128xf32>
    %cst_212 = arith.constant 0.333333343 : f32
    %588 = vector.broadcast %cst_212 : f32 to vector<16x128xf32>
    %589 = arith.mulf %587, %588 : vector<16x128xf32>
    %590 = arith.truncf %589 : vector<16x128xf32> to vector<16x128xbf16>
    %c3_213 = arith.constant 3 : index
    %c0_214 = arith.constant 0 : index
    %c0_215 = arith.constant 0 : index
    %591 = vector.load %arg11[%c3_213, %c0_214, %c0_215] : memref<9x128x128xbf16, #tpu.memory_space<vmem>>, vector<1x128x128xbf16>
    %592 = vector.shape_cast %591 : vector<1x128x128xbf16> to vector<128x128xbf16>
    %cst_216 = arith.constant dense<0.000000e+00> : vector<16x128xf32>
    %593 = tpu.matmul %590, %592, %cst_216 {dimension_numbers = #tpu.dot_dimension_numbers<[1], [0], [0], [1], [0, 0, 1, 1], [], []>} : vector<16x128xbf16>, vector<128x128xbf16>, vector<16x128xf32> -> vector<16x128xf32>
    %594 = arith.addf %580, %593 : vector<16x128xf32>
    %cst_217 = arith.constant 3.000000e+00 : f32
    %595 = vector.broadcast %cst_217 : f32 to vector<16x128xf32>
    %596 = arith.subf %322, %595 : vector<16x128xf32>
    %597 = arith.mulf %596, %507 : vector<16x128xf32>
    %cst_218 = arith.constant 7.000000e+00 : f32
    %598 = vector.broadcast %cst_218 : f32 to vector<16x128xf32>
    %599 = arith.subf %598, %322 : vector<16x128xf32>
    %600 = arith.mulf %599, %516 : vector<16x128xf32>
    %601 = arith.addf %597, %600 : vector<16x128xf32>
    %cst_219 = arith.constant 0.333333343 : f32
    %602 = vector.broadcast %cst_219 : f32 to vector<16x128xf32>
    %603 = arith.mulf %601, %602 : vector<16x128xf32>
    %604 = arith.truncf %603 : vector<16x128xf32> to vector<16x128xbf16>
    %c4_220 = arith.constant 4 : index
    %c0_221 = arith.constant 0 : index
    %c0_222 = arith.constant 0 : index
    %605 = vector.load %arg11[%c4_220, %c0_221, %c0_222] : memref<9x128x128xbf16, #tpu.memory_space<vmem>>, vector<1x128x128xbf16>
    %606 = vector.shape_cast %605 : vector<1x128x128xbf16> to vector<128x128xbf16>
    %cst_223 = arith.constant dense<0.000000e+00> : vector<16x128xf32>
    %607 = tpu.matmul %604, %606, %cst_223 {dimension_numbers = #tpu.dot_dimension_numbers<[1], [0], [0], [1], [0, 0, 1, 1], [], []>} : vector<16x128xbf16>, vector<128x128xbf16>, vector<16x128xf32> -> vector<16x128xf32>
    %608 = arith.addf %594, %607 : vector<16x128xf32>
    %cst_224 = arith.constant 4.000000e+00 : f32
    %609 = vector.broadcast %cst_224 : f32 to vector<16x128xf32>
    %610 = arith.subf %322, %609 : vector<16x128xf32>
    %611 = arith.mulf %610, %516 : vector<16x128xf32>
    %cst_225 = arith.constant 8.000000e+00 : f32
    %612 = vector.broadcast %cst_225 : f32 to vector<16x128xf32>
    %613 = arith.subf %612, %322 : vector<16x128xf32>
    %614 = arith.mulf %613, %525 : vector<16x128xf32>
    %615 = arith.addf %611, %614 : vector<16x128xf32>
    %cst_226 = arith.constant 0.333333343 : f32
    %616 = vector.broadcast %cst_226 : f32 to vector<16x128xf32>
    %617 = arith.mulf %615, %616 : vector<16x128xf32>
    %618 = arith.truncf %617 : vector<16x128xf32> to vector<16x128xbf16>
    %c5_227 = arith.constant 5 : index
    %c0_228 = arith.constant 0 : index
    %c0_229 = arith.constant 0 : index
    %619 = vector.load %arg11[%c5_227, %c0_228, %c0_229] : memref<9x128x128xbf16, #tpu.memory_space<vmem>>, vector<1x128x128xbf16>
    %620 = vector.shape_cast %619 : vector<1x128x128xbf16> to vector<128x128xbf16>
    %cst_230 = arith.constant dense<0.000000e+00> : vector<16x128xf32>
    %621 = tpu.matmul %618, %620, %cst_230 {dimension_numbers = #tpu.dot_dimension_numbers<[1], [0], [0], [1], [0, 0, 1, 1], [], []>} : vector<16x128xbf16>, vector<128x128xbf16>, vector<16x128xf32> -> vector<16x128xf32>
    %622 = arith.addf %608, %621 : vector<16x128xf32>
    %cst_231 = arith.constant 5.000000e+00 : f32
    %623 = vector.broadcast %cst_231 : f32 to vector<16x128xf32>
    %624 = arith.subf %322, %623 : vector<16x128xf32>
    %625 = arith.mulf %624, %525 : vector<16x128xf32>
    %cst_232 = arith.constant 9.000000e+00 : f32
    %626 = vector.broadcast %cst_232 : f32 to vector<16x128xf32>
    %627 = arith.subf %626, %322 : vector<16x128xf32>
    %628 = arith.mulf %627, %534 : vector<16x128xf32>
    %629 = arith.addf %625, %628 : vector<16x128xf32>
    %cst_233 = arith.constant 0.333333343 : f32
    %630 = vector.broadcast %cst_233 : f32 to vector<16x128xf32>
    %631 = arith.mulf %629, %630 : vector<16x128xf32>
    %632 = arith.truncf %631 : vector<16x128xf32> to vector<16x128xbf16>
    %c6_234 = arith.constant 6 : index
    %c0_235 = arith.constant 0 : index
    %c0_236 = arith.constant 0 : index
    %633 = vector.load %arg11[%c6_234, %c0_235, %c0_236] : memref<9x128x128xbf16, #tpu.memory_space<vmem>>, vector<1x128x128xbf16>
    %634 = vector.shape_cast %633 : vector<1x128x128xbf16> to vector<128x128xbf16>
    %cst_237 = arith.constant dense<0.000000e+00> : vector<16x128xf32>
    %635 = tpu.matmul %632, %634, %cst_237 {dimension_numbers = #tpu.dot_dimension_numbers<[1], [0], [0], [1], [0, 0, 1, 1], [], []>} : vector<16x128xbf16>, vector<128x128xbf16>, vector<16x128xf32> -> vector<16x128xf32>
    %636 = arith.addf %622, %635 : vector<16x128xf32>
    %cst_238 = arith.constant 6.000000e+00 : f32
    %637 = vector.broadcast %cst_238 : f32 to vector<16x128xf32>
    %638 = arith.subf %322, %637 : vector<16x128xf32>
    %639 = arith.mulf %638, %534 : vector<16x128xf32>
    %cst_239 = arith.constant 1.000000e+01 : f32
    %640 = vector.broadcast %cst_239 : f32 to vector<16x128xf32>
    %641 = arith.subf %640, %322 : vector<16x128xf32>
    %642 = arith.mulf %641, %543 : vector<16x128xf32>
    %643 = arith.addf %639, %642 : vector<16x128xf32>
    %cst_240 = arith.constant 0.333333343 : f32
    %644 = vector.broadcast %cst_240 : f32 to vector<16x128xf32>
    %645 = arith.mulf %643, %644 : vector<16x128xf32>
    %646 = arith.truncf %645 : vector<16x128xf32> to vector<16x128xbf16>
    %c7_241 = arith.constant 7 : index
    %c0_242 = arith.constant 0 : index
    %c0_243 = arith.constant 0 : index
    %647 = vector.load %arg11[%c7_241, %c0_242, %c0_243] : memref<9x128x128xbf16, #tpu.memory_space<vmem>>, vector<1x128x128xbf16>
    %648 = vector.shape_cast %647 : vector<1x128x128xbf16> to vector<128x128xbf16>
    %cst_244 = arith.constant dense<0.000000e+00> : vector<16x128xf32>
    %649 = tpu.matmul %646, %648, %cst_244 {dimension_numbers = #tpu.dot_dimension_numbers<[1], [0], [0], [1], [0, 0, 1, 1], [], []>} : vector<16x128xbf16>, vector<128x128xbf16>, vector<16x128xf32> -> vector<16x128xf32>
    %650 = arith.addf %636, %649 : vector<16x128xf32>
    %cst_245 = arith.constant 7.000000e+00 : f32
    %651 = vector.broadcast %cst_245 : f32 to vector<16x128xf32>
    %652 = arith.subf %322, %651 : vector<16x128xf32>
    %653 = arith.mulf %652, %543 : vector<16x128xf32>
    %cst_246 = arith.constant 1.100000e+01 : f32
    %654 = vector.broadcast %cst_246 : f32 to vector<16x128xf32>
    %655 = arith.subf %654, %322 : vector<16x128xf32>
    %656 = arith.mulf %655, %552 : vector<16x128xf32>
    %657 = arith.addf %653, %656 : vector<16x128xf32>
    %cst_247 = arith.constant 0.333333343 : f32
    %658 = vector.broadcast %cst_247 : f32 to vector<16x128xf32>
    %659 = arith.mulf %657, %658 : vector<16x128xf32>
    %660 = arith.truncf %659 : vector<16x128xf32> to vector<16x128xbf16>
    %c8_248 = arith.constant 8 : index
    %c0_249 = arith.constant 0 : index
    %c0_250 = arith.constant 0 : index
    %661 = vector.load %arg11[%c8_248, %c0_249, %c0_250] : memref<9x128x128xbf16, #tpu.memory_space<vmem>>, vector<1x128x128xbf16>
    %662 = vector.shape_cast %661 : vector<1x128x128xbf16> to vector<128x128xbf16>
    %cst_251 = arith.constant dense<0.000000e+00> : vector<16x128xf32>
    %663 = tpu.matmul %660, %662, %cst_251 {dimension_numbers = #tpu.dot_dimension_numbers<[1], [0], [0], [1], [0, 0, 1, 1], [], []>} : vector<16x128xbf16>, vector<128x128xbf16>, vector<16x128xf32> -> vector<16x128xf32>
    %664 = arith.addf %650, %663 : vector<16x128xf32>
    %665 = arith.addf %664, %41 : vector<16x128xf32>
    %666 = math.tanh %665 : vector<16x128xf32>
    %c0_252 = arith.constant 0 : index
    %c0_253 = arith.constant 0 : index
    %667 = vector.load %arg12[%c0_252, %c0_253] : memref<16x128xf32, #tpu.memory_space<vmem>>, vector<16x128xf32>
    tpu.vector_store %arg12[%c0_252, %c0_253], %666 {strides = array<i32>} : memref<16x128xf32, #tpu.memory_space<vmem>>, vector<16x128xf32>,
    %c0_254 = arith.constant 0 : index
    %c0_255 = arith.constant 0 : index
    %668 = vector.load %arg13[%c0_254, %c0_255] : memref<16x128xf32, #tpu.memory_space<vmem>>, vector<16x128xf32>
    tpu.vector_store %arg13[%c0_254, %c0_255], %34 {strides = array<i32>} : memref<16x128xf32, #tpu.memory_space<vmem>>, vector<16x128xf32>,
    return
  }
  func.func @transform_0(%arg0: i32) -> (i32, i32) {
    %c0_i32 = arith.constant 0 : i32
    %c0_i32_0 = arith.constant 0 : i32
    return %arg0, %c0_i32 : i32, i32
  }
  func.func @transform_1(%arg0: i32) -> (i32, i32) {
    %c0_i32 = arith.constant 0 : i32
    %c0_i32_0 = arith.constant 0 : i32
    return %arg0, %c0_i32 : i32, i32
  }
  func.func @transform_2(%arg0: i32) -> (i32, i32) {
    %c0_i32 = arith.constant 0 : i32
    %c0_i32_0 = arith.constant 0 : i32
    %c0_i32_1 = arith.constant 0 : i32
    return %c0_i32, %c0_i32_0 : i32, i32
  }
  func.func @transform_3(%arg0: i32) -> (i32, i32) {
    %c0_i32 = arith.constant 0 : i32
    %c0_i32_0 = arith.constant 0 : i32
    %c0_i32_1 = arith.constant 0 : i32
    return %c0_i32, %c0_i32_0 : i32, i32
  }
  func.func @transform_4(%arg0: i32) -> (i32, i32) {
    %c0_i32 = arith.constant 0 : i32
    %c0_i32_0 = arith.constant 0 : i32
    %c0_i32_1 = arith.constant 0 : i32
    return %c0_i32, %c0_i32_0 : i32, i32
  }
  func.func @transform_5(%arg0: i32) -> (i32, i32) {
    %c0_i32 = arith.constant 0 : i32
    %c0_i32_0 = arith.constant 0 : i32
    %c0_i32_1 = arith.constant 0 : i32
    return %c0_i32, %c0_i32_0 : i32, i32
  }
  func.func @transform_6(%arg0: i32) -> (i32, i32) {
    %c0_i32 = arith.constant 0 : i32
    %c0_i32_0 = arith.constant 0 : i32
    %c0_i32_1 = arith.constant 0 : i32
    return %c0_i32, %c0_i32_0 : i32, i32
  }
  func.func @transform_7(%arg0: i32) -> (i32, i32) {
    %c0_i32 = arith.constant 0 : i32
    %c0_i32_0 = arith.constant 0 : i32
    %c0_i32_1 = arith.constant 0 : i32
    return %c0_i32, %c0_i32_0 : i32, i32
  }
  func.func @transform_8(%arg0: i32) -> (i32, i32) {
    %c0_i32 = arith.constant 0 : i32
    %c0_i32_0 = arith.constant 0 : i32
    %c0_i32_1 = arith.constant 0 : i32
    return %c0_i32, %c0_i32_0 : i32, i32
  }
  func.func @transform_9(%arg0: i32) -> (i32, i32, i32) {
    %c0_i32 = arith.constant 0 : i32
    %c0_i32_0 = arith.constant 0 : i32
    %c0_i32_1 = arith.constant 0 : i32
    %c0_i32_2 = arith.constant 0 : i32
    return %c0_i32, %c0_i32_0, %c0_i32_1 : i32, i32, i32
  }
  func.func @transform_10(%arg0: i32) -> (i32, i32, i32) {
    %c0_i32 = arith.constant 0 : i32
    %c0_i32_0 = arith.constant 0 : i32
    %c0_i32_1 = arith.constant 0 : i32
    %c0_i32_2 = arith.constant 0 : i32
    return %c0_i32, %c0_i32_0, %c0_i32_1 : i32, i32, i32
  }
  func.func @transform_11(%arg0: i32) -> (i32, i32) {
    %c0_i32 = arith.constant 0 : i32
    %c0_i32_0 = arith.constant 0 : i32
    return %arg0, %c0_i32 : i32, i32
  }
  func.func @transform_12(%arg0: i32) -> (i32, i32) {
    %c0_i32 = arith.constant 0 : i32
    %c0_i32_0 = arith.constant 0 : i32
    return %arg0, %c0_i32 : i32, i32
  }
}

module attributes {stable_mosaic.version = 11 : i64} {
  func.func @kernel(%arg0: i32, %arg1: memref<16x384xbf16, #tpu.memory_space<vmem>>, %arg2: memref<16x128xf32, #tpu.memory_space<vmem>>, %arg3: memref<128x128xbf16, #tpu.memory_space<vmem>>, %arg4: memref<128x128xbf16, #tpu.memory_space<vmem>>, %arg5: memref<128x128xbf16, #tpu.memory_space<vmem>>, %arg6: memref<1x128xf32, #tpu.memory_space<vmem>>, %arg7: memref<1x128xf32, #tpu.memory_space<vmem>>, %arg8: memref<1x128xf32, #tpu.memory_space<vmem>>, %arg9: memref<3x128xf32, #tpu.memory_space<vmem>>, %arg10: memref<9x128x128xbf16, #tpu.memory_space<vmem>>, %arg11: memref<9x128x128xbf16, #tpu.memory_space<vmem>>, %arg12: memref<16x128xf32, #tpu.memory_space<vmem>>, %arg13: memref<16x128xf32, #tpu.memory_space<vmem>>) attributes {dimension_semantics = [#tpu.dimension_semantics<parallel>], iteration_bounds = array<i64: 1>, scalar_prefetch = 0 : i64, scratch_operands = 0 : i64, tpu.core_type = #tpu.core_type<tc>, window_params = [{transform_indices = @transform_0, window_bounds = array<i64: 16, 384>}, {transform_indices = @transform_1, window_bounds = array<i64: 16, 128>}, {pipeline_mode = #tpu.pipeline_mode<synchronous>, transform_indices = @transform_2, window_bounds = array<i64: 128, 128>}, {pipeline_mode = #tpu.pipeline_mode<synchronous>, transform_indices = @transform_3, window_bounds = array<i64: 128, 128>}, {pipeline_mode = #tpu.pipeline_mode<synchronous>, transform_indices = @transform_4, window_bounds = array<i64: 128, 128>}, {pipeline_mode = #tpu.pipeline_mode<synchronous>, transform_indices = @transform_5, window_bounds = array<i64: 1, 128>}, {pipeline_mode = #tpu.pipeline_mode<synchronous>, transform_indices = @transform_6, window_bounds = array<i64: 1, 128>}, {pipeline_mode = #tpu.pipeline_mode<synchronous>, transform_indices = @transform_7, window_bounds = array<i64: 1, 128>}, {pipeline_mode = #tpu.pipeline_mode<synchronous>, transform_indices = @transform_8, window_bounds = array<i64: 3, 128>}, {pipeline_mode = #tpu.pipeline_mode<synchronous>, transform_indices = @transform_9, window_bounds = array<i64: 9, 128, 128>}, {pipeline_mode = #tpu.pipeline_mode<synchronous>, transform_indices = @transform_10, window_bounds = array<i64: 9, 128, 128>}, {transform_indices = @transform_11, window_bounds = array<i64: 16, 128>}, {transform_indices = @transform_12, window_bounds = array<i64: 16, 128>}]} {
    %c0 = arith.constant 0 : index
    %c0_0 = arith.constant 0 : index
    %0 = vector.load %arg1[%c0, %c0_0] : memref<16x384xbf16, #tpu.memory_space<vmem>>, vector<16x384xbf16>
    %1 = vector.extract_strided_slice %0 {offsets = [0, 0], sizes = [16, 128], strides = [1, 1]} : vector<16x384xbf16> to vector<16x128xbf16>
    %2 = vector.extract_strided_slice %0 {offsets = [0, 128], sizes = [16, 128], strides = [1, 1]} : vector<16x384xbf16> to vector<16x128xbf16>
    %3 = vector.extract_strided_slice %0 {offsets = [0, 256], sizes = [16, 128], strides = [1, 1]} : vector<16x384xbf16> to vector<16x128xbf16>
    %c0_1 = arith.constant 0 : index
    %c0_2 = arith.constant 0 : index
    %4 = vector.load %arg3[%c0_1, %c0_2] : memref<128x128xbf16, #tpu.memory_space<vmem>>, vector<128x128xbf16>
    %cst = arith.constant dense<0.000000e+00> : vector<16x128xf32>
    %5 = tpu.matmul %1, %4, %cst {dimension_numbers = #tpu.dot_dimension_numbers<[1], [0], [0], [1], [0, 0, 1, 1], [], []>} : vector<16x128xbf16>, vector<128x128xbf16>, vector<16x128xf32> -> vector<16x128xf32>
    %c0_3 = arith.constant 0 : index
    %c0_4 = arith.constant 0 : index
    %6 = vector.load %arg4[%c0_3, %c0_4] : memref<128x128xbf16, #tpu.memory_space<vmem>>, vector<128x128xbf16>
    %cst_5 = arith.constant dense<0.000000e+00> : vector<16x128xf32>
    %7 = tpu.matmul %2, %6, %cst_5 {dimension_numbers = #tpu.dot_dimension_numbers<[1], [0], [0], [1], [0, 0, 1, 1], [], []>} : vector<16x128xbf16>, vector<128x128xbf16>, vector<16x128xf32> -> vector<16x128xf32>
    %c0_6 = arith.constant 0 : index
    %c0_7 = arith.constant 0 : index
    %8 = vector.load %arg5[%c0_6, %c0_7] : memref<128x128xbf16, #tpu.memory_space<vmem>>, vector<128x128xbf16>
    %cst_8 = arith.constant dense<0.000000e+00> : vector<16x128xf32>
    %9 = tpu.matmul %3, %8, %cst_8 {dimension_numbers = #tpu.dot_dimension_numbers<[1], [0], [0], [1], [0, 0, 1, 1], [], []>} : vector<16x128xbf16>, vector<128x128xbf16>, vector<16x128xf32> -> vector<16x128xf32>
    %c0_9 = arith.constant 0 : index
    %c0_10 = arith.constant 0 : index
    %10 = vector.load %arg7[%c0_9, %c0_10] : memref<1x128xf32, #tpu.memory_space<vmem>>, vector<1x128xf32>
    %11 = arith.mulf %7, %9 : vector<16x128xf32>
    %12 = vector.broadcast %10 : vector<1x128xf32> to vector<16x128xf32>
    %13 = arith.mulf %12, %11 : vector<16x128xf32>
    %c0_11 = arith.constant 0 : index
    %c0_12 = arith.constant 0 : index
    %14 = vector.load %arg8[%c0_11, %c0_12] : memref<1x128xf32, #tpu.memory_space<vmem>>, vector<1x128xf32>
    %c0_13 = arith.constant 0 : index
    %c0_14 = arith.constant 0 : index
    %15 = vector.load %arg2[%c0_13, %c0_14] : memref<16x128xf32, #tpu.memory_space<vmem>>, vector<16x128xf32>
    %16 = vector.broadcast %14 : vector<1x128xf32> to vector<16x128xf32>
    %17 = arith.mulf %16, %15 : vector<16x128xf32>
    %18 = arith.addf %13, %17 : vector<16x128xf32>
    %c0_15 = arith.constant 0 : index
    %c0_16 = arith.constant 0 : index
    %19 = vector.load %arg9[%c0_15, %c0_16] : memref<3x128xf32, #tpu.memory_space<vmem>>, vector<3x128xf32>
    %20 = vector.extract_strided_slice %19 {offsets = [0, 0], sizes = [1, 128], strides = [1, 1]} : vector<3x128xf32> to vector<1x128xf32>
    %c1_i32 = arith.constant 1 : i32
    %21 = tpu.dynamic_rotate %18 by %c1_i32 dim 1 : vector<16x128xf32>, i32 -> vector<16x128xf32>
    %22 = vector.broadcast %20 : vector<1x128xf32> to vector<16x128xf32>
    %23 = arith.mulf %22, %21 : vector<16x128xf32>
    %24 = arith.addf %18, %23 : vector<16x128xf32>
    %25 = vector.extract_strided_slice %19 {offsets = [1, 0], sizes = [1, 128], strides = [1, 1]} : vector<3x128xf32> to vector<1x128xf32>
    %c2_i32 = arith.constant 2 : i32
    %26 = tpu.dynamic_rotate %24 by %c2_i32 dim 1 : vector<16x128xf32>, i32 -> vector<16x128xf32>
    %27 = vector.broadcast %25 : vector<1x128xf32> to vector<16x128xf32>
    %28 = arith.mulf %27, %26 : vector<16x128xf32>
    %29 = arith.addf %24, %28 : vector<16x128xf32>
    %30 = vector.extract_strided_slice %19 {offsets = [2, 0], sizes = [1, 128], strides = [1, 1]} : vector<3x128xf32> to vector<1x128xf32>
    %c4_i32 = arith.constant 4 : i32
    %31 = tpu.dynamic_rotate %29 by %c4_i32 dim 1 : vector<16x128xf32>, i32 -> vector<16x128xf32>
    %32 = vector.broadcast %30 : vector<1x128xf32> to vector<16x128xf32>
    %33 = arith.mulf %32, %31 : vector<16x128xf32>
    %34 = arith.addf %29, %33 : vector<16x128xf32>
    %35 = arith.addf %5, %34 : vector<16x128xf32>
    %c0_17 = arith.constant 0 : index
    %c0_18 = arith.constant 0 : index
    %36 = vector.load %arg6[%c0_17, %c0_18] : memref<1x128xf32, #tpu.memory_space<vmem>>, vector<1x128xf32>
    %37 = vector.broadcast %36 : vector<1x128xf32> to vector<16x128xf32>
    %38 = arith.mulf %35, %37 : vector<16x128xf32>
    %39 = arith.extf %1 : vector<16x128xbf16> to vector<16x128xf32>
    %40 = arith.addf %38, %39 : vector<16x128xf32>
    %41 = math.tanh %40 : vector<16x128xf32>
    %42 = arith.negf %41 : vector<16x128xf32>
    %43 = math.exp %42 : vector<16x128xf32>
    %cst_19 = arith.constant 1.000000e+00 : f32
    %44 = vector.broadcast %cst_19 : f32 to vector<16x128xf32>
    %45 = arith.addf %44, %43 : vector<16x128xf32>
    %46 = arith.divf %44, %45 : vector<16x128xf32>
    %47 = arith.mulf %41, %46 : vector<16x128xf32>
    %48 = arith.truncf %47 : vector<16x128xf32> to vector<16x128xbf16>
    %c0_20 = arith.constant 0 : index
    %c0_21 = arith.constant 0 : index
    %c0_22 = arith.constant 0 : index
    %49 = vector.load %arg10[%c0_20, %c0_21, %c0_22] : memref<9x128x128xbf16, #tpu.memory_space<vmem>>, vector<1x128x128xbf16>
    %50 = vector.shape_cast %49 : vector<1x128x128xbf16> to vector<128x128xbf16>
    %cst_23 = arith.constant dense<0.000000e+00> : vector<16x128xf32>
    %51 = tpu.matmul %48, %50, %cst_23 {dimension_numbers = #tpu.dot_dimension_numbers<[1], [0], [0], [1], [0, 0, 1, 1], [], []>} : vector<16x128xbf16>, vector<128x128xbf16>, vector<16x128xf32> -> vector<16x128xf32>
    %cst_24 = arith.constant -2.200000e+00 : f32
    %52 = vector.broadcast %cst_24 : f32 to vector<16x128xf32>
    %53 = arith.subf %41, %52 : vector<16x128xf32>
    %cst_25 = arith.constant 2.500000e+00 : f32
    %54 = vector.broadcast %cst_25 : f32 to vector<16x128xf32>
    %55 = arith.mulf %53, %54 : vector<16x128xf32>
    %cst_26 = arith.constant 4.000000e+00 : f32
    %56 = vector.broadcast %cst_26 : f32 to vector<16x128xf32>
    %57 = arith.cmpf oge, %55, %56 : vector<16x128xf32>
    %58 = arith.extui %57 : vector<16x128xi1> to vector<16x128xi32>
    %59 = arith.sitofp %58 : vector<16x128xi32> to vector<16x128xf32>
    %cst_27 = arith.constant 5.000000e+00 : f32
    %60 = vector.broadcast %cst_27 : f32 to vector<16x128xf32>
    %61 = arith.cmpf oge, %55, %60 : vector<16x128xf32>
    %62 = arith.extui %61 : vector<16x128xi1> to vector<16x128xi32>
    %63 = arith.sitofp %62 : vector<16x128xi32> to vector<16x128xf32>
    %cst_28 = arith.constant 6.000000e+00 : f32
    %64 = vector.broadcast %cst_28 : f32 to vector<16x128xf32>
    %65 = arith.cmpf oge, %55, %64 : vector<16x128xf32>
    %66 = arith.extui %65 : vector<16x128xi1> to vector<16x128xi32>
    %67 = arith.sitofp %66 : vector<16x128xi32> to vector<16x128xf32>
    %cst_29 = arith.constant 7.000000e+00 : f32
    %68 = vector.broadcast %cst_29 : f32 to vector<16x128xf32>
    %69 = arith.cmpf oge, %55, %68 : vector<16x128xf32>
    %70 = arith.extui %69 : vector<16x128xi1> to vector<16x128xi32>
    %71 = arith.sitofp %70 : vector<16x128xi32> to vector<16x128xf32>
    %cst_30 = arith.constant 8.000000e+00 : f32
    %72 = vector.broadcast %cst_30 : f32 to vector<16x128xf32>
    %73 = arith.cmpf oge, %55, %72 : vector<16x128xf32>
    %74 = arith.extui %73 : vector<16x128xi1> to vector<16x128xi32>
    %75 = arith.sitofp %74 : vector<16x128xi32> to vector<16x128xf32>
    %cst_31 = arith.constant 1.000000e+00 : f32
    %76 = vector.broadcast %cst_31 : f32 to vector<16x128xf32>
    %77 = arith.subf %76, %59 : vector<16x128xf32>
    %78 = arith.subf %59, %63 : vector<16x128xf32>
    %79 = arith.subf %63, %67 : vector<16x128xf32>
    %80 = arith.subf %67, %71 : vector<16x128xf32>
    %81 = arith.subf %71, %75 : vector<16x128xf32>
    %cst_32 = arith.constant 4.000000e+00 : f32
    %82 = vector.broadcast %cst_32 : f32 to vector<16x128xf32>
    %83 = arith.subf %82, %55 : vector<16x128xf32>
    %84 = arith.mulf %83, %77 : vector<16x128xf32>
    %cst_33 = arith.constant 1.000000e+00 : f32
    %85 = vector.broadcast %cst_33 : f32 to vector<16x128xf32>
    %86 = arith.mulf %84, %85 : vector<16x128xf32>
    %cst_34 = arith.constant 3.000000e+00 : f32
    %87 = vector.broadcast %cst_34 : f32 to vector<16x128xf32>
    %88 = arith.subf %55, %87 : vector<16x128xf32>
    %89 = arith.mulf %88, %77 : vector<16x128xf32>
    %cst_35 = arith.constant 5.000000e+00 : f32
    %90 = vector.broadcast %cst_35 : f32 to vector<16x128xf32>
    %91 = arith.subf %90, %55 : vector<16x128xf32>
    %92 = arith.mulf %91, %78 : vector<16x128xf32>
    %93 = arith.addf %89, %92 : vector<16x128xf32>
    %cst_36 = arith.constant 1.000000e+00 : f32
    %94 = vector.broadcast %cst_36 : f32 to vector<16x128xf32>
    %95 = arith.mulf %93, %94 : vector<16x128xf32>
    %cst_37 = arith.constant 4.000000e+00 : f32
    %96 = vector.broadcast %cst_37 : f32 to vector<16x128xf32>
    %97 = arith.subf %55, %96 : vector<16x128xf32>
    %98 = arith.mulf %97, %78 : vector<16x128xf32>
    %cst_38 = arith.constant 6.000000e+00 : f32
    %99 = vector.broadcast %cst_38 : f32 to vector<16x128xf32>
    %100 = arith.subf %99, %55 : vector<16x128xf32>
    %101 = arith.mulf %100, %79 : vector<16x128xf32>
    %102 = arith.addf %98, %101 : vector<16x128xf32>
    %cst_39 = arith.constant 1.000000e+00 : f32
    %103 = vector.broadcast %cst_39 : f32 to vector<16x128xf32>
    %104 = arith.mulf %102, %103 : vector<16x128xf32>
    %cst_40 = arith.constant 5.000000e+00 : f32
    %105 = vector.broadcast %cst_40 : f32 to vector<16x128xf32>
    %106 = arith.subf %55, %105 : vector<16x128xf32>
    %107 = arith.mulf %106, %79 : vector<16x128xf32>
    %cst_41 = arith.constant 7.000000e+00 : f32
    %108 = vector.broadcast %cst_41 : f32 to vector<16x128xf32>
    %109 = arith.subf %108, %55 : vector<16x128xf32>
    %110 = arith.mulf %109, %80 : vector<16x128xf32>
    %111 = arith.addf %107, %110 : vector<16x128xf32>
    %cst_42 = arith.constant 1.000000e+00 : f32
    %112 = vector.broadcast %cst_42 : f32 to vector<16x128xf32>
    %113 = arith.mulf %111, %112 : vector<16x128xf32>
    %cst_43 = arith.constant 6.000000e+00 : f32
    %114 = vector.broadcast %cst_43 : f32 to vector<16x128xf32>
    %115 = arith.subf %55, %114 : vector<16x128xf32>
    %116 = arith.mulf %115, %80 : vector<16x128xf32>
    %cst_44 = arith.constant 8.000000e+00 : f32
    %117 = vector.broadcast %cst_44 : f32 to vector<16x128xf32>
    %118 = arith.subf %117, %55 : vector<16x128xf32>
    %119 = arith.mulf %118, %81 : vector<16x128xf32>
    %120 = arith.addf %116, %119 : vector<16x128xf32>
    %cst_45 = arith.constant 1.000000e+00 : f32
    %121 = vector.broadcast %cst_45 : f32 to vector<16x128xf32>
    %122 = arith.mulf %120, %121 : vector<16x128xf32>
    %cst_46 = arith.constant 7.000000e+00 : f32
    %123 = vector.broadcast %cst_46 : f32 to vector<16x128xf32>
    %124 = arith.subf %55, %123 : vector<16x128xf32>
    %125 = arith.mulf %124, %81 : vector<16x128xf32>
    %cst_47 = arith.constant 9.000000e+00 : f32
    %126 = vector.broadcast %cst_47 : f32 to vector<16x128xf32>
    %127 = arith.subf %126, %55 : vector<16x128xf32>
    %128 = arith.mulf %127, %75 : vector<16x128xf32>
    %129 = arith.addf %125, %128 : vector<16x128xf32>
    %cst_48 = arith.constant 1.000000e+00 : f32
    %130 = vector.broadcast %cst_48 : f32 to vector<16x128xf32>
    %131 = arith.mulf %129, %130 : vector<16x128xf32>
    %cst_49 = arith.constant 8.000000e+00 : f32
    %132 = vector.broadcast %cst_49 : f32 to vector<16x128xf32>
    %133 = arith.subf %55, %132 : vector<16x128xf32>
    %134 = arith.mulf %133, %75 : vector<16x128xf32>
    %cst_50 = arith.constant 1.000000e+00 : f32
    %135 = vector.broadcast %cst_50 : f32 to vector<16x128xf32>
    %136 = arith.mulf %134, %135 : vector<16x128xf32>
    %cst_51 = arith.constant 4.000000e+00 : f32
    %137 = vector.broadcast %cst_51 : f32 to vector<16x128xf32>
    %138 = arith.subf %137, %55 : vector<16x128xf32>
    %139 = arith.mulf %138, %86 : vector<16x128xf32>
    %cst_52 = arith.constant 5.000000e-01 : f32
    %140 = vector.broadcast %cst_52 : f32 to vector<16x128xf32>
    %141 = arith.mulf %139, %140 : vector<16x128xf32>
    %cst_53 = arith.constant 2.000000e+00 : f32
    %142 = vector.broadcast %cst_53 : f32 to vector<16x128xf32>
    %143 = arith.subf %55, %142 : vector<16x128xf32>
    %144 = arith.mulf %143, %86 : vector<16x128xf32>
    %cst_54 = arith.constant 5.000000e+00 : f32
    %145 = vector.broadcast %cst_54 : f32 to vector<16x128xf32>
    %146 = arith.subf %145, %55 : vector<16x128xf32>
    %147 = arith.mulf %146, %95 : vector<16x128xf32>
    %148 = arith.addf %144, %147 : vector<16x128xf32>
    %cst_55 = arith.constant 5.000000e-01 : f32
    %149 = vector.broadcast %cst_55 : f32 to vector<16x128xf32>
    %150 = arith.mulf %148, %149 : vector<16x128xf32>
    %cst_56 = arith.constant 3.000000e+00 : f32
    %151 = vector.broadcast %cst_56 : f32 to vector<16x128xf32>
    %152 = arith.subf %55, %151 : vector<16x128xf32>
    %153 = arith.mulf %152, %95 : vector<16x128xf32>
    %cst_57 = arith.constant 6.000000e+00 : f32
    %154 = vector.broadcast %cst_57 : f32 to vector<16x128xf32>
    %155 = arith.subf %154, %55 : vector<16x128xf32>
    %156 = arith.mulf %155, %104 : vector<16x128xf32>
    %157 = arith.addf %153, %156 : vector<16x128xf32>
    %cst_58 = arith.constant 5.000000e-01 : f32
    %158 = vector.broadcast %cst_58 : f32 to vector<16x128xf32>
    %159 = arith.mulf %157, %158 : vector<16x128xf32>
    %cst_59 = arith.constant 4.000000e+00 : f32
    %160 = vector.broadcast %cst_59 : f32 to vector<16x128xf32>
    %161 = arith.subf %55, %160 : vector<16x128xf32>
    %162 = arith.mulf %161, %104 : vector<16x128xf32>
    %cst_60 = arith.constant 7.000000e+00 : f32
    %163 = vector.broadcast %cst_60 : f32 to vector<16x128xf32>
    %164 = arith.subf %163, %55 : vector<16x128xf32>
    %165 = arith.mulf %164, %113 : vector<16x128xf32>
    %166 = arith.addf %162, %165 : vector<16x128xf32>
    %cst_61 = arith.constant 5.000000e-01 : f32
    %167 = vector.broadcast %cst_61 : f32 to vector<16x128xf32>
    %168 = arith.mulf %166, %167 : vector<16x128xf32>
    %cst_62 = arith.constant 5.000000e+00 : f32
    %169 = vector.broadcast %cst_62 : f32 to vector<16x128xf32>
    %170 = arith.subf %55, %169 : vector<16x128xf32>
    %171 = arith.mulf %170, %113 : vector<16x128xf32>
    %cst_63 = arith.constant 8.000000e+00 : f32
    %172 = vector.broadcast %cst_63 : f32 to vector<16x128xf32>
    %173 = arith.subf %172, %55 : vector<16x128xf32>
    %174 = arith.mulf %173, %122 : vector<16x128xf32>
    %175 = arith.addf %171, %174 : vector<16x128xf32>
    %cst_64 = arith.constant 5.000000e-01 : f32
    %176 = vector.broadcast %cst_64 : f32 to vector<16x128xf32>
    %177 = arith.mulf %175, %176 : vector<16x128xf32>
    %cst_65 = arith.constant 6.000000e+00 : f32
    %178 = vector.broadcast %cst_65 : f32 to vector<16x128xf32>
    %179 = arith.subf %55, %178 : vector<16x128xf32>
    %180 = arith.mulf %179, %122 : vector<16x128xf32>
    %cst_66 = arith.constant 9.000000e+00 : f32
    %181 = vector.broadcast %cst_66 : f32 to vector<16x128xf32>
    %182 = arith.subf %181, %55 : vector<16x128xf32>
    %183 = arith.mulf %182, %131 : vector<16x128xf32>
    %184 = arith.addf %180, %183 : vector<16x128xf32>
    %cst_67 = arith.constant 5.000000e-01 : f32
    %185 = vector.broadcast %cst_67 : f32 to vector<16x128xf32>
    %186 = arith.mulf %184, %185 : vector<16x128xf32>
    %cst_68 = arith.constant 7.000000e+00 : f32
    %187 = vector.broadcast %cst_68 : f32 to vector<16x128xf32>
    %188 = arith.subf %55, %187 : vector<16x128xf32>
    %189 = arith.mulf %188, %131 : vector<16x128xf32>
    %cst_69 = arith.constant 1.000000e+01 : f32
    %190 = vector.broadcast %cst_69 : f32 to vector<16x128xf32>
    %191 = arith.subf %190, %55 : vector<16x128xf32>
    %192 = arith.mulf %191, %136 : vector<16x128xf32>
    %193 = arith.addf %189, %192 : vector<16x128xf32>
    %cst_70 = arith.constant 5.000000e-01 : f32
    %194 = vector.broadcast %cst_70 : f32 to vector<16x128xf32>
    %195 = arith.mulf %193, %194 : vector<16x128xf32>
    %cst_71 = arith.constant 8.000000e+00 : f32
    %196 = vector.broadcast %cst_71 : f32 to vector<16x128xf32>
    %197 = arith.subf %55, %196 : vector<16x128xf32>
    %198 = arith.mulf %197, %136 : vector<16x128xf32>
    %cst_72 = arith.constant 5.000000e-01 : f32
    %199 = vector.broadcast %cst_72 : f32 to vector<16x128xf32>
    %200 = arith.mulf %198, %199 : vector<16x128xf32>
    %cst_73 = arith.constant 4.000000e+00 : f32
    %201 = vector.broadcast %cst_73 : f32 to vector<16x128xf32>
    %202 = arith.subf %201, %55 : vector<16x128xf32>
    %203 = arith.mulf %202, %141 : vector<16x128xf32>
    %cst_74 = arith.constant 0.333333343 : f32
    %204 = vector.broadcast %cst_74 : f32 to vector<16x128xf32>
    %205 = arith.mulf %203, %204 : vector<16x128xf32>
    %206 = arith.truncf %205 : vector<16x128xf32> to vector<16x128xbf16>
    %c1 = arith.constant 1 : index
    %c0_75 = arith.constant 0 : index
    %c0_76 = arith.constant 0 : index
    %207 = vector.load %arg10[%c1, %c0_75, %c0_76] : memref<9x128x128xbf16, #tpu.memory_space<vmem>>, vector<1x128x128xbf16>
    %208 = vector.shape_cast %207 : vector<1x128x128xbf16> to vector<128x128xbf16>
    %cst_77 = arith.constant dense<0.000000e+00> : vector<16x128xf32>
    %209 = tpu.matmul %206, %208, %cst_77 {dimension_numbers = #tpu.dot_dimension_numbers<[1], [0], [0], [1], [0, 0, 1, 1], [], []>} : vector<16x128xbf16>, vector<128x128xbf16>, vector<16x128xf32> -> vector<16x128xf32>
    %210 = arith.addf %51, %209 : vector<16x128xf32>
    %cst_78 = arith.constant 1.000000e+00 : f32
    %211 = vector.broadcast %cst_78 : f32 to vector<16x128xf32>
    %212 = arith.subf %55, %211 : vector<16x128xf32>
    %213 = arith.mulf %212, %141 : vector<16x128xf32>
    %cst_79 = arith.constant 5.000000e+00 : f32
    %214 = vector.broadcast %cst_79 : f32 to vector<16x128xf32>
    %215 = arith.subf %214, %55 : vector<16x128xf32>
    %216 = arith.mulf %215, %150 : vector<16x128xf32>
    %217 = arith.addf %213, %216 : vector<16x128xf32>
    %cst_80 = arith.constant 0.333333343 : f32
    %218 = vector.broadcast %cst_80 : f32 to vector<16x128xf32>
    %219 = arith.mulf %217, %218 : vector<16x128xf32>
    %220 = arith.truncf %219 : vector<16x128xf32> to vector<16x128xbf16>
    %c2 = arith.constant 2 : index
    %c0_81 = arith.constant 0 : index
    %c0_82 = arith.constant 0 : index
    %221 = vector.load %arg10[%c2, %c0_81, %c0_82] : memref<9x128x128xbf16, #tpu.memory_space<vmem>>, vector<1x128x128xbf16>
    %222 = vector.shape_cast %221 : vector<1x128x128xbf16> to vector<128x128xbf16>
    %cst_83 = arith.constant dense<0.000000e+00> : vector<16x128xf32>
    %223 = tpu.matmul %220, %222, %cst_83 {dimension_numbers = #tpu.dot_dimension_numbers<[1], [0], [0], [1], [0, 0, 1, 1], [], []>} : vector<16x128xbf16>, vector<128x128xbf16>, vector<16x128xf32> -> vector<16x128xf32>
    %224 = arith.addf %210, %223 : vector<16x128xf32>
    %cst_84 = arith.constant 2.000000e+00 : f32
    %225 = vector.broadcast %cst_84 : f32 to vector<16x128xf32>
    %226 = arith.subf %55, %225 : vector<16x128xf32>
    %227 = arith.mulf %226, %150 : vector<16x128xf32>
    %cst_85 = arith.constant 6.000000e+00 : f32
    %228 = vector.broadcast %cst_85 : f32 to vector<16x128xf32>
    %229 = arith.subf %228, %55 : vector<16x128xf32>
    %230 = arith.mulf %229, %159 : vector<16x128xf32>
    %231 = arith.addf %227, %230 : vector<16x128xf32>
    %cst_86 = arith.constant 0.333333343 : f32
    %232 = vector.broadcast %cst_86 : f32 to vector<16x128xf32>
    %233 = arith.mulf %231, %232 : vector<16x128xf32>
    %234 = arith.truncf %233 : vector<16x128xf32> to vector<16x128xbf16>
    %c3 = arith.constant 3 : index
    %c0_87 = arith.constant 0 : index
    %c0_88 = arith.constant 0 : index
    %235 = vector.load %arg10[%c3, %c0_87, %c0_88] : memref<9x128x128xbf16, #tpu.memory_space<vmem>>, vector<1x128x128xbf16>
    %236 = vector.shape_cast %235 : vector<1x128x128xbf16> to vector<128x128xbf16>
    %cst_89 = arith.constant dense<0.000000e+00> : vector<16x128xf32>
    %237 = tpu.matmul %234, %236, %cst_89 {dimension_numbers = #tpu.dot_dimension_numbers<[1], [0], [0], [1], [0, 0, 1, 1], [], []>} : vector<16x128xbf16>, vector<128x128xbf16>, vector<16x128xf32> -> vector<16x128xf32>
    %238 = arith.addf %224, %237 : vector<16x128xf32>
    %cst_90 = arith.constant 3.000000e+00 : f32
    %239 = vector.broadcast %cst_90 : f32 to vector<16x128xf32>
    %240 = arith.subf %55, %239 : vector<16x128xf32>
    %241 = arith.mulf %240, %159 : vector<16x128xf32>
    %cst_91 = arith.constant 7.000000e+00 : f32
    %242 = vector.broadcast %cst_91 : f32 to vector<16x128xf32>
    %243 = arith.subf %242, %55 : vector<16x128xf32>
    %244 = arith.mulf %243, %168 : vector<16x128xf32>
    %245 = arith.addf %241, %244 : vector<16x128xf32>
    %cst_92 = arith.constant 0.333333343 : f32
    %246 = vector.broadcast %cst_92 : f32 to vector<16x128xf32>
    %247 = arith.mulf %245, %246 : vector<16x128xf32>
    %248 = arith.truncf %247 : vector<16x128xf32> to vector<16x128xbf16>
    %c4 = arith.constant 4 : index
    %c0_93 = arith.constant 0 : index
    %c0_94 = arith.constant 0 : index
    %249 = vector.load %arg10[%c4, %c0_93, %c0_94] : memref<9x128x128xbf16, #tpu.memory_space<vmem>>, vector<1x128x128xbf16>
    %250 = vector.shape_cast %249 : vector<1x128x128xbf16> to vector<128x128xbf16>
    %cst_95 = arith.constant dense<0.000000e+00> : vector<16x128xf32>
    %251 = tpu.matmul %248, %250, %cst_95 {dimension_numbers = #tpu.dot_dimension_numbers<[1], [0], [0], [1], [0, 0, 1, 1], [], []>} : vector<16x128xbf16>, vector<128x128xbf16>, vector<16x128xf32> -> vector<16x128xf32>
    %252 = arith.addf %238, %251 : vector<16x128xf32>
    %cst_96 = arith.constant 4.000000e+00 : f32
    %253 = vector.broadcast %cst_96 : f32 to vector<16x128xf32>
    %254 = arith.subf %55, %253 : vector<16x128xf32>
    %255 = arith.mulf %254, %168 : vector<16x128xf32>
    %cst_97 = arith.constant 8.000000e+00 : f32
    %256 = vector.broadcast %cst_97 : f32 to vector<16x128xf32>
    %257 = arith.subf %256, %55 : vector<16x128xf32>
    %258 = arith.mulf %257, %177 : vector<16x128xf32>
    %259 = arith.addf %255, %258 : vector<16x128xf32>
    %cst_98 = arith.constant 0.333333343 : f32
    %260 = vector.broadcast %cst_98 : f32 to vector<16x128xf32>
    %261 = arith.mulf %259, %260 : vector<16x128xf32>
    %262 = arith.truncf %261 : vector<16x128xf32> to vector<16x128xbf16>
    %c5 = arith.constant 5 : index
    %c0_99 = arith.constant 0 : index
    %c0_100 = arith.constant 0 : index
    %263 = vector.load %arg10[%c5, %c0_99, %c0_100] : memref<9x128x128xbf16, #tpu.memory_space<vmem>>, vector<1x128x128xbf16>
    %264 = vector.shape_cast %263 : vector<1x128x128xbf16> to vector<128x128xbf16>
    %cst_101 = arith.constant dense<0.000000e+00> : vector<16x128xf32>
    %265 = tpu.matmul %262, %264, %cst_101 {dimension_numbers = #tpu.dot_dimension_numbers<[1], [0], [0], [1], [0, 0, 1, 1], [], []>} : vector<16x128xbf16>, vector<128x128xbf16>, vector<16x128xf32> -> vector<16x128xf32>
    %266 = arith.addf %252, %265 : vector<16x128xf32>
    %cst_102 = arith.constant 5.000000e+00 : f32
    %267 = vector.broadcast %cst_102 : f32 to vector<16x128xf32>
    %268 = arith.subf %55, %267 : vector<16x128xf32>
    %269 = arith.mulf %268, %177 : vector<16x128xf32>
    %cst_103 = arith.constant 9.000000e+00 : f32
    %270 = vector.broadcast %cst_103 : f32 to vector<16x128xf32>
    %271 = arith.subf %270, %55 : vector<16x128xf32>
    %272 = arith.mulf %271, %186 : vector<16x128xf32>
    %273 = arith.addf %269, %272 : vector<16x128xf32>
    %cst_104 = arith.constant 0.333333343 : f32
    %274 = vector.broadcast %cst_104 : f32 to vector<16x128xf32>
    %275 = arith.mulf %273, %274 : vector<16x128xf32>
    %276 = arith.truncf %275 : vector<16x128xf32> to vector<16x128xbf16>
    %c6 = arith.constant 6 : index
    %c0_105 = arith.constant 0 : index
    %c0_106 = arith.constant 0 : index
    %277 = vector.load %arg10[%c6, %c0_105, %c0_106] : memref<9x128x128xbf16, #tpu.memory_space<vmem>>, vector<1x128x128xbf16>
    %278 = vector.shape_cast %277 : vector<1x128x128xbf16> to vector<128x128xbf16>
    %cst_107 = arith.constant dense<0.000000e+00> : vector<16x128xf32>
    %279 = tpu.matmul %276, %278, %cst_107 {dimension_numbers = #tpu.dot_dimension_numbers<[1], [0], [0], [1], [0, 0, 1, 1], [], []>} : vector<16x128xbf16>, vector<128x128xbf16>, vector<16x128xf32> -> vector<16x128xf32>
    %280 = arith.addf %266, %279 : vector<16x128xf32>
    %cst_108 = arith.constant 6.000000e+00 : f32
    %281 = vector.broadcast %cst_108 : f32 to vector<16x128xf32>
    %282 = arith.subf %55, %281 : vector<16x128xf32>
    %283 = arith.mulf %282, %186 : vector<16x128xf32>
    %cst_109 = arith.constant 1.000000e+01 : f32
    %284 = vector.broadcast %cst_109 : f32 to vector<16x128xf32>
    %285 = arith.subf %284, %55 : vector<16x128xf32>
    %286 = arith.mulf %285, %195 : vector<16x128xf32>
    %287 = arith.addf %283, %286 : vector<16x128xf32>
    %cst_110 = arith.constant 0.333333343 : f32
    %288 = vector.broadcast %cst_110 : f32 to vector<16x128xf32>
    %289 = arith.mulf %287, %288 : vector<16x128xf32>
    %290 = arith.truncf %289 : vector<16x128xf32> to vector<16x128xbf16>
    %c7 = arith.constant 7 : index
    %c0_111 = arith.constant 0 : index
    %c0_112 = arith.constant 0 : index
    %291 = vector.load %arg10[%c7, %c0_111, %c0_112] : memref<9x128x128xbf16, #tpu.memory_space<vmem>>, vector<1x128x128xbf16>
    %292 = vector.shape_cast %291 : vector<1x128x128xbf16> to vector<128x128xbf16>
    %cst_113 = arith.constant dense<0.000000e+00> : vector<16x128xf32>
    %293 = tpu.matmul %290, %292, %cst_113 {dimension_numbers = #tpu.dot_dimension_numbers<[1], [0], [0], [1], [0, 0, 1, 1], [], []>} : vector<16x128xbf16>, vector<128x128xbf16>, vector<16x128xf32> -> vector<16x128xf32>
    %294 = arith.addf %280, %293 : vector<16x128xf32>
    %cst_114 = arith.constant 7.000000e+00 : f32
    %295 = vector.broadcast %cst_114 : f32 to vector<16x128xf32>
    %296 = arith.subf %55, %295 : vector<16x128xf32>
    %297 = arith.mulf %296, %195 : vector<16x128xf32>
    %cst_115 = arith.constant 1.100000e+01 : f32
    %298 = vector.broadcast %cst_115 : f32 to vector<16x128xf32>
    %299 = arith.subf %298, %55 : vector<16x128xf32>
    %300 = arith.mulf %299, %200 : vector<16x128xf32>
    %301 = arith.addf %297, %300 : vector<16x128xf32>
    %cst_116 = arith.constant 0.333333343 : f32
    %302 = vector.broadcast %cst_116 : f32 to vector<16x128xf32>
    %303 = arith.mulf %301, %302 : vector<16x128xf32>
    %304 = arith.truncf %303 : vector<16x128xf32> to vector<16x128xbf16>
    %c8 = arith.constant 8 : index
    %c0_117 = arith.constant 0 : index
    %c0_118 = arith.constant 0 : index
    %305 = vector.load %arg10[%c8, %c0_117, %c0_118] : memref<9x128x128xbf16, #tpu.memory_space<vmem>>, vector<1x128x128xbf16>
    %306 = vector.shape_cast %305 : vector<1x128x128xbf16> to vector<128x128xbf16>
    %cst_119 = arith.constant dense<0.000000e+00> : vector<16x128xf32>
    %307 = tpu.matmul %304, %306, %cst_119 {dimension_numbers = #tpu.dot_dimension_numbers<[1], [0], [0], [1], [0, 0, 1, 1], [], []>} : vector<16x128xbf16>, vector<128x128xbf16>, vector<16x128xf32> -> vector<16x128xf32>
    %308 = arith.addf %294, %307 : vector<16x128xf32>
    %309 = arith.negf %308 : vector<16x128xf32>
    %310 = math.exp %309 : vector<16x128xf32>
    %cst_120 = arith.constant 1.000000e+00 : f32
    %311 = vector.broadcast %cst_120 : f32 to vector<16x128xf32>
    %312 = arith.addf %311, %310 : vector<16x128xf32>
    %313 = arith.divf %311, %312 : vector<16x128xf32>
    %314 = arith.mulf %308, %313 : vector<16x128xf32>
    %315 = arith.truncf %314 : vector<16x128xf32> to vector<16x128xbf16>
    %c0_121 = arith.constant 0 : index
    %c0_122 = arith.constant 0 : index
    %c0_123 = arith.constant 0 : index
    %316 = vector.load %arg11[%c0_121, %c0_122, %c0_123] : memref<9x128x128xbf16, #tpu.memory_space<vmem>>, vector<1x128x128xbf16>
    %317 = vector.shape_cast %316 : vector<1x128x128xbf16> to vector<128x128xbf16>
    %cst_124 = arith.constant dense<0.000000e+00> : vector<16x128xf32>
    %318 = tpu.matmul %315, %317, %cst_124 {dimension_numbers = #tpu.dot_dimension_numbers<[1], [0], [0], [1], [0, 0, 1, 1], [], []>} : vector<16x128xbf16>, vector<128x128xbf16>, vector<16x128xf32> -> vector<16x128xf32>
    %cst_125 = arith.constant -2.200000e+00 : f32
    %319 = vector.broadcast %cst_125 : f32 to vector<16x128xf32>
    %320 = arith.subf %308, %319 : vector<16x128xf32>
    %cst_126 = arith.constant 2.500000e+00 : f32
    %321 = vector.broadcast %cst_126 : f32 to vector<16x128xf32>
    %322 = arith.mulf %320, %321 : vector<16x128xf32>
    %cst_127 = arith.constant 0.000000e+00 : f32
    %323 = vector.broadcast %cst_127 : f32 to vector<16x128xf32>
    %324 = arith.cmpf oge, %322, %323 : vector<16x128xf32>
    %325 = arith.extui %324 : vector<16x128xi1> to vector<16x128xi32>
    %326 = arith.sitofp %325 : vector<16x128xi32> to vector<16x128xf32>
    %cst_128 = arith.constant 1.000000e+00 : f32
    %327 = vector.broadcast %cst_128 : f32 to vector<16x128xf32>
    %328 = arith.cmpf oge, %322, %327 : vector<16x128xf32>
    %329 = arith.extui %328 : vector<16x128xi1> to vector<16x128xi32>
    %330 = arith.sitofp %329 : vector<16x128xi32> to vector<16x128xf32>
    %cst_129 = arith.constant 2.000000e+00 : f32
    %331 = vector.broadcast %cst_129 : f32 to vector<16x128xf32>
    %332 = arith.cmpf oge, %322, %331 : vector<16x128xf32>
    %333 = arith.extui %332 : vector<16x128xi1> to vector<16x128xi32>
    %334 = arith.sitofp %333 : vector<16x128xi32> to vector<16x128xf32>
    %cst_130 = arith.constant 3.000000e+00 : f32
    %335 = vector.broadcast %cst_130 : f32 to vector<16x128xf32>
    %336 = arith.cmpf oge, %322, %335 : vector<16x128xf32>
    %337 = arith.extui %336 : vector<16x128xi1> to vector<16x128xi32>
    %338 = arith.sitofp %337 : vector<16x128xi32> to vector<16x128xf32>
    %cst_131 = arith.constant 4.000000e+00 : f32
    %339 = vector.broadcast %cst_131 : f32 to vector<16x128xf32>
    %340 = arith.cmpf oge, %322, %339 : vector<16x128xf32>
    %341 = arith.extui %340 : vector<16x128xi1> to vector<16x128xi32>
    %342 = arith.sitofp %341 : vector<16x128xi32> to vector<16x128xf32>
    %cst_132 = arith.constant 5.000000e+00 : f32
    %343 = vector.broadcast %cst_132 : f32 to vector<16x128xf32>
    %344 = arith.cmpf oge, %322, %343 : vector<16x128xf32>
    %345 = arith.extui %344 : vector<16x128xi1> to vector<16x128xi32>
    %346 = arith.sitofp %345 : vector<16x128xi32> to vector<16x128xf32>
    %cst_133 = arith.constant 6.000000e+00 : f32
    %347 = vector.broadcast %cst_133 : f32 to vector<16x128xf32>
    %348 = arith.cmpf oge, %322, %347 : vector<16x128xf32>
    %349 = arith.extui %348 : vector<16x128xi1> to vector<16x128xi32>
    %350 = arith.sitofp %349 : vector<16x128xi32> to vector<16x128xf32>
    %cst_134 = arith.constant 7.000000e+00 : f32
    %351 = vector.broadcast %cst_134 : f32 to vector<16x128xf32>
    %352 = arith.cmpf oge, %322, %351 : vector<16x128xf32>
    %353 = arith.extui %352 : vector<16x128xi1> to vector<16x128xi32>
    %354 = arith.sitofp %353 : vector<16x128xi32> to vector<16x128xf32>
    %cst_135 = arith.constant 8.000000e+00 : f32
    %355 = vector.broadcast %cst_135 : f32 to vector<16x128xf32>
    %356 = arith.cmpf oge, %322, %355 : vector<16x128xf32>
    %357 = arith.extui %356 : vector<16x128xi1> to vector<16x128xi32>
    %358 = arith.sitofp %357 : vector<16x128xi32> to vector<16x128xf32>
    %cst_136 = arith.constant 9.000000e+00 : f32
    %359 = vector.broadcast %cst_136 : f32 to vector<16x128xf32>
    %360 = arith.cmpf oge, %322, %359 : vector<16x128xf32>
    %361 = arith.extui %360 : vector<16x128xi1> to vector<16x128xi32>
    %362 = arith.sitofp %361 : vector<16x128xi32> to vector<16x128xf32>
    %cst_137 = arith.constant 1.000000e+01 : f32
    %363 = vector.broadcast %cst_137 : f32 to vector<16x128xf32>
    %364 = arith.cmpf oge, %322, %363 : vector<16x128xf32>
    %365 = arith.extui %364 : vector<16x128xi1> to vector<16x128xi32>
    %366 = arith.sitofp %365 : vector<16x128xi32> to vector<16x128xf32>
    %cst_138 = arith.constant 1.100000e+01 : f32
    %367 = vector.broadcast %cst_138 : f32 to vector<16x128xf32>
    %368 = arith.cmpf oge, %322, %367 : vector<16x128xf32>
    %369 = arith.extui %368 : vector<16x128xi1> to vector<16x128xi32>
    %370 = arith.sitofp %369 : vector<16x128xi32> to vector<16x128xf32>
    %371 = arith.subf %326, %330 : vector<16x128xf32>
    %372 = arith.subf %330, %334 : vector<16x128xf32>
    %373 = arith.subf %334, %338 : vector<16x128xf32>
    %374 = arith.subf %338, %342 : vector<16x128xf32>
    %375 = arith.subf %342, %346 : vector<16x128xf32>
    %376 = arith.subf %346, %350 : vector<16x128xf32>
    %377 = arith.subf %350, %354 : vector<16x128xf32>
    %378 = arith.subf %354, %358 : vector<16x128xf32>
    %379 = arith.subf %358, %362 : vector<16x128xf32>
    %380 = arith.subf %362, %366 : vector<16x128xf32>
    %381 = arith.subf %366, %370 : vector<16x128xf32>
    %cst_139 = arith.constant 0.000000e+00 : f32
    %382 = vector.broadcast %cst_139 : f32 to vector<16x128xf32>
    %383 = arith.subf %322, %382 : vector<16x128xf32>
    %384 = arith.mulf %383, %371 : vector<16x128xf32>
    %cst_140 = arith.constant 2.000000e+00 : f32
    %385 = vector.broadcast %cst_140 : f32 to vector<16x128xf32>
    %386 = arith.subf %385, %322 : vector<16x128xf32>
    %387 = arith.mulf %386, %372 : vector<16x128xf32>
    %388 = arith.addf %384, %387 : vector<16x128xf32>
    %cst_141 = arith.constant 1.000000e+00 : f32
    %389 = vector.broadcast %cst_141 : f32 to vector<16x128xf32>
    %390 = arith.mulf %388, %389 : vector<16x128xf32>
    %cst_142 = arith.constant 1.000000e+00 : f32
    %391 = vector.broadcast %cst_142 : f32 to vector<16x128xf32>
    %392 = arith.subf %322, %391 : vector<16x128xf32>
    %393 = arith.mulf %392, %372 : vector<16x128xf32>
    %cst_143 = arith.constant 3.000000e+00 : f32
    %394 = vector.broadcast %cst_143 : f32 to vector<16x128xf32>
    %395 = arith.subf %394, %322 : vector<16x128xf32>
    %396 = arith.mulf %395, %373 : vector<16x128xf32>
    %397 = arith.addf %393, %396 : vector<16x128xf32>
    %cst_144 = arith.constant 1.000000e+00 : f32
    %398 = vector.broadcast %cst_144 : f32 to vector<16x128xf32>
    %399 = arith.mulf %397, %398 : vector<16x128xf32>
    %cst_145 = arith.constant 2.000000e+00 : f32
    %400 = vector.broadcast %cst_145 : f32 to vector<16x128xf32>
    %401 = arith.subf %322, %400 : vector<16x128xf32>
    %402 = arith.mulf %401, %373 : vector<16x128xf32>
    %cst_146 = arith.constant 4.000000e+00 : f32
    %403 = vector.broadcast %cst_146 : f32 to vector<16x128xf32>
    %404 = arith.subf %403, %322 : vector<16x128xf32>
    %405 = arith.mulf %404, %374 : vector<16x128xf32>
    %406 = arith.addf %402, %405 : vector<16x128xf32>
    %cst_147 = arith.constant 1.000000e+00 : f32
    %407 = vector.broadcast %cst_147 : f32 to vector<16x128xf32>
    %408 = arith.mulf %406, %407 : vector<16x128xf32>
    %cst_148 = arith.constant 3.000000e+00 : f32
    %409 = vector.broadcast %cst_148 : f32 to vector<16x128xf32>
    %410 = arith.subf %322, %409 : vector<16x128xf32>
    %411 = arith.mulf %410, %374 : vector<16x128xf32>
    %cst_149 = arith.constant 5.000000e+00 : f32
    %412 = vector.broadcast %cst_149 : f32 to vector<16x128xf32>
    %413 = arith.subf %412, %322 : vector<16x128xf32>
    %414 = arith.mulf %413, %375 : vector<16x128xf32>
    %415 = arith.addf %411, %414 : vector<16x128xf32>
    %cst_150 = arith.constant 1.000000e+00 : f32
    %416 = vector.broadcast %cst_150 : f32 to vector<16x128xf32>
    %417 = arith.mulf %415, %416 : vector<16x128xf32>
    %cst_151 = arith.constant 4.000000e+00 : f32
    %418 = vector.broadcast %cst_151 : f32 to vector<16x128xf32>
    %419 = arith.subf %322, %418 : vector<16x128xf32>
    %420 = arith.mulf %419, %375 : vector<16x128xf32>
    %cst_152 = arith.constant 6.000000e+00 : f32
    %421 = vector.broadcast %cst_152 : f32 to vector<16x128xf32>
    %422 = arith.subf %421, %322 : vector<16x128xf32>
    %423 = arith.mulf %422, %376 : vector<16x128xf32>
    %424 = arith.addf %420, %423 : vector<16x128xf32>
    %cst_153 = arith.constant 1.000000e+00 : f32
    %425 = vector.broadcast %cst_153 : f32 to vector<16x128xf32>
    %426 = arith.mulf %424, %425 : vector<16x128xf32>
    %cst_154 = arith.constant 5.000000e+00 : f32
    %427 = vector.broadcast %cst_154 : f32 to vector<16x128xf32>
    %428 = arith.subf %322, %427 : vector<16x128xf32>
    %429 = arith.mulf %428, %376 : vector<16x128xf32>
    %cst_155 = arith.constant 7.000000e+00 : f32
    %430 = vector.broadcast %cst_155 : f32 to vector<16x128xf32>
    %431 = arith.subf %430, %322 : vector<16x128xf32>
    %432 = arith.mulf %431, %377 : vector<16x128xf32>
    %433 = arith.addf %429, %432 : vector<16x128xf32>
    %cst_156 = arith.constant 1.000000e+00 : f32
    %434 = vector.broadcast %cst_156 : f32 to vector<16x128xf32>
    %435 = arith.mulf %433, %434 : vector<16x128xf32>
    %cst_157 = arith.constant 6.000000e+00 : f32
    %436 = vector.broadcast %cst_157 : f32 to vector<16x128xf32>
    %437 = arith.subf %322, %436 : vector<16x128xf32>
    %438 = arith.mulf %437, %377 : vector<16x128xf32>
    %cst_158 = arith.constant 8.000000e+00 : f32
    %439 = vector.broadcast %cst_158 : f32 to vector<16x128xf32>
    %440 = arith.subf %439, %322 : vector<16x128xf32>
    %441 = arith.mulf %440, %378 : vector<16x128xf32>
    %442 = arith.addf %438, %441 : vector<16x128xf32>
    %cst_159 = arith.constant 1.000000e+00 : f32
    %443 = vector.broadcast %cst_159 : f32 to vector<16x128xf32>
    %444 = arith.mulf %442, %443 : vector<16x128xf32>
    %cst_160 = arith.constant 7.000000e+00 : f32
    %445 = vector.broadcast %cst_160 : f32 to vector<16x128xf32>
    %446 = arith.subf %322, %445 : vector<16x128xf32>
    %447 = arith.mulf %446, %378 : vector<16x128xf32>
    %cst_161 = arith.constant 9.000000e+00 : f32
    %448 = vector.broadcast %cst_161 : f32 to vector<16x128xf32>
    %449 = arith.subf %448, %322 : vector<16x128xf32>
    %450 = arith.mulf %449, %379 : vector<16x128xf32>
    %451 = arith.addf %447, %450 : vector<16x128xf32>
    %cst_162 = arith.constant 1.000000e+00 : f32
    %452 = vector.broadcast %cst_162 : f32 to vector<16x128xf32>
    %453 = arith.mulf %451, %452 : vector<16x128xf32>
    %cst_163 = arith.constant 8.000000e+00 : f32
    %454 = vector.broadcast %cst_163 : f32 to vector<16x128xf32>
    %455 = arith.subf %322, %454 : vector<16x128xf32>
    %456 = arith.mulf %455, %379 : vector<16x128xf32>
    %cst_164 = arith.constant 1.000000e+01 : f32
    %457 = vector.broadcast %cst_164 : f32 to vector<16x128xf32>
    %458 = arith.subf %457, %322 : vector<16x128xf32>
    %459 = arith.mulf %458, %380 : vector<16x128xf32>
    %460 = arith.addf %456, %459 : vector<16x128xf32>
    %cst_165 = arith.constant 1.000000e+00 : f32
    %461 = vector.broadcast %cst_165 : f32 to vector<16x128xf32>
    %462 = arith.mulf %460, %461 : vector<16x128xf32>
    %cst_166 = arith.constant 9.000000e+00 : f32
    %463 = vector.broadcast %cst_166 : f32 to vector<16x128xf32>
    %464 = arith.subf %322, %463 : vector<16x128xf32>
    %465 = arith.mulf %464, %380 : vector<16x128xf32>
    %cst_167 = arith.constant 1.100000e+01 : f32
    %466 = vector.broadcast %cst_167 : f32 to vector<16x128xf32>
    %467 = arith.subf %466, %322 : vector<16x128xf32>
    %468 = arith.mulf %467, %381 : vector<16x128xf32>
    %469 = arith.addf %465, %468 : vector<16x128xf32>
    %cst_168 = arith.constant 1.000000e+00 : f32
    %470 = vector.broadcast %cst_168 : f32 to vector<16x128xf32>
    %471 = arith.mulf %469, %470 : vector<16x128xf32>
    %cst_169 = arith.constant 0.000000e+00 : f32
    %472 = vector.broadcast %cst_169 : f32 to vector<16x128xf32>
    %473 = arith.subf %322, %472 : vector<16x128xf32>
    %474 = arith.mulf %473, %390 : vector<16x128xf32>
    %cst_170 = arith.constant 3.000000e+00 : f32
    %475 = vector.broadcast %cst_170 : f32 to vector<16x128xf32>
    %476 = arith.subf %475, %322 : vector<16x128xf32>
    %477 = arith.mulf %476, %399 : vector<16x128xf32>
    %478 = arith.addf %474, %477 : vector<16x128xf32>
    %cst_171 = arith.constant 5.000000e-01 : f32
    %479 = vector.broadcast %cst_171 : f32 to vector<16x128xf32>
    %480 = arith.mulf %478, %479 : vector<16x128xf32>
    %cst_172 = arith.constant 1.000000e+00 : f32
    %481 = vector.broadcast %cst_172 : f32 to vector<16x128xf32>
    %482 = arith.subf %322, %481 : vector<16x128xf32>
    %483 = arith.mulf %482, %399 : vector<16x128xf32>
    %cst_173 = arith.constant 4.000000e+00 : f32
    %484 = vector.broadcast %cst_173 : f32 to vector<16x128xf32>
    %485 = arith.subf %484, %322 : vector<16x128xf32>
    %486 = arith.mulf %485, %408 : vector<16x128xf32>
    %487 = arith.addf %483, %486 : vector<16x128xf32>
    %cst_174 = arith.constant 5.000000e-01 : f32
    %488 = vector.broadcast %cst_174 : f32 to vector<16x128xf32>
    %489 = arith.mulf %487, %488 : vector<16x128xf32>
    %cst_175 = arith.constant 2.000000e+00 : f32
    %490 = vector.broadcast %cst_175 : f32 to vector<16x128xf32>
    %491 = arith.subf %322, %490 : vector<16x128xf32>
    %492 = arith.mulf %491, %408 : vector<16x128xf32>
    %cst_176 = arith.constant 5.000000e+00 : f32
    %493 = vector.broadcast %cst_176 : f32 to vector<16x128xf32>
    %494 = arith.subf %493, %322 : vector<16x128xf32>
    %495 = arith.mulf %494, %417 : vector<16x128xf32>
    %496 = arith.addf %492, %495 : vector<16x128xf32>
    %cst_177 = arith.constant 5.000000e-01 : f32
    %497 = vector.broadcast %cst_177 : f32 to vector<16x128xf32>
    %498 = arith.mulf %496, %497 : vector<16x128xf32>
    %cst_178 = arith.constant 3.000000e+00 : f32
    %499 = vector.broadcast %cst_178 : f32 to vector<16x128xf32>
    %500 = arith.subf %322, %499 : vector<16x128xf32>
    %501 = arith.mulf %500, %417 : vector<16x128xf32>
    %cst_179 = arith.constant 6.000000e+00 : f32
    %502 = vector.broadcast %cst_179 : f32 to vector<16x128xf32>
    %503 = arith.subf %502, %322 : vector<16x128xf32>
    %504 = arith.mulf %503, %426 : vector<16x128xf32>
    %505 = arith.addf %501, %504 : vector<16x128xf32>
    %cst_180 = arith.constant 5.000000e-01 : f32
    %506 = vector.broadcast %cst_180 : f32 to vector<16x128xf32>
    %507 = arith.mulf %505, %506 : vector<16x128xf32>
    %cst_181 = arith.constant 4.000000e+00 : f32
    %508 = vector.broadcast %cst_181 : f32 to vector<16x128xf32>
    %509 = arith.subf %322, %508 : vector<16x128xf32>
    %510 = arith.mulf %509, %426 : vector<16x128xf32>
    %cst_182 = arith.constant 7.000000e+00 : f32
    %511 = vector.broadcast %cst_182 : f32 to vector<16x128xf32>
    %512 = arith.subf %511, %322 : vector<16x128xf32>
    %513 = arith.mulf %512, %435 : vector<16x128xf32>
    %514 = arith.addf %510, %513 : vector<16x128xf32>
    %cst_183 = arith.constant 5.000000e-01 : f32
    %515 = vector.broadcast %cst_183 : f32 to vector<16x128xf32>
    %516 = arith.mulf %514, %515 : vector<16x128xf32>
    %cst_184 = arith.constant 5.000000e+00 : f32
    %517 = vector.broadcast %cst_184 : f32 to vector<16x128xf32>
    %518 = arith.subf %322, %517 : vector<16x128xf32>
    %519 = arith.mulf %518, %435 : vector<16x128xf32>
    %cst_185 = arith.constant 8.000000e+00 : f32
    %520 = vector.broadcast %cst_185 : f32 to vector<16x128xf32>
    %521 = arith.subf %520, %322 : vector<16x128xf32>
    %522 = arith.mulf %521, %444 : vector<16x128xf32>
    %523 = arith.addf %519, %522 : vector<16x128xf32>
    %cst_186 = arith.constant 5.000000e-01 : f32
    %524 = vector.broadcast %cst_186 : f32 to vector<16x128xf32>
    %525 = arith.mulf %523, %524 : vector<16x128xf32>
    %cst_187 = arith.constant 6.000000e+00 : f32
    %526 = vector.broadcast %cst_187 : f32 to vector<16x128xf32>
    %527 = arith.subf %322, %526 : vector<16x128xf32>
    %528 = arith.mulf %527, %444 : vector<16x128xf32>
    %cst_188 = arith.constant 9.000000e+00 : f32
    %529 = vector.broadcast %cst_188 : f32 to vector<16x128xf32>
    %530 = arith.subf %529, %322 : vector<16x128xf32>
    %531 = arith.mulf %530, %453 : vector<16x128xf32>
    %532 = arith.addf %528, %531 : vector<16x128xf32>
    %cst_189 = arith.constant 5.000000e-01 : f32
    %533 = vector.broadcast %cst_189 : f32 to vector<16x128xf32>
    %534 = arith.mulf %532, %533 : vector<16x128xf32>
    %cst_190 = arith.constant 7.000000e+00 : f32
    %535 = vector.broadcast %cst_190 : f32 to vector<16x128xf32>
    %536 = arith.subf %322, %535 : vector<16x128xf32>
    %537 = arith.mulf %536, %453 : vector<16x128xf32>
    %cst_191 = arith.constant 1.000000e+01 : f32
    %538 = vector.broadcast %cst_191 : f32 to vector<16x128xf32>
    %539 = arith.subf %538, %322 : vector<16x128xf32>
    %540 = arith.mulf %539, %462 : vector<16x128xf32>
    %541 = arith.addf %537, %540 : vector<16x128xf32>
    %cst_192 = arith.constant 5.000000e-01 : f32
    %542 = vector.broadcast %cst_192 : f32 to vector<16x128xf32>
    %543 = arith.mulf %541, %542 : vector<16x128xf32>
    %cst_193 = arith.constant 8.000000e+00 : f32
    %544 = vector.broadcast %cst_193 : f32 to vector<16x128xf32>
    %545 = arith.subf %322, %544 : vector<16x128xf32>
    %546 = arith.mulf %545, %462 : vector<16x128xf32>
    %cst_194 = arith.constant 1.100000e+01 : f32
    %547 = vector.broadcast %cst_194 : f32 to vector<16x128xf32>
    %548 = arith.subf %547, %322 : vector<16x128xf32>
    %549 = arith.mulf %548, %471 : vector<16x128xf32>
    %550 = arith.addf %546, %549 : vector<16x128xf32>
    %cst_195 = arith.constant 5.000000e-01 : f32
    %551 = vector.broadcast %cst_195 : f32 to vector<16x128xf32>
    %552 = arith.mulf %550, %551 : vector<16x128xf32>
    %cst_196 = arith.constant 0.000000e+00 : f32
    %553 = vector.broadcast %cst_196 : f32 to vector<16x128xf32>
    %554 = arith.subf %322, %553 : vector<16x128xf32>
    %555 = arith.mulf %554, %480 : vector<16x128xf32>
    %cst_197 = arith.constant 4.000000e+00 : f32
    %556 = vector.broadcast %cst_197 : f32 to vector<16x128xf32>
    %557 = arith.subf %556, %322 : vector<16x128xf32>
    %558 = arith.mulf %557, %489 : vector<16x128xf32>
    %559 = arith.addf %555, %558 : vector<16x128xf32>
    %cst_198 = arith.constant 0.333333343 : f32
    %560 = vector.broadcast %cst_198 : f32 to vector<16x128xf32>
    %561 = arith.mulf %559, %560 : vector<16x128xf32>
    %562 = arith.truncf %561 : vector<16x128xf32> to vector<16x128xbf16>
    %c1_199 = arith.constant 1 : index
    %c0_200 = arith.constant 0 : index
    %c0_201 = arith.constant 0 : index
    %563 = vector.load %arg11[%c1_199, %c0_200, %c0_201] : memref<9x128x128xbf16, #tpu.memory_space<vmem>>, vector<1x128x128xbf16>
    %564 = vector.shape_cast %563 : vector<1x128x128xbf16> to vector<128x128xbf16>
    %cst_202 = arith.constant dense<0.000000e+00> : vector<16x128xf32>
    %565 = tpu.matmul %562, %564, %cst_202 {dimension_numbers = #tpu.dot_dimension_numbers<[1], [0], [0], [1], [0, 0, 1, 1], [], []>} : vector<16x128xbf16>, vector<128x128xbf16>, vector<16x128xf32> -> vector<16x128xf32>
    %566 = arith.addf %318, %565 : vector<16x128xf32>
    %cst_203 = arith.constant 1.000000e+00 : f32
    %567 = vector.broadcast %cst_203 : f32 to vector<16x128xf32>
    %568 = arith.subf %322, %567 : vector<16x128xf32>
    %569 = arith.mulf %568, %489 : vector<16x128xf32>
    %cst_204 = arith.constant 5.000000e+00 : f32
    %570 = vector.broadcast %cst_204 : f32 to vector<16x128xf32>
    %571 = arith.subf %570, %322 : vector<16x128xf32>
    %572 = arith.mulf %571, %498 : vector<16x128xf32>
    %573 = arith.addf %569, %572 : vector<16x128xf32>
    %cst_205 = arith.constant 0.333333343 : f32
    %574 = vector.broadcast %cst_205 : f32 to vector<16x128xf32>
    %575 = arith.mulf %573, %574 : vector<16x128xf32>
    %576 = arith.truncf %575 : vector<16x128xf32> to vector<16x128xbf16>
    %c2_206 = arith.constant 2 : index
    %c0_207 = arith.constant 0 : index
    %c0_208 = arith.constant 0 : index
    %577 = vector.load %arg11[%c2_206, %c0_207, %c0_208] : memref<9x128x128xbf16, #tpu.memory_space<vmem>>, vector<1x128x128xbf16>
    %578 = vector.shape_cast %577 : vector<1x128x128xbf16> to vector<128x128xbf16>
    %cst_209 = arith.constant dense<0.000000e+00> : vector<16x128xf32>
    %579 = tpu.matmul %576, %578, %cst_209 {dimension_numbers = #tpu.dot_dimension_numbers<[1], [0], [0], [1], [0, 0, 1, 1], [], []>} : vector<16x128xbf16>, vector<128x128xbf16>, vector<16x128xf32> -> vector<16x128xf32>
    %580 = arith.addf %566, %579 : vector<16x128xf32>
    %cst_210 = arith.constant 2.000000e+00 : f32
    %581 = vector.broadcast %cst_210 : f32 to vector<16x128xf32>
    %582 = arith.subf %322, %581 : vector<16x128xf32>
    %583 = arith.mulf %582, %498 : vector<16x128xf32>
    %cst_211 = arith.constant 6.000000e+00 : f32
    %584 = vector.broadcast %cst_211 : f32 to vector<16x128xf32>
    %585 = arith.subf %584, %322 : vector<16x128xf32>
    %586 = arith.mulf %585, %507 : vector<16x128xf32>
    %587 = arith.addf %583, %586 : vector<16x128xf32>
    %cst_212 = arith.constant 0.333333343 : f32
    %588 = vector.broadcast %cst_212 : f32 to vector<16x128xf32>
    %589 = arith.mulf %587, %588 : vector<16x128xf32>
    %590 = arith.truncf %589 : vector<16x128xf32> to vector<16x128xbf16>
    %c3_213 = arith.constant 3 : index
    %c0_214 = arith.constant 0 : index
    %c0_215 = arith.constant 0 : index
    %591 = vector.load %arg11[%c3_213, %c0_214, %c0_215] : memref<9x128x128xbf16, #tpu.memory_space<vmem>>, vector<1x128x128xbf16>
    %592 = vector.shape_cast %591 : vector<1x128x128xbf16> to vector<128x128xbf16>
    %cst_216 = arith.constant dense<0.000000e+00> : vector<16x128xf32>
    %593 = tpu.matmul %590, %592, %cst_216 {dimension_numbers = #tpu.dot_dimension_numbers<[1], [0], [0], [1], [0, 0, 1, 1], [], []>} : vector<16x128xbf16>, vector<128x128xbf16>, vector<16x128xf32> -> vector<16x128xf32>
    %594 = arith.addf %580, %593 : vector<16x128xf32>
    %cst_217 = arith.constant 3.000000e+00 : f32
    %595 = vector.broadcast %cst_217 : f32 to vector<16x128xf32>
    %596 = arith.subf %322, %595 : vector<16x128xf32>
    %597 = arith.mulf %596, %507 : vector<16x128xf32>
    %cst_218 = arith.constant 7.000000e+00 : f32
    %598 = vector.broadcast %cst_218 : f32 to vector<16x128xf32>
    %599 = arith.subf %598, %322 : vector<16x128xf32>
    %600 = arith.mulf %599, %516 : vector<16x128xf32>
    %601 = arith.addf %597, %600 : vector<16x128xf32>
    %cst_219 = arith.constant 0.333333343 : f32
    %602 = vector.broadcast %cst_219 : f32 to vector<16x128xf32>
    %603 = arith.mulf %601, %602 : vector<16x128xf32>
    %604 = arith.truncf %603 : vector<16x128xf32> to vector<16x128xbf16>
    %c4_220 = arith.constant 4 : index
    %c0_221 = arith.constant 0 : index
    %c0_222 = arith.constant 0 : index
    %605 = vector.load %arg11[%c4_220, %c0_221, %c0_222] : memref<9x128x128xbf16, #tpu.memory_space<vmem>>, vector<1x128x128xbf16>
    %606 = vector.shape_cast %605 : vector<1x128x128xbf16> to vector<128x128xbf16>
    %cst_223 = arith.constant dense<0.000000e+00> : vector<16x128xf32>
    %607 = tpu.matmul %604, %606, %cst_223 {dimension_numbers = #tpu.dot_dimension_numbers<[1], [0], [0], [1], [0, 0, 1, 1], [], []>} : vector<16x128xbf16>, vector<128x128xbf16>, vector<16x128xf32> -> vector<16x128xf32>
    %608 = arith.addf %594, %607 : vector<16x128xf32>
    %cst_224 = arith.constant 4.000000e+00 : f32
    %609 = vector.broadcast %cst_224 : f32 to vector<16x128xf32>
    %610 = arith.subf %322, %609 : vector<16x128xf32>
    %611 = arith.mulf %610, %516 : vector<16x128xf32>
    %cst_225 = arith.constant 8.000000e+00 : f32
    %612 = vector.broadcast %cst_225 : f32 to vector<16x128xf32>
    %613 = arith.subf %612, %322 : vector<16x128xf32>
    %614 = arith.mulf %613, %525 : vector<16x128xf32>
    %615 = arith.addf %611, %614 : vector<16x128xf32>
    %cst_226 = arith.constant 0.333333343 : f32
    %616 = vector.broadcast %cst_226 : f32 to vector<16x128xf32>
    %617 = arith.mulf %615, %616 : vector<16x128xf32>
    %618 = arith.truncf %617 : vector<16x128xf32> to vector<16x128xbf16>
    %c5_227 = arith.constant 5 : index
    %c0_228 = arith.constant 0 : index
    %c0_229 = arith.constant 0 : index
    %619 = vector.load %arg11[%c5_227, %c0_228, %c0_229] : memref<9x128x128xbf16, #tpu.memory_space<vmem>>, vector<1x128x128xbf16>
    %620 = vector.shape_cast %619 : vector<1x128x128xbf16> to vector<128x128xbf16>
    %cst_230 = arith.constant dense<0.000000e+00> : vector<16x128xf32>
    %621 = tpu.matmul %618, %620, %cst_230 {dimension_numbers = #tpu.dot_dimension_numbers<[1], [0], [0], [1], [0, 0, 1, 1], [], []>} : vector<16x128xbf16>, vector<128x128xbf16>, vector<16x128xf32> -> vector<16x128xf32>
    %622 = arith.addf %608, %621 : vector<16x128xf32>
    %cst_231 = arith.constant 5.000000e+00 : f32
    %623 = vector.broadcast %cst_231 : f32 to vector<16x128xf32>
    %624 = arith.subf %322, %623 : vector<16x128xf32>
    %625 = arith.mulf %624, %525 : vector<16x128xf32>
    %cst_232 = arith.constant 9.000000e+00 : f32
    %626 = vector.broadcast %cst_232 : f32 to vector<16x128xf32>
    %627 = arith.subf %626, %322 : vector<16x128xf32>
    %628 = arith.mulf %627, %534 : vector<16x128xf32>
    %629 = arith.addf %625, %628 : vector<16x128xf32>
    %cst_233 = arith.constant 0.333333343 : f32
    %630 = vector.broadcast %cst_233 : f32 to vector<16x128xf32>
    %631 = arith.mulf %629, %630 : vector<16x128xf32>
    %632 = arith.truncf %631 : vector<16x128xf32> to vector<16x128xbf16>
    %c6_234 = arith.constant 6 : index
    %c0_235 = arith.constant 0 : index
    %c0_236 = arith.constant 0 : index
    %633 = vector.load %arg11[%c6_234, %c0_235, %c0_236] : memref<9x128x128xbf16, #tpu.memory_space<vmem>>, vector<1x128x128xbf16>
    %634 = vector.shape_cast %633 : vector<1x128x128xbf16> to vector<128x128xbf16>
    %cst_237 = arith.constant dense<0.000000e+00> : vector<16x128xf32>
    %635 = tpu.matmul %632, %634, %cst_237 {dimension_numbers = #tpu.dot_dimension_numbers<[1], [0], [0], [1], [0, 0, 1, 1], [], []>} : vector<16x128xbf16>, vector<128x128xbf16>, vector<16x128xf32> -> vector<16x128xf32>
    %636 = arith.addf %622, %635 : vector<16x128xf32>
    %cst_238 = arith.constant 6.000000e+00 : f32
    %637 = vector.broadcast %cst_238 : f32 to vector<16x128xf32>
    %638 = arith.subf %322, %637 : vector<16x128xf32>
    %639 = arith.mulf %638, %534 : vector<16x128xf32>
    %cst_239 = arith.constant 1.000000e+01 : f32
    %640 = vector.broadcast %cst_239 : f32 to vector<16x128xf32>
    %641 = arith.subf %640, %322 : vector<16x128xf32>
    %642 = arith.mulf %641, %543 : vector<16x128xf32>
    %643 = arith.addf %639, %642 : vector<16x128xf32>
    %cst_240 = arith.constant 0.333333343 : f32
    %644 = vector.broadcast %cst_240 : f32 to vector<16x128xf32>
    %645 = arith.mulf %643, %644 : vector<16x128xf32>
    %646 = arith.truncf %645 : vector<16x128xf32> to vector<16x128xbf16>
    %c7_241 = arith.constant 7 : index
    %c0_242 = arith.constant 0 : index
    %c0_243 = arith.constant 0 : index
    %647 = vector.load %arg11[%c7_241, %c0_242, %c0_243] : memref<9x128x128xbf16, #tpu.memory_space<vmem>>, vector<1x128x128xbf16>
    %648 = vector.shape_cast %647 : vector<1x128x128xbf16> to vector<128x128xbf16>
    %cst_244 = arith.constant dense<0.000000e+00> : vector<16x128xf32>
    %649 = tpu.matmul %646, %648, %cst_244 {dimension_numbers = #tpu.dot_dimension_numbers<[1], [0], [0], [1], [0, 0, 1, 1], [], []>} : vector<16x128xbf16>, vector<128x128xbf16>, vector<16x128xf32> -> vector<16x128xf32>
    %650 = arith.addf %636, %649 : vector<16x128xf32>
    %cst_245 = arith.constant 7.000000e+00 : f32
    %651 = vector.broadcast %cst_245 : f32 to vector<16x128xf32>
    %652 = arith.subf %322, %651 : vector<16x128xf32>
    %653 = arith.mulf %652, %543 : vector<16x128xf32>
    %cst_246 = arith.constant 1.100000e+01 : f32
    %654 = vector.broadcast %cst_246 : f32 to vector<16x128xf32>
    %655 = arith.subf %654, %322 : vector<16x128xf32>
    %656 = arith.mulf %655, %552 : vector<16x128xf32>
    %657 = arith.addf %653, %656 : vector<16x128xf32>
    %cst_247 = arith.constant 0.333333343 : f32
    %658 = vector.broadcast %cst_247 : f32 to vector<16x128xf32>
    %659 = arith.mulf %657, %658 : vector<16x128xf32>
    %660 = arith.truncf %659 : vector<16x128xf32> to vector<16x128xbf16>
    %c8_248 = arith.constant 8 : index
    %c0_249 = arith.constant 0 : index
    %c0_250 = arith.constant 0 : index
    %661 = vector.load %arg11[%c8_248, %c0_249, %c0_250] : memref<9x128x128xbf16, #tpu.memory_space<vmem>>, vector<1x128x128xbf16>
    %662 = vector.shape_cast %661 : vector<1x128x128xbf16> to vector<128x128xbf16>
    %cst_251 = arith.constant dense<0.000000e+00> : vector<16x128xf32>
    %663 = tpu.matmul %660, %662, %cst_251 {dimension_numbers = #tpu.dot_dimension_numbers<[1], [0], [0], [1], [0, 0, 1, 1], [], []>} : vector<16x128xbf16>, vector<128x128xbf16>, vector<16x128xf32> -> vector<16x128xf32>
    %664 = arith.addf %650, %663 : vector<16x128xf32>
    %665 = arith.addf %664, %41 : vector<16x128xf32>
    %666 = math.tanh %665 : vector<16x128xf32>
    %c0_252 = arith.constant 0 : index
    %c0_253 = arith.constant 0 : index
    %667 = vector.load %arg12[%c0_252, %c0_253] : memref<16x128xf32, #tpu.memory_space<vmem>>, vector<16x128xf32>
    tpu.vector_store %arg12[%c0_252, %c0_253], %666 {strides = array<i32>} : memref<16x128xf32, #tpu.memory_space<vmem>>, vector<16x128xf32>,
    %c0_254 = arith.constant 0 : index
    %c0_255 = arith.constant 0 : index
    %668 = vector.load %arg13[%c0_254, %c0_255] : memref<16x128xf32, #tpu.memory_space<vmem>>, vector<16x128xf32>
    tpu.vector_store %arg13[%c0_254, %c0_255], %34 {strides = array<i32>} : memref<16x128xf32, #tpu.memory_space<vmem>>, vector<16x128xf32>,
    return
  }
  func.func @transform_0(%arg0: i32) -> (i32, i32) {
    %c0_i32 = arith.constant 0 : i32
    %c0_i32_0 = arith.constant 0 : i32
    return %arg0, %c0_i32 : i32, i32
  }
  func.func @transform_1(%arg0: i32) -> (i32, i32) {
    %c0_i32 = arith.constant 0 : i32
    %c0_i32_0 = arith.constant 0 : i32
    return %arg0, %c0_i32 : i32, i32
  }
  func.func @transform_2(%arg0: i32) -> (i32, i32) {
    %c0_i32 = arith.constant 0 : i32
    %c0_i32_0 = arith.constant 0 : i32
    %c0_i32_1 = arith.constant 0 : i32
    return %c0_i32, %c0_i32_0 : i32, i32
  }
  func.func @transform_3(%arg0: i32) -> (i32, i32) {
    %c0_i32 = arith.constant 0 : i32
    %c0_i32_0 = arith.constant 0 : i32
    %c0_i32_1 = arith.constant 0 : i32
    return %c0_i32, %c0_i32_0 : i32, i32
  }
  func.func @transform_4(%arg0: i32) -> (i32, i32) {
    %c0_i32 = arith.constant 0 : i32
    %c0_i32_0 = arith.constant 0 : i32
    %c0_i32_1 = arith.constant 0 : i32
    return %c0_i32, %c0_i32_0 : i32, i32
  }
  func.func @transform_5(%arg0: i32) -> (i32, i32) {
    %c0_i32 = arith.constant 0 : i32
    %c0_i32_0 = arith.constant 0 : i32
    %c0_i32_1 = arith.constant 0 : i32
    return %c0_i32, %c0_i32_0 : i32, i32
  }
  func.func @transform_6(%arg0: i32) -> (i32, i32) {
    %c0_i32 = arith.constant 0 : i32
    %c0_i32_0 = arith.constant 0 : i32
    %c0_i32_1 = arith.constant 0 : i32
    return %c0_i32, %c0_i32_0 : i32, i32
  }
  func.func @transform_7(%arg0: i32) -> (i32, i32) {
    %c0_i32 = arith.constant 0 : i32
    %c0_i32_0 = arith.constant 0 : i32
    %c0_i32_1 = arith.constant 0 : i32
    return %c0_i32, %c0_i32_0 : i32, i32
  }
  func.func @transform_8(%arg0: i32) -> (i32, i32) {
    %c0_i32 = arith.constant 0 : i32
    %c0_i32_0 = arith.constant 0 : i32
    %c0_i32_1 = arith.constant 0 : i32
    return %c0_i32, %c0_i32_0 : i32, i32
  }
  func.func @transform_9(%arg0: i32) -> (i32, i32, i32) {
    %c0_i32 = arith.constant 0 : i32
    %c0_i32_0 = arith.constant 0 : i32
    %c0_i32_1 = arith.constant 0 : i32
    %c0_i32_2 = arith.constant 0 : i32
    return %c0_i32, %c0_i32_0, %c0_i32_1 : i32, i32, i32
  }
  func.func @transform_10(%arg0: i32) -> (i32, i32, i32) {
    %c0_i32 = arith.constant 0 : i32
    %c0_i32_0 = arith.constant 0 : i32
    %c0_i32_1 = arith.constant 0 : i32
    %c0_i32_2 = arith.constant 0 : i32
    return %c0_i32, %c0_i32_0, %c0_i32_1 : i32, i32, i32
  }
  func.func @transform_11(%arg0: i32) -> (i32, i32) {
    %c0_i32 = arith.constant 0 : i32
    %c0_i32_0 = arith.constant 0 : i32
    return %arg0, %c0_i32 : i32, i32
  }
  func.func @transform_12(%arg0: i32) -> (i32, i32) {
    %c0_i32 = arith.constant 0 : i32
    %c0_i32_0 = arith.constant 0 : i32
    return %arg0, %c0_i32 : i32, i32
  }
}

</mosaic_0001>

<bundles_post_ra>
// kernel: tpu_custom_call.1
= control target key start
LH: loop header
LB: loop body
LE: loop exit
PB: predicated region body
PF: predicated region fallthrough
CT: control target
= control target key end

     0   :  { %18 = vsyncpa [#allocation3], 0  ;;  %s5388_s0 = inlined_call_operand.hbm [shape: bf16[16,384], index: 0, kind: input, shape index: {}]   ;;  %s5389_s1 = inlined_call_operand.hbm [shape: f32[16,128], index: 1, kind: input, shape index: {}]   ;;  %s5390_s2 = inlined_call_operand.hbm [shape: bf16[128,128], index: 2, kind: input, shape index: {}]   ;;  %s5391_s3 = inlined_call_operand.hbm [shape: bf16[128,128], index: 3, kind: input, shape index: {}]   ;;  %s5392_s4 = inlined_call_operand.hbm [shape: bf16[128,128], index: 4, kind: input, shape index: {}]   ;;  %s5393_s5 = inlined_call_operand.vmem [shape: f32[1,128], index: 5, kind: input, shape index: {}]   ;;  %s5394_s6 = inlined_call_operand.vmem [shape: f32[1,128], index: 6, kind: input, shape index: {}]   ;;  %s5395_s7 = inlined_call_operand.vmem [shape: f32[1,128], index: 7, kind: input, shape index: {}]   ;;  %s5396_s8 = inlined_call_operand.vmem [shape: f32[3,128], index: 8, kind: input, shape index: {}]   ;;  %s5397_s9 = inlined_call_operand.hbm [shape: bf16[9,128,128], index: 9, kind: input, shape index: {}]   ;;  %s5398_s10 = inlined_call_operand.hbm [shape: bf16[9,128,128], index: 10, kind: input, shape index: {}]   ;;  %s5399_s11 = inlined_call_operand.hbm [shape: f32[16,128], index: 11, kind: output, shape index: {0}]   ;;  %s5400_s12 = inlined_call_operand.hbm [shape: f32[16,128], index: 12, kind: output, shape index: {1}]  }
   0x1   :  { %19 = vsyncpa [#allocation6], 0 }
   0x2   :  { %20 = vsyncpa [#allocation9], 0 }
   0x3   :  { %21 = vsyncpa [#allocation12], 0 }
   0x4   :  { %22 = vsyncpa [#allocation4], 0 }
   0x5   :  { %23 = vsyncpa [#allocation16], 0  ;;  %s4446_s21 = smov [#allocation5]   ;;  %s4236_s25 = scalar_lea.hbm %s5389_s1, 256 }
   0x6   :  { %s41_s22 = sshll.u32 %s4446_s21, 4  ;;  %p4237_p0 = scmp.ne.s32.totalorder %s5389_s1, %s4236_s25  ;;  %s42_s22 = int_to_ptr.vmem [resolvable:$true] %s41_s22 }
   0x7   :  { %p4240_p1 = scmp.lt.u32.totalorder %s4236_s25, %s5389_s1 }
   0x9   :  { %p4242_p2 = pnand %p4240_p1, %p4237_p0 }
   0xb   :  { %4245 = shalt.err (!%p4242_p2)
}
   0xc   :  { %s4246_s30 = scalar_lea.vmem %s42_s22, 256  ;;  %p4251_p4 = scmp.lt.s32.totalorder %s42_s22, %s42_s22 }
   0xd   :  { %p4247_p3 = scmp.ne.s32.totalorder %s42_s22, %s4246_s30  ;;  %p4252_p5 = scmp.lt.s32.totalorder %s4246_s30, %s4246_s30 }
   0xf   :  { %p4253_p6 = por %p4252_p5, %p4251_p4 }
  0x11   :  { %p4254_p7 = pnand %p4253_p6, %p4247_p3 }
  0x13   :  { %4257 = shalt.err (!%p4254_p7)
}
  0x14   :  { %s4447_s13 = smov 128   ;;  %s4448_s14 = smov 8  }
  0x15   :  { %47 = dma.hbm_to_vmem [thread:$0]  %s5389_s1, 256, %s42_s22, [#allocation6], %s4447_s13, %s4447_s13, %s4448_s14  }
  0x16   :  { %s4449_s17 = smov [#allocation8]   ;;  %s4450_s19 = smov [#allocation11]  }
  0x17   :  { %s65_s18 = sshll.u32 %s4449_s17, 4  ;;  %s97_s20 = sshll.u32 %s4450_s19, 4  ;;  %s66_s18 = int_to_ptr.vmem [resolvable:$true] %s65_s18  ;;  %s98_s20 = int_to_ptr.vmem [resolvable:$true] %s97_s20 }
  0x18   :  { %s4258_s24 = scalar_lea.hbm %s5391_s3, 1024 }
  0x19   :  { %p4259_p8 = scmp.ne.s32.totalorder %s5391_s3, %s4258_s24  ;;  %p4262_p9 = scmp.lt.u32.totalorder %s4258_s24, %s5391_s3 }
  0x1b   :  { %p4264_p10 = pnand %p4262_p9, %p4259_p8 }
  0x1d   :  { %4267 = shalt.err (!%p4264_p10)
}
  0x1e   :  { %s4268_s1 = scalar_lea.vmem %s66_s18, 1024  ;;  %p4273_p12 = scmp.lt.s32.totalorder %s66_s18, %s66_s18 }
  0x1f   :  { %p4269_p11 = scmp.ne.s32.totalorder %s66_s18, %s4268_s1  ;;  %p4274_p13 = scmp.lt.s32.totalorder %s4268_s1, %s4268_s1 }
  0x21   :  { %p4275_p0 = por %p4274_p13, %p4273_p12 }
  0x23   :  { %p4276_p1 = pnand %p4275_p0, %p4269_p11 }
  0x25   :  { %4279 = shalt.err (!%p4276_p1)
}
  0x26   :  { %s4451_s22 = smov 64   ;;  %s4452_s29 = smov 4  }
  0x27   :  { %71 = dma.hbm_to_vmem [thread:$0]  %s5391_s3, 1024, %s66_s18, [#allocation9], %s4451_s22, %s4451_s22, %s4452_s29  }
  0x28   :  { %s4280_s19 = scalar_lea.hbm %s5397_s9, 9216 }
  0x29   :  { %p4281_p2 = scmp.ne.s32.totalorder %s5397_s9, %s4280_s19  ;;  %p4284_p3 = scmp.lt.u32.totalorder %s4280_s19, %s5397_s9 }
  0x2b   :  { %p4286_p4 = pnand %p4284_p3, %p4281_p2 }
  0x2d   :  { %4289 = shalt.err (!%p4286_p4)
}
  0x2e   :  { %s4290_s26 = scalar_lea.vmem %s98_s20, 9216  ;;  %p4295_p6 = scmp.lt.s32.totalorder %s98_s20, %s98_s20 }
  0x2f   :  { %p4291_p5 = scmp.ne.s32.totalorder %s98_s20, %s4290_s26  ;;  %p4296_p7 = scmp.lt.s32.totalorder %s4290_s26, %s4290_s26 }
  0x31   :  { %p4297_p8 = por %p4296_p7, %p4295_p6 }
  0x33   :  { %p4298_p9 = pnand %p4297_p8, %p4291_p5 }
  0x35   :  { %4301 = shalt.err (!%p4298_p9)
}
  0x36   :  { %103 = dma.hbm_to_vmem [thread:$0]  %s5397_s9, 9216, %s98_s20, [#allocation12], %s4451_s22, %s4451_s22, %s4452_s29  }
  0x37   :  { %s4453_s27 = smov [#allocation2]   ;;  %s4302_s15 = scalar_lea.hbm %s5388_s0, 384 }
  0x38   :  { %s29_s28 = sshll.u32 %s4453_s27, 4  ;;  %p4303_p10 = scmp.ne.s32.totalorder %s5388_s0, %s4302_s15  ;;  %s30_s28 = int_to_ptr.vmem [resolvable:$true] %s29_s28 }
  0x39   :  { %p4306_p11 = scmp.lt.u32.totalorder %s4302_s15, %s5388_s0 }
  0x3b   :  { %p4308_p12 = pnand %p4306_p11, %p4303_p10 }
  0x3d   :  { %4311 = shalt.err (!%p4308_p12)
}
  0x3e   :  { %s4312_s23 = scalar_lea.vmem %s30_s28, 384  ;;  %p4317_p0 = scmp.lt.s32.totalorder %s30_s28, %s30_s28 }
  0x3f   :  { %p4313_p13 = scmp.ne.s32.totalorder %s30_s28, %s4312_s23  ;;  %p4318_p1 = scmp.lt.s32.totalorder %s4312_s23, %s4312_s23 }
  0x41   :  { %p4319_p2 = por %p4318_p1, %p4317_p0 }
  0x43   :  { %p4320_p3 = pnand %p4319_p2, %p4313_p13 }
  0x45   :  { %4323 = shalt.err (!%p4320_p3)
}
  0x46   :  { %s4454_s9 = smov 192   ;;  %s4455_s20 = smov 12  }
  0x47   :  { %35 = dma.hbm_to_vmem [thread:$0]  %s5388_s0, 384, %s30_s28, [#allocation3], %s4454_s9, %s4454_s9, %s4455_s20  }
  0x48   :  { %s4456_s26 = smov [#allocation7]   ;;  %s4457_s18 = smov [#allocation10]  }
  0x49   :  { %s53_s3 = sshll.u32 %s4456_s26, 4  ;;  %s77_s27 = sshll.u32 %s4457_s18, 4  ;;  %s54_s3 = int_to_ptr.vmem [resolvable:$true] %s53_s3  ;;  %s4587_s27 = int_to_ptr.vmem [resolvable:$true] %s77_s27 }
  0x4a   :  { %s4324_s15 = scalar_lea.hbm %s5390_s2, 1024 }
  0x4b   :  { %p4325_p4 = scmp.ne.s32.totalorder %s5390_s2, %s4324_s15  ;;  %p4328_p5 = scmp.lt.u32.totalorder %s4324_s15, %s5390_s2 }
  0x4d   :  { %p4330_p6 = pnand %p4328_p5, %p4325_p4 }
  0x4f   :  { %4333 = shalt.err (!%p4330_p6)
}
  0x50   :  { %s4334_s0 = scalar_lea.vmem %s54_s3, 1024  ;;  %p4339_p8 = scmp.lt.s32.totalorder %s54_s3, %s54_s3 }
  0x51   :  { %p4335_p7 = scmp.ne.s32.totalorder %s54_s3, %s4334_s0  ;;  %p4340_p9 = scmp.lt.s32.totalorder %s4334_s0, %s4334_s0 }
  0x53   :  { %p4341_p10 = por %p4340_p9, %p4339_p8 }
  0x55   :  { %p4342_p11 = pnand %p4341_p10, %p4335_p7 }
  0x57   :  { %4345 = shalt.err (!%p4342_p11)
}
  0x58   :  { %59 = dma.hbm_to_vmem [thread:$0]  %s5390_s2, 1024, %s54_s3, [#allocation6], %s4451_s22, %s4451_s22, %s4452_s29  }
  0x59   :  { %s4346_s24 = scalar_lea.hbm %s5392_s4, 1024 }
  0x5a   :  { %p4347_p12 = scmp.ne.s32.totalorder %s5392_s4, %s4346_s24  ;;  %p4350_p13 = scmp.lt.u32.totalorder %s4346_s24, %s5392_s4 }
  0x5c   :  { %p4352_p0 = pnand %p4350_p13, %p4347_p12 }
  0x5e   :  { %4355 = shalt.err (!%p4352_p0)
}
  0x5f   :  { %s4356_s30 = scalar_lea.vmem %s4587_s27, 1024  ;;  %p4361_p2 = scmp.lt.s32.totalorder %s4587_s27, %s4587_s27 }
  0x60   :  { %p4357_p1 = scmp.ne.s32.totalorder %s4587_s27, %s4356_s30  ;;  %p4362_p3 = scmp.lt.s32.totalorder %s4356_s30, %s4356_s30 }
  0x62   :  { %p4363_p4 = por %p4362_p3, %p4361_p2 }
  0x64   :  { %p4364_p5 = pnand %p4363_p4, %p4357_p1 }
  0x66   :  { %4367 = shalt.err (!%p4364_p5)
}
  0x67   :  { %83 = dma.hbm_to_vmem [thread:$0]  %s5392_s4, 1024, %s4587_s27, [#allocation9], %s4451_s22, %s4451_s22, %s4452_s29  }
  0x68   :  { %s4458_s15 = smov [#allocation13]   ;;  %s4368_s21 = scalar_lea.hbm %s5398_s10, 9216 }
  0x69   :  { %s109_s16 = sshll.u32 %s4458_s15, 4  ;;  %p4369_p6 = scmp.ne.s32.totalorder %s5398_s10, %s4368_s21  ;;  %s110_s16 = int_to_ptr.vmem [resolvable:$true] %s109_s16 }
  0x6a   :  { %p4372_p7 = scmp.lt.u32.totalorder %s4368_s21, %s5398_s10 }
  0x6c   :  { %p4374_p8 = pnand %p4372_p7, %p4369_p6 }
  0x6e   :  { %4377 = shalt.err (!%p4374_p8)
}
  0x6f   :  { %s4378_s20 = scalar_lea.vmem %s110_s16, 9216  ;;  %p4383_p10 = scmp.lt.s32.totalorder %s110_s16, %s110_s16 }
  0x70   :  { %p4379_p9 = scmp.ne.s32.totalorder %s110_s16, %s4378_s20  ;;  %p4384_p11 = scmp.lt.s32.totalorder %s4378_s20, %s4378_s20 }
  0x72   :  { %p4385_p12 = por %p4384_p11, %p4383_p10 }
  0x74   :  { %p4386_p13 = pnand %p4385_p12, %p4379_p9 }
  0x76   :  { %4389 = shalt.err (!%p4386_p13)
}
  0x77   :  { %115 = dma.hbm_to_vmem [thread:$0]  %s5398_s10, 9216, %s110_s16, [#allocation12], %s4451_s22, %s4451_s22, %s4452_s29  }
  0x78   :  { %4434 = dma.done.wait [#allocation3], 384  }
  0x79   :  { %4435 = vsyncadd [#allocation3], 4294966912 }
  0x7a   :  { %4436 = dma.done.wait [#allocation6], 1280  }
  0x7b   :  { %4437 = vsyncadd [#allocation6], 4294966016 }
  0x7c   :  { %4438 = dma.done.wait [#allocation9], 2048  }
  0x7d   :  { %4439 = vsyncadd [#allocation9], 4294965248 }
  0x7e   :  { %4440 = dma.done.wait [#allocation12], 18432  }
  0x7f   :  { %4441 = vsyncadd [#allocation12], 4294948864  ;;  %v4459_v0 = vmov 0.0   ;;  %vm4460_vm0 = vmmov 0   ;;  %v4041_v1 = vld [vmem:[#allocation8] sm:$0xff]   ;;  %v4043_v3 = vld [vmem:[#allocation8 + $0x8] sm:$0xff]   ;;  %v409_v50 = vlaneseq }
  0x80   :  { %3570 = vmatprep.subr.bf16.mxu0 %v4459_v0  ;;  %3590 = vmatprep.subr.bf16.mxu1 %v4459_v0  ;;  %v4042_v2 = vld [vmem:[#allocation10] sm:$0xff]   ;;  %v4044_v4 = vld [vmem:[#allocation10 + $0x8] sm:$0xff]   ;;  %v4045_v5 = vld [vmem:[#allocation8 + $0x10] sm:$0xff]   ;;  %s4462_s18 = smov 2  }
  0x81   :  { %3586 = vmatprep.mubr.msk.bf16.mxu0 %vm4460_vm0, %v4459_v0  ;;  %3606 = vmatprep.mubr.msk.bf16.mxu1 %vm4460_vm0, %v4459_v0  ;;  %v4046_v6 = vld [vmem:[#allocation10 + $0x10] sm:$0xff]   ;;  %v4047_v7 = vld [vmem:[#allocation8 + $0x18] sm:$0xff]   ;;  %v4049_v9 = vld [vmem:[#allocation8 + $0x20] sm:$0xff]   ;;  %v410_v51 = vshrl.u32 %v409_v50, 7 }
  0x82   :  { %3571 = vmatpush3.bf16.msra.mxu0 %v4041_v1  ;;  %3591 = vmatpush3.bf16.msra.mxu1 %v4042_v2  ;;  %v4048_v8 = vld [vmem:[#allocation10 + $0x18] sm:$0xff]   ;;  %v4050_v10 = vld [vmem:[#allocation10 + $0x20] sm:$0xff]   ;;  %v4051_v11 = vld [vmem:[#allocation8 + $0x28] sm:$0xff]  }
  0x83   :  { %3572 = vmatprep.subr.bf16.mxu0 %v4459_v0  ;;  %3592 = vmatprep.subr.bf16.mxu1 %v4459_v0  ;;  %v4052_v12 = vld [vmem:[#allocation10 + $0x28] sm:$0xff]   ;;  %v4053_v13 = vld [vmem:[#allocation8 + $0x30] sm:$0xff]   ;;  %v4055_v15 = vld [vmem:[#allocation8 + $0x38] sm:$0xff]   ;;  %v411_v52 = vsub.s32 0, %v410_v51  ;;  %v423_v61 = vsub.s32 1, %v410_v51 }
  0x84   :  { %v4054_v14 = vld [vmem:[#allocation10 + $0x30] sm:$0xff]   ;;  %v4657_v16 = vld [vmem:[#allocation2] sm:$0xff]  ;;  %v4659_v17 = vld [vmem:[#allocation2 + $0xc] sm:$0xff] }
  0x85   :  { %v4056_v18 = vld [vmem:[#allocation10 + $0x38] sm:$0xff]   ;;  %v4058_v19 = vld [vmem:[#allocation2 + $0x8] ss:$12 sps:$4 sm:$0xff]   ;;  %v3131_v20 = vcombine.high %v4657_v16, %v4659_v17  ;;  %v392_v24 = vld [vmem:[#allocation5] sm:$0xff]  ;;  %v3151_v49 = vcombine.low %v4657_v16, %v4659_v17 }
  0x86   :  { %3573 = vmatpush3.bf16.msra.mxu0 %v4043_v3  ;;  %3593 = vmatpush3.bf16.msra.mxu1 %v4044_v4  ;;  %v4059_v21 = vld [vmem:[#allocation7] sm:$0xff]   ;;  %v4060_v22 = vld [vmem:[#allocation7 + $0x8] sm:$0xff]   ;;  %v3150_v23 = vld [vmem:[%s5395_s7] ss:$0 sm:$0xff] }
  0x87   :  { %3574 = vmatprep.subr.bf16.mxu0 %v4459_v0  ;;  %3594 = vmatprep.subr.bf16.mxu1 %v4459_v0  ;;  %v4061_v25 = vld [vmem:[#allocation7 + $0x10] sm:$0xff]   ;;  %v3149_v28 = vld [vmem:[%s5394_s6] ss:$0 sm:$0xff]  ;;  %v400_v33 = vmul.f32 %v3150_v23, %v392_v24  ;;  %v4063_v41 = vld [vmem:[#allocation7 + $0x20] sm:$0xff]   ;;  %s4461_s6 = smov 1  }
  0x88   :  { %v393_v36 = vld [vmem:[#allocation5 + $0x8] sm:$0xff]  ;;  %v4064_v45 = vld [vmem:[#allocation7 + $0x28] sm:$0xff]   ;;  %v4065_v47 = vld [vmem:[#allocation7 + $0x30] sm:$0xff]  }
  0x89   :  { %v4062_v37 = vld [vmem:[#allocation7 + $0x18] sm:$0xff]   ;;  %v401_v43 = vmul.f32 %v3150_v23, %v393_v36 }
  0x8a   :  { %3575 = vmatpush3.bf16.msra.mxu0 %v4045_v5  ;;  %3595 = vmatpush3.bf16.msra.mxu1 %v4046_v6  ;;  %v4066_v48 = vld [vmem:[#allocation7 + $0x38] sm:$0xff]  }
  0x8b   :  { %3576 = vmatprep.subr.bf16.mxu0 %v4459_v0  ;;  %3596 = vmatprep.subr.bf16.mxu1 %v4459_v0  ;;  %v404_v53 = vld [vmem:[%s5396_s8] sm:$0x7] }
  0x8c   :  { %v412_v54 = vrot.slane %v404_v53, %v411_v52  ;;  %v424_v2 = vrot.slane %v404_v53, %v423_v61 }
  0x8e   :  { %3577 = vmatpush3.bf16.msra.mxu0 %v4047_v7  ;;  %3597 = vmatpush3.bf16.msra.mxu1 %v4048_v8  ;;  %v4068_v7 = vld [vmem:[#allocation11 + $0x40] sm:$0xff]  }
  0x8f   :  { %3578 = vmatprep.subr.bf16.mxu0 %v4459_v0  ;;  %3598 = vmatprep.subr.bf16.mxu1 %v4459_v0 }
  0x92   :  { %3579 = vmatpush3.bf16.msra.mxu0 %v4049_v9  ;;  %3599 = vmatpush3.bf16.msra.mxu1 %v4050_v10 }
  0x93   :  { %3580 = vmatprep.subr.bf16.mxu0 %v4459_v0  ;;  %3600 = vmatprep.subr.bf16.mxu1 %v4459_v0 }
  0x96   :  { %3581 = vmatpush3.bf16.msra.mxu0 %v4051_v11  ;;  %3601 = vmatpush3.bf16.msra.mxu1 %v4052_v12  ;;  %v4069_v11 = vld [vmem:[#allocation11 + $0x48] sm:$0xff]   ;;  %v4070_v12 = vld [vmem:[#allocation11 + $0x50] sm:$0xff]  }
  0x97   :  { %3582 = vmatprep.subr.bf16.mxu0 %v4459_v0  ;;  %3602 = vmatprep.subr.bf16.mxu1 %v4459_v0 }
  0x9a   :  { %3583 = vmatpush3.bf16.msra.mxu0 %v4053_v13  ;;  %3603 = vmatpush3.bf16.msra.mxu1 %v4054_v14  ;;  %v4071_v13 = vld [vmem:[#allocation11 + $0x58] sm:$0xff]   ;;  %v4072_v14 = vld [vmem:[#allocation11 + $0x60] sm:$0xff]  }
  0x9b   :  { %3584 = vmatprep.subr.bf16.mxu0 %v4459_v0  ;;  %3604 = vmatprep.subr.bf16.mxu1 %v4459_v0 }
  0x9e   :  { %3585 = vmatpush3.bf16.msra.mxu0 %v4055_v15  ;;  %3605 = vmatpush3.bf16.msra.mxu1 %v4056_v18  ;;  %v4073_v15 = vld [vmem:[#allocation11 + $0x68] sm:$0xff]   ;;  %v4074_v18 = vld [vmem:[#allocation11 + $0x70] sm:$0xff]  }
  0x9f   :  { %3610 = vmatprep.subr.bf16.mxu0 %v4459_v0  ;;  %3630 = vmatprep.subr.bf16.mxu1 %v4459_v0 }
  0xa1   :  { %3587 = vmatmul.mubr.bf16.vlgmr.msra.gmra.mrb[0].mxu0 %v3131_v20  ;;  %3607 = vmatmul.mubr.bf16.vlgmr.msra.gmra.mrb[0].mxu1 %v4058_v19  ;;  %v4075_v19 = vld [vmem:[#allocation11 + $0x78] sm:$0xff]   ;;  %v435_v20 = vsub.s32 2, %v410_v51 }
  0xa2   :  { %3626 = vmatprep.mubr.msk.bf16.mxu0 %vm4460_vm0, %v4459_v0  ;;  %3646 = vmatprep.mubr.msk.bf16.mxu1 %vm4460_vm0, %v4459_v0 }
  0xa3   :  { %3611 = vmatpush3.bf16.msra.mxu0 %v4059_v21  ;;  %3631 = vmatpush3.bf16.msra.mxu1 %v4068_v7  ;;  %v436_v21 = vrot.slane %v404_v53, %v435_v20 }
  0xa4   :  { %3612 = vmatprep.subr.bf16.mxu0 %v4459_v0  ;;  %3632 = vmatprep.subr.bf16.mxu1 %v4459_v0 }
  0xa7   :  { %3613 = vmatpush3.bf16.msra.mxu0 %v4060_v22  ;;  %3633 = vmatpush3.bf16.msra.mxu1 %v4069_v11 }
  0xa8   :  { %3614 = vmatprep.subr.bf16.mxu0 %v4459_v0  ;;  %3634 = vmatprep.subr.bf16.mxu1 %v4459_v0 }
  0xab   :  { %3615 = vmatpush3.bf16.msra.mxu0 %v4061_v25  ;;  %3635 = vmatpush3.bf16.msra.mxu1 %v4070_v12  ;;  %v3160_v25 = vld [vmem:[%s5393_s5] ss:$0 sm:$0xff]  ;;  %s4463_s5 = smov [#allocation15]  }
  0xac   :  { %3616 = vmatprep.subr.bf16.mxu0 %v4459_v0  ;;  %3636 = vmatprep.subr.bf16.mxu1 %v4459_v0  ;;  %s3112_s1 = sshll.u32 %s4463_s5, 4  ;;  %s3113_s1 = int_to_ptr.vmem [resolvable:$true] %s3112_s1 }
  0xad   :  { %s4390_s30 = scalar_lea.vmem %s3113_s1, 256  ;;  %p4395_p1 = scmp.lt.s32.totalorder %s3113_s1, %s3113_s1 }
  0xae   :  { %p4391_p0 = scmp.ne.s32.totalorder %s3113_s1, %s4390_s30  ;;  %p4396_p2 = scmp.lt.s32.totalorder %s4390_s30, %s4390_s30 }
  0xaf   :  { %3617 = vmatpush3.bf16.msra.mxu0 %v4062_v37  ;;  %3637 = vmatpush3.bf16.msra.mxu1 %v4071_v13 }
  0xb0   :  { %3618 = vmatprep.subr.bf16.mxu0 %v4459_v0  ;;  %3638 = vmatprep.subr.bf16.mxu1 %v4459_v0  ;;  %p4397_p3 = por %p4396_p2, %p4395_p1 }
  0xb2   :  { %p4398_p4 = pnand %p4397_p3, %p4391_p0 }
  0xb3   :  { %3619 = vmatpush3.bf16.msra.mxu0 %v4063_v41  ;;  %3639 = vmatpush3.bf16.msra.mxu1 %v4072_v14 }
  0xb4   :  { %3620 = vmatprep.subr.bf16.mxu0 %v4459_v0  ;;  %3640 = vmatprep.subr.bf16.mxu1 %v4459_v0 }
  0xb7   :  { %3621 = vmatpush3.bf16.msra.mxu0 %v4064_v45  ;;  %3641 = vmatpush3.bf16.msra.mxu1 %v4073_v15 }
  0xb8   :  { %3622 = vmatprep.subr.bf16.mxu0 %v4459_v0  ;;  %3642 = vmatprep.subr.bf16.mxu1 %v4459_v0 }
  0xbb   :  { %3623 = vmatpush3.bf16.msra.mxu0 %v4065_v47  ;;  %3643 = vmatpush3.bf16.msra.mxu1 %v4074_v18 }
  0xbc   :  { %3624 = vmatprep.subr.bf16.mxu0 %v4459_v0  ;;  %3644 = vmatprep.subr.bf16.mxu1 %v4459_v0 }
  0xbf   :  { %3625 = vmatpush3.bf16.msra.mxu0 %v4066_v48  ;;  %3645 = vmatpush3.bf16.msra.mxu1 %v4075_v19 }
  0xc0   :  { %3810 = vmatprep.subr.bf16.mxu0 %v4459_v0  ;;  %3650 = vmatprep.subr.bf16.mxu1 %v4459_v0 }
  0xc2   :  { %3627 = vmatmul.mubr.bf16.vlgmr.msra.gmra.mrb[4].mxu0 %v3151_v49 }
  0xc3   :  { %3826 = vmatprep.mubr.msk.bf16.mxu0 %vm4460_vm0, %v4459_v0 }
 0x174   :  { %v262_v26 = vpop.f32.mrb[0].mxu0  ;;  %v373_v27 = vpop.f32.mrb[0].mxu1 }
 0x175   :  { %v3588_v29 = vpop.f32.mrb[1].mxu0  ;;  %v381_v30 = vmul.f32 %v373_v27, %v262_v26  ;;  %v3608_v31 = vpop.f32.mrb[1].mxu1 }
 0x176   :  { %v265_v32 = vpop.f32.mrb[2].mxu0  ;;  %v376_v34 = vpop.f32.mrb[2].mxu1 }
 0x177   :  { %v3589_v35 = vpop.f32.mrb[3].mxu0  ;;  %v389_v38 = vmul.f32 %v3149_v28, %v381_v30  ;;  %v382_v39 = vmul.f32 %v376_v34, %v265_v32  ;;  %v3609_v40 = vpop.f32.mrb[3].mxu1  ;;  %v544_v34 = vunpack.c.l.bf16 %v4659_v17 }
 0x179   :  { %v390_v42 = vmul.f32 %v3149_v28, %v382_v39  ;;  %v402_v44 = vadd.f32 %v400_v33, %v389_v38  ;;  %v543_v28 = vunpack.c.l.bf16 %v4657_v16 }
 0x17b   :  { %405 = vrot.lane.b32.xlu0 %v402_v44, %s4461_s6  ;;  %v403_v46 = vadd.f32 %v401_v43, %v390_v42 }
 0x17f   :  { %407 = vrot.lane.b32.xlu0 %v403_v46, %s4461_s6 }
 0x195   :  { %v527_v62 = vpop.f32.mrb[4].mxu0 }
 0x196   :  { %v3628_v63 = vpop.f32.mrb[5].mxu0 }
 0x197   :  { %v530_v1 = vpop.f32.mrb[6].mxu0 }
 0x198   :  { %v3629_v3 = vpop.f32.mrb[7].mxu0 }
 0x1ed   :  { %v406_v55 = vpop.permute.xlu0 %405 }
 0x1ee   :  { %v413_v56 = vmul.f32 %v412_v54, %v406_v55 }
 0x1f0   :  { %v415_v57 = vadd.f32 %v413_v56, %v402_v44 }
 0x1f1   :  { %v408_v58 = vpop.permute.xlu0 %407 }
 0x1f2   :  { %v414_v59 = vmul.f32 %v412_v54, %v408_v58  ;;  %417 = vrot.lane.b32.xlu1 %v415_v57, %s4462_s18 }
 0x1f4   :  { %v416_v60 = vadd.f32 %v414_v59, %v403_v46 }
 0x1f6   :  { %419 = vrot.lane.b32.xlu1 %v416_v60, %s4462_s18 }
 0x264   :  { %v418_v4 = vpop.permute.xlu1 %417 }
 0x265   :  { %v425_v5 = vmul.f32 %v424_v2, %v418_v4 }
 0x267   :  { %v427_v6 = vadd.f32 %v425_v5, %v415_v57 }
 0x268   :  { %v420_v8 = vpop.permute.xlu1 %419 }
 0x269   :  { %v426_v9 = vmul.f32 %v424_v2, %v420_v8  ;;  %429 = vrot.lane.b32.xlu0 %v427_v6, %s4452_s29 }
 0x26b   :  { %v428_v10 = vadd.f32 %v426_v9, %v416_v60 }
 0x26d   :  { %431 = vrot.lane.b32.xlu1 %v428_v10, %s4452_s29 }
 0x2db   :  { %v430_v22 = vpop.permute.xlu0 %429 }
 0x2dc   :  { %v437_v23 = vmul.f32 %v436_v21, %v430_v22 }
 0x2de   :  { %v439_v24 = vadd.f32 %v437_v23, %v427_v6 }
 0x2df   :  { %v432_v26 = vpop.permute.xlu1 %431 }
 0x2e0   :  { %v528_v27 = vadd.f32 %v527_v62, %v439_v24  ;;  %3093 = vst [vmem:[#allocation15] sm:$0xff] %v439_v24  ;;  %v438_v29 = vmul.f32 %v436_v21, %v432_v26 }
 0x2e2   :  { %v541_v30 = vmul.f32 %v3160_v25, %v528_v27  ;;  %v440_v31 = vadd.f32 %v438_v29, %v428_v10 }
 0x2e4   :  { %v545_v32 = vadd.f32 %v543_v28, %v541_v30  ;;  %v531_v33 = vadd.f32 %v530_v1, %v440_v31  ;;  %3094 = vst [vmem:[#allocation15 + $0x8] sm:$0xff] %v440_v31 }
 0x2e6   :  { %4212 = vtanh.f32 %v545_v32  ;;  %v542_v35 = vmul.f32 %v3160_v25, %v531_v33 }
 0x2e8   :  { %v546_v36 = vadd.f32 %v544_v34, %v542_v35 }
 0x2ea   :  { %4214 = vtanh.f32 %v546_v36 }
 0x2f0   :  { %v4707_v37 = vpop.eup %4212 }
 0x2f1   :  { %v3163_v38 = vadd.f32 2.2, %v4707_v37  ;;  %v3161_v39 = vmul.f32 -1.442695, %v4707_v37 }
 0x2f3   :  { %v4711_v16 = vmul.f32 2.5, %v3163_v38  ;;  %4216 = vpow2.f32 %v3161_v39 }
 0x2f4   :  { %v4713_v40 = vpop.eup %4214 }
 0x2f5   :  { %v3164_v41 = vadd.f32 2.2, %v4713_v40  ;;  %vm584_vm1 = vcmp.ge.f32.partialorder %v4711_v16, 4.0  ;;  %vm590_vm2 = vcmp.ge.f32.partialorder %v4711_v16, 5.0  ;;  %vm596_vm3 = vcmp.ge.f32.partialorder %v4711_v16, 6.0 }
 0x2f6   :  { %v3165_v17 = vsel %vm584_vm1, 1.0, %v4459_v0  ;;  %v3167_v42 = vsel %vm590_vm2, 1.0, %v4459_v0  ;;  %v4722_v43 = vsel %vm596_vm3, 1.0, %v4459_v0  ;;  %v624_v44 = vsub.f32 4.0, %v4711_v16 }
 0x2f7   :  { %v4725_v45 = vmul.f32 2.5, %v3164_v41  ;;  %v614_v46 = vsub.f32 1.0, %v3165_v17  ;;  %v616_v47 = vsub.f32 %v3165_v17, %v3167_v42  ;;  %v4728_v48 = vsub.f32 %v3167_v42, %v4722_v43  ;;  %v4076_v42 = vld [vmem:[#allocation11] sm:$0xff]  }
 0x2f8   :  { %v4731_v49 = vadd.f32 -3.0, %v4711_v16  ;;  %v3162_v50 = vmul.f32 -1.442695, %v4713_v40  ;;  %v4735_v51 = vsub.f32 5.0, %v4711_v16  ;;  %v4738_v52 = vadd.f32 -2.0, %v4711_v16 }
 0x2f9   :  { %vm585_vm4 = vcmp.ge.f32.partialorder %v4725_v45, 4.0  ;;  %vm591_vm5 = vcmp.ge.f32.partialorder %v4725_v45, 5.0  ;;  %vm597_vm6 = vcmp.ge.f32.partialorder %v4725_v45, 6.0  ;;  %v625_v53 = vsub.f32 4.0, %v4725_v45 }
 0x2fa   :  { %v3166_v54 = vsel %vm585_vm4, 1.0, %v4459_v0  ;;  %v3168_v55 = vsel %vm591_vm5, 1.0, %v4459_v0  ;;  %v4747_v56 = vsel %vm597_vm6, 1.0, %v4459_v0  ;;  %v626_v57 = vmul.f32 %v624_v44, %v614_v46 }
 0x2fb   :  { %v615_v58 = vsub.f32 1.0, %v3166_v54  ;;  %v617_v59 = vsub.f32 %v3166_v54, %v3168_v55  ;;  %v4750_v60 = vsub.f32 %v3168_v55, %v4747_v56  ;;  %v4753_v61 = vadd.f32 -3.0, %v4725_v45 }
 0x2fc   :  { %v630_v62 = vmul.f32 %v4731_v49, %v614_v46  ;;  %v682_v63 = vmul.f32 %v626_v57, %v624_v44  ;;  %4218 = vpow2.f32 %v3162_v50  ;;  %v633_v1 = vsub.f32 5.0, %v4725_v45 }
 0x2fd   :  { %v4217_v2 = vpop.eup %4216  ;;  %v627_v3 = vmul.f32 %v625_v53, %v615_v58  ;;  %v631_v4 = vmul.f32 %v4753_v61, %v615_v58  ;;  %v634_v5 = vmul.f32 %v4735_v51, %v616_v47  ;;  %v3188_v6 = vadd.f32 -2.0, %v4725_v45 }
 0x2fe   :  { %v684_v7 = vmul.f32 0.5, %v682_v63  ;;  %v555_v8 = vadd.f32 1.0, %v4217_v2  ;;  %v635_v9 = vmul.f32 %v633_v1, %v617_v59  ;;  %v688_v10 = vmul.f32 %v4738_v52, %v626_v57 }
 0x2ff   :  { %v683_v11 = vmul.f32 %v627_v3, %v625_v53  ;;  %v636_v12 = vadd.f32 %v634_v5, %v630_v62  ;;  %v689_v13 = vmul.f32 %v3188_v6, %v627_v3  ;;  %v3205_v14 = vadd.f32 -1.0, %v4711_v16 }
 0x300   :  { %v742_v15 = vmul.f32 %v684_v7, %v624_v44  ;;  %4220 = vrcp.f32 %v555_v8  ;;  %v637_v18 = vadd.f32 %v635_v9, %v631_v4  ;;  %v3206_v19 = vadd.f32 -1.0, %v4725_v45  ;;  %v4077_v4 = vld [vmem:[#allocation11 + $0x8] sm:$0xff]  }
 0x301   :  { %v685_v20 = vmul.f32 0.5, %v683_v11  ;;  %v690_v21 = vmul.f32 %v636_v12, %v4735_v51  ;;  %v944_v22 = vmul.f32 %v3205_v14, %v684_v7  ;;  %v4765_v23 = vadd.f32 -4.0, %v4711_v16 }
 0x302   :  { %v744_v24 = vmul.f32 0.33333334, %v742_v15  ;;  %v691_v25 = vmul.f32 %v637_v18, %v633_v1  ;;  %v4768_v26 = vadd.f32 -4.0, %v4725_v45  ;;  %v642_v27 = vsub.f32 6.0, %v4711_v16 }
 0x303   :  { %v743_v28 = vmul.f32 %v685_v20, %v625_v53  ;;  %v692_v29 = vadd.f32 %v690_v21, %v688_v10  ;;  %v945_v30 = vmul.f32 %v3206_v19, %v685_v20  ;;  %v640_v31 = vmul.f32 %v4765_v23, %v616_v47 }
 0x304   :  { %v693_v32 = vadd.f32 %v691_v25, %v689_v13  ;;  %v641_v33 = vmul.f32 %v4768_v26, %v617_v59  ;;  %v643_v34 = vsub.f32 6.0, %v4725_v45  ;;  %v644_v35 = vmul.f32 %v642_v27, %v4728_v48 }
 0x305   :  { %v745_v36 = vmul.f32 0.33333334, %v743_v28  ;;  %v694_v38 = vmul.f32 0.5, %v692_v29  ;;  %v696_v39 = vmul.f32 %v4731_v49, %v636_v12  ;;  %v697_v41 = vmul.f32 %v4753_v61, %v637_v18 }
 0x306   :  { %v4219_v17 = vpop.eup %4218  ;;  %v695_v44 = vmul.f32 0.5, %v693_v32  ;;  %v645_v46 = vmul.f32 %v643_v34, %v4750_v60  ;;  %v646_v50 = vadd.f32 %v644_v35, %v640_v31  ;;  %vm602_vm7 = vcmp.ge.f32.partialorder %v4711_v16, 7.0 }
 0x307   :  { %v746_v47 = vpack.c.bf16 %v745_v36, %v744_v24  ;;  %v556_v53 = vadd.f32 1.0, %v4219_v17  ;;  %v946_v54 = vmul.f32 %v694_v38, %v4735_v51  ;;  %v1061_v55 = vmul.f32 %v4738_v52, %v694_v38 }
 0x308   :  { %v947_v57 = vmul.f32 %v695_v44, %v633_v1  ;;  %v647_v58 = vadd.f32 %v645_v46, %v641_v33  ;;  %v698_v59 = vmul.f32 %v646_v50, %v642_v27  ;;  %v1062_v62 = vmul.f32 %v3188_v6, %v695_v44 }
 0x309   :  { %3647 = vmatmul.mubr.bf16.vlgmr.msra.gmra.mrb[4].mxu1 %v746_v47  ;;  %4222 = vrcp.f32 %v556_v53  ;;  %v948_v63 = vadd.f32 %v946_v54, %v944_v22  ;;  %vm603_vm8 = vcmp.ge.f32.partialorder %v4725_v45, 7.0  ;;  %v3171_v2 = vsel %vm602_vm7, 1.0, %v4459_v0 }
 0x30a   :  { %v4221_v3 = vpop.eup %4220  ;;  %3651 = vmatpush3.bf16.msra.mxu1 %v4076_v42  ;;  %3666 = vmatprep.mubr.msk.bf16.mxu1 %vm4460_vm0, %v4459_v0  ;;  %v949_v51 = vadd.f32 %v947_v57, %v945_v30  ;;  %v699_v5 = vmul.f32 %v647_v58, %v643_v34  ;;  %v700_v52 = vadd.f32 %v698_v59, %v696_v39  ;;  %v3172_v1 = vsel %vm603_vm8, 1.0, %v4459_v0  ;;  %v4080_v57 = vld [vmem:[#allocation11 + $0x20] sm:$0xff]  }
 0x30b   :  { %3652 = vmatprep.subr.bf16.mxu1 %v4459_v0  ;;  %v4788_v6 = vmul.f32 %v4221_v3, %v4707_v37  ;;  %v4790_v7 = vmul.f32 0.33333334, %v948_v63  ;;  %v620_v8 = vsub.f32 %v4722_v43, %v3171_v2  ;;  %v621_v9 = vsub.f32 %v4747_v56, %v3172_v1  ;;  %v4078_v43 = vld [vmem:[#allocation11 + $0x10] sm:$0xff]  }
 0x30c   :  { %v4794_v10 = vmul.f32 0.33333334, %v949_v51  ;;  %v701_v11 = vadd.f32 %v699_v5, %v697_v41  ;;  %v702_v12 = vmul.f32 0.5, %v700_v52  ;;  %v4797_v13 = vadd.f32 -5.0, %v4711_v16 }
 0x30d   :  { %v4800_v14 = vadd.f32 -5.0, %v4725_v45  ;;  %v652_v15 = vsub.f32 7.0, %v4711_v16  ;;  %v653_v18 = vsub.f32 7.0, %v4725_v45  ;;  %v704_v19 = vmul.f32 %v4765_v23, %v646_v50 }
 0x30e   :  { %3653 = vmatpush3.bf16.msra.mxu1 %v4077_v4  ;;  %v952_v56 = vpack.c.bf16 %v4794_v10, %v4790_v7  ;;  %v703_v20 = vmul.f32 0.5, %v701_v11  ;;  %v1063_v21 = vmul.f32 %v702_v12, %v642_v27  ;;  %v650_v22 = vmul.f32 %v4797_v13, %v4728_v48  ;;  %v4079_v48 = vld [vmem:[#allocation11 + $0x18] sm:$0xff]   ;;  %v4097_v7 = vld [vmem:[#allocation11 + $0xe8] sm:$0xff]   ;;  %v4098_v10 = vld [vmem:[#allocation11 + $0xf0] sm:$0xff]  }
 0x30f   :  { %3654 = vmatprep.subr.bf16.mxu1 %v4459_v0  ;;  %v651_v24 = vmul.f32 %v4800_v14, %v4750_v60  ;;  %v654_v25 = vmul.f32 %v652_v15, %v620_v8  ;;  %v655_v28 = vmul.f32 %v653_v18, %v621_v9  ;;  %v705_v29 = vmul.f32 %v4768_v26, %v647_v58 }
 0x310   :  { %v1064_v30 = vmul.f32 %v703_v20, %v643_v34  ;;  %v1065_v31 = vadd.f32 %v1063_v21, %v1061_v55  ;;  %v1178_v32 = vmul.f32 %v4731_v49, %v702_v12  ;;  %v1179_v33 = vmul.f32 %v4753_v61, %v703_v20 }
 0x311   :  { %v656_v35 = vadd.f32 %v654_v25, %v650_v22  ;;  %v657_v27 = vadd.f32 %v655_v28, %v651_v24  ;;  %vm608_vm9 = vcmp.ge.f32.partialorder %v4711_v16, 8.0  ;;  %vm609_vm10 = vcmp.ge.f32.partialorder %v4725_v45, 8.0 }
 0x312   :  { %3655 = vmatpush3.bf16.msra.mxu1 %v4078_v43  ;;  %v1066_v36 = vadd.f32 %v1064_v30, %v1062_v62  ;;  %v4817_v60 = vmul.f32 0.33333334, %v1065_v31  ;;  %v4820_v38 = vsel %vm608_vm9, 1.0, %v4459_v0  ;;  %v4823_v34 = vsel %vm609_vm10, 1.0, %v4459_v0  ;;  %v4081_v43 = vld [vmem:[#allocation11 + $0x28] sm:$0xff]  }
 0x313   :  { %v4223_v49 = vpop.eup %4222  ;;  %3656 = vmatprep.subr.bf16.mxu1 %v4459_v0  ;;  %v706_v61 = vmul.f32 %v656_v35, %v652_v15  ;;  %v707_v39 = vmul.f32 %v657_v27, %v653_v18  ;;  %v622_v41 = vsub.f32 %v3171_v2, %v4820_v38  ;;  %v623_v17 = vsub.f32 %v3172_v1, %v4823_v34 }
 0x314   :  { %v4829_v42 = vmul.f32 %v4223_v49, %v4713_v40  ;;  %v4831_v44 = vmul.f32 0.33333334, %v1066_v36  ;;  %v4834_v46 = vadd.f32 -6.0, %v4711_v16  ;;  %v4837_v50 = vadd.f32 -6.0, %v4725_v45  ;;  %v4082_v36 = vld [vmem:[#allocation11 + $0x30] sm:$0xff]  }
 0x315   :  { %v708_v47 = vadd.f32 %v706_v61, %v704_v19  ;;  %v709_v53 = vadd.f32 %v707_v39, %v705_v29  ;;  %v662_v54 = vsub.f32 8.0, %v4711_v16  ;;  %v663_v55 = vsub.f32 8.0, %v4725_v45 }
 0x316   :  { %3657 = vmatpush3.bf16.msra.mxu1 %v4079_v48  ;;  %v563_v58 = vpack.c.bf16 %v4829_v42, %v4788_v6  ;;  %v1069_v59 = vpack.c.bf16 %v4831_v44, %v4817_v60  ;;  %v660_v62 = vmul.f32 %v4834_v46, %v620_v8  ;;  %v661_v63 = vmul.f32 %v4837_v50, %v621_v9  ;;  %v4105_v60 = vld [vmem:[#allocation11 + $0x128] sm:$0xff]   ;;  %v4106_v44 = vld [vmem:[#allocation11 + $0x130] sm:$0xff]  }
 0x317   :  { %3658 = vmatprep.subr.bf16.mxu1 %v4459_v0  ;;  %v710_v2 = vmul.f32 0.5, %v708_v47  ;;  %v711_v3 = vmul.f32 0.5, %v709_v53  ;;  %v664_v4 = vmul.f32 %v662_v54, %v622_v41  ;;  %v665_v51 = vmul.f32 %v663_v55, %v623_v17 }
 0x318   :  { %v712_v5 = vmul.f32 %v4797_v13, %v656_v35  ;;  %v713_v52 = vmul.f32 %v4800_v14, %v657_v27  ;;  %v4851_v1 = vadd.f32 -7.0, %v4711_v16  ;;  %v4854_v11 = vadd.f32 -7.0, %v4725_v45 }
 0x319   :  { %v1180_v12 = vmul.f32 %v710_v2, %v652_v15  ;;  %v1181_v8 = vmul.f32 %v711_v3, %v653_v18  ;;  %v666_v19 = vadd.f32 %v664_v4, %v660_v62  ;;  %v667_v9 = vadd.f32 %v665_v51, %v661_v63 }
 0x31a   :  { %3659 = vmatpush3.bf16.msra.mxu1 %v4080_v57  ;;  %v1295_v20 = vmul.f32 %v4765_v23, %v710_v2  ;;  %v1296_v21 = vmul.f32 %v4768_v26, %v711_v3  ;;  %v670_v22 = vmul.f32 %v4851_v1, %v622_v41  ;;  %v671_v24 = vmul.f32 %v4854_v11, %v623_v17 }
 0x31b   :  { %3660 = vmatprep.subr.bf16.mxu1 %v4459_v0  ;;  %v1182_v25 = vadd.f32 %v1180_v12, %v1178_v32  ;;  %v1183_v28 = vadd.f32 %v1181_v8, %v1179_v33  ;;  %v714_v29 = vmul.f32 %v666_v19, %v662_v54  ;;  %v715_v30 = vmul.f32 %v667_v9, %v663_v55 }
 0x31c   :  { %v672_v15 = vsub.f32 9.0, %v4711_v16  ;;  %v673_v18 = vsub.f32 9.0, %v4725_v45  ;;  %v720_v31 = vmul.f32 %v4834_v46, %v666_v19  ;;  %v721_v23 = vmul.f32 %v4837_v50, %v667_v9 }
 0x31d   :  { %v4865_v35 = vmul.f32 0.33333334, %v1182_v25  ;;  %v4867_v26 = vmul.f32 0.33333334, %v1183_v28  ;;  %v716_v27 = vadd.f32 %v714_v29, %v712_v5  ;;  %v717_v48 = vadd.f32 %v715_v30, %v713_v52  ;;  %v4083_v5 = vld [vmem:[#allocation11 + $0x38] sm:$0xff]   ;;  %v4084_v29 = vld [vmem:[#allocation11 + $0x80] sm:$0xff]  }
 0x31e   :  { %3661 = vmatpush3.bf16.msra.mxu1 %v4081_v43  ;;  %v674_v32 = vmul.f32 %v4820_v38, %v672_v15  ;;  %v675_v33 = vmul.f32 %v4823_v34, %v673_v18  ;;  %v3185_v49 = vadd.f32 -8.0, %v4711_v16  ;;  %v3186_v61 = vadd.f32 -8.0, %v4725_v45 }
 0x31f   :  { %3662 = vmatprep.subr.bf16.mxu1 %v4459_v0  ;;  %v1186_v39 = vpack.c.bf16 %v4867_v26, %v4865_v35  ;;  %v718_v41 = vmul.f32 0.5, %v716_v27  ;;  %v719_v17 = vmul.f32 0.5, %v717_v48  ;;  %v730_v47 = vsub.f32 10.0, %v4711_v16  ;;  %v4112_v35 = vld [vmem:[#allocation11 + $0x160] sm:$0xff]   ;;  %v4113_v26 = vld [vmem:[#allocation11 + $0x168] sm:$0xff]  }
 0x320   :  { %v676_v53 = vadd.f32 %v674_v32, %v670_v22  ;;  %v677_v57 = vadd.f32 %v675_v33, %v671_v24  ;;  %v680_v62 = vmul.f32 %v3185_v49, %v4820_v38  ;;  %v681_v63 = vmul.f32 %v3186_v61, %v4823_v34 }
 0x321   :  { %v1297_v2 = vmul.f32 %v718_v41, %v662_v54  ;;  %v1298_v3 = vmul.f32 %v719_v17, %v663_v55  ;;  %v1412_v4 = vmul.f32 %v4797_v13, %v718_v41  ;;  %v1413_v51 = vmul.f32 %v4800_v14, %v719_v17 }
 0x322   :  { %3663 = vmatpush3.bf16.msra.mxu1 %v4082_v36  ;;  %v722_v52 = vmul.f32 %v676_v53, %v672_v15  ;;  %v723_v12 = vmul.f32 %v677_v57, %v673_v18  ;;  %v728_v8 = vmul.f32 %v4851_v1, %v676_v53  ;;  %v729_v19 = vmul.f32 %v4854_v11, %v677_v57 }
 0x323   :  { %3664 = vmatprep.subr.bf16.mxu1 %v4459_v0  ;;  %v1299_v9 = vadd.f32 %v1297_v2, %v1295_v20  ;;  %v1300_v38 = vadd.f32 %v1298_v3, %v1296_v21  ;;  %v731_v34 = vsub.f32 10.0, %v4725_v45  ;;  %v732_v54 = vmul.f32 %v730_v47, %v680_v62  ;;  %v4086_v2 = vld [vmem:[#allocation11 + $0x90] sm:$0xff]  }
 0x324   :  { %v724_v55 = vadd.f32 %v722_v52, %v720_v31  ;;  %v725_v43 = vadd.f32 %v723_v12, %v721_v23  ;;  %v738_v13 = vmul.f32 %v3185_v49, %v680_v62  ;;  %v739_v22 = vmul.f32 %v3186_v61, %v681_v63  ;;  %v4085_v62 = vld [vmem:[#allocation11 + $0x88] sm:$0xff]  }
 0x325   :  { %v4885_v14 = vmul.f32 0.33333334, %v1299_v9  ;;  %v4887_v24 = vmul.f32 0.33333334, %v1300_v38  ;;  %v733_v25 = vmul.f32 %v731_v34, %v681_v63  ;;  %v734_v28 = vadd.f32 %v732_v54, %v728_v8  ;;  %v4087_v8 = vld [vmem:[#allocation11 + $0x98] sm:$0xff]   ;;  %v4089_v9 = vld [vmem:[#allocation11 + $0xa8] sm:$0xff]  }
 0x326   :  { %3665 = vmatpush3.bf16.msra.mxu1 %v4083_v5  ;;  %v726_v30 = vmul.f32 0.5, %v724_v55  ;;  %v727_v27 = vmul.f32 0.5, %v725_v43  ;;  %v740_v48 = vmul.f32 0.5, %v738_v13  ;;  %v741_v20 = vmul.f32 0.5, %v739_v22  ;;  %v4090_v38 = vld [vmem:[#allocation11 + $0xb0] sm:$0xff]   ;;  %v4092_v54 = vld [vmem:[#allocation11 + $0xc0] sm:$0xff]  }
 0x327   :  { %3670 = vmatprep.subr.bf16.mxu1 %v4459_v0  ;;  %v1303_v21 = vpack.c.bf16 %v4887_v24, %v4885_v14  ;;  %v735_v31 = vadd.f32 %v733_v25, %v729_v19  ;;  %v736_v23 = vmul.f32 0.5, %v734_v28  ;;  %v1648_v36 = vsub.f32 11.0, %v4711_v16  ;;  %v4088_v19 = vld [vmem:[#allocation11 + $0xa0] sm:$0xff]   ;;  %v4093_v55 = vld [vmem:[#allocation11 + $0xc8] sm:$0xff]   ;;  %v4094_v43 = vld [vmem:[#allocation11 + $0xd0] sm:$0xff]  }
 0x328   :  { %v1414_v32 = vmul.f32 %v726_v30, %v672_v15  ;;  %v1415_v33 = vmul.f32 %v727_v27, %v673_v18  ;;  %v1529_v49 = vmul.f32 %v4834_v46, %v726_v30  ;;  %v1530_v61 = vmul.f32 %v4837_v50, %v727_v27  ;;  %v4095_v13 = vld [vmem:[#allocation11 + $0xd8] sm:$0xff]   ;;  %v4096_v22 = vld [vmem:[#allocation11 + $0xe0] sm:$0xff]   ;;  %v4101_v28 = vld [vmem:[#allocation11 + $0x108] sm:$0xff]  }
 0x329   :  { %3667 = vmatmul.mubr.bf16.vlgmr.msra.gmra.mrb[4].mxu1 %v563_v58  ;;  %v737_v41 = vmul.f32 0.5, %v735_v31  ;;  %v1531_v17 = vmul.f32 %v736_v23, %v730_v47  ;;  %v1646_v53 = vmul.f32 %v4851_v1, %v736_v23  ;;  %v1649_v57 = vsub.f32 11.0, %v4725_v45  ;;  %v4100_v25 = vld [vmem:[#allocation11 + $0x100] sm:$0xff]   ;;  %v4103_v30 = vld [vmem:[#allocation11 + $0x118] sm:$0xff]   ;;  %v4109_v31 = vld [vmem:[#allocation11 + $0x148] sm:$0xff]  }
 0x32a   :  { %3671 = vmatpush3.bf16.msra.mxu1 %v4084_v29  ;;  %3686 = vmatprep.mubr.msk.bf16.mxu1 %vm4460_vm0, %v4459_v0  ;;  %v1416_v16 = vadd.f32 %v1414_v32, %v1412_v4  ;;  %v1417_v15 = vadd.f32 %v1415_v33, %v1413_v51  ;;  %v1650_v46 = vmul.f32 %v1648_v36, %v740_v48  ;;  %v4102_v29 = vld [vmem:[#allocation11 + $0x110] sm:$0xff]   ;;  %v4104_v27 = vld [vmem:[#allocation11 + $0x120] sm:$0xff]   ;;  %v4111_v36 = vld [vmem:[#allocation11 + $0x158] sm:$0xff]  }
 0x32b   :  { %3672 = vmatprep.subr.bf16.mxu1 %v4459_v0  ;;  %v1532_v50 = vmul.f32 %v737_v41, %v731_v34  ;;  %v1533_v18 = vadd.f32 %v1531_v17, %v1529_v49  ;;  %v1647_v6 = vmul.f32 %v4854_v11, %v737_v41  ;;  %v1651_v42 = vmul.f32 %v1649_v57, %v741_v20  ;;  %v4091_v34 = vld [vmem:[#allocation11 + $0xb8] sm:$0xff]   ;;  %v4108_v48 = vld [vmem:[#allocation11 + $0x140] sm:$0xff]   ;;  %v4110_v23 = vld [vmem:[#allocation11 + $0x150] sm:$0xff]  }
 0x32c   :  { %v4904_v58 = vmul.f32 0.33333334, %v1416_v16  ;;  %v4906_v1 = vmul.f32 0.33333334, %v1417_v15  ;;  %v1652_v45 = vadd.f32 %v1650_v46, %v1646_v53  ;;  %v4140_v20 = vld [vmem:[#allocation13 + $0x40] sm:$0xff]   ;;  %v4115_v32 = vld [vmem:[#allocation11 + $0x178] sm:$0xff]  }
 0x32d   :  { %v1534_v47 = vadd.f32 %v1532_v50, %v1530_v61  ;;  %v1653_v63 = vadd.f32 %v1651_v42, %v1647_v6  ;;  %v4910_v4 = vmul.f32 0.33333334, %v1533_v18  ;;  %3811 = vmatpush3.bf16.msra.mxu0 %v4140_v20  ;;  %v4116_v33 = vld [vmem:[#allocation11 + $0x180] sm:$0xff]   ;;  %v4117_v49 = vld [vmem:[#allocation11 + $0x188] sm:$0xff]   ;;  %v4118_v61 = vld [vmem:[#allocation11 + $0x190] sm:$0xff]  }
 0x32e   :  { %3673 = vmatpush3.bf16.msra.mxu1 %v4085_v62  ;;  %v1420_v3 = vpack.c.bf16 %v4906_v1, %v4904_v58  ;;  %v4915_v11 = vmul.f32 0.33333334, %v1652_v45  ;;  %3812 = vmatprep.subr.bf16.mxu0 %v4459_v0  ;;  %v4119_v41 = vld [vmem:[#allocation11 + $0x198] sm:$0xff]   ;;  %v4120_v17 = vld [vmem:[#allocation11 + $0x1a0] sm:$0xff]   ;;  %v4121_v14 = vld [vmem:[#allocation11 + $0x1a8] sm:$0xff]  }
 0x32f   :  { %3674 = vmatprep.subr.bf16.mxu1 %v4459_v0  ;;  %v4913_v51 = vmul.f32 0.33333334, %v1534_v47  ;;  %v4917_v5 = vmul.f32 0.33333334, %v1653_v63  ;;  %v4122_v24 = vld [vmem:[#allocation11 + $0x1b0] sm:$0xff]   ;;  %v4124_v53 = vld [vmem:[#allocation11 + $0x1c0] sm:$0xff]  }
 0x330   :  { %v4125_v57 = vld [vmem:[#allocation11 + $0x1c8] sm:$0xff]   ;;  %v4126_v62 = vld [vmem:[#allocation11 + $0x1d0] sm:$0xff]   ;;  %v4127_v16 = vld [vmem:[#allocation11 + $0x1d8] sm:$0xff]  }
 0x331   :  { %v1537_v52 = vpack.c.bf16 %v4913_v51, %v4910_v4  ;;  %v1656_v12 = vpack.c.bf16 %v4917_v5, %v4915_v11  ;;  %v4128_v15 = vld [vmem:[#allocation11 + $0x1e0] sm:$0xff]   ;;  %v4129_v46 = vld [vmem:[#allocation11 + $0x1e8] sm:$0xff]   ;;  %v4130_v50 = vld [vmem:[#allocation11 + $0x1f0] sm:$0xff]  }
 0x332   :  { %3675 = vmatpush3.bf16.msra.mxu1 %v4086_v2  ;;  %v4131_v18 = vld [vmem:[#allocation11 + $0x1f8] sm:$0xff]   ;;  %v4132_v6 = vld [vmem:[#allocation11 + $0x200] sm:$0xff]   ;;  %v4133_v42 = vld [vmem:[#allocation11 + $0x208] sm:$0xff]  }
 0x333   :  { %3676 = vmatprep.subr.bf16.mxu1 %v4459_v0  ;;  %v4134_v58 = vld [vmem:[#allocation11 + $0x210] sm:$0xff]   ;;  %v4135_v1 = vld [vmem:[#allocation11 + $0x218] sm:$0xff]   ;;  %v4136_v45 = vld [vmem:[#allocation11 + $0x220] sm:$0xff]  }
 0x334   :  { %v4137_v47 = vld [vmem:[#allocation11 + $0x228] sm:$0xff]   ;;  %v4138_v63 = vld [vmem:[#allocation11 + $0x230] sm:$0xff]   ;;  %v4139_v2 = vld [vmem:[#allocation11 + $0x238] sm:$0xff]  }
 0x335   :  { %v4142_v4 = vld [vmem:[#allocation13 + $0x50] sm:$0xff]   ;;  %v4143_v51 = vld [vmem:[#allocation13 + $0x58] sm:$0xff]  }
 0x336   :  { %3677 = vmatpush3.bf16.msra.mxu1 %v4087_v8  ;;  %v4145_v8 = vld [vmem:[#allocation13 + $0x68] sm:$0xff]   ;;  %v4146_v11 = vld [vmem:[#allocation13 + $0x70] sm:$0xff]   ;;  %v4147_v5 = vld [vmem:[#allocation13 + $0x78] sm:$0xff]  }
 0x337   :  { %3678 = vmatprep.subr.bf16.mxu1 %v4459_v0 }
 0x33a   :  { %3679 = vmatpush3.bf16.msra.mxu1 %v4088_v19 }
 0x33b   :  { %3680 = vmatprep.subr.bf16.mxu1 %v4459_v0 }
 0x33e   :  { %3681 = vmatpush3.bf16.msra.mxu1 %v4089_v9 }
 0x33f   :  { %3682 = vmatprep.subr.bf16.mxu1 %v4459_v0 }
 0x342   :  { %3683 = vmatpush3.bf16.msra.mxu1 %v4090_v38 }
 0x343   :  { %3684 = vmatprep.subr.bf16.mxu1 %v4459_v0 }
 0x346   :  { %3685 = vmatpush3.bf16.msra.mxu1 %v4091_v34 }
 0x347   :  { %3690 = vmatprep.subr.bf16.mxu1 %v4459_v0 }
 0x349   :  { %3687 = vmatmul.mubr.bf16.vlgmr.msra.gmra.mrb[4].mxu1 %v952_v56  ;;  %v4099_v56 = vld [vmem:[#allocation11 + $0xf8] sm:$0xff]  }
 0x34a   :  { %3691 = vmatpush3.bf16.msra.mxu1 %v4092_v54  ;;  %3706 = vmatprep.mubr.msk.bf16.mxu1 %vm4460_vm0, %v4459_v0 }
 0x34b   :  { %3692 = vmatprep.subr.bf16.mxu1 %v4459_v0 }
 0x34e   :  { %3693 = vmatpush3.bf16.msra.mxu1 %v4093_v55 }
 0x34f   :  { %3694 = vmatprep.subr.bf16.mxu1 %v4459_v0 }
 0x352   :  { %3695 = vmatpush3.bf16.msra.mxu1 %v4094_v43 }
 0x353   :  { %3696 = vmatprep.subr.bf16.mxu1 %v4459_v0 }
 0x356   :  { %3697 = vmatpush3.bf16.msra.mxu1 %v4095_v13 }
 0x357   :  { %3698 = vmatprep.subr.bf16.mxu1 %v4459_v0 }
 0x35a   :  { %3699 = vmatpush3.bf16.msra.mxu1 %v4096_v22 }
 0x35b   :  { %3700 = vmatprep.subr.bf16.mxu1 %v4459_v0 }
 0x35e   :  { %3701 = vmatpush3.bf16.msra.mxu1 %v4097_v7 }
 0x35f   :  { %3702 = vmatprep.subr.bf16.mxu1 %v4459_v0 }
 0x362   :  { %3703 = vmatpush3.bf16.msra.mxu1 %v4098_v10 }
 0x363   :  { %3704 = vmatprep.subr.bf16.mxu1 %v4459_v0 }
 0x366   :  { %3705 = vmatpush3.bf16.msra.mxu1 %v4099_v56 }
 0x367   :  { %3710 = vmatprep.subr.bf16.mxu1 %v4459_v0 }
 0x369   :  { %3707 = vmatmul.mubr.bf16.vlgmr.msra.gmra.mrb[4].mxu1 %v1069_v59  ;;  %v4107_v59 = vld [vmem:[#allocation11 + $0x138] sm:$0xff]  }
 0x36a   :  { %3711 = vmatpush3.bf16.msra.mxu1 %v4100_v25  ;;  %3726 = vmatprep.mubr.msk.bf16.mxu1 %vm4460_vm0, %v4459_v0 }
 0x36b   :  { %3712 = vmatprep.subr.bf16.mxu1 %v4459_v0 }
 0x36e   :  { %3713 = vmatpush3.bf16.msra.mxu1 %v4101_v28 }
 0x36f   :  { %3714 = vmatprep.subr.bf16.mxu1 %v4459_v0 }
 0x372   :  { %3715 = vmatpush3.bf16.msra.mxu1 %v4102_v29 }
 0x373   :  { %3716 = vmatprep.subr.bf16.mxu1 %v4459_v0 }
 0x376   :  { %3717 = vmatpush3.bf16.msra.mxu1 %v4103_v30 }
 0x377   :  { %3718 = vmatprep.subr.bf16.mxu1 %v4459_v0 }
 0x37a   :  { %3719 = vmatpush3.bf16.msra.mxu1 %v4104_v27 }
 0x37b   :  { %3720 = vmatprep.subr.bf16.mxu1 %v4459_v0 }
 0x37e   :  { %3721 = vmatpush3.bf16.msra.mxu1 %v4105_v60 }
 0x37f   :  { %3722 = vmatprep.subr.bf16.mxu1 %v4459_v0 }
 0x382   :  { %3723 = vmatpush3.bf16.msra.mxu1 %v4106_v44 }
 0x383   :  { %3724 = vmatprep.subr.bf16.mxu1 %v4459_v0 }
 0x386   :  { %3725 = vmatpush3.bf16.msra.mxu1 %v4107_v59 }
 0x387   :  { %3730 = vmatprep.subr.bf16.mxu1 %v4459_v0 }
 0x389   :  { %3727 = vmatmul.mubr.bf16.vlgmr.msra.gmra.mrb[4].mxu1 %v1186_v39  ;;  %v4114_v39 = vld [vmem:[#allocation11 + $0x170] sm:$0xff]  }
 0x38a   :  { %3731 = vmatpush3.bf16.msra.mxu1 %v4108_v48  ;;  %3746 = vmatprep.mubr.msk.bf16.mxu1 %vm4460_vm0, %v4459_v0 }
 0x38b   :  { %3732 = vmatprep.subr.bf16.mxu1 %v4459_v0 }
 0x38e   :  { %3733 = vmatpush3.bf16.msra.mxu1 %v4109_v31 }
 0x38f   :  { %3734 = vmatprep.subr.bf16.mxu1 %v4459_v0 }
 0x392   :  { %3735 = vmatpush3.bf16.msra.mxu1 %v4110_v23 }
 0x393   :  { %3736 = vmatprep.subr.bf16.mxu1 %v4459_v0 }
 0x396   :  { %3737 = vmatpush3.bf16.msra.mxu1 %v4111_v36 }
 0x397   :  { %3738 = vmatprep.subr.bf16.mxu1 %v4459_v0 }
 0x39a   :  { %3739 = vmatpush3.bf16.msra.mxu1 %v4112_v35 }
 0x39b   :  { %3740 = vmatprep.subr.bf16.mxu1 %v4459_v0 }
 0x39e   :  { %3741 = vmatpush3.bf16.msra.mxu1 %v4113_v26 }
 0x39f   :  { %3742 = vmatprep.subr.bf16.mxu1 %v4459_v0 }
 0x3a2   :  { %3743 = vmatpush3.bf16.msra.mxu1 %v4114_v39 }
 0x3a3   :  { %3744 = vmatprep.subr.bf16.mxu1 %v4459_v0 }
 0x3a6   :  { %3745 = vmatpush3.bf16.msra.mxu1 %v4115_v32 }
 0x3a7   :  { %3750 = vmatprep.subr.bf16.mxu1 %v4459_v0 }
 0x3a9   :  { %3747 = vmatmul.mubr.bf16.vlgmr.msra.gmra.mrb[4].mxu1 %v1303_v21  ;;  %v4123_v21 = vld [vmem:[#allocation11 + $0x1b8] sm:$0xff]  }
 0x3aa   :  { %3751 = vmatpush3.bf16.msra.mxu1 %v4116_v33  ;;  %3766 = vmatprep.mubr.msk.bf16.mxu1 %vm4460_vm0, %v4459_v0 }
 0x3ab   :  { %3752 = vmatprep.subr.bf16.mxu1 %v4459_v0 }
 0x3ae   :  { %3753 = vmatpush3.bf16.msra.mxu1 %v4117_v49 }
 0x3af   :  { %3754 = vmatprep.subr.bf16.mxu1 %v4459_v0 }
 0x3b2   :  { %3755 = vmatpush3.bf16.msra.mxu1 %v4118_v61 }
 0x3b3   :  { %3756 = vmatprep.subr.bf16.mxu1 %v4459_v0 }
 0x3b6   :  { %3757 = vmatpush3.bf16.msra.mxu1 %v4119_v41 }
 0x3b7   :  { %3758 = vmatprep.subr.bf16.mxu1 %v4459_v0 }
 0x3ba   :  { %3759 = vmatpush3.bf16.msra.mxu1 %v4120_v17 }
 0x3bb   :  { %3760 = vmatprep.subr.bf16.mxu1 %v4459_v0 }
 0x3be   :  { %3761 = vmatpush3.bf16.msra.mxu1 %v4121_v14 }
 0x3bf   :  { %3762 = vmatprep.subr.bf16.mxu1 %v4459_v0 }
 0x3c2   :  { %3763 = vmatpush3.bf16.msra.mxu1 %v4122_v24 }
 0x3c3   :  { %3764 = vmatprep.subr.bf16.mxu1 %v4459_v0 }
 0x3c6   :  { %3765 = vmatpush3.bf16.msra.mxu1 %v4123_v21 }
 0x3c7   :  { %3770 = vmatprep.subr.bf16.mxu1 %v4459_v0 }
 0x3c9   :  { %3767 = vmatmul.mubr.bf16.vlgmr.msra.gmra.mrb[4].mxu1 %v1420_v3  ;;  %v4141_v3 = vld [vmem:[#allocation13 + $0x48] sm:$0xff]  }
 0x3ca   :  { %3771 = vmatpush3.bf16.msra.mxu1 %v4124_v53  ;;  %3786 = vmatprep.mubr.msk.bf16.mxu1 %vm4460_vm0, %v4459_v0 }
 0x3cb   :  { %3772 = vmatprep.subr.bf16.mxu1 %v4459_v0  ;;  %3813 = vmatpush3.bf16.msra.mxu0 %v4141_v3 }
 0x3cc   :  { %3814 = vmatprep.subr.bf16.mxu0 %v4459_v0 }
 0x3ce   :  { %3773 = vmatpush3.bf16.msra.mxu1 %v4125_v57 }
 0x3cf   :  { %3774 = vmatprep.subr.bf16.mxu1 %v4459_v0  ;;  %3815 = vmatpush3.bf16.msra.mxu0 %v4142_v4 }
 0x3d0   :  { %3816 = vmatprep.subr.bf16.mxu0 %v4459_v0 }
 0x3d2   :  { %3775 = vmatpush3.bf16.msra.mxu1 %v4126_v62 }
 0x3d3   :  { %3776 = vmatprep.subr.bf16.mxu1 %v4459_v0  ;;  %3817 = vmatpush3.bf16.msra.mxu0 %v4143_v51 }
 0x3d4   :  { %3818 = vmatprep.subr.bf16.mxu0 %v4459_v0 }
 0x3d6   :  { %3777 = vmatpush3.bf16.msra.mxu1 %v4127_v16 }
 0x3d7   :  { %3778 = vmatprep.subr.bf16.mxu1 %v4459_v0 }
 0x3da   :  { %3779 = vmatpush3.bf16.msra.mxu1 %v4128_v15 }
 0x3db   :  { %3780 = vmatprep.subr.bf16.mxu1 %v4459_v0 }
 0x3de   :  { %3781 = vmatpush3.bf16.msra.mxu1 %v4129_v46 }
 0x3df   :  { %3782 = vmatprep.subr.bf16.mxu1 %v4459_v0 }
 0x3e2   :  { %3783 = vmatpush3.bf16.msra.mxu1 %v4130_v50 }
 0x3e3   :  { %3784 = vmatprep.subr.bf16.mxu1 %v4459_v0 }
 0x3e6   :  { %3785 = vmatpush3.bf16.msra.mxu1 %v4131_v18 }
 0x3e7   :  { %3790 = vmatprep.subr.bf16.mxu1 %v4459_v0 }
 0x3e9   :  { %3787 = vmatmul.mubr.bf16.vlgmr.msra.gmra.mrb[4].mxu1 %v1537_v52  ;;  %v4144_v52 = vld [vmem:[#allocation13 + $0x60] sm:$0xff]  }
 0x3ea   :  { %3791 = vmatpush3.bf16.msra.mxu1 %v4132_v6  ;;  %3806 = vmatprep.mubr.msk.bf16.mxu1 %vm4460_vm0, %v4459_v0 }
 0x3eb   :  { %3792 = vmatprep.subr.bf16.mxu1 %v4459_v0  ;;  %3819 = vmatpush3.bf16.msra.mxu0 %v4144_v52 }
 0x3ec   :  { %3820 = vmatprep.subr.bf16.mxu0 %v4459_v0 }
 0x3ee   :  { %3793 = vmatpush3.bf16.msra.mxu1 %v4133_v42 }
 0x3ef   :  { %3794 = vmatprep.subr.bf16.mxu1 %v4459_v0  ;;  %3821 = vmatpush3.bf16.msra.mxu0 %v4145_v8 }
 0x3f0   :  { %3822 = vmatprep.subr.bf16.mxu0 %v4459_v0 }
 0x3f2   :  { %3795 = vmatpush3.bf16.msra.mxu1 %v4134_v58 }
 0x3f3   :  { %3796 = vmatprep.subr.bf16.mxu1 %v4459_v0  ;;  %3823 = vmatpush3.bf16.msra.mxu0 %v4146_v11 }
 0x3f4   :  { %3824 = vmatprep.subr.bf16.mxu0 %v4459_v0 }
 0x3f6   :  { %3797 = vmatpush3.bf16.msra.mxu1 %v4135_v1 }
 0x3f7   :  { %3798 = vmatprep.subr.bf16.mxu1 %v4459_v0  ;;  %3825 = vmatpush3.bf16.msra.mxu0 %v4147_v5 }
 0x3f8   :  { %3830 = vmatprep.subr.bf16.mxu0 %v4459_v0 }
 0x3fa   :  { %3799 = vmatpush3.bf16.msra.mxu1 %v4136_v45 }
 0x3fb   :  { %3800 = vmatprep.subr.bf16.mxu1 %v4459_v0 }
 0x3fe   :  { %3801 = vmatpush3.bf16.msra.mxu1 %v4137_v47 }
 0x3ff   :  { %3802 = vmatprep.subr.bf16.mxu1 %v4459_v0 }
 0x402   :  { %3803 = vmatpush3.bf16.msra.mxu1 %v4138_v63 }
 0x403   :  { %3804 = vmatprep.subr.bf16.mxu1 %v4459_v0 }
 0x406   :  { %3805 = vmatpush3.bf16.msra.mxu1 %v4139_v2 }
 0x409   :  { %3807 = vmatmul.mubr.bf16.vlgmr.msra.gmra.mrb[4].mxu1 %v1656_v12 }
 0x4dc   :  { %v5017_v12 = vpop.f32.mrb[4].mxu1 }
 0x4dd   :  { %v3263_v19 = vmul.f32 -1.442695, %v5017_v12  ;;  %v3265_v9 = vadd.f32 2.2, %v5017_v12  ;;  %v3808_v38 = vpop.f32.mrb[5].mxu1 }
 0x4de   :  { %v5021_v34 = vpop.f32.mrb[6].mxu1 }
 0x4df   :  { %4224 = vpow2.f32 %v3263_v19  ;;  %v5023_v54 = vmul.f32 2.5, %v3265_v9  ;;  %v3264_v55 = vmul.f32 -1.442695, %v5021_v34  ;;  %v3266_v43 = vadd.f32 2.2, %v5021_v34  ;;  %v3809_v13 = vpop.f32.mrb[7].mxu1 }
 0x4e1   :  { %4226 = vpow2.f32 %v3264_v55  ;;  %v5027_v22 = vmul.f32 2.5, %v3266_v43  ;;  %vm1800_vm11 = vcmp.ge.f32.partialorder %v5023_v54, 0.0  ;;  %vm1806_vm12 = vcmp.ge.f32.partialorder %v5023_v54, 1.0 }
 0x4e2   :  { %v3267_v7 = vsel %vm1800_vm11, 1.0, %v4459_v0  ;;  %v3269_v10 = vsel %vm1806_vm12, 1.0, %v4459_v0  ;;  %vm1812_vm13 = vcmp.ge.f32.partialorder %v5023_v54, 2.0  ;;  %vm1818_vm14 = vcmp.ge.f32.partialorder %v5023_v54, 3.0 }
 0x4e3   :  { %vm1801_vm15 = vcmp.ge.f32.partialorder %v5027_v22, 0.0  ;;  %vm1807_vm1 = vcmp.ge.f32.partialorder %v5027_v22, 1.0  ;;  %vm1813_vm2 = vcmp.ge.f32.partialorder %v5027_v22, 2.0  ;;  %v3271_v56 = vsel %vm1812_vm13, 1.0, %v4459_v0 }
 0x4e4   :  { %v3268_v25 = vsel %vm1801_vm15, 1.0, %v4459_v0  ;;  %v3270_v28 = vsel %vm1807_vm1, 1.0, %v4459_v0  ;;  %v3272_v29 = vsel %vm1813_vm2, 1.0, %v4459_v0  ;;  %vm1819_vm3 = vcmp.ge.f32.partialorder %v5027_v22, 3.0 }
 0x4e5   :  { %v3273_v30 = vsel %vm1818_vm14, 1.0, %v4459_v0  ;;  %v3274_v27 = vsel %vm1819_vm3, 1.0, %v4459_v0  ;;  %vm1824_vm4 = vcmp.ge.f32.partialorder %v5023_v54, 4.0  ;;  %vm1825_vm5 = vcmp.ge.f32.partialorder %v5027_v22, 4.0 }
 0x4e6   :  { %v3275_v60 = vsel %vm1824_vm4, 1.0, %v4459_v0  ;;  %v3276_v44 = vsel %vm1825_vm5, 1.0, %v4459_v0  ;;  %v1872_v59 = vsub.f32 %v3267_v7, %v3269_v10  ;;  %v1873_v48 = vsub.f32 %v3268_v25, %v3270_v28 }
 0x4e7   :  { %v1874_v20 = vsub.f32 %v3269_v10, %v3271_v56  ;;  %v1875_v31 = vsub.f32 %v3270_v28, %v3272_v29  ;;  %v1876_v23 = vsub.f32 %v3271_v56, %v3273_v30  ;;  %v1877_v36 = vsub.f32 %v3272_v29, %v3274_v27 }
 0x4e8   :  { %v1878_v35 = vsub.f32 %v3273_v30, %v3275_v60  ;;  %v5049_v26 = vsub.f32 %v3274_v27, %v3276_v44  ;;  %v1894_v39 = vmul.f32 %v1872_v59, %v5023_v54  ;;  %v1895_v32 = vmul.f32 %v1873_v48, %v5027_v22 }
 0x4e9   :  { %v4225_v33 = vpop.eup %4224  ;;  %v1896_v49 = vsub.f32 2.0, %v5023_v54  ;;  %v1897_v61 = vsub.f32 2.0, %v5027_v22  ;;  %v5056_v41 = vadd.f32 -1.0, %v5023_v54  ;;  %v5059_v17 = vadd.f32 -1.0, %v5027_v22 }
 0x4ea   :  { %v1771_v14 = vadd.f32 1.0, %v4225_v33  ;;  %v1906_v24 = vsub.f32 3.0, %v5023_v54  ;;  %v1907_v21 = vsub.f32 3.0, %v5027_v22  ;;  %v5064_v53 = vadd.f32 -2.0, %v5023_v54 }
 0x4eb   :  { %v4227_v57 = vpop.eup %4226  ;;  %v1898_v62 = vmul.f32 %v1896_v49, %v1874_v20  ;;  %v1899_v16 = vmul.f32 %v1897_v61, %v1875_v31  ;;  %v1904_v15 = vmul.f32 %v5056_v41, %v1874_v20  ;;  %v1905_v46 = vmul.f32 %v5059_v17, %v1875_v31 }
 0x4ec   :  { %4228 = vrcp.f32 %v1771_v14  ;;  %v1772_v50 = vadd.f32 1.0, %v4227_v57  ;;  %v1908_v18 = vmul.f32 %v1906_v24, %v1876_v23  ;;  %v1909_v6 = vmul.f32 %v1907_v21, %v1877_v36 }
 0x4ed   :  { %v1900_v42 = vadd.f32 %v1898_v62, %v1894_v39  ;;  %v1901_v58 = vadd.f32 %v1899_v16, %v1895_v32  ;;  %v5069_v1 = vadd.f32 -2.0, %v5027_v22  ;;  %v1914_v45 = vmul.f32 %v5064_v53, %v1876_v23 }
 0x4ee   :  { %4230 = vrcp.f32 %v1772_v50  ;;  %v1910_v47 = vadd.f32 %v1908_v18, %v1904_v15  ;;  %v1911_v63 = vadd.f32 %v1909_v6, %v1905_v46  ;;  %v1916_v2 = vsub.f32 4.0, %v5023_v54 }
 0x4ef   :  { %v1915_v3 = vmul.f32 %v5069_v1, %v1877_v36  ;;  %v1917_v4 = vsub.f32 4.0, %v5027_v22  ;;  %v1992_v51 = vmul.f32 %v1900_v42, %v5023_v54  ;;  %v1993_v52 = vmul.f32 %v1901_v58, %v5027_v22 }
 0x4f0   :  { %v1918_v8 = vmul.f32 %v1916_v2, %v1878_v35  ;;  %v1994_v11 = vmul.f32 %v1910_v47, %v1906_v24  ;;  %v1995_v5 = vmul.f32 %v1911_v63, %v1907_v21  ;;  %v2000_v19 = vmul.f32 %v5056_v41, %v1910_v47 }
 0x4f1   :  { %v1919_v9 = vmul.f32 %v1917_v4, %v5049_v26  ;;  %v2001_v38 = vmul.f32 %v5059_v17, %v1911_v63  ;;  %vm1830_vm6 = vcmp.ge.f32.partialorder %v5023_v54, 5.0  ;;  %vm1831_vm7 = vcmp.ge.f32.partialorder %v5027_v22, 5.0 }
 0x4f2   :  { %v1920_v55 = vadd.f32 %v1918_v8, %v1914_v45  ;;  %v1996_v43 = vadd.f32 %v1994_v11, %v1992_v51  ;;  %v1997_v13 = vadd.f32 %v1995_v5, %v1993_v52  ;;  %v3277_v7 = vsel %vm1830_vm6, 1.0, %v4459_v0 }
 0x4f3   :  { %v1921_v10 = vadd.f32 %v1919_v9, %v1915_v3  ;;  %v3278_v56 = vsel %vm1831_vm7, 1.0, %v4459_v0  ;;  %v1880_v25 = vsub.f32 %v3275_v60, %v3277_v7  ;;  %v5085_v28 = vadd.f32 -3.0, %v5023_v54 }
 0x4f4   :  { %v1998_v29 = vmul.f32 0.5, %v1996_v43  ;;  %v1999_v30 = vmul.f32 0.5, %v1997_v13  ;;  %v2002_v27 = vmul.f32 %v1920_v55, %v1916_v2  ;;  %v1881_v59 = vsub.f32 %v3276_v44, %v3278_v56 }
 0x4f5   :  { %v2003_v48 = vmul.f32 %v1921_v10, %v1917_v4  ;;  %v5088_v20 = vadd.f32 -3.0, %v5027_v22  ;;  %v1924_v31 = vmul.f32 %v5085_v28, %v1878_v35  ;;  %v1926_v23 = vsub.f32 5.0, %v5023_v54 }
 0x4f6   :  { %v4229_v36 = vpop.eup %4228  ;;  %v2004_v39 = vadd.f32 %v2002_v27, %v2000_v19  ;;  %v2064_v32 = vmul.f32 %v1998_v29, %v5023_v54  ;;  %v2065_v60 = vmul.f32 %v1999_v30, %v5027_v22  ;;  %v1927_v33 = vsub.f32 5.0, %v5027_v22 }
 0x4f7   :  { %v5096_v49 = vmul.f32 %v4229_v36, %v5017_v12  ;;  %v2005_v44 = vadd.f32 %v2003_v48, %v2001_v38  ;;  %v1925_v61 = vmul.f32 %v5088_v20, %v5049_v26  ;;  %v1928_v14 = vmul.f32 %v1926_v23, %v1880_v25  ;;  %v4148_v38 = vld [vmem:[#allocation13] sm:$0xff]  }
 0x4f8   :  { %v4231_v24 = vpop.eup %4230  ;;  %v2006_v35 = vmul.f32 0.5, %v2004_v39  ;;  %v1929_v21 = vmul.f32 %v1927_v33, %v1881_v59  ;;  %v2008_v57 = vmul.f32 %v5064_v53, %v1920_v55  ;;  %v2009_v62 = vmul.f32 %v5069_v1, %v1921_v10 }
 0x4f9   :  { %v5103_v16 = vmul.f32 %v4231_v24, %v5021_v34  ;;  %v2007_v15 = vmul.f32 0.5, %v2005_v44  ;;  %v1930_v46 = vadd.f32 %v1928_v14, %v1924_v31  ;;  %vm1836_vm8 = vcmp.ge.f32.partialorder %v5023_v54, 6.0 }
 0x4fa   :  { %v2066_v12 = vmul.f32 %v2006_v35, %v1916_v2  ;;  %v1931_v50 = vadd.f32 %v1929_v21, %v1925_v61  ;;  %v2268_v18 = vmul.f32 %v5056_v41, %v2006_v35  ;;  %vm1837_vm9 = vcmp.ge.f32.partialorder %v5027_v22, 6.0 }
 0x4fb   :  { %v1779_v26 = vpack.c.bf16 %v5103_v16, %v5096_v49  ;;  %v2067_v6 = vmul.f32 %v2007_v15, %v1917_v4  ;;  %v2010_v42 = vmul.f32 %v1930_v46, %v1926_v23  ;;  %v2269_v58 = vmul.f32 %v5059_v17, %v2007_v15 }
 0x4fc   :  { %v2068_v45 = vadd.f32 %v2066_v12, %v2064_v32  ;;  %v2011_v34 = vmul.f32 %v1931_v50, %v1927_v33  ;;  %v3279_v47 = vsel %vm1836_vm8, 1.0, %v4459_v0  ;;  %v3280_v63 = vsel %vm1837_vm9, 1.0, %v4459_v0  ;;  %v4150_v12 = vld [vmem:[#allocation13 + $0x10] sm:$0xff]  }
 0x4fd   :  { %v2069_v3 = vadd.f32 %v2067_v6, %v2065_v60  ;;  %v2012_v2 = vadd.f32 %v2010_v42, %v2008_v57  ;;  %v1882_v51 = vsub.f32 %v3277_v7, %v3279_v47  ;;  %v1883_v52 = vsub.f32 %v3278_v56, %v3280_v63 }
 0x4fe   :  { %v2070_v41 = vmul.f32 0.33333334, %v2068_v45  ;;  %v2013_v8 = vadd.f32 %v2011_v34, %v2009_v62  ;;  %v5114_v11 = vadd.f32 -4.0, %v5023_v54  ;;  %v5117_v4 = vadd.f32 -4.0, %v5027_v22 }
 0x4ff   :  { %v2071_v5 = vmul.f32 0.33333334, %v2069_v3  ;;  %v2014_v17 = vmul.f32 0.5, %v2012_v2  ;;  %v1936_v19 = vsub.f32 6.0, %v5023_v54  ;;  %v1937_v9 = vsub.f32 6.0, %v5027_v22 }
 0x500   :  { %v2015_v55 = vmul.f32 0.5, %v2013_v8  ;;  %v1934_v43 = vmul.f32 %v5114_v11, %v1880_v25  ;;  %v1935_v13 = vmul.f32 %v5117_v4, %v1881_v59  ;;  %v2016_v7 = vmul.f32 %v5085_v28, %v1930_v46  ;;  %v4149_v25 = vld [vmem:[#allocation13 + $0x8] sm:$0xff]   ;;  %v4151_v8 = vld [vmem:[#allocation13 + $0x18] sm:$0xff]  }
 0x501   :  { %v2072_v10 = vpack.c.bf16 %v2071_v5, %v2070_v41  ;;  %v2270_v56 = vmul.f32 %v2014_v17, %v1926_v23  ;;  %v1938_v29 = vmul.f32 %v1936_v19, %v1882_v51  ;;  %v1939_v30 = vmul.f32 %v1937_v9, %v1883_v52 }
 0x502   :  { %v2271_v27 = vmul.f32 %v2015_v55, %v1927_v33  ;;  %v2017_v48 = vmul.f32 %v5088_v20, %v1931_v50  ;;  %v2385_v31 = vmul.f32 %v5064_v53, %v2014_v17  ;;  %v2386_v36 = vmul.f32 %v5069_v1, %v2015_v55 }
 0x503   :  { %3827 = vmatmul.mubr.bf16.vlgmr.msra.gmra.mrb[8].mxu0 %v2072_v10  ;;  %v2272_v39 = vadd.f32 %v2270_v56, %v2268_v18  ;;  %v1940_v32 = vadd.f32 %v1938_v29, %v1934_v43  ;;  %v1941_v60 = vadd.f32 %v1939_v30, %v1935_v13  ;;  %vm1842_vm10 = vcmp.ge.f32.partialorder %v5023_v54, 7.0 }
 0x504   :  { %3831 = vmatpush3.bf16.msra.mxu0 %v4148_v38  ;;  %3846 = vmatprep.mubr.msk.bf16.mxu0 %vm4460_vm0, %v4459_v0  ;;  %v2273_v59 = vadd.f32 %v2271_v27, %v2269_v58  ;;  %vm1843_vm11 = vcmp.ge.f32.partialorder %v5027_v22, 7.0  ;;  %v3281_v23 = vsel %vm1842_vm10, 1.0, %v4459_v0  ;;  %v5133_v53 = vadd.f32 -5.0, %v5023_v54 }
 0x505   :  { %3832 = vmatprep.subr.bf16.mxu0 %v4459_v0  ;;  %v5136_v1 = vmul.f32 0.33333334, %v2272_v39  ;;  %v2018_v33 = vmul.f32 %v1940_v32, %v1936_v19  ;;  %v2019_v44 = vmul.f32 %v1941_v60, %v1937_v9  ;;  %v3282_v61 = vsel %vm1843_vm11, 1.0, %v4459_v0 }
 0x506   :  { %v5139_v14 = vmul.f32 0.33333334, %v2273_v59  ;;  %v1884_v24 = vsub.f32 %v3279_v47, %v3281_v23  ;;  %v1885_v35 = vsub.f32 %v3280_v63, %v3282_v61  ;;  %v5142_v21 = vadd.f32 -5.0, %v5027_v22 }
 0x507   :  { %v2020_v57 = vadd.f32 %v2018_v33, %v2016_v7  ;;  %v2021_v62 = vadd.f32 %v2019_v44, %v2017_v48  ;;  %v1944_v15 = vmul.f32 %v5133_v53, %v1882_v51  ;;  %v1946_v46 = vsub.f32 7.0, %v5023_v54  ;;  %v4152_v48 = vld [vmem:[#allocation13 + $0x20] sm:$0xff]  }
 0x508   :  { %3833 = vmatpush3.bf16.msra.mxu0 %v4149_v25  ;;  %v2276_v50 = vpack.c.bf16 %v5139_v14, %v5136_v1  ;;  %v1945_v18 = vmul.f32 %v5142_v21, %v1883_v52  ;;  %v1947_v6 = vsub.f32 7.0, %v5027_v22  ;;  %v2024_v42 = vmul.f32 %v5114_v11, %v1940_v32  ;;  %v4169_v1 = vld [vmem:[#allocation13 + $0xe8] sm:$0xff]   ;;  %v4170_v14 = vld [vmem:[#allocation13 + $0xf0] sm:$0xff]  }
 0x509   :  { %3834 = vmatprep.subr.bf16.mxu0 %v4459_v0  ;;  %v2022_v58 = vmul.f32 0.5, %v2020_v57  ;;  %v2023_v45 = vmul.f32 0.5, %v2021_v62  ;;  %v1948_v34 = vmul.f32 %v1946_v46, %v1884_v24  ;;  %v2025_v47 = vmul.f32 %v5117_v4, %v1941_v60  ;;  %v4153_v62 = vld [vmem:[#allocation13 + $0x28] sm:$0xff]  }
 0x50a   :  { %v1949_v63 = vmul.f32 %v1947_v6, %v1885_v35  ;;  %vm1848_vm12 = vcmp.ge.f32.partialorder %v5023_v54, 8.0  ;;  %vm1849_vm13 = vcmp.ge.f32.partialorder %v5027_v22, 8.0  ;;  %v5156_v3 = vadd.f32 -6.0, %v5023_v54 }
 0x50b   :  { %v2387_v2 = vmul.f32 %v2022_v58, %v1936_v19  ;;  %v2388_v51 = vmul.f32 %v2023_v45, %v1937_v9  ;;  %v1950_v52 = vadd.f32 %v1948_v34, %v1944_v15  ;;  %v2502_v41 = vmul.f32 %v5085_v28, %v2022_v58 }
 0x50c   :  { %3835 = vmatpush3.bf16.msra.mxu0 %v4150_v12  ;;  %v1951_v5 = vadd.f32 %v1949_v63, %v1945_v18  ;;  %v2503_v17 = vmul.f32 %v5088_v20, %v2023_v45  ;;  %v3283_v38 = vsel %vm1848_vm12, 1.0, %v4459_v0  ;;  %v3284_v55 = vsel %vm1849_vm13, 1.0, %v4459_v0 }
 0x50d   :  { %3836 = vmatprep.subr.bf16.mxu0 %v4459_v0  ;;  %v2389_v43 = vadd.f32 %v2387_v2, %v2385_v31  ;;  %v2390_v13 = vadd.f32 %v2388_v51, %v2386_v36  ;;  %v2026_v7 = vmul.f32 %v1950_v52, %v1946_v46  ;;  %v1886_v10 = vsub.f32 %v3281_v23, %v3283_v38 }
 0x50e   :  { %v2027_v19 = vmul.f32 %v1951_v5, %v1947_v6  ;;  %v1887_v9 = vsub.f32 %v3282_v61, %v3284_v55  ;;  %v5164_v56 = vadd.f32 -6.0, %v5027_v22  ;;  %v1954_v28 = vmul.f32 %v5156_v3, %v1884_v24 }
 0x50f   :  { %v5167_v29 = vmul.f32 0.33333334, %v2389_v43  ;;  %v5169_v20 = vmul.f32 0.33333334, %v2390_v13  ;;  %v2028_v30 = vadd.f32 %v2026_v7, %v2024_v42  ;;  %v1956_v27 = vsub.f32 8.0, %v5023_v54 }
 0x510   :  { %3837 = vmatpush3.bf16.msra.mxu0 %v4151_v8  ;;  %v2029_v31 = vadd.f32 %v2027_v19, %v2025_v47  ;;  %v1955_v36 = vmul.f32 %v5164_v56, %v1885_v35  ;;  %v1957_v39 = vsub.f32 8.0, %v5027_v22  ;;  %v2032_v32 = vmul.f32 %v5133_v53, %v1950_v52 }
 0x511   :  { %3838 = vmatprep.subr.bf16.mxu0 %v4459_v0  ;;  %v2393_v60 = vpack.c.bf16 %v5169_v20, %v5167_v29  ;;  %v2030_v25 = vmul.f32 0.5, %v2028_v30  ;;  %v1958_v59 = vmul.f32 %v1956_v27, %v1886_v10  ;;  %v2033_v23 = vmul.f32 %v5142_v21, %v1951_v5  ;;  %v4177_v29 = vld [vmem:[#allocation13 + $0x128] sm:$0xff]   ;;  %v4178_v20 = vld [vmem:[#allocation13 + $0x130] sm:$0xff]  }
 0x512   :  { %v2031_v33 = vmul.f32 0.5, %v2029_v31  ;;  %v1959_v44 = vmul.f32 %v1957_v39, %v1887_v9  ;;  %vm1854_vm14 = vcmp.ge.f32.partialorder %v5023_v54, 9.0  ;;  %vm1855_vm15 = vcmp.ge.f32.partialorder %v5027_v22, 9.0 }
 0x513   :  { %v2504_v61 = vmul.f32 %v2030_v25, %v1946_v46  ;;  %v1960_v24 = vadd.f32 %v1958_v59, %v1954_v28  ;;  %v2619_v35 = vmul.f32 %v5114_v11, %v2030_v25  ;;  %v3285_v57 = vsel %vm1854_vm14, 1.0, %v4459_v0 }
 0x514   :  { %3839 = vmatpush3.bf16.msra.mxu0 %v4152_v48  ;;  %v2505_v15 = vmul.f32 %v2031_v33, %v1947_v6  ;;  %v1961_v12 = vadd.f32 %v1959_v44, %v1955_v36  ;;  %v2620_v18 = vmul.f32 %v5117_v4, %v2031_v33  ;;  %v3286_v42 = vsel %vm1855_vm15, 1.0, %v4459_v0 }
 0x515   :  { %3840 = vmatprep.subr.bf16.mxu0 %v4459_v0  ;;  %v2506_v58 = vadd.f32 %v2504_v61, %v2502_v41  ;;  %v2034_v45 = vmul.f32 %v1960_v24, %v1956_v27  ;;  %v1888_v34 = vsub.f32 %v3283_v38, %v3285_v57  ;;  %v1889_v47 = vsub.f32 %v3284_v55, %v3286_v42  ;;  %v4154_v41 = vld [vmem:[#allocation13 + $0x30] sm:$0xff]  }
 0x516   :  { %v2507_v46 = vadd.f32 %v2505_v15, %v2503_v17  ;;  %v2035_v63 = vmul.f32 %v1961_v12, %v1957_v39  ;;  %v5187_v11 = vadd.f32 -7.0, %v5023_v54  ;;  %v5190_v2 = vadd.f32 -7.0, %v5027_v22 }
 0x517   :  { %v5192_v6 = vmul.f32 0.33333334, %v2506_v58  ;;  %v2036_v51 = vadd.f32 %v2034_v45, %v2032_v32  ;;  %v1966_v4 = vsub.f32 9.0, %v5023_v54  ;;  %v1967_v52 = vsub.f32 9.0, %v5027_v22 }
 0x518   :  { %3841 = vmatpush3.bf16.msra.mxu0 %v4153_v62  ;;  %v5196_v8 = vmul.f32 0.33333334, %v2507_v46  ;;  %v2037_v5 = vadd.f32 %v2035_v63, %v2033_v23  ;;  %v1964_v17 = vmul.f32 %v5187_v11, %v1886_v10  ;;  %v1965_v38 = vmul.f32 %v5190_v2, %v1887_v9  ;;  %v4155_v9 = vld [vmem:[#allocation13 + $0x38] sm:$0xff]  }
 0x519   :  { %3842 = vmatprep.subr.bf16.mxu0 %v4459_v0  ;;  %v2038_v55 = vmul.f32 0.5, %v2036_v51  ;;  %v1968_v43 = vmul.f32 %v1966_v4, %v1888_v34  ;;  %v1969_v13 = vmul.f32 %v1967_v52, %v1889_v47  ;;  %v2040_v28 = vmul.f32 %v5156_v3, %v1960_v24 }
 0x51a   :  { %v2510_v7 = vpack.c.bf16 %v5196_v8, %v5192_v6  ;;  %v2039_v19 = vmul.f32 0.5, %v2037_v5  ;;  %vm1860_vm1 = vcmp.ge.f32.partialorder %v5023_v54, 10.0  ;;  %v2041_v10 = vmul.f32 %v5164_v56, %v1961_v12  ;;  %v4185_v6 = vld [vmem:[#allocation13 + $0x168] sm:$0xff]   ;;  %v4186_v8 = vld [vmem:[#allocation13 + $0x170] sm:$0xff]  }
 0x51b   :  { %v2621_v30 = vmul.f32 %v2038_v55, %v1956_v27  ;;  %v1970_v48 = vadd.f32 %v1968_v43, %v1964_v17  ;;  %v1971_v31 = vadd.f32 %v1969_v13, %v1965_v38  ;;  %v2736_v32 = vmul.f32 %v5133_v53, %v2038_v55 }
 0x51c   :  { %3843 = vmatpush3.bf16.msra.mxu0 %v4154_v41  ;;  %v2622_v36 = vmul.f32 %v2039_v19, %v1957_v39  ;;  %vm1861_vm2 = vcmp.ge.f32.partialorder %v5027_v22, 10.0  ;;  %v5209_v25 = vsel %vm1860_vm1, 1.0, %v4459_v0  ;;  %v3305_v53 = vadd.f32 -8.0, %v5023_v54 }
 0x51d   :  { %3844 = vmatprep.subr.bf16.mxu0 %v4459_v0  ;;  %v2623_v59 = vadd.f32 %v2621_v30, %v2619_v35  ;;  %v2042_v23 = vmul.f32 %v1970_v48, %v1966_v4  ;;  %v2043_v33 = vmul.f32 %v1971_v31, %v1967_v52  ;;  %v5213_v27 = vsel %vm1861_vm2, 1.0, %v4459_v0  ;;  %v4156_v35 = vld [vmem:[#allocation13 + $0x80] sm:$0xff]  }
 0x51e   :  { %v2624_v44 = vadd.f32 %v2622_v36, %v2620_v18  ;;  %v1890_v61 = vsub.f32 %v3285_v57, %v5209_v25  ;;  %v1891_v39 = vsub.f32 %v3286_v42, %v5213_v27  ;;  %v3306_v12 = vadd.f32 -8.0, %v5027_v22  ;;  %v4158_v36 = vld [vmem:[#allocation13 + $0x90] sm:$0xff]  }
 0x51f   :  { %v5218_v24 = vmul.f32 0.33333334, %v2623_v59  ;;  %v2044_v62 = vadd.f32 %v2042_v23, %v2040_v28  ;;  %v2045_v15 = vadd.f32 %v2043_v33, %v2041_v10  ;;  %v1974_v45 = vmul.f32 %v3305_v53, %v1888_v34 }
 0x520   :  { %3845 = vmatpush3.bf16.msra.mxu0 %v4155_v9  ;;  %v5221_v58 = vmul.f32 0.33333334, %v2624_v44  ;;  %v1976_v46 = vsub.f32 10.0, %v5023_v54  ;;  %v1977_v18 = vsub.f32 10.0, %v5027_v22  ;;  %v2737_v63 = vmul.f32 %v5142_v21, %v2039_v19  ;;  %v4157_v21 = vld [vmem:[#allocation13 + $0x88] sm:$0xff]  }
 0x521   :  { %3850 = vmatprep.subr.bf16.mxu0 %v4459_v0  ;;  %v2046_v57 = vmul.f32 0.5, %v2044_v62  ;;  %v2047_v42 = vmul.f32 0.5, %v2045_v15  ;;  %v1975_v51 = vmul.f32 %v3306_v12, %v1889_v47  ;;  %v2048_v38 = vmul.f32 %v5187_v11, %v1970_v48 }
 0x522   :  { %v2627_v41 = vpack.c.bf16 %v5221_v58, %v5218_v24  ;;  %v1978_v5 = vmul.f32 %v1976_v46, %v1890_v61  ;;  %v1979_v17 = vmul.f32 %v1977_v18, %v1891_v39  ;;  %v2049_v43 = vmul.f32 %v5190_v2, %v1971_v31  ;;  %v4193_v24 = vld [vmem:[#allocation13 + $0x1a8] sm:$0xff]   ;;  %v4194_v58 = vld [vmem:[#allocation13 + $0x1b0] sm:$0xff]  }
 0x523   :  { %3847 = vmatmul.mubr.bf16.vlgmr.msra.gmra.mrb[12].mxu0 %v1779_v26  ;;  %v2738_v34 = vmul.f32 %v2046_v57, %v1966_v4  ;;  %v2739_v55 = vmul.f32 %v2047_v42, %v1967_v52  ;;  %v2853_v13 = vmul.f32 %v5156_v3, %v2046_v57  ;;  %vm1866_vm3 = vcmp.ge.f32.partialorder %v5023_v54, 11.0 }
 0x524   :  { %3851 = vmatpush3.bf16.msra.mxu0 %v4156_v35  ;;  %3866 = vmatprep.mubr.msk.bf16.mxu0 %vm4460_vm0, %v4459_v0  ;;  %v1980_v47 = vadd.f32 %v1978_v5, %v1974_v45  ;;  %v1981_v19 = vadd.f32 %v1979_v17, %v1975_v51  ;;  %vm1867_vm4 = vcmp.ge.f32.partialorder %v5027_v22, 11.0  ;;  %v3289_v26 = vsel %vm1866_vm3, 1.0, %v4459_v0  ;;  %v4159_v5 = vld [vmem:[#allocation13 + $0x98] sm:$0xff]  }
 0x525   :  { %3852 = vmatprep.subr.bf16.mxu0 %v4459_v0  ;;  %v2740_v49 = vadd.f32 %v2738_v34, %v2736_v32  ;;  %v2741_v16 = vadd.f32 %v2739_v55, %v2737_v63  ;;  %v3290_v4 = vsel %vm1867_vm4, 1.0, %v4459_v0  ;;  %v1892_v28 = vsub.f32 %v5209_v25, %v3289_v26 }
 0x526   :  { %v2050_v3 = vmul.f32 %v1980_v47, %v1976_v46  ;;  %v2051_v52 = vmul.f32 %v1981_v19, %v1977_v18  ;;  %v1893_v30 = vsub.f32 %v5213_v27, %v3290_v4  ;;  %v3307_v10 = vadd.f32 -9.0, %v5023_v54 }
 0x527   :  { %v5244_v48 = vmul.f32 0.33333334, %v2740_v49  ;;  %v5246_v31 = vmul.f32 0.33333334, %v2741_v16  ;;  %v3308_v9 = vadd.f32 -9.0, %v5027_v22  ;;  %v1986_v23 = vsub.f32 11.0, %v5023_v54 }
 0x528   :  { %3853 = vmatpush3.bf16.msra.mxu0 %v4157_v21  ;;  %v2052_v32 = vadd.f32 %v2050_v3, %v2048_v38  ;;  %v2053_v59 = vadd.f32 %v2051_v52, %v2049_v43  ;;  %v1987_v33 = vsub.f32 11.0, %v5027_v22  ;;  %v2854_v27 = vmul.f32 %v5164_v56, %v2047_v42  ;;  %v4162_v3 = vld [vmem:[#allocation13 + $0xb0] sm:$0xff]  }
 0x529   :  { %3854 = vmatprep.subr.bf16.mxu0 %v4459_v0  ;;  %v2744_v25 = vpack.c.bf16 %v5246_v31, %v5244_v48  ;;  %v1984_v44 = vmul.f32 %v3307_v10, %v1890_v61  ;;  %v1985_v62 = vmul.f32 %v3308_v9, %v1891_v39  ;;  %v1988_v45 = vmul.f32 %v1986_v23, %v1892_v28  ;;  %v4160_v61 = vld [vmem:[#allocation13 + $0xa0] sm:$0xff]   ;;  %v4165_v10 = vld [vmem:[#allocation13 + $0xc8] sm:$0xff]   ;;  %v4166_v9 = vld [vmem:[#allocation13 + $0xd0] sm:$0xff]  }
 0x52a   :  { %v2054_v15 = vmul.f32 0.5, %v2052_v32  ;;  %v2055_v35 = vmul.f32 0.5, %v2053_v59  ;;  %v1989_v57 = vmul.f32 %v1987_v33, %v1893_v30  ;;  %v2056_v63 = vmul.f32 %v3305_v53, %v1980_v47  ;;  %v4164_v30 = vld [vmem:[#allocation13 + $0xc0] sm:$0xff]   ;;  %v4201_v48 = vld [vmem:[#allocation13 + $0x1e8] sm:$0xff]  }
 0x52b   :  { %v2057_v51 = vmul.f32 %v3306_v12, %v1981_v19  ;;  %v1990_v22 = vadd.f32 %v1988_v45, %v1984_v44  ;;  %v4161_v19 = vld [vmem:[#allocation13 + $0xa8] sm:$0xff]   ;;  %v4168_v32 = vld [vmem:[#allocation13 + $0xe0] sm:$0xff]   ;;  %v4183_v45 = vld [vmem:[#allocation13 + $0x158] sm:$0xff]  }
 0x52c   :  { %3855 = vmatpush3.bf16.msra.mxu0 %v4158_v36  ;;  %v2855_v54 = vmul.f32 %v2054_v15, %v1976_v46  ;;  %v2856_v17 = vmul.f32 %v2055_v35, %v1977_v18  ;;  %v1991_v38 = vadd.f32 %v1989_v57, %v1985_v62  ;;  %v2970_v46 = vmul.f32 %v5187_v11, %v2054_v15  ;;  %v4167_v36 = vld [vmem:[#allocation13 + $0xd8] sm:$0xff]   ;;  %v4172_v59 = vld [vmem:[#allocation13 + $0x100] sm:$0xff]   ;;  %v4181_v15 = vld [vmem:[#allocation13 + $0x148] sm:$0xff]  }
 0x52d   :  { %3856 = vmatprep.subr.bf16.mxu0 %v4459_v0  ;;  %v2058_v43 = vmul.f32 %v1990_v22, %v1986_v23  ;;  %v2971_v47 = vmul.f32 %v5190_v2, %v2055_v35  ;;  %v4163_v2 = vld [vmem:[#allocation13 + $0xb8] sm:$0xff]   ;;  %v4176_v44 = vld [vmem:[#allocation13 + $0x120] sm:$0xff]   ;;  %v4182_v35 = vld [vmem:[#allocation13 + $0x150] sm:$0xff]  }
 0x52e   :  { %v2857_v34 = vadd.f32 %v2855_v54, %v2853_v13  ;;  %v2858_v55 = vadd.f32 %v2856_v17, %v2854_v27  ;;  %v2059_v56 = vmul.f32 %v1991_v38, %v1987_v33  ;;  %v4175_v27 = vld [vmem:[#allocation13 + $0x118] sm:$0xff]   ;;  %v4180_v62 = vld [vmem:[#allocation13 + $0x140] sm:$0xff]   ;;  %v4197_v38 = vld [vmem:[#allocation13 + $0x1c8] sm:$0xff]  }
 0x52f   :  { %v2060_v53 = vadd.f32 %v2058_v43, %v2056_v63  ;;  %v4184_v57 = vld [vmem:[#allocation13 + $0x160] sm:$0xff]   ;;  %v4191_v54 = vld [vmem:[#allocation13 + $0x198] sm:$0xff]  }
 0x530   :  { %3857 = vmatpush3.bf16.msra.mxu0 %v4159_v5  ;;  %v5257_v39 = vmul.f32 0.33333334, %v2857_v34  ;;  %v5259_v42 = vmul.f32 0.33333334, %v2858_v55  ;;  %v2061_v12 = vadd.f32 %v2059_v56, %v2057_v51  ;;  %v4188_v63 = vld [vmem:[#allocation13 + $0x180] sm:$0xff]   ;;  %v4189_v51 = vld [vmem:[#allocation13 + $0x188] sm:$0xff]  }
 0x531   :  { %3858 = vmatprep.subr.bf16.mxu0 %v4459_v0  ;;  %v2062_v21 = vmul.f32 0.5, %v2060_v53  ;;  %v4190_v5 = vld [vmem:[#allocation13 + $0x190] sm:$0xff]   ;;  %v4192_v17 = vld [vmem:[#allocation13 + $0x1a0] sm:$0xff]   ;;  %v4199_v55 = vld [vmem:[#allocation13 + $0x1d8] sm:$0xff]  }
 0x532   :  { %v2861_v18 = vpack.c.bf16 %v5259_v42, %v5257_v39  ;;  %v2063_v13 = vmul.f32 0.5, %v2061_v12  ;;  %v4196_v22 = vld [vmem:[#allocation13 + $0x1c0] sm:$0xff]   ;;  %v4198_v34 = vld [vmem:[#allocation13 + $0x1d0] sm:$0xff]   ;;  %v4203_v12 = vld [vmem:[#allocation13 + $0x1f8] sm:$0xff]  }
 0x533   :  { %v2972_v49 = vmul.f32 %v2062_v21, %v1986_v23  ;;  %v4173_v23 = vld [vmem:[#allocation13 + $0x108] sm:$0xff]   ;;  %v4200_v43 = vld [vmem:[#allocation13 + $0x1e0] sm:$0xff]  }
 0x534   :  { %3859 = vmatpush3.bf16.msra.mxu0 %v4160_v61  ;;  %v2973_v16 = vmul.f32 %v2063_v13, %v1987_v33  ;;  %v4174_v33 = vld [vmem:[#allocation13 + $0x110] sm:$0xff]   ;;  %v4205_v21 = vld [vmem:[#allocation13 + $0x208] sm:$0xff]  }
 0x535   :  { %3860 = vmatprep.subr.bf16.mxu0 %v4459_v0  ;;  %v2974_v26 = vadd.f32 %v2972_v49, %v2970_v46  ;;  %v4202_v61 = vld [vmem:[#allocation13 + $0x1f0] sm:$0xff]   ;;  %v4204_v46 = vld [vmem:[#allocation13 + $0x200] sm:$0xff]   ;;  %v4209_v39 = vld [vmem:[#allocation13 + $0x228] sm:$0xff]  }
 0x536   :  { %v2975_v4 = vadd.f32 %v2973_v16, %v2971_v47  ;;  %v4206_v13 = vld [vmem:[#allocation13 + $0x210] sm:$0xff]   ;;  %v4207_v47 = vld [vmem:[#allocation13 + $0x218] sm:$0xff]  }
 0x537   :  { %v5267_v52 = vmul.f32 0.33333334, %v2974_v26  ;;  %v4210_v26 = vld [vmem:[#allocation13 + $0x230] sm:$0xff]  }
 0x538   :  { %3861 = vmatpush3.bf16.msra.mxu0 %v4161_v19  ;;  %v5269_v11 = vmul.f32 0.33333334, %v2975_v4  ;;  %v4208_v19 = vld [vmem:[#allocation13 + $0x220] sm:$0xff]  }
 0x539   :  { %3862 = vmatprep.subr.bf16.mxu0 %v4459_v0 }
 0x53a   :  { %v2978_v28 = vpack.c.bf16 %v5269_v11, %v5267_v52 }
 0x53c   :  { %3863 = vmatpush3.bf16.msra.mxu0 %v4162_v3 }
 0x53d   :  { %3864 = vmatprep.subr.bf16.mxu0 %v4459_v0 }
 0x540   :  { %3865 = vmatpush3.bf16.msra.mxu0 %v4163_v2  ;;  %v4211_v2 = vld [vmem:[#allocation13 + $0x238] sm:$0xff]  }
 0x541   :  { %3870 = vmatprep.subr.bf16.mxu0 %v4459_v0 }
 0x543   :  { %3867 = vmatmul.mubr.bf16.vlgmr.msra.gmra.mrb[16].mxu0 %v2276_v50  ;;  %v4171_v50 = vld [vmem:[#allocation13 + $0xf8] sm:$0xff]  }
 0x544   :  { %3871 = vmatpush3.bf16.msra.mxu0 %v4164_v30  ;;  %3886 = vmatprep.mubr.msk.bf16.mxu0 %vm4460_vm0, %v4459_v0 }
 0x545   :  { %3872 = vmatprep.subr.bf16.mxu0 %v4459_v0 }
 0x548   :  { %3873 = vmatpush3.bf16.msra.mxu0 %v4165_v10 }
 0x549   :  { %3874 = vmatprep.subr.bf16.mxu0 %v4459_v0 }
 0x54c   :  { %3875 = vmatpush3.bf16.msra.mxu0 %v4166_v9 }
 0x54d   :  { %3876 = vmatprep.subr.bf16.mxu0 %v4459_v0 }
 0x550   :  { %3877 = vmatpush3.bf16.msra.mxu0 %v4167_v36 }
 0x551   :  { %3878 = vmatprep.subr.bf16.mxu0 %v4459_v0 }
 0x554   :  { %3879 = vmatpush3.bf16.msra.mxu0 %v4168_v32 }
 0x555   :  { %3880 = vmatprep.subr.bf16.mxu0 %v4459_v0 }
 0x558   :  { %3881 = vmatpush3.bf16.msra.mxu0 %v4169_v1 }
 0x559   :  { %3882 = vmatprep.subr.bf16.mxu0 %v4459_v0 }
 0x55c   :  { %3883 = vmatpush3.bf16.msra.mxu0 %v4170_v14 }
 0x55d   :  { %3884 = vmatprep.subr.bf16.mxu0 %v4459_v0 }
 0x560   :  { %3885 = vmatpush3.bf16.msra.mxu0 %v4171_v50 }
 0x561   :  { %3890 = vmatprep.subr.bf16.mxu0 %v4459_v0 }
 0x563   :  { %3887 = vmatmul.mubr.bf16.vlgmr.msra.gmra.mrb[20].mxu0 %v2393_v60  ;;  %v4179_v60 = vld [vmem:[#allocation13 + $0x138] sm:$0xff]  }
 0x564   :  { %3891 = vmatpush3.bf16.msra.mxu0 %v4172_v59  ;;  %3906 = vmatprep.mubr.msk.bf16.mxu0 %vm4460_vm0, %v4459_v0 }
 0x565   :  { %3892 = vmatprep.subr.bf16.mxu0 %v4459_v0 }
 0x568   :  { %3893 = vmatpush3.bf16.msra.mxu0 %v4173_v23 }
 0x569   :  { %3894 = vmatprep.subr.bf16.mxu0 %v4459_v0 }
 0x56c   :  { %3895 = vmatpush3.bf16.msra.mxu0 %v4174_v33 }
 0x56d   :  { %3896 = vmatprep.subr.bf16.mxu0 %v4459_v0 }
 0x570   :  { %3897 = vmatpush3.bf16.msra.mxu0 %v4175_v27 }
 0x571   :  { %3898 = vmatprep.subr.bf16.mxu0 %v4459_v0 }
 0x574   :  { %3899 = vmatpush3.bf16.msra.mxu0 %v4176_v44 }
 0x575   :  { %3900 = vmatprep.subr.bf16.mxu0 %v4459_v0 }
 0x578   :  { %3901 = vmatpush3.bf16.msra.mxu0 %v4177_v29 }
 0x579   :  { %3902 = vmatprep.subr.bf16.mxu0 %v4459_v0 }
 0x57c   :  { %3903 = vmatpush3.bf16.msra.mxu0 %v4178_v20 }
 0x57d   :  { %3904 = vmatprep.subr.bf16.mxu0 %v4459_v0 }
 0x580   :  { %3905 = vmatpush3.bf16.msra.mxu0 %v4179_v60 }
 0x581   :  { %3910 = vmatprep.subr.bf16.mxu0 %v4459_v0 }
 0x583   :  { %3907 = vmatmul.mubr.bf16.vlgmr.msra.gmra.mrb[24].mxu0 %v2510_v7  ;;  %v4187_v7 = vld [vmem:[#allocation13 + $0x178] sm:$0xff]  }
 0x584   :  { %3911 = vmatpush3.bf16.msra.mxu0 %v4180_v62  ;;  %3926 = vmatprep.mubr.msk.bf16.mxu0 %vm4460_vm0, %v4459_v0 }
 0x585   :  { %3912 = vmatprep.subr.bf16.mxu0 %v4459_v0 }
 0x588   :  { %3913 = vmatpush3.bf16.msra.mxu0 %v4181_v15 }
 0x589   :  { %3914 = vmatprep.subr.bf16.mxu0 %v4459_v0 }
 0x58c   :  { %3915 = vmatpush3.bf16.msra.mxu0 %v4182_v35 }
 0x58d   :  { %3916 = vmatprep.subr.bf16.mxu0 %v4459_v0 }
 0x590   :  { %3917 = vmatpush3.bf16.msra.mxu0 %v4183_v45 }
 0x591   :  { %3918 = vmatprep.subr.bf16.mxu0 %v4459_v0 }
 0x594   :  { %3919 = vmatpush3.bf16.msra.mxu0 %v4184_v57 }
 0x595   :  { %3920 = vmatprep.subr.bf16.mxu0 %v4459_v0 }
 0x598   :  { %3921 = vmatpush3.bf16.msra.mxu0 %v4185_v6 }
 0x599   :  { %3922 = vmatprep.subr.bf16.mxu0 %v4459_v0 }
 0x59c   :  { %3923 = vmatpush3.bf16.msra.mxu0 %v4186_v8 }
 0x59d   :  { %3924 = vmatprep.subr.bf16.mxu0 %v4459_v0 }
 0x5a0   :  { %3925 = vmatpush3.bf16.msra.mxu0 %v4187_v7 }
 0x5a1   :  { %3930 = vmatprep.subr.bf16.mxu0 %v4459_v0 }
 0x5a3   :  { %3927 = vmatmul.mubr.bf16.vlgmr.msra.gmra.mrb[28].mxu0 %v2627_v41  ;;  %v4195_v41 = vld [vmem:[#allocation13 + $0x1b8] sm:$0xff]  }
 0x5a4   :  { %3931 = vmatpush3.bf16.msra.mxu0 %v4188_v63  ;;  %3946 = vmatprep.mubr.msk.bf16.mxu0 %vm4460_vm0, %v4459_v0 }
 0x5a5   :  { %3932 = vmatprep.subr.bf16.mxu0 %v4459_v0 }
 0x5a8   :  { %3933 = vmatpush3.bf16.msra.mxu0 %v4189_v51 }
 0x5a9   :  { %3934 = vmatprep.subr.bf16.mxu0 %v4459_v0 }
 0x5ac   :  { %3935 = vmatpush3.bf16.msra.mxu0 %v4190_v5 }
 0x5ad   :  { %3936 = vmatprep.subr.bf16.mxu0 %v4459_v0 }
 0x5b0   :  { %3937 = vmatpush3.bf16.msra.mxu0 %v4191_v54 }
 0x5b1   :  { %3938 = vmatprep.subr.bf16.mxu0 %v4459_v0 }
 0x5b4   :  { %3939 = vmatpush3.bf16.msra.mxu0 %v4192_v17 }
 0x5b5   :  { %3940 = vmatprep.subr.bf16.mxu0 %v4459_v0 }
 0x5b8   :  { %3941 = vmatpush3.bf16.msra.mxu0 %v4193_v24 }
 0x5b9   :  { %3942 = vmatprep.subr.bf16.mxu0 %v4459_v0 }
 0x5bc   :  { %3943 = vmatpush3.bf16.msra.mxu0 %v4194_v58 }
 0x5bd   :  { %3944 = vmatprep.subr.bf16.mxu0 %v4459_v0 }
 0x5c0   :  { %3945 = vmatpush3.bf16.msra.mxu0 %v4195_v41 }
 0x5c1   :  { %3950 = vmatprep.subr.bf16.mxu0 %v4459_v0 }
 0x5c3   :  { %3947 = vmatmul.mubr.bf16.vlgmr.msra.gmra.mrb[32].mxu0 %v2744_v25 }
 0x5c4   :  { %3951 = vmatpush3.bf16.msra.mxu0 %v4196_v22  ;;  %3966 = vmatprep.mubr.msk.bf16.mxu0 %vm4460_vm0, %v4459_v0 }
 0x5c5   :  { %3952 = vmatprep.subr.bf16.mxu0 %v4459_v0 }
 0x5c8   :  { %3953 = vmatpush3.bf16.msra.mxu0 %v4197_v38 }
 0x5c9   :  { %3954 = vmatprep.subr.bf16.mxu0 %v4459_v0 }
 0x5cc   :  { %3955 = vmatpush3.bf16.msra.mxu0 %v4198_v34 }
 0x5cd   :  { %3956 = vmatprep.subr.bf16.mxu0 %v4459_v0 }
 0x5d0   :  { %3957 = vmatpush3.bf16.msra.mxu0 %v4199_v55 }
 0x5d1   :  { %3958 = vmatprep.subr.bf16.mxu0 %v4459_v0 }
 0x5d4   :  { %3959 = vmatpush3.bf16.msra.mxu0 %v4200_v43 }
 0x5d5   :  { %3960 = vmatprep.subr.bf16.mxu0 %v4459_v0 }
 0x5d6   :  { %v2172_v31 = vpop.f32.mrb[8].mxu0 }
 0x5d7   :  { %v3828_v25 = vpop.f32.mrb[9].mxu0 }
 0x5d8   :  { %3961 = vmatpush3.bf16.msra.mxu0 %v4201_v48  ;;  %v2175_v56 = vpop.f32.mrb[10].mxu0 }
 0x5d9   :  { %v3829_v53 = vpop.f32.mrb[11].mxu0  ;;  %3962 = vmatprep.subr.bf16.mxu0 %v4459_v0 }
 0x5dc   :  { %3963 = vmatpush3.bf16.msra.mxu0 %v4202_v61 }
 0x5dd   :  { %3964 = vmatprep.subr.bf16.mxu0 %v4459_v0 }
 0x5e0   :  { %3965 = vmatpush3.bf16.msra.mxu0 %v4203_v12 }
 0x5e1   :  { %3970 = vmatprep.subr.bf16.mxu0 %v4459_v0 }
 0x5e3   :  { %3967 = vmatmul.mubr.bf16.vlgmr.msra.gmra.mrb[36].mxu0 %v2861_v18 }
 0x5e4   :  { %3971 = vmatpush3.bf16.msra.mxu0 %v4204_v46  ;;  %3986 = vmatprep.mubr.msk.bf16.mxu0 %vm4460_vm0, %v4459_v0 }
 0x5e5   :  { %3972 = vmatprep.subr.bf16.mxu0 %v4459_v0 }
 0x5e8   :  { %3973 = vmatpush3.bf16.msra.mxu0 %v4205_v21 }
 0x5e9   :  { %3974 = vmatprep.subr.bf16.mxu0 %v4459_v0 }
 0x5ec   :  { %3975 = vmatpush3.bf16.msra.mxu0 %v4206_v13 }
 0x5ed   :  { %3976 = vmatprep.subr.bf16.mxu0 %v4459_v0 }
 0x5f0   :  { %3977 = vmatpush3.bf16.msra.mxu0 %v4207_v47 }
 0x5f1   :  { %3978 = vmatprep.subr.bf16.mxu0 %v4459_v0 }
 0x5f4   :  { %3979 = vmatpush3.bf16.msra.mxu0 %v4208_v19 }
 0x5f5   :  { %3980 = vmatprep.subr.bf16.mxu0 %v4459_v0 }
 0x5f6   :  { %v2261_v42 = vpop.f32.mrb[12].mxu0 }
 0x5f7   :  { %v2262_v18 = vadd.f32 %v2261_v42, %v2172_v31  ;;  %v3848_v49 = vpop.f32.mrb[13].mxu0 }
 0x5f8   :  { %v2264_v16 = vpop.f32.mrb[14].mxu0  ;;  %3981 = vmatpush3.bf16.msra.mxu0 %v4209_v39 }
 0x5f9   :  { %v2265_v4 = vadd.f32 %v2264_v16, %v2175_v56  ;;  %v3849_v3 = vpop.f32.mrb[15].mxu0  ;;  %3982 = vmatprep.subr.bf16.mxu0 %v4459_v0 }
 0x5fc   :  { %3983 = vmatpush3.bf16.msra.mxu0 %v4210_v26 }
 0x5fd   :  { %3984 = vmatprep.subr.bf16.mxu0 %v4459_v0 }
 0x600   :  { %3985 = vmatpush3.bf16.msra.mxu0 %v4211_v2 }
 0x603   :  { %3987 = vmatmul.mubr.bf16.vlgmr.msra.gmra.mrb[40].mxu0 %v2978_v28 }
 0x616   :  { %v2376_v30 = vpop.f32.mrb[16].mxu0 }
 0x617   :  { %v2383_v10 = vadd.f32 %v2376_v30, %v2262_v18  ;;  %v3868_v9 = vpop.f32.mrb[17].mxu0 }
 0x618   :  { %v2379_v36 = vpop.f32.mrb[18].mxu0 }
 0x619   :  { %v2384_v32 = vadd.f32 %v2379_v36, %v2265_v4  ;;  %v3869_v1 = vpop.f32.mrb[19].mxu0 }
 0x636   :  { %v2493_v14 = vpop.f32.mrb[20].mxu0 }
 0x637   :  { %v2500_v50 = vadd.f32 %v2493_v14, %v2383_v10  ;;  %v3888_v59 = vpop.f32.mrb[21].mxu0 }
 0x638   :  { %v2496_v23 = vpop.f32.mrb[22].mxu0 }
 0x639   :  { %v2501_v33 = vadd.f32 %v2496_v23, %v2384_v32  ;;  %v3889_v27 = vpop.f32.mrb[23].mxu0 }
 0x656   :  { %v2610_v44 = vpop.f32.mrb[24].mxu0 }
 0x657   :  { %v2617_v29 = vadd.f32 %v2610_v44, %v2500_v50  ;;  %v3908_v0 = vpop.f32.mrb[25].mxu0 }
 0x658   :  { %v2613_v20 = vpop.f32.mrb[26].mxu0 }
 0x659   :  { %v2618_v60 = vadd.f32 %v2613_v20, %v2501_v33  ;;  %v3909_v62 = vpop.f32.mrb[27].mxu0 }
 0x65a   :  { %4401 = shalt.err (!%p4398_p4)
}
 0x65b   :  { %s4402_s15 = scalar_lea.hbm %s5400_s12, 256 }
 0x65c   :  { %p4403_p5 = scmp.ne.s32.totalorder %s5400_s12, %s4402_s15  ;;  %p4406_p6 = scmp.lt.u32.totalorder %s4402_s15, %s5400_s12 }
 0x65e   :  { %p4408_p7 = pnand %p4406_p6, %p4403_p5 }
 0x660   :  { %4411 = shalt.err (!%p4408_p7)
}
 0x661   :  { %3118 = dma.vmem_to_hbm [thread:$0]  %s3113_s1, 256, %s5400_s12, [#allocation16], %s4447_s13, %s4447_s13, %s4448_s14  }
 0x662   :  { %s4464_s12 = smov [#allocation14]  }
 0x663   :  { %s3100_s23 = sshll.u32 %s4464_s12, 4  ;;  %s3101_s23 = int_to_ptr.vmem [resolvable:$true] %s3100_s23 }
 0x664   :  { %s4412_s9 = scalar_lea.vmem %s3101_s23, 256  ;;  %p4417_p9 = scmp.lt.s32.totalorder %s3101_s23, %s3101_s23 }
 0x665   :  { %p4413_p8 = scmp.ne.s32.totalorder %s3101_s23, %s4412_s9  ;;  %p4418_p10 = scmp.lt.s32.totalorder %s4412_s9, %s4412_s9 }
 0x667   :  { %p4419_p11 = por %p4418_p10, %p4417_p9 }
 0x669   :  { %p4420_p12 = pnand %p4419_p11, %p4413_p8 }
 0x676   :  { %v2727_v52 = vpop.f32.mrb[28].mxu0 }
 0x677   :  { %v2734_v11 = vadd.f32 %v2727_v52, %v2617_v29  ;;  %v3928_v28 = vpop.f32.mrb[29].mxu0 }
 0x678   :  { %v2730_v15 = vpop.f32.mrb[30].mxu0 }
 0x679   :  { %v2735_v35 = vadd.f32 %v2730_v15, %v2618_v60  ;;  %v3929_v45 = vpop.f32.mrb[31].mxu0 }
 0x696   :  { %v2844_v57 = vpop.f32.mrb[32].mxu0 }
 0x697   :  { %v2851_v6 = vadd.f32 %v2844_v57, %v2734_v11  ;;  %v3948_v8 = vpop.f32.mrb[33].mxu0 }
 0x698   :  { %v2847_v7 = vpop.f32.mrb[34].mxu0 }
 0x699   :  { %v2852_v63 = vadd.f32 %v2847_v7, %v2735_v35  ;;  %v3949_v51 = vpop.f32.mrb[35].mxu0 }
 0x6b6   :  { %v2961_v5 = vpop.f32.mrb[36].mxu0 }
 0x6b7   :  { %v2968_v54 = vadd.f32 %v2961_v5, %v2851_v6  ;;  %v3968_v17 = vpop.f32.mrb[37].mxu0 }
 0x6b8   :  { %v2964_v24 = vpop.f32.mrb[38].mxu0 }
 0x6b9   :  { %v2969_v58 = vadd.f32 %v2964_v24, %v2852_v63  ;;  %v3969_v41 = vpop.f32.mrb[39].mxu0 }
 0x6d6   :  { %v3078_v22 = vpop.f32.mrb[40].mxu0 }
 0x6d7   :  { %v3085_v38 = vadd.f32 %v3078_v22, %v2968_v54  ;;  %v3988_v34 = vpop.f32.mrb[41].mxu0 }
 0x6d8   :  { %v3081_v55 = vpop.f32.mrb[42].mxu0 }
 0x6d9   :  { %v3087_v43 = vadd.f32 %v4707_v37, %v3085_v38  ;;  %v3086_v48 = vadd.f32 %v3081_v55, %v2969_v58  ;;  %v3989_v31 = vpop.f32.mrb[43].mxu0 }
 0x6db   :  { %4232 = vtanh.f32 %v3087_v43  ;;  %v3088_v25 = vadd.f32 %v4713_v40, %v3086_v48 }
 0x6dd   :  { %4234 = vtanh.f32 %v3088_v25 }
 0x6e5   :  { %v4233_v56 = vpop.eup %4232 }
 0x6e6   :  { %3091 = vst [vmem:[#allocation14] sm:$0xff] %v4233_v56 }
 0x6e7   :  { %v4235_v61 = vpop.eup %4234 }
 0x6e8   :  { %3092 = vst [vmem:[#allocation14 + $0x8] sm:$0xff] %v4235_v61 }
 0x6e9   :  { %4423 = shalt.err (!%p4420_p12)
}
 0x6ea   :  { %s4424_s27 = scalar_lea.hbm %s5399_s11, 256 }
 0x6eb   :  { %p4425_p13 = scmp.ne.s32.totalorder %s5399_s11, %s4424_s27  ;;  %p4428_p0 = scmp.lt.u32.totalorder %s4424_s27, %s5399_s11 }
 0x6ed   :  { %p4430_p1 = pnand %p4428_p0, %p4425_p13 }
 0x6ef   :  { %4433 = shalt.err (!%p4430_p1)
}
 0x6f0   :  { %3106 = dma.vmem_to_hbm [thread:$0]  %s3101_s23, 256, %s5399_s11, [#allocation4], %s4447_s13, %s4447_s13, %s4448_s14  }
 0x6f1   :  { %4442 = dma.done.wait [#allocation4], 256  }
 0x6f2   :  { %4443 = vsyncadd [#allocation4], 4294967040 }
 0x6f3   :  { %4444 = dma.done.wait [#allocation16], 256  }
 0x6f4   :  { %4445 = vsyncadd [#allocation16], 4294967040 }
 0x6f5   :  { %3125 = vsyncpa [#allocation3], 1 }
 0x6f6   :  { %3126 = vsyncpa [#allocation6], 1 }
 0x6f7   :  { %3127 = vsyncpa [#allocation9], 1 }
 0x6f8   :  { %3128 = vsyncpa [#allocation12], 1 }
 0x6f9   :  { %3129 = vsyncpa [#allocation4], 1 }
 0x6fa   :  { %3130 = vsyncpa [#allocation16], 1 }

// kernel: tpu_custom_call.1
= control target key start
LH: loop header
LB: loop body
LE: loop exit
PB: predicated region body
PF: predicated region fallthrough
CT: control target
= control target key end

     0   :  { %18 = vsyncpa [#allocation3], 0  ;;  %s5388_s0 = inlined_call_operand.hbm [shape: bf16[16,384], index: 0, kind: input, shape index: {}]   ;;  %s5389_s1 = inlined_call_operand.hbm [shape: f32[16,128], index: 1, kind: input, shape index: {}]   ;;  %s5390_s2 = inlined_call_operand.hbm [shape: bf16[128,128], index: 2, kind: input, shape index: {}]   ;;  %s5391_s3 = inlined_call_operand.hbm [shape: bf16[128,128], index: 3, kind: input, shape index: {}]   ;;  %s5392_s4 = inlined_call_operand.hbm [shape: bf16[128,128], index: 4, kind: input, shape index: {}]   ;;  %s5393_s5 = inlined_call_operand.vmem [shape: f32[1,128], index: 5, kind: input, shape index: {}]   ;;  %s5394_s6 = inlined_call_operand.vmem [shape: f32[1,128], index: 6, kind: input, shape index: {}]   ;;  %s5395_s7 = inlined_call_operand.vmem [shape: f32[1,128], index: 7, kind: input, shape index: {}]   ;;  %s5396_s8 = inlined_call_operand.vmem [shape: f32[3,128], index: 8, kind: input, shape index: {}]   ;;  %s5397_s9 = inlined_call_operand.hbm [shape: bf16[9,128,128], index: 9, kind: input, shape index: {}]   ;;  %s5398_s10 = inlined_call_operand.hbm [shape: bf16[9,128,128], index: 10, kind: input, shape index: {}]   ;;  %s5399_s11 = inlined_call_operand.hbm [shape: f32[16,128], index: 11, kind: output, shape index: {0}]   ;;  %s5400_s12 = inlined_call_operand.hbm [shape: f32[16,128], index: 12, kind: output, shape index: {1}]  }
   0x1   :  { %19 = vsyncpa [#allocation6], 0 }
   0x2   :  { %20 = vsyncpa [#allocation9], 0 }
   0x3   :  { %21 = vsyncpa [#allocation12], 0 }
   0x4   :  { %22 = vsyncpa [#allocation4], 0 }
   0x5   :  { %23 = vsyncpa [#allocation16], 0  ;;  %s4446_s21 = smov [#allocation5]   ;;  %s4236_s25 = scalar_lea.hbm %s5389_s1, 256 }
   0x6   :  { %s41_s22 = sshll.u32 %s4446_s21, 4  ;;  %p4237_p0 = scmp.ne.s32.totalorder %s5389_s1, %s4236_s25  ;;  %s42_s22 = int_to_ptr.vmem [resolvable:$true] %s41_s22 }
   0x7   :  { %p4240_p1 = scmp.lt.u32.totalorder %s4236_s25, %s5389_s1 }
   0x9   :  { %p4242_p2 = pnand %p4240_p1, %p4237_p0 }
   0xb   :  { %4245 = shalt.err (!%p4242_p2)
}
   0xc   :  { %s4246_s30 = scalar_lea.vmem %s42_s22, 256  ;;  %p4251_p4 = scmp.lt.s32.totalorder %s42_s22, %s42_s22 }
   0xd   :  { %p4247_p3 = scmp.ne.s32.totalorder %s42_s22, %s4246_s30  ;;  %p4252_p5 = scmp.lt.s32.totalorder %s4246_s30, %s4246_s30 }
   0xf   :  { %p4253_p6 = por %p4252_p5, %p4251_p4 }
  0x11   :  { %p4254_p7 = pnand %p4253_p6, %p4247_p3 }
  0x13   :  { %4257 = shalt.err (!%p4254_p7)
}
  0x14   :  { %s4447_s13 = smov 128   ;;  %s4448_s14 = smov 8  }
  0x15   :  { %47 = dma.hbm_to_vmem [thread:$0]  %s5389_s1, 256, %s42_s22, [#allocation6], %s4447_s13, %s4447_s13, %s4448_s14  }
  0x16   :  { %s4449_s17 = smov [#allocation8]   ;;  %s4450_s19 = smov [#allocation11]  }
  0x17   :  { %s65_s18 = sshll.u32 %s4449_s17, 4  ;;  %s97_s20 = sshll.u32 %s4450_s19, 4  ;;  %s66_s18 = int_to_ptr.vmem [resolvable:$true] %s65_s18  ;;  %s98_s20 = int_to_ptr.vmem [resolvable:$true] %s97_s20 }
  0x18   :  { %s4258_s24 = scalar_lea.hbm %s5391_s3, 1024 }
  0x19   :  { %p4259_p8 = scmp.ne.s32.totalorder %s5391_s3, %s4258_s24  ;;  %p4262_p9 = scmp.lt.u32.totalorder %s4258_s24, %s5391_s3 }
  0x1b   :  { %p4264_p10 = pnand %p4262_p9, %p4259_p8 }
  0x1d   :  { %4267 = shalt.err (!%p4264_p10)
}
  0x1e   :  { %s4268_s1 = scalar_lea.vmem %s66_s18, 1024  ;;  %p4273_p12 = scmp.lt.s32.totalorder %s66_s18, %s66_s18 }
  0x1f   :  { %p4269_p11 = scmp.ne.s32.totalorder %s66_s18, %s4268_s1  ;;  %p4274_p13 = scmp.lt.s32.totalorder %s4268_s1, %s4268_s1 }
  0x21   :  { %p4275_p0 = por %p4274_p13, %p4273_p12 }
  0x23   :  { %p4276_p1 = pnand %p4275_p0, %p4269_p11 }
  0x25   :  { %4279 = shalt.err (!%p4276_p1)
}
  0x26   :  { %s4451_s22 = smov 64   ;;  %s4452_s29 = smov 4  }
  0x27   :  { %71 = dma.hbm_to_vmem [thread:$0]  %s5391_s3, 1024, %s66_s18, [#allocation9], %s4451_s22, %s4451_s22, %s4452_s29  }
  0x28   :  { %s4280_s19 = scalar_lea.hbm %s5397_s9, 9216 }
  0x29   :  { %p4281_p2 = scmp.ne.s32.totalorder %s5397_s9, %s4280_s19  ;;  %p4284_p3 = scmp.lt.u32.totalorder %s4280_s19, %s5397_s9 }
  0x2b   :  { %p4286_p4 = pnand %p4284_p3, %p4281_p2 }
  0x2d   :  { %4289 = shalt.err (!%p4286_p4)
}
  0x2e   :  { %s4290_s26 = scalar_lea.vmem %s98_s20, 9216  ;;  %p4295_p6 = scmp.lt.s32.totalorder %s98_s20, %s98_s20 }
  0x2f   :  { %p4291_p5 = scmp.ne.s32.totalorder %s98_s20, %s4290_s26  ;;  %p4296_p7 = scmp.lt.s32.totalorder %s4290_s26, %s4290_s26 }
  0x31   :  { %p4297_p8 = por %p4296_p7, %p4295_p6 }
  0x33   :  { %p4298_p9 = pnand %p4297_p8, %p4291_p5 }
  0x35   :  { %4301 = shalt.err (!%p4298_p9)
}
  0x36   :  { %103 = dma.hbm_to_vmem [thread:$0]  %s5397_s9, 9216, %s98_s20, [#allocation12], %s4451_s22, %s4451_s22, %s4452_s29  }
  0x37   :  { %s4453_s27 = smov [#allocation2]   ;;  %s4302_s15 = scalar_lea.hbm %s5388_s0, 384 }
  0x38   :  { %s29_s28 = sshll.u32 %s4453_s27, 4  ;;  %p4303_p10 = scmp.ne.s32.totalorder %s5388_s0, %s4302_s15  ;;  %s30_s28 = int_to_ptr.vmem [resolvable:$true] %s29_s28 }
  0x39   :  { %p4306_p11 = scmp.lt.u32.totalorder %s4302_s15, %s5388_s0 }
  0x3b   :  { %p4308_p12 = pnand %p4306_p11, %p4303_p10 }
  0x3d   :  { %4311 = shalt.err (!%p4308_p12)
}
  0x3e   :  { %s4312_s23 = scalar_lea.vmem %s30_s28, 384  ;;  %p4317_p0 = scmp.lt.s32.totalorder %s30_s28, %s30_s28 }
  0x3f   :  { %p4313_p13 = scmp.ne.s32.totalorder %s30_s28, %s4312_s23  ;;  %p4318_p1 = scmp.lt.s32.totalorder %s4312_s23, %s4312_s23 }
  0x41   :  { %p4319_p2 = por %p4318_p1, %p4317_p0 }
  0x43   :  { %p4320_p3 = pnand %p4319_p2, %p4313_p13 }
  0x45   :  { %4323 = shalt.err (!%p4320_p3)
}
  0x46   :  { %s4454_s9 = smov 192   ;;  %s4455_s20 = smov 12  }
  0x47   :  { %35 = dma.hbm_to_vmem [thread:$0]  %s5388_s0, 384, %s30_s28, [#allocation3], %s4454_s9, %s4454_s9, %s4455_s20  }
  0x48   :  { %s4456_s26 = smov [#allocation7]   ;;  %s4457_s18 = smov [#allocation10]  }
  0x49   :  { %s53_s3 = sshll.u32 %s4456_s26, 4  ;;  %s77_s27 = sshll.u32 %s4457_s18, 4  ;;  %s54_s3 = int_to_ptr.vmem [resolvable:$true] %s53_s3  ;;  %s4587_s27 = int_to_ptr.vmem [resolvable:$true] %s77_s27 }
  0x4a   :  { %s4324_s15 = scalar_lea.hbm %s5390_s2, 1024 }
  0x4b   :  { %p4325_p4 = scmp.ne.s32.totalorder %s5390_s2, %s4324_s15  ;;  %p4328_p5 = scmp.lt.u32.totalorder %s4324_s15, %s5390_s2 }
  0x4d   :  { %p4330_p6 = pnand %p4328_p5, %p4325_p4 }
  0x4f   :  { %4333 = shalt.err (!%p4330_p6)
}
  0x50   :  { %s4334_s0 = scalar_lea.vmem %s54_s3, 1024  ;;  %p4339_p8 = scmp.lt.s32.totalorder %s54_s3, %s54_s3 }
  0x51   :  { %p4335_p7 = scmp.ne.s32.totalorder %s54_s3, %s4334_s0  ;;  %p4340_p9 = scmp.lt.s32.totalorder %s4334_s0, %s4334_s0 }
  0x53   :  { %p4341_p10 = por %p4340_p9, %p4339_p8 }
  0x55   :  { %p4342_p11 = pnand %p4341_p10, %p4335_p7 }
  0x57   :  { %4345 = shalt.err (!%p4342_p11)
}
  0x58   :  { %59 = dma.hbm_to_vmem [thread:$0]  %s5390_s2, 1024, %s54_s3, [#allocation6], %s4451_s22, %s4451_s22, %s4452_s29  }
  0x59   :  { %s4346_s24 = scalar_lea.hbm %s5392_s4, 1024 }
  0x5a   :  { %p4347_p12 = scmp.ne.s32.totalorder %s5392_s4, %s4346_s24  ;;  %p4350_p13 = scmp.lt.u32.totalorder %s4346_s24, %s5392_s4 }
  0x5c   :  { %p4352_p0 = pnand %p4350_p13, %p4347_p12 }
  0x5e   :  { %4355 = shalt.err (!%p4352_p0)
}
  0x5f   :  { %s4356_s30 = scalar_lea.vmem %s4587_s27, 1024  ;;  %p4361_p2 = scmp.lt.s32.totalorder %s4587_s27, %s4587_s27 }
  0x60   :  { %p4357_p1 = scmp.ne.s32.totalorder %s4587_s27, %s4356_s30  ;;  %p4362_p3 = scmp.lt.s32.totalorder %s4356_s30, %s4356_s30 }
  0x62   :  { %p4363_p4 = por %p4362_p3, %p4361_p2 }
  0x64   :  { %p4364_p5 = pnand %p4363_p4, %p4357_p1 }
  0x66   :  { %4367 = shalt.err (!%p4364_p5)
}
  0x67   :  { %83 = dma.hbm_to_vmem [thread:$0]  %s5392_s4, 1024, %s4587_s27, [#allocation9], %s4451_s22, %s4451_s22, %s4452_s29  }
  0x68   :  { %s4458_s15 = smov [#allocation13]   ;;  %s4368_s21 = scalar_lea.hbm %s5398_s10, 9216 }
  0x69   :  { %s109_s16 = sshll.u32 %s4458_s15, 4  ;;  %p4369_p6 = scmp.ne.s32.totalorder %s5398_s10, %s4368_s21  ;;  %s110_s16 = int_to_ptr.vmem [resolvable:$true] %s109_s16 }
  0x6a   :  { %p4372_p7 = scmp.lt.u32.totalorder %s4368_s21, %s5398_s10 }
  0x6c   :  { %p4374_p8 = pnand %p4372_p7, %p4369_p6 }
  0x6e   :  { %4377 = shalt.err (!%p4374_p8)
}
  0x6f   :  { %s4378_s20 = scalar_lea.vmem %s110_s16, 9216  ;;  %p4383_p10 = scmp.lt.s32.totalorder %s110_s16, %s110_s16 }
  0x70   :  { %p4379_p9 = scmp.ne.s32.totalorder %s110_s16, %s4378_s20  ;;  %p4384_p11 = scmp.lt.s32.totalorder %s4378_s20, %s4378_s20 }
  0x72   :  { %p4385_p12 = por %p4384_p11, %p4383_p10 }
  0x74   :  { %p4386_p13 = pnand %p4385_p12, %p4379_p9 }
  0x76   :  { %4389 = shalt.err (!%p4386_p13)
}
  0x77   :  { %115 = dma.hbm_to_vmem [thread:$0]  %s5398_s10, 9216, %s110_s16, [#allocation12], %s4451_s22, %s4451_s22, %s4452_s29  }
  0x78   :  { %4434 = dma.done.wait [#allocation3], 384  }
  0x79   :  { %4435 = vsyncadd [#allocation3], 4294966912 }
  0x7a   :  { %4436 = dma.done.wait [#allocation6], 1280  }
  0x7b   :  { %4437 = vsyncadd [#allocation6], 4294966016 }
  0x7c   :  { %4438 = dma.done.wait [#allocation9], 2048  }
  0x7d   :  { %4439 = vsyncadd [#allocation9], 4294965248 }
  0x7e   :  { %4440 = dma.done.wait [#allocation12], 18432  }
  0x7f   :  { %4441 = vsyncadd [#allocation12], 4294948864  ;;  %v4459_v0 = vmov 0.0   ;;  %vm4460_vm0 = vmmov 0   ;;  %v4041_v1 = vld [vmem:[#allocation8] sm:$0xff]   ;;  %v4043_v3 = vld [vmem:[#allocation8 + $0x8] sm:$0xff]   ;;  %v409_v50 = vlaneseq }
  0x80   :  { %3570 = vmatprep.subr.bf16.mxu0 %v4459_v0  ;;  %3590 = vmatprep.subr.bf16.mxu1 %v4459_v0  ;;  %v4042_v2 = vld [vmem:[#allocation10] sm:$0xff]   ;;  %v4044_v4 = vld [vmem:[#allocation10 + $0x8] sm:$0xff]   ;;  %v4045_v5 = vld [vmem:[#allocation8 + $0x10] sm:$0xff]   ;;  %s4462_s18 = smov 2  }
  0x81   :  { %3586 = vmatprep.mubr.msk.bf16.mxu0 %vm4460_vm0, %v4459_v0  ;;  %3606 = vmatprep.mubr.msk.bf16.mxu1 %vm4460_vm0, %v4459_v0  ;;  %v4046_v6 = vld [vmem:[#allocation10 + $0x10] sm:$0xff]   ;;  %v4047_v7 = vld [vmem:[#allocation8 + $0x18] sm:$0xff]   ;;  %v4049_v9 = vld [vmem:[#allocation8 + $0x20] sm:$0xff]   ;;  %v410_v51 = vshrl.u32 %v409_v50, 7 }
  0x82   :  { %3571 = vmatpush3.bf16.msra.mxu0 %v4041_v1  ;;  %3591 = vmatpush3.bf16.msra.mxu1 %v4042_v2  ;;  %v4048_v8 = vld [vmem:[#allocation10 + $0x18] sm:$0xff]   ;;  %v4050_v10 = vld [vmem:[#allocation10 + $0x20] sm:$0xff]   ;;  %v4051_v11 = vld [vmem:[#allocation8 + $0x28] sm:$0xff]  }
  0x83   :  { %3572 = vmatprep.subr.bf16.mxu0 %v4459_v0  ;;  %3592 = vmatprep.subr.bf16.mxu1 %v4459_v0  ;;  %v4052_v12 = vld [vmem:[#allocation10 + $0x28] sm:$0xff]   ;;  %v4053_v13 = vld [vmem:[#allocation8 + $0x30] sm:$0xff]   ;;  %v4055_v15 = vld [vmem:[#allocation8 + $0x38] sm:$0xff]   ;;  %v411_v52 = vsub.s32 0, %v410_v51  ;;  %v423_v61 = vsub.s32 1, %v410_v51 }
  0x84   :  { %v4054_v14 = vld [vmem:[#allocation10 + $0x30] sm:$0xff]   ;;  %v4657_v16 = vld [vmem:[#allocation2] sm:$0xff]  ;;  %v4659_v17 = vld [vmem:[#allocation2 + $0xc] sm:$0xff] }
  0x85   :  { %v4056_v18 = vld [vmem:[#allocation10 + $0x38] sm:$0xff]   ;;  %v4058_v19 = vld [vmem:[#allocation2 + $0x8] ss:$12 sps:$4 sm:$0xff]   ;;  %v3131_v20 = vcombine.high %v4657_v16, %v4659_v17  ;;  %v392_v24 = vld [vmem:[#allocation5] sm:$0xff]  ;;  %v3151_v49 = vcombine.low %v4657_v16, %v4659_v17 }
  0x86   :  { %3573 = vmatpush3.bf16.msra.mxu0 %v4043_v3  ;;  %3593 = vmatpush3.bf16.msra.mxu1 %v4044_v4  ;;  %v4059_v21 = vld [vmem:[#allocation7] sm:$0xff]   ;;  %v4060_v22 = vld [vmem:[#allocation7 + $0x8] sm:$0xff]   ;;  %v3150_v23 = vld [vmem:[%s5395_s7] ss:$0 sm:$0xff] }
  0x87   :  { %3574 = vmatprep.subr.bf16.mxu0 %v4459_v0  ;;  %3594 = vmatprep.subr.bf16.mxu1 %v4459_v0  ;;  %v4061_v25 = vld [vmem:[#allocation7 + $0x10] sm:$0xff]   ;;  %v3149_v28 = vld [vmem:[%s5394_s6] ss:$0 sm:$0xff]  ;;  %v400_v33 = vmul.f32 %v3150_v23, %v392_v24  ;;  %v4063_v41 = vld [vmem:[#allocation7 + $0x20] sm:$0xff]   ;;  %s4461_s6 = smov 1  }
  0x88   :  { %v393_v36 = vld [vmem:[#allocation5 + $0x8] sm:$0xff]  ;;  %v4064_v45 = vld [vmem:[#allocation7 + $0x28] sm:$0xff]   ;;  %v4065_v47 = vld [vmem:[#allocation7 + $0x30] sm:$0xff]  }
  0x89   :  { %v4062_v37 = vld [vmem:[#allocation7 + $0x18] sm:$0xff]   ;;  %v401_v43 = vmul.f32 %v3150_v23, %v393_v36 }
  0x8a   :  { %3575 = vmatpush3.bf16.msra.mxu0 %v4045_v5  ;;  %3595 = vmatpush3.bf16.msra.mxu1 %v4046_v6  ;;  %v4066_v48 = vld [vmem:[#allocation7 + $0x38] sm:$0xff]  }
  0x8b   :  { %3576 = vmatprep.subr.bf16.mxu0 %v4459_v0  ;;  %3596 = vmatprep.subr.bf16.mxu1 %v4459_v0  ;;  %v404_v53 = vld [vmem:[%s5396_s8] sm:$0x7] }
  0x8c   :  { %v412_v54 = vrot.slane %v404_v53, %v411_v52  ;;  %v424_v2 = vrot.slane %v404_v53, %v423_v61 }
  0x8e   :  { %3577 = vmatpush3.bf16.msra.mxu0 %v4047_v7  ;;  %3597 = vmatpush3.bf16.msra.mxu1 %v4048_v8  ;;  %v4068_v7 = vld [vmem:[#allocation11 + $0x40] sm:$0xff]  }
  0x8f   :  { %3578 = vmatprep.subr.bf16.mxu0 %v4459_v0  ;;  %3598 = vmatprep.subr.bf16.mxu1 %v4459_v0 }
  0x92   :  { %3579 = vmatpush3.bf16.msra.mxu0 %v4049_v9  ;;  %3599 = vmatpush3.bf16.msra.mxu1 %v4050_v10 }
  0x93   :  { %3580 = vmatprep.subr.bf16.mxu0 %v4459_v0  ;;  %3600 = vmatprep.subr.bf16.mxu1 %v4459_v0 }
  0x96   :  { %3581 = vmatpush3.bf16.msra.mxu0 %v4051_v11  ;;  %3601 = vmatpush3.bf16.msra.mxu1 %v4052_v12  ;;  %v4069_v11 = vld [vmem:[#allocation11 + $0x48] sm:$0xff]   ;;  %v4070_v12 = vld [vmem:[#allocation11 + $0x50] sm:$0xff]  }
  0x97   :  { %3582 = vmatprep.subr.bf16.mxu0 %v4459_v0  ;;  %3602 = vmatprep.subr.bf16.mxu1 %v4459_v0 }
  0x9a   :  { %3583 = vmatpush3.bf16.msra.mxu0 %v4053_v13  ;;  %3603 = vmatpush3.bf16.msra.mxu1 %v4054_v14  ;;  %v4071_v13 = vld [vmem:[#allocation11 + $0x58] sm:$0xff]   ;;  %v4072_v14 = vld [vmem:[#allocation11 + $0x60] sm:$0xff]  }
  0x9b   :  { %3584 = vmatprep.subr.bf16.mxu0 %v4459_v0  ;;  %3604 = vmatprep.subr.bf16.mxu1 %v4459_v0 }
  0x9e   :  { %3585 = vmatpush3.bf16.msra.mxu0 %v4055_v15  ;;  %3605 = vmatpush3.bf16.msra.mxu1 %v4056_v18  ;;  %v4073_v15 = vld [vmem:[#allocation11 + $0x68] sm:$0xff]   ;;  %v4074_v18 = vld [vmem:[#allocation11 + $0x70] sm:$0xff]  }
  0x9f   :  { %3610 = vmatprep.subr.bf16.mxu0 %v4459_v0  ;;  %3630 = vmatprep.subr.bf16.mxu1 %v4459_v0 }
  0xa1   :  { %3587 = vmatmul.mubr.bf16.vlgmr.msra.gmra.mrb[0].mxu0 %v3131_v20  ;;  %3607 = vmatmul.mubr.bf16.vlgmr.msra.gmra.mrb[0].mxu1 %v4058_v19  ;;  %v4075_v19 = vld [vmem:[#allocation11 + $0x78] sm:$0xff]   ;;  %v435_v20 = vsub.s32 2, %v410_v51 }
  0xa2   :  { %3626 = vmatprep.mubr.msk.bf16.mxu0 %vm4460_vm0, %v4459_v0  ;;  %3646 = vmatprep.mubr.msk.bf16.mxu1 %vm4460_vm0, %v4459_v0 }
  0xa3   :  { %3611 = vmatpush3.bf16.msra.mxu0 %v4059_v21  ;;  %3631 = vmatpush3.bf16.msra.mxu1 %v4068_v7  ;;  %v436_v21 = vrot.slane %v404_v53, %v435_v20 }
  0xa4   :  { %3612 = vmatprep.subr.bf16.mxu0 %v4459_v0  ;;  %3632 = vmatprep.subr.bf16.mxu1 %v4459_v0 }
  0xa7   :  { %3613 = vmatpush3.bf16.msra.mxu0 %v4060_v22  ;;  %3633 = vmatpush3.bf16.msra.mxu1 %v4069_v11 }
  0xa8   :  { %3614 = vmatprep.subr.bf16.mxu0 %v4459_v0  ;;  %3634 = vmatprep.subr.bf16.mxu1 %v4459_v0 }
  0xab   :  { %3615 = vmatpush3.bf16.msra.mxu0 %v4061_v25  ;;  %3635 = vmatpush3.bf16.msra.mxu1 %v4070_v12  ;;  %v3160_v25 = vld [vmem:[%s5393_s5] ss:$0 sm:$0xff]  ;;  %s4463_s5 = smov [#allocation15]  }
  0xac   :  { %3616 = vmatprep.subr.bf16.mxu0 %v4459_v0  ;;  %3636 = vmatprep.subr.bf16.mxu1 %v4459_v0  ;;  %s3112_s1 = sshll.u32 %s4463_s5, 4  ;;  %s3113_s1 = int_to_ptr.vmem [resolvable:$true] %s3112_s1 }
  0xad   :  { %s4390_s30 = scalar_lea.vmem %s3113_s1, 256  ;;  %p4395_p1 = scmp.lt.s32.totalorder %s3113_s1, %s3113_s1 }
  0xae   :  { %p4391_p0 = scmp.ne.s32.totalorder %s3113_s1, %s4390_s30  ;;  %p4396_p2 = scmp.lt.s32.totalorder %s4390_s30, %s4390_s30 }
  0xaf   :  { %3617 = vmatpush3.bf16.msra.mxu0 %v4062_v37  ;;  %3637 = vmatpush3.bf16.msra.mxu1 %v4071_v13 }
  0xb0   :  { %3618 = vmatprep.subr.bf16.mxu0 %v4459_v0  ;;  %3638 = vmatprep.subr.bf16.mxu1 %v4459_v0  ;;  %p4397_p3 = por %p4396_p2, %p4395_p1 }
  0xb2   :  { %p4398_p4 = pnand %p4397_p3, %p4391_p0 }
  0xb3   :  { %3619 = vmatpush3.bf16.msra.mxu0 %v4063_v41  ;;  %3639 = vmatpush3.bf16.msra.mxu1 %v4072_v14 }
  0xb4   :  { %3620 = vmatprep.subr.bf16.mxu0 %v4459_v0  ;;  %3640 = vmatprep.subr.bf16.mxu1 %v4459_v0 }
  0xb7   :  { %3621 = vmatpush3.bf16.msra.mxu0 %v4064_v45  ;;  %3641 = vmatpush3.bf16.msra.mxu1 %v4073_v15 }
  0xb8   :  { %3622 = vmatprep.subr.bf16.mxu0 %v4459_v0  ;;  %3642 = vmatprep.subr.bf16.mxu1 %v4459_v0 }
  0xbb   :  { %3623 = vmatpush3.bf16.msra.mxu0 %v4065_v47  ;;  %3643 = vmatpush3.bf16.msra.mxu1 %v4074_v18 }
  0xbc   :  { %3624 = vmatprep.subr.bf16.mxu0 %v4459_v0  ;;  %3644 = vmatprep.subr.bf16.mxu1 %v4459_v0 }
  0xbf   :  { %3625 = vmatpush3.bf16.msra.mxu0 %v4066_v48  ;;  %3645 = vmatpush3.bf16.msra.mxu1 %v4075_v19 }
  0xc0   :  { %3810 = vmatprep.subr.bf16.mxu0 %v4459_v0  ;;  %3650 = vmatprep.subr.bf16.mxu1 %v4459_v0 }
  0xc2   :  { %3627 = vmatmul.mubr.bf16.vlgmr.msra.gmra.mrb[4].mxu0 %v3151_v49 }
  0xc3   :  { %3826 = vmatprep.mubr.msk.bf16.mxu0 %vm4460_vm0, %v4459_v0 }
 0x174   :  { %v262_v26 = vpop.f32.mrb[0].mxu0  ;;  %v373_v27 = vpop.f32.mrb[0].mxu1 }
 0x175   :  { %v3588_v29 = vpop.f32.mrb[1].mxu0  ;;  %v381_v30 = vmul.f32 %v373_v27, %v262_v26  ;;  %v3608_v31 = vpop.f32.mrb[1].mxu1 }
 0x176   :  { %v265_v32 = vpop.f32.mrb[2].mxu0  ;;  %v376_v34 = vpop.f32.mrb[2].mxu1 }
 0x177   :  { %v3589_v35 = vpop.f32.mrb[3].mxu0  ;;  %v389_v38 = vmul.f32 %v3149_v28, %v381_v30  ;;  %v382_v39 = vmul.f32 %v376_v34, %v265_v32  ;;  %v3609_v40 = vpop.f32.mrb[3].mxu1  ;;  %v544_v34 = vunpack.c.l.bf16 %v4659_v17 }
 0x179   :  { %v390_v42 = vmul.f32 %v3149_v28, %v382_v39  ;;  %v402_v44 = vadd.f32 %v400_v33, %v389_v38  ;;  %v543_v28 = vunpack.c.l.bf16 %v4657_v16 }
 0x17b   :  { %405 = vrot.lane.b32.xlu0 %v402_v44, %s4461_s6  ;;  %v403_v46 = vadd.f32 %v401_v43, %v390_v42 }
 0x17f   :  { %407 = vrot.lane.b32.xlu0 %v403_v46, %s4461_s6 }
 0x195   :  { %v527_v62 = vpop.f32.mrb[4].mxu0 }
 0x196   :  { %v3628_v63 = vpop.f32.mrb[5].mxu0 }
 0x197   :  { %v530_v1 = vpop.f32.mrb[6].mxu0 }
 0x198   :  { %v3629_v3 = vpop.f32.mrb[7].mxu0 }
 0x1ed   :  { %v406_v55 = vpop.permute.xlu0 %405 }
 0x1ee   :  { %v413_v56 = vmul.f32 %v412_v54, %v406_v55 }
 0x1f0   :  { %v415_v57 = vadd.f32 %v413_v56, %v402_v44 }
 0x1f1   :  { %v408_v58 = vpop.permute.xlu0 %407 }
 0x1f2   :  { %v414_v59 = vmul.f32 %v412_v54, %v408_v58  ;;  %417 = vrot.lane.b32.xlu1 %v415_v57, %s4462_s18 }
 0x1f4   :  { %v416_v60 = vadd.f32 %v414_v59, %v403_v46 }
 0x1f6   :  { %419 = vrot.lane.b32.xlu1 %v416_v60, %s4462_s18 }
 0x264   :  { %v418_v4 = vpop.permute.xlu1 %417 }
 0x265   :  { %v425_v5 = vmul.f32 %v424_v2, %v418_v4 }
 0x267   :  { %v427_v6 = vadd.f32 %v425_v5, %v415_v57 }
 0x268   :  { %v420_v8 = vpop.permute.xlu1 %419 }
 0x269   :  { %v426_v9 = vmul.f32 %v424_v2, %v420_v8  ;;  %429 = vrot.lane.b32.xlu0 %v427_v6, %s4452_s29 }
 0x26b   :  { %v428_v10 = vadd.f32 %v426_v9, %v416_v60 }
 0x26d   :  { %431 = vrot.lane.b32.xlu1 %v428_v10, %s4452_s29 }
 0x2db   :  { %v430_v22 = vpop.permute.xlu0 %429 }
 0x2dc   :  { %v437_v23 = vmul.f32 %v436_v21, %v430_v22 }
 0x2de   :  { %v439_v24 = vadd.f32 %v437_v23, %v427_v6 }
 0x2df   :  { %v432_v26 = vpop.permute.xlu1 %431 }
 0x2e0   :  { %v528_v27 = vadd.f32 %v527_v62, %v439_v24  ;;  %3093 = vst [vmem:[#allocation15] sm:$0xff] %v439_v24  ;;  %v438_v29 = vmul.f32 %v436_v21, %v432_v26 }
 0x2e2   :  { %v541_v30 = vmul.f32 %v3160_v25, %v528_v27  ;;  %v440_v31 = vadd.f32 %v438_v29, %v428_v10 }
 0x2e4   :  { %v545_v32 = vadd.f32 %v543_v28, %v541_v30  ;;  %v531_v33 = vadd.f32 %v530_v1, %v440_v31  ;;  %3094 = vst [vmem:[#allocation15 + $0x8] sm:$0xff] %v440_v31 }
 0x2e6   :  { %4212 = vtanh.f32 %v545_v32  ;;  %v542_v35 = vmul.f32 %v3160_v25, %v531_v33 }
 0x2e8   :  { %v546_v36 = vadd.f32 %v544_v34, %v542_v35 }
 0x2ea   :  { %4214 = vtanh.f32 %v546_v36 }
 0x2f0   :  { %v4707_v37 = vpop.eup %4212 }
 0x2f1   :  { %v3163_v38 = vadd.f32 2.2, %v4707_v37  ;;  %v3161_v39 = vmul.f32 -1.442695, %v4707_v37 }
 0x2f3   :  { %v4711_v16 = vmul.f32 2.5, %v3163_v38  ;;  %4216 = vpow2.f32 %v3161_v39 }
 0x2f4   :  { %v4713_v40 = vpop.eup %4214 }
 0x2f5   :  { %v3164_v41 = vadd.f32 2.2, %v4713_v40  ;;  %vm584_vm1 = vcmp.ge.f32.partialorder %v4711_v16, 4.0  ;;  %vm590_vm2 = vcmp.ge.f32.partialorder %v4711_v16, 5.0  ;;  %vm596_vm3 = vcmp.ge.f32.partialorder %v4711_v16, 6.0 }
 0x2f6   :  { %v3165_v17 = vsel %vm584_vm1, 1.0, %v4459_v0  ;;  %v3167_v42 = vsel %vm590_vm2, 1.0, %v4459_v0  ;;  %v4722_v43 = vsel %vm596_vm3, 1.0, %v4459_v0  ;;  %v624_v44 = vsub.f32 4.0, %v4711_v16 }
 0x2f7   :  { %v4725_v45 = vmul.f32 2.5, %v3164_v41  ;;  %v614_v46 = vsub.f32 1.0, %v3165_v17  ;;  %v616_v47 = vsub.f32 %v3165_v17, %v3167_v42  ;;  %v4728_v48 = vsub.f32 %v3167_v42, %v4722_v43  ;;  %v4076_v42 = vld [vmem:[#allocation11] sm:$0xff]  }
 0x2f8   :  { %v4731_v49 = vadd.f32 -3.0, %v4711_v16  ;;  %v3162_v50 = vmul.f32 -1.442695, %v4713_v40  ;;  %v4735_v51 = vsub.f32 5.0, %v4711_v16  ;;  %v4738_v52 = vadd.f32 -2.0, %v4711_v16 }
 0x2f9   :  { %vm585_vm4 = vcmp.ge.f32.partialorder %v4725_v45, 4.0  ;;  %vm591_vm5 = vcmp.ge.f32.partialorder %v4725_v45, 5.0  ;;  %vm597_vm6 = vcmp.ge.f32.partialorder %v4725_v45, 6.0  ;;  %v625_v53 = vsub.f32 4.0, %v4725_v45 }
 0x2fa   :  { %v3166_v54 = vsel %vm585_vm4, 1.0, %v4459_v0  ;;  %v3168_v55 = vsel %vm591_vm5, 1.0, %v4459_v0  ;;  %v4747_v56 = vsel %vm597_vm6, 1.0, %v4459_v0  ;;  %v626_v57 = vmul.f32 %v624_v44, %v614_v46 }
 0x2fb   :  { %v615_v58 = vsub.f32 1.0, %v3166_v54  ;;  %v617_v59 = vsub.f32 %v3166_v54, %v3168_v55  ;;  %v4750_v60 = vsub.f32 %v3168_v55, %v4747_v56  ;;  %v4753_v61 = vadd.f32 -3.0, %v4725_v45 }
 0x2fc   :  { %v630_v62 = vmul.f32 %v4731_v49, %v614_v46  ;;  %v682_v63 = vmul.f32 %v626_v57, %v624_v44  ;;  %4218 = vpow2.f32 %v3162_v50  ;;  %v633_v1 = vsub.f32 5.0, %v4725_v45 }
 0x2fd   :  { %v4217_v2 = vpop.eup %4216  ;;  %v627_v3 = vmul.f32 %v625_v53, %v615_v58  ;;  %v631_v4 = vmul.f32 %v4753_v61, %v615_v58  ;;  %v634_v5 = vmul.f32 %v4735_v51, %v616_v47  ;;  %v3188_v6 = vadd.f32 -2.0, %v4725_v45 }
 0x2fe   :  { %v684_v7 = vmul.f32 0.5, %v682_v63  ;;  %v555_v8 = vadd.f32 1.0, %v4217_v2  ;;  %v635_v9 = vmul.f32 %v633_v1, %v617_v59  ;;  %v688_v10 = vmul.f32 %v4738_v52, %v626_v57 }
 0x2ff   :  { %v683_v11 = vmul.f32 %v627_v3, %v625_v53  ;;  %v636_v12 = vadd.f32 %v634_v5, %v630_v62  ;;  %v689_v13 = vmul.f32 %v3188_v6, %v627_v3  ;;  %v3205_v14 = vadd.f32 -1.0, %v4711_v16 }
 0x300   :  { %v742_v15 = vmul.f32 %v684_v7, %v624_v44  ;;  %4220 = vrcp.f32 %v555_v8  ;;  %v637_v18 = vadd.f32 %v635_v9, %v631_v4  ;;  %v3206_v19 = vadd.f32 -1.0, %v4725_v45  ;;  %v4077_v4 = vld [vmem:[#allocation11 + $0x8] sm:$0xff]  }
 0x301   :  { %v685_v20 = vmul.f32 0.5, %v683_v11  ;;  %v690_v21 = vmul.f32 %v636_v12, %v4735_v51  ;;  %v944_v22 = vmul.f32 %v3205_v14, %v684_v7  ;;  %v4765_v23 = vadd.f32 -4.0, %v4711_v16 }
 0x302   :  { %v744_v24 = vmul.f32 0.33333334, %v742_v15  ;;  %v691_v25 = vmul.f32 %v637_v18, %v633_v1  ;;  %v4768_v26 = vadd.f32 -4.0, %v4725_v45  ;;  %v642_v27 = vsub.f32 6.0, %v4711_v16 }
 0x303   :  { %v743_v28 = vmul.f32 %v685_v20, %v625_v53  ;;  %v692_v29 = vadd.f32 %v690_v21, %v688_v10  ;;  %v945_v30 = vmul.f32 %v3206_v19, %v685_v20  ;;  %v640_v31 = vmul.f32 %v4765_v23, %v616_v47 }
 0x304   :  { %v693_v32 = vadd.f32 %v691_v25, %v689_v13  ;;  %v641_v33 = vmul.f32 %v4768_v26, %v617_v59  ;;  %v643_v34 = vsub.f32 6.0, %v4725_v45  ;;  %v644_v35 = vmul.f32 %v642_v27, %v4728_v48 }
 0x305   :  { %v745_v36 = vmul.f32 0.33333334, %v743_v28  ;;  %v694_v38 = vmul.f32 0.5, %v692_v29  ;;  %v696_v39 = vmul.f32 %v4731_v49, %v636_v12  ;;  %v697_v41 = vmul.f32 %v4753_v61, %v637_v18 }
 0x306   :  { %v4219_v17 = vpop.eup %4218  ;;  %v695_v44 = vmul.f32 0.5, %v693_v32  ;;  %v645_v46 = vmul.f32 %v643_v34, %v4750_v60  ;;  %v646_v50 = vadd.f32 %v644_v35, %v640_v31  ;;  %vm602_vm7 = vcmp.ge.f32.partialorder %v4711_v16, 7.0 }
 0x307   :  { %v746_v47 = vpack.c.bf16 %v745_v36, %v744_v24  ;;  %v556_v53 = vadd.f32 1.0, %v4219_v17  ;;  %v946_v54 = vmul.f32 %v694_v38, %v4735_v51  ;;  %v1061_v55 = vmul.f32 %v4738_v52, %v694_v38 }
 0x308   :  { %v947_v57 = vmul.f32 %v695_v44, %v633_v1  ;;  %v647_v58 = vadd.f32 %v645_v46, %v641_v33  ;;  %v698_v59 = vmul.f32 %v646_v50, %v642_v27  ;;  %v1062_v62 = vmul.f32 %v3188_v6, %v695_v44 }
 0x309   :  { %3647 = vmatmul.mubr.bf16.vlgmr.msra.gmra.mrb[4].mxu1 %v746_v47  ;;  %4222 = vrcp.f32 %v556_v53  ;;  %v948_v63 = vadd.f32 %v946_v54, %v944_v22  ;;  %vm603_vm8 = vcmp.ge.f32.partialorder %v4725_v45, 7.0  ;;  %v3171_v2 = vsel %vm602_vm7, 1.0, %v4459_v0 }
 0x30a   :  { %v4221_v3 = vpop.eup %4220  ;;  %3651 = vmatpush3.bf16.msra.mxu1 %v4076_v42  ;;  %3666 = vmatprep.mubr.msk.bf16.mxu1 %vm4460_vm0, %v4459_v0  ;;  %v949_v51 = vadd.f32 %v947_v57, %v945_v30  ;;  %v699_v5 = vmul.f32 %v647_v58, %v643_v34  ;;  %v700_v52 = vadd.f32 %v698_v59, %v696_v39  ;;  %v3172_v1 = vsel %vm603_vm8, 1.0, %v4459_v0  ;;  %v4080_v57 = vld [vmem:[#allocation11 + $0x20] sm:$0xff]  }
 0x30b   :  { %3652 = vmatprep.subr.bf16.mxu1 %v4459_v0  ;;  %v4788_v6 = vmul.f32 %v4221_v3, %v4707_v37  ;;  %v4790_v7 = vmul.f32 0.33333334, %v948_v63  ;;  %v620_v8 = vsub.f32 %v4722_v43, %v3171_v2  ;;  %v621_v9 = vsub.f32 %v4747_v56, %v3172_v1  ;;  %v4078_v43 = vld [vmem:[#allocation11 + $0x10] sm:$0xff]  }
 0x30c   :  { %v4794_v10 = vmul.f32 0.33333334, %v949_v51  ;;  %v701_v11 = vadd.f32 %v699_v5, %v697_v41  ;;  %v702_v12 = vmul.f32 0.5, %v700_v52  ;;  %v4797_v13 = vadd.f32 -5.0, %v4711_v16 }
 0x30d   :  { %v4800_v14 = vadd.f32 -5.0, %v4725_v45  ;;  %v652_v15 = vsub.f32 7.0, %v4711_v16  ;;  %v653_v18 = vsub.f32 7.0, %v4725_v45  ;;  %v704_v19 = vmul.f32 %v4765_v23, %v646_v50 }
 0x30e   :  { %3653 = vmatpush3.bf16.msra.mxu1 %v4077_v4  ;;  %v952_v56 = vpack.c.bf16 %v4794_v10, %v4790_v7  ;;  %v703_v20 = vmul.f32 0.5, %v701_v11  ;;  %v1063_v21 = vmul.f32 %v702_v12, %v642_v27  ;;  %v650_v22 = vmul.f32 %v4797_v13, %v4728_v48  ;;  %v4079_v48 = vld [vmem:[#allocation11 + $0x18] sm:$0xff]   ;;  %v4097_v7 = vld [vmem:[#allocation11 + $0xe8] sm:$0xff]   ;;  %v4098_v10 = vld [vmem:[#allocation11 + $0xf0] sm:$0xff]  }
 0x30f   :  { %3654 = vmatprep.subr.bf16.mxu1 %v4459_v0  ;;  %v651_v24 = vmul.f32 %v4800_v14, %v4750_v60  ;;  %v654_v25 = vmul.f32 %v652_v15, %v620_v8  ;;  %v655_v28 = vmul.f32 %v653_v18, %v621_v9  ;;  %v705_v29 = vmul.f32 %v4768_v26, %v647_v58 }
 0x310   :  { %v1064_v30 = vmul.f32 %v703_v20, %v643_v34  ;;  %v1065_v31 = vadd.f32 %v1063_v21, %v1061_v55  ;;  %v1178_v32 = vmul.f32 %v4731_v49, %v702_v12  ;;  %v1179_v33 = vmul.f32 %v4753_v61, %v703_v20 }
 0x311   :  { %v656_v35 = vadd.f32 %v654_v25, %v650_v22  ;;  %v657_v27 = vadd.f32 %v655_v28, %v651_v24  ;;  %vm608_vm9 = vcmp.ge.f32.partialorder %v4711_v16, 8.0  ;;  %vm609_vm10 = vcmp.ge.f32.partialorder %v4725_v45, 8.0 }
 0x312   :  { %3655 = vmatpush3.bf16.msra.mxu1 %v4078_v43  ;;  %v1066_v36 = vadd.f32 %v1064_v30, %v1062_v62  ;;  %v4817_v60 = vmul.f32 0.33333334, %v1065_v31  ;;  %v4820_v38 = vsel %vm608_vm9, 1.0, %v4459_v0  ;;  %v4823_v34 = vsel %vm609_vm10, 1.0, %v4459_v0  ;;  %v4081_v43 = vld [vmem:[#allocation11 + $0x28] sm:$0xff]  }
 0x313   :  { %v4223_v49 = vpop.eup %4222  ;;  %3656 = vmatprep.subr.bf16.mxu1 %v4459_v0  ;;  %v706_v61 = vmul.f32 %v656_v35, %v652_v15  ;;  %v707_v39 = vmul.f32 %v657_v27, %v653_v18  ;;  %v622_v41 = vsub.f32 %v3171_v2, %v4820_v38  ;;  %v623_v17 = vsub.f32 %v3172_v1, %v4823_v34 }
 0x314   :  { %v4829_v42 = vmul.f32 %v4223_v49, %v4713_v40  ;;  %v4831_v44 = vmul.f32 0.33333334, %v1066_v36  ;;  %v4834_v46 = vadd.f32 -6.0, %v4711_v16  ;;  %v4837_v50 = vadd.f32 -6.0, %v4725_v45  ;;  %v4082_v36 = vld [vmem:[#allocation11 + $0x30] sm:$0xff]  }
 0x315   :  { %v708_v47 = vadd.f32 %v706_v61, %v704_v19  ;;  %v709_v53 = vadd.f32 %v707_v39, %v705_v29  ;;  %v662_v54 = vsub.f32 8.0, %v4711_v16  ;;  %v663_v55 = vsub.f32 8.0, %v4725_v45 }
 0x316   :  { %3657 = vmatpush3.bf16.msra.mxu1 %v4079_v48  ;;  %v563_v58 = vpack.c.bf16 %v4829_v42, %v4788_v6  ;;  %v1069_v59 = vpack.c.bf16 %v4831_v44, %v4817_v60  ;;  %v660_v62 = vmul.f32 %v4834_v46, %v620_v8  ;;  %v661_v63 = vmul.f32 %v4837_v50, %v621_v9  ;;  %v4105_v60 = vld [vmem:[#allocation11 + $0x128] sm:$0xff]   ;;  %v4106_v44 = vld [vmem:[#allocation11 + $0x130] sm:$0xff]  }
 0x317   :  { %3658 = vmatprep.subr.bf16.mxu1 %v4459_v0  ;;  %v710_v2 = vmul.f32 0.5, %v708_v47  ;;  %v711_v3 = vmul.f32 0.5, %v709_v53  ;;  %v664_v4 = vmul.f32 %v662_v54, %v622_v41  ;;  %v665_v51 = vmul.f32 %v663_v55, %v623_v17 }
 0x318   :  { %v712_v5 = vmul.f32 %v4797_v13, %v656_v35  ;;  %v713_v52 = vmul.f32 %v4800_v14, %v657_v27  ;;  %v4851_v1 = vadd.f32 -7.0, %v4711_v16  ;;  %v4854_v11 = vadd.f32 -7.0, %v4725_v45 }
 0x319   :  { %v1180_v12 = vmul.f32 %v710_v2, %v652_v15  ;;  %v1181_v8 = vmul.f32 %v711_v3, %v653_v18  ;;  %v666_v19 = vadd.f32 %v664_v4, %v660_v62  ;;  %v667_v9 = vadd.f32 %v665_v51, %v661_v63 }
 0x31a   :  { %3659 = vmatpush3.bf16.msra.mxu1 %v4080_v57  ;;  %v1295_v20 = vmul.f32 %v4765_v23, %v710_v2  ;;  %v1296_v21 = vmul.f32 %v4768_v26, %v711_v3  ;;  %v670_v22 = vmul.f32 %v4851_v1, %v622_v41  ;;  %v671_v24 = vmul.f32 %v4854_v11, %v623_v17 }
 0x31b   :  { %3660 = vmatprep.subr.bf16.mxu1 %v4459_v0  ;;  %v1182_v25 = vadd.f32 %v1180_v12, %v1178_v32  ;;  %v1183_v28 = vadd.f32 %v1181_v8, %v1179_v33  ;;  %v714_v29 = vmul.f32 %v666_v19, %v662_v54  ;;  %v715_v30 = vmul.f32 %v667_v9, %v663_v55 }
 0x31c   :  { %v672_v15 = vsub.f32 9.0, %v4711_v16  ;;  %v673_v18 = vsub.f32 9.0, %v4725_v45  ;;  %v720_v31 = vmul.f32 %v4834_v46, %v666_v19  ;;  %v721_v23 = vmul.f32 %v4837_v50, %v667_v9 }
 0x31d   :  { %v4865_v35 = vmul.f32 0.33333334, %v1182_v25  ;;  %v4867_v26 = vmul.f32 0.33333334, %v1183_v28  ;;  %v716_v27 = vadd.f32 %v714_v29, %v712_v5  ;;  %v717_v48 = vadd.f32 %v715_v30, %v713_v52  ;;  %v4083_v5 = vld [vmem:[#allocation11 + $0x38] sm:$0xff]   ;;  %v4084_v29 = vld [vmem:[#allocation11 + $0x80] sm:$0xff]  }
 0x31e   :  { %3661 = vmatpush3.bf16.msra.mxu1 %v4081_v43  ;;  %v674_v32 = vmul.f32 %v4820_v38, %v672_v15  ;;  %v675_v33 = vmul.f32 %v4823_v34, %v673_v18  ;;  %v3185_v49 = vadd.f32 -8.0, %v4711_v16  ;;  %v3186_v61 = vadd.f32 -8.0, %v4725_v45 }
 0x31f   :  { %3662 = vmatprep.subr.bf16.mxu1 %v4459_v0  ;;  %v1186_v39 = vpack.c.bf16 %v4867_v26, %v4865_v35  ;;  %v718_v41 = vmul.f32 0.5, %v716_v27  ;;  %v719_v17 = vmul.f32 0.5, %v717_v48  ;;  %v730_v47 = vsub.f32 10.0, %v4711_v16  ;;  %v4112_v35 = vld [vmem:[#allocation11 + $0x160] sm:$0xff]   ;;  %v4113_v26 = vld [vmem:[#allocation11 + $0x168] sm:$0xff]  }
 0x320   :  { %v676_v53 = vadd.f32 %v674_v32, %v670_v22  ;;  %v677_v57 = vadd.f32 %v675_v33, %v671_v24  ;;  %v680_v62 = vmul.f32 %v3185_v49, %v4820_v38  ;;  %v681_v63 = vmul.f32 %v3186_v61, %v4823_v34 }
 0x321   :  { %v1297_v2 = vmul.f32 %v718_v41, %v662_v54  ;;  %v1298_v3 = vmul.f32 %v719_v17, %v663_v55  ;;  %v1412_v4 = vmul.f32 %v4797_v13, %v718_v41  ;;  %v1413_v51 = vmul.f32 %v4800_v14, %v719_v17 }
 0x322   :  { %3663 = vmatpush3.bf16.msra.mxu1 %v4082_v36  ;;  %v722_v52 = vmul.f32 %v676_v53, %v672_v15  ;;  %v723_v12 = vmul.f32 %v677_v57, %v673_v18  ;;  %v728_v8 = vmul.f32 %v4851_v1, %v676_v53  ;;  %v729_v19 = vmul.f32 %v4854_v11, %v677_v57 }
 0x323   :  { %3664 = vmatprep.subr.bf16.mxu1 %v4459_v0  ;;  %v1299_v9 = vadd.f32 %v1297_v2, %v1295_v20  ;;  %v1300_v38 = vadd.f32 %v1298_v3, %v1296_v21  ;;  %v731_v34 = vsub.f32 10.0, %v4725_v45  ;;  %v732_v54 = vmul.f32 %v730_v47, %v680_v62  ;;  %v4086_v2 = vld [vmem:[#allocation11 + $0x90] sm:$0xff]  }
 0x324   :  { %v724_v55 = vadd.f32 %v722_v52, %v720_v31  ;;  %v725_v43 = vadd.f32 %v723_v12, %v721_v23  ;;  %v738_v13 = vmul.f32 %v3185_v49, %v680_v62  ;;  %v739_v22 = vmul.f32 %v3186_v61, %v681_v63  ;;  %v4085_v62 = vld [vmem:[#allocation11 + $0x88] sm:$0xff]  }
 0x325   :  { %v4885_v14 = vmul.f32 0.33333334, %v1299_v9  ;;  %v4887_v24 = vmul.f32 0.33333334, %v1300_v38  ;;  %v733_v25 = vmul.f32 %v731_v34, %v681_v63  ;;  %v734_v28 = vadd.f32 %v732_v54, %v728_v8  ;;  %v4087_v8 = vld [vmem:[#allocation11 + $0x98] sm:$0xff]   ;;  %v4089_v9 = vld [vmem:[#allocation11 + $0xa8] sm:$0xff]  }
 0x326   :  { %3665 = vmatpush3.bf16.msra.mxu1 %v4083_v5  ;;  %v726_v30 = vmul.f32 0.5, %v724_v55  ;;  %v727_v27 = vmul.f32 0.5, %v725_v43  ;;  %v740_v48 = vmul.f32 0.5, %v738_v13  ;;  %v741_v20 = vmul.f32 0.5, %v739_v22  ;;  %v4090_v38 = vld [vmem:[#allocation11 + $0xb0] sm:$0xff]   ;;  %v4092_v54 = vld [vmem:[#allocation11 + $0xc0] sm:$0xff]  }
 0x327   :  { %3670 = vmatprep.subr.bf16.mxu1 %v4459_v0  ;;  %v1303_v21 = vpack.c.bf16 %v4887_v24, %v4885_v14  ;;  %v735_v31 = vadd.f32 %v733_v25, %v729_v19  ;;  %v736_v23 = vmul.f32 0.5, %v734_v28  ;;  %v1648_v36 = vsub.f32 11.0, %v4711_v16  ;;  %v4088_v19 = vld [vmem:[#allocation11 + $0xa0] sm:$0xff]   ;;  %v4093_v55 = vld [vmem:[#allocation11 + $0xc8] sm:$0xff]   ;;  %v4094_v43 = vld [vmem:[#allocation11 + $0xd0] sm:$0xff]  }
 0x328   :  { %v1414_v32 = vmul.f32 %v726_v30, %v672_v15  ;;  %v1415_v33 = vmul.f32 %v727_v27, %v673_v18  ;;  %v1529_v49 = vmul.f32 %v4834_v46, %v726_v30  ;;  %v1530_v61 = vmul.f32 %v4837_v50, %v727_v27  ;;  %v4095_v13 = vld [vmem:[#allocation11 + $0xd8] sm:$0xff]   ;;  %v4096_v22 = vld [vmem:[#allocation11 + $0xe0] sm:$0xff]   ;;  %v4101_v28 = vld [vmem:[#allocation11 + $0x108] sm:$0xff]  }
 0x329   :  { %3667 = vmatmul.mubr.bf16.vlgmr.msra.gmra.mrb[4].mxu1 %v563_v58  ;;  %v737_v41 = vmul.f32 0.5, %v735_v31  ;;  %v1531_v17 = vmul.f32 %v736_v23, %v730_v47  ;;  %v1646_v53 = vmul.f32 %v4851_v1, %v736_v23  ;;  %v1649_v57 = vsub.f32 11.0, %v4725_v45  ;;  %v4100_v25 = vld [vmem:[#allocation11 + $0x100] sm:$0xff]   ;;  %v4103_v30 = vld [vmem:[#allocation11 + $0x118] sm:$0xff]   ;;  %v4109_v31 = vld [vmem:[#allocation11 + $0x148] sm:$0xff]  }
 0x32a   :  { %3671 = vmatpush3.bf16.msra.mxu1 %v4084_v29  ;;  %3686 = vmatprep.mubr.msk.bf16.mxu1 %vm4460_vm0, %v4459_v0  ;;  %v1416_v16 = vadd.f32 %v1414_v32, %v1412_v4  ;;  %v1417_v15 = vadd.f32 %v1415_v33, %v1413_v51  ;;  %v1650_v46 = vmul.f32 %v1648_v36, %v740_v48  ;;  %v4102_v29 = vld [vmem:[#allocation11 + $0x110] sm:$0xff]   ;;  %v4104_v27 = vld [vmem:[#allocation11 + $0x120] sm:$0xff]   ;;  %v4111_v36 = vld [vmem:[#allocation11 + $0x158] sm:$0xff]  }
 0x32b   :  { %3672 = vmatprep.subr.bf16.mxu1 %v4459_v0  ;;  %v1532_v50 = vmul.f32 %v737_v41, %v731_v34  ;;  %v1533_v18 = vadd.f32 %v1531_v17, %v1529_v49  ;;  %v1647_v6 = vmul.f32 %v4854_v11, %v737_v41  ;;  %v1651_v42 = vmul.f32 %v1649_v57, %v741_v20  ;;  %v4091_v34 = vld [vmem:[#allocation11 + $0xb8] sm:$0xff]   ;;  %v4108_v48 = vld [vmem:[#allocation11 + $0x140] sm:$0xff]   ;;  %v4110_v23 = vld [vmem:[#allocation11 + $0x150] sm:$0xff]  }
 0x32c   :  { %v4904_v58 = vmul.f32 0.33333334, %v1416_v16  ;;  %v4906_v1 = vmul.f32 0.33333334, %v1417_v15  ;;  %v1652_v45 = vadd.f32 %v1650_v46, %v1646_v53  ;;  %v4140_v20 = vld [vmem:[#allocation13 + $0x40] sm:$0xff]   ;;  %v4115_v32 = vld [vmem:[#allocation11 + $0x178] sm:$0xff]  }
 0x32d   :  { %v1534_v47 = vadd.f32 %v1532_v50, %v1530_v61  ;;  %v1653_v63 = vadd.f32 %v1651_v42, %v1647_v6  ;;  %v4910_v4 = vmul.f32 0.33333334, %v1533_v18  ;;  %3811 = vmatpush3.bf16.msra.mxu0 %v4140_v20  ;;  %v4116_v33 = vld [vmem:[#allocation11 + $0x180] sm:$0xff]   ;;  %v4117_v49 = vld [vmem:[#allocation11 + $0x188] sm:$0xff]   ;;  %v4118_v61 = vld [vmem:[#allocation11 + $0x190] sm:$0xff]  }
 0x32e   :  { %3673 = vmatpush3.bf16.msra.mxu1 %v4085_v62  ;;  %v1420_v3 = vpack.c.bf16 %v4906_v1, %v4904_v58  ;;  %v4915_v11 = vmul.f32 0.33333334, %v1652_v45  ;;  %3812 = vmatprep.subr.bf16.mxu0 %v4459_v0  ;;  %v4119_v41 = vld [vmem:[#allocation11 + $0x198] sm:$0xff]   ;;  %v4120_v17 = vld [vmem:[#allocation11 + $0x1a0] sm:$0xff]   ;;  %v4121_v14 = vld [vmem:[#allocation11 + $0x1a8] sm:$0xff]  }
 0x32f   :  { %3674 = vmatprep.subr.bf16.mxu1 %v4459_v0  ;;  %v4913_v51 = vmul.f32 0.33333334, %v1534_v47  ;;  %v4917_v5 = vmul.f32 0.33333334, %v1653_v63  ;;  %v4122_v24 = vld [vmem:[#allocation11 + $0x1b0] sm:$0xff]   ;;  %v4124_v53 = vld [vmem:[#allocation11 + $0x1c0] sm:$0xff]  }
 0x330   :  { %v4125_v57 = vld [vmem:[#allocation11 + $0x1c8] sm:$0xff]   ;;  %v4126_v62 = vld [vmem:[#allocation11 + $0x1d0] sm:$0xff]   ;;  %v4127_v16 = vld [vmem:[#allocation11 + $0x1d8] sm:$0xff]  }
 0x331   :  { %v1537_v52 = vpack.c.bf16 %v4913_v51, %v4910_v4  ;;  %v1656_v12 = vpack.c.bf16 %v4917_v5, %v4915_v11  ;;  %v4128_v15 = vld [vmem:[#allocation11 + $0x1e0] sm:$0xff]   ;;  %v4129_v46 = vld [vmem:[#allocation11 + $0x1e8] sm:$0xff]   ;;  %v4130_v50 = vld [vmem:[#allocation11 + $0x1f0] sm:$0xff]  }
 0x332   :  { %3675 = vmatpush3.bf16.msra.mxu1 %v4086_v2  ;;  %v4131_v18 = vld [vmem:[#allocation11 + $0x1f8] sm:$0xff]   ;;  %v4132_v6 = vld [vmem:[#allocation11 + $0x200] sm:$0xff]   ;;  %v4133_v42 = vld [vmem:[#allocation11 + $0x208] sm:$0xff]  }
 0x333   :  { %3676 = vmatprep.subr.bf16.mxu1 %v4459_v0  ;;  %v4134_v58 = vld [vmem:[#allocation11 + $0x210] sm:$0xff]   ;;  %v4135_v1 = vld [vmem:[#allocation11 + $0x218] sm:$0xff]   ;;  %v4136_v45 = vld [vmem:[#allocation11 + $0x220] sm:$0xff]  }
 0x334   :  { %v4137_v47 = vld [vmem:[#allocation11 + $0x228] sm:$0xff]   ;;  %v4138_v63 = vld [vmem:[#allocation11 + $0x230] sm:$0xff]   ;;  %v4139_v2 = vld [vmem:[#allocation11 + $0x238] sm:$0xff]  }
 0x335   :  { %v4142_v4 = vld [vmem:[#allocation13 + $0x50] sm:$0xff]   ;;  %v4143_v51 = vld [vmem:[#allocation13 + $0x58] sm:$0xff]  }
 0x336   :  { %3677 = vmatpush3.bf16.msra.mxu1 %v4087_v8  ;;  %v4145_v8 = vld [vmem:[#allocation13 + $0x68] sm:$0xff]   ;;  %v4146_v11 = vld [vmem:[#allocation13 + $0x70] sm:$0xff]   ;;  %v4147_v5 = vld [vmem:[#allocation13 + $0x78] sm:$0xff]  }
 0x337   :  { %3678 = vmatprep.subr.bf16.mxu1 %v4459_v0 }
 0x33a   :  { %3679 = vmatpush3.bf16.msra.mxu1 %v4088_v19 }
 0x33b   :  { %3680 = vmatprep.subr.bf16.mxu1 %v4459_v0 }
 0x33e   :  { %3681 = vmatpush3.bf16.msra.mxu1 %v4089_v9 }
 0x33f   :  { %3682 = vmatprep.subr.bf16.mxu1 %v4459_v0 }
 0x342   :  { %3683 = vmatpush3.bf16.msra.mxu1 %v4090_v38 }
 0x343   :  { %3684 = vmatprep.subr.bf16.mxu1 %v4459_v0 }
 0x346   :  { %3685 = vmatpush3.bf16.msra.mxu1 %v4091_v34 }
 0x347   :  { %3690 = vmatprep.subr.bf16.mxu1 %v4459_v0 }
 0x349   :  { %3687 = vmatmul.mubr.bf16.vlgmr.msra.gmra.mrb[4].mxu1 %v952_v56  ;;  %v4099_v56 = vld [vmem:[#allocation11 + $0xf8] sm:$0xff]  }
 0x34a   :  { %3691 = vmatpush3.bf16.msra.mxu1 %v4092_v54  ;;  %3706 = vmatprep.mubr.msk.bf16.mxu1 %vm4460_vm0, %v4459_v0 }
 0x34b   :  { %3692 = vmatprep.subr.bf16.mxu1 %v4459_v0 }
 0x34e   :  { %3693 = vmatpush3.bf16.msra.mxu1 %v4093_v55 }
 0x34f   :  { %3694 = vmatprep.subr.bf16.mxu1 %v4459_v0 }
 0x352   :  { %3695 = vmatpush3.bf16.msra.mxu1 %v4094_v43 }
 0x353   :  { %3696 = vmatprep.subr.bf16.mxu1 %v4459_v0 }
 0x356   :  { %3697 = vmatpush3.bf16.msra.mxu1 %v4095_v13 }
 0x357   :  { %3698 = vmatprep.subr.bf16.mxu1 %v4459_v0 }
 0x35a   :  { %3699 = vmatpush3.bf16.msra.mxu1 %v4096_v22 }
 0x35b   :  { %3700 = vmatprep.subr.bf16.mxu1 %v4459_v0 }
 0x35e   :  { %3701 = vmatpush3.bf16.msra.mxu1 %v4097_v7 }
 0x35f   :  { %3702 = vmatprep.subr.bf16.mxu1 %v4459_v0 }
 0x362   :  { %3703 = vmatpush3.bf16.msra.mxu1 %v4098_v10 }
 0x363   :  { %3704 = vmatprep.subr.bf16.mxu1 %v4459_v0 }
 0x366   :  { %3705 = vmatpush3.bf16.msra.mxu1 %v4099_v56 }
 0x367   :  { %3710 = vmatprep.subr.bf16.mxu1 %v4459_v0 }
 0x369   :  { %3707 = vmatmul.mubr.bf16.vlgmr.msra.gmra.mrb[4].mxu1 %v1069_v59  ;;  %v4107_v59 = vld [vmem:[#allocation11 + $0x138] sm:$0xff]  }
 0x36a   :  { %3711 = vmatpush3.bf16.msra.mxu1 %v4100_v25  ;;  %3726 = vmatprep.mubr.msk.bf16.mxu1 %vm4460_vm0, %v4459_v0 }
 0x36b   :  { %3712 = vmatprep.subr.bf16.mxu1 %v4459_v0 }
 0x36e   :  { %3713 = vmatpush3.bf16.msra.mxu1 %v4101_v28 }
 0x36f   :  { %3714 = vmatprep.subr.bf16.mxu1 %v4459_v0 }
 0x372   :  { %3715 = vmatpush3.bf16.msra.mxu1 %v4102_v29 }
 0x373   :  { %3716 = vmatprep.subr.bf16.mxu1 %v4459_v0 }
 0x376   :  { %3717 = vmatpush3.bf16.msra.mxu1 %v4103_v30 }
 0x377   :  { %3718 = vmatprep.subr.bf16.mxu1 %v4459_v0 }
 0x37a   :  { %3719 = vmatpush3.bf16.msra.mxu1 %v4104_v27 }
 0x37b   :  { %3720 = vmatprep.subr.bf16.mxu1 %v4459_v0 }
 0x37e   :  { %3721 = vmatpush3.bf16.msra.mxu1 %v4105_v60 }
 0x37f   :  { %3722 = vmatprep.subr.bf16.mxu1 %v4459_v0 }
 0x382   :  { %3723 = vmatpush3.bf16.msra.mxu1 %v4106_v44 }
 0x383   :  { %3724 = vmatprep.subr.bf16.mxu1 %v4459_v0 }
 0x386   :  { %3725 = vmatpush3.bf16.msra.mxu1 %v4107_v59 }
 0x387   :  { %3730 = vmatprep.subr.bf16.mxu1 %v4459_v0 }
 0x389   :  { %3727 = vmatmul.mubr.bf16.vlgmr.msra.gmra.mrb[4].mxu1 %v1186_v39  ;;  %v4114_v39 = vld [vmem:[#allocation11 + $0x170] sm:$0xff]  }
 0x38a   :  { %3731 = vmatpush3.bf16.msra.mxu1 %v4108_v48  ;;  %3746 = vmatprep.mubr.msk.bf16.mxu1 %vm4460_vm0, %v4459_v0 }
 0x38b   :  { %3732 = vmatprep.subr.bf16.mxu1 %v4459_v0 }
 0x38e   :  { %3733 = vmatpush3.bf16.msra.mxu1 %v4109_v31 }
 0x38f   :  { %3734 = vmatprep.subr.bf16.mxu1 %v4459_v0 }
 0x392   :  { %3735 = vmatpush3.bf16.msra.mxu1 %v4110_v23 }
 0x393   :  { %3736 = vmatprep.subr.bf16.mxu1 %v4459_v0 }
 0x396   :  { %3737 = vmatpush3.bf16.msra.mxu1 %v4111_v36 }
 0x397   :  { %3738 = vmatprep.subr.bf16.mxu1 %v4459_v0 }
 0x39a   :  { %3739 = vmatpush3.bf16.msra.mxu1 %v4112_v35 }
 0x39b   :  { %3740 = vmatprep.subr.bf16.mxu1 %v4459_v0 }
 0x39e   :  { %3741 = vmatpush3.bf16.msra.mxu1 %v4113_v26 }
 0x39f   :  { %3742 = vmatprep.subr.bf16.mxu1 %v4459_v0 }
 0x3a2   :  { %3743 = vmatpush3.bf16.msra.mxu1 %v4114_v39 }
 0x3a3   :  { %3744 = vmatprep.subr.bf16.mxu1 %v4459_v0 }
 0x3a6   :  { %3745 = vmatpush3.bf16.msra.mxu1 %v4115_v32 }
 0x3a7   :  { %3750 = vmatprep.subr.bf16.mxu1 %v4459_v0 }
 0x3a9   :  { %3747 = vmatmul.mubr.bf16.vlgmr.msra.gmra.mrb[4].mxu1 %v1303_v21  ;;  %v4123_v21 = vld [vmem:[#allocation11 + $0x1b8] sm:$0xff]  }
 0x3aa   :  { %3751 = vmatpush3.bf16.msra.mxu1 %v4116_v33  ;;  %3766 = vmatprep.mubr.msk.bf16.mxu1 %vm4460_vm0, %v4459_v0 }
 0x3ab   :  { %3752 = vmatprep.subr.bf16.mxu1 %v4459_v0 }
 0x3ae   :  { %3753 = vmatpush3.bf16.msra.mxu1 %v4117_v49 }
 0x3af   :  { %3754 = vmatprep.subr.bf16.mxu1 %v4459_v0 }
 0x3b2   :  { %3755 = vmatpush3.bf16.msra.mxu1 %v4118_v61 }
 0x3b3   :  { %3756 = vmatprep.subr.bf16.mxu1 %v4459_v0 }
 0x3b6   :  { %3757 = vmatpush3.bf16.msra.mxu1 %v4119_v41 }
 0x3b7   :  { %3758 = vmatprep.subr.bf16.mxu1 %v4459_v0 }
 0x3ba   :  { %3759 = vmatpush3.bf16.msra.mxu1 %v4120_v17 }
 0x3bb   :  { %3760 = vmatprep.subr.bf16.mxu1 %v4459_v0 }
 0x3be   :  { %3761 = vmatpush3.bf16.msra.mxu1 %v4121_v14 }
 0x3bf   :  { %3762 = vmatprep.subr.bf16.mxu1 %v4459_v0 }
 0x3c2   :  { %3763 = vmatpush3.bf16.msra.mxu1 %v4122_v24 }
 0x3c3   :  { %3764 = vmatprep.subr.bf16.mxu1 %v4459_v0 }
 0x3c6   :  { %3765 = vmatpush3.bf16.msra.mxu1 %v4123_v21 }
 0x3c7   :  { %3770 = vmatprep.subr.bf16.mxu1 %v4459_v0 }
 0x3c9   :  { %3767 = vmatmul.mubr.bf16.vlgmr.msra.gmra.mrb[4].mxu1 %v1420_v3  ;;  %v4141_v3 = vld [vmem:[#allocation13 + $0x48] sm:$0xff]  }
 0x3ca   :  { %3771 = vmatpush3.bf16.msra.mxu1 %v4124_v53  ;;  %3786 = vmatprep.mubr.msk.bf16.mxu1 %vm4460_vm0, %v4459_v0 }
 0x3cb   :  { %3772 = vmatprep.subr.bf16.mxu1 %v4459_v0  ;;  %3813 = vmatpush3.bf16.msra.mxu0 %v4141_v3 }
 0x3cc   :  { %3814 = vmatprep.subr.bf16.mxu0 %v4459_v0 }
 0x3ce   :  { %3773 = vmatpush3.bf16.msra.mxu1 %v4125_v57 }
 0x3cf   :  { %3774 = vmatprep.subr.bf16.mxu1 %v4459_v0  ;;  %3815 = vmatpush3.bf16.msra.mxu0 %v4142_v4 }
 0x3d0   :  { %3816 = vmatprep.subr.bf16.mxu0 %v4459_v0 }
 0x3d2   :  { %3775 = vmatpush3.bf16.msra.mxu1 %v4126_v62 }
 0x3d3   :  { %3776 = vmatprep.subr.bf16.mxu1 %v4459_v0  ;;  %3817 = vmatpush3.bf16.msra.mxu0 %v4143_v51 }
 0x3d4   :  { %3818 = vmatprep.subr.bf16.mxu0 %v4459_v0 }
 0x3d6   :  { %3777 = vmatpush3.bf16.msra.mxu1 %v4127_v16 }
 0x3d7   :  { %3778 = vmatprep.subr.bf16.mxu1 %v4459_v0 }
 0x3da   :  { %3779 = vmatpush3.bf16.msra.mxu1 %v4128_v15 }
 0x3db   :  { %3780 = vmatprep.subr.bf16.mxu1 %v4459_v0 }
 0x3de   :  { %3781 = vmatpush3.bf16.msra.mxu1 %v4129_v46 }
 0x3df   :  { %3782 = vmatprep.subr.bf16.mxu1 %v4459_v0 }
 0x3e2   :  { %3783 = vmatpush3.bf16.msra.mxu1 %v4130_v50 }
 0x3e3   :  { %3784 = vmatprep.subr.bf16.mxu1 %v4459_v0 }
 0x3e6   :  { %3785 = vmatpush3.bf16.msra.mxu1 %v4131_v18 }
 0x3e7   :  { %3790 = vmatprep.subr.bf16.mxu1 %v4459_v0 }
 0x3e9   :  { %3787 = vmatmul.mubr.bf16.vlgmr.msra.gmra.mrb[4].mxu1 %v1537_v52  ;;  %v4144_v52 = vld [vmem:[#allocation13 + $0x60] sm:$0xff]  }
 0x3ea   :  { %3791 = vmatpush3.bf16.msra.mxu1 %v4132_v6  ;;  %3806 = vmatprep.mubr.msk.bf16.mxu1 %vm4460_vm0, %v4459_v0 }
 0x3eb   :  { %3792 = vmatprep.subr.bf16.mxu1 %v4459_v0  ;;  %3819 = vmatpush3.bf16.msra.mxu0 %v4144_v52 }
 0x3ec   :  { %3820 = vmatprep.subr.bf16.mxu0 %v4459_v0 }
 0x3ee   :  { %3793 = vmatpush3.bf16.msra.mxu1 %v4133_v42 }
 0x3ef   :  { %3794 = vmatprep.subr.bf16.mxu1 %v4459_v0  ;;  %3821 = vmatpush3.bf16.msra.mxu0 %v4145_v8 }
 0x3f0   :  { %3822 = vmatprep.subr.bf16.mxu0 %v4459_v0 }
 0x3f2   :  { %3795 = vmatpush3.bf16.msra.mxu1 %v4134_v58 }
 0x3f3   :  { %3796 = vmatprep.subr.bf16.mxu1 %v4459_v0  ;;  %3823 = vmatpush3.bf16.msra.mxu0 %v4146_v11 }
 0x3f4   :  { %3824 = vmatprep.subr.bf16.mxu0 %v4459_v0 }
 0x3f6   :  { %3797 = vmatpush3.bf16.msra.mxu1 %v4135_v1 }
 0x3f7   :  { %3798 = vmatprep.subr.bf16.mxu1 %v4459_v0  ;;  %3825 = vmatpush3.bf16.msra.mxu0 %v4147_v5 }
 0x3f8   :  { %3830 = vmatprep.subr.bf16.mxu0 %v4459_v0 }
 0x3fa   :  { %3799 = vmatpush3.bf16.msra.mxu1 %v4136_v45 }
 0x3fb   :  { %3800 = vmatprep.subr.bf16.mxu1 %v4459_v0 }
 0x3fe   :  { %3801 = vmatpush3.bf16.msra.mxu1 %v4137_v47 }
 0x3ff   :  { %3802 = vmatprep.subr.bf16.mxu1 %v4459_v0 }
 0x402   :  { %3803 = vmatpush3.bf16.msra.mxu1 %v4138_v63 }
 0x403   :  { %3804 = vmatprep.subr.bf16.mxu1 %v4459_v0 }
 0x406   :  { %3805 = vmatpush3.bf16.msra.mxu1 %v4139_v2 }
 0x409   :  { %3807 = vmatmul.mubr.bf16.vlgmr.msra.gmra.mrb[4].mxu1 %v1656_v12 }
 0x4dc   :  { %v5017_v12 = vpop.f32.mrb[4].mxu1 }
 0x4dd   :  { %v3263_v19 = vmul.f32 -1.442695, %v5017_v12  ;;  %v3265_v9 = vadd.f32 2.2, %v5017_v12  ;;  %v3808_v38 = vpop.f32.mrb[5].mxu1 }
 0x4de   :  { %v5021_v34 = vpop.f32.mrb[6].mxu1 }
 0x4df   :  { %4224 = vpow2.f32 %v3263_v19  ;;  %v5023_v54 = vmul.f32 2.5, %v3265_v9  ;;  %v3264_v55 = vmul.f32 -1.442695, %v5021_v34  ;;  %v3266_v43 = vadd.f32 2.2, %v5021_v34  ;;  %v3809_v13 = vpop.f32.mrb[7].mxu1 }
 0x4e1   :  { %4226 = vpow2.f32 %v3264_v55  ;;  %v5027_v22 = vmul.f32 2.5, %v3266_v43  ;;  %vm1800_vm11 = vcmp.ge.f32.partialorder %v5023_v54, 0.0  ;;  %vm1806_vm12 = vcmp.ge.f32.partialorder %v5023_v54, 1.0 }
 0x4e2   :  { %v3267_v7 = vsel %vm1800_vm11, 1.0, %v4459_v0  ;;  %v3269_v10 = vsel %vm1806_vm12, 1.0, %v4459_v0  ;;  %vm1812_vm13 = vcmp.ge.f32.partialorder %v5023_v54, 2.0  ;;  %vm1818_vm14 = vcmp.ge.f32.partialorder %v5023_v54, 3.0 }
 0x4e3   :  { %vm1801_vm15 = vcmp.ge.f32.partialorder %v5027_v22, 0.0  ;;  %vm1807_vm1 = vcmp.ge.f32.partialorder %v5027_v22, 1.0  ;;  %vm1813_vm2 = vcmp.ge.f32.partialorder %v5027_v22, 2.0  ;;  %v3271_v56 = vsel %vm1812_vm13, 1.0, %v4459_v0 }
 0x4e4   :  { %v3268_v25 = vsel %vm1801_vm15, 1.0, %v4459_v0  ;;  %v3270_v28 = vsel %vm1807_vm1, 1.0, %v4459_v0  ;;  %v3272_v29 = vsel %vm1813_vm2, 1.0, %v4459_v0  ;;  %vm1819_vm3 = vcmp.ge.f32.partialorder %v5027_v22, 3.0 }
 0x4e5   :  { %v3273_v30 = vsel %vm1818_vm14, 1.0, %v4459_v0  ;;  %v3274_v27 = vsel %vm1819_vm3, 1.0, %v4459_v0  ;;  %vm1824_vm4 = vcmp.ge.f32.partialorder %v5023_v54, 4.0  ;;  %vm1825_vm5 = vcmp.ge.f32.partialorder %v5027_v22, 4.0 }
 0x4e6   :  { %v3275_v60 = vsel %vm1824_vm4, 1.0, %v4459_v0  ;;  %v3276_v44 = vsel %vm1825_vm5, 1.0, %v4459_v0  ;;  %v1872_v59 = vsub.f32 %v3267_v7, %v3269_v10  ;;  %v1873_v48 = vsub.f32 %v3268_v25, %v3270_v28 }
 0x4e7   :  { %v1874_v20 = vsub.f32 %v3269_v10, %v3271_v56  ;;  %v1875_v31 = vsub.f32 %v3270_v28, %v3272_v29  ;;  %v1876_v23 = vsub.f32 %v3271_v56, %v3273_v30  ;;  %v1877_v36 = vsub.f32 %v3272_v29, %v3274_v27 }
 0x4e8   :  { %v1878_v35 = vsub.f32 %v3273_v30, %v3275_v60  ;;  %v5049_v26 = vsub.f32 %v3274_v27, %v3276_v44  ;;  %v1894_v39 = vmul.f32 %v1872_v59, %v5023_v54  ;;  %v1895_v32 = vmul.f32 %v1873_v48, %v5027_v22 }
 0x4e9   :  { %v4225_v33 = vpop.eup %4224  ;;  %v1896_v49 = vsub.f32 2.0, %v5023_v54  ;;  %v1897_v61 = vsub.f32 2.0, %v5027_v22  ;;  %v5056_v41 = vadd.f32 -1.0, %v5023_v54  ;;  %v5059_v17 = vadd.f32 -1.0, %v5027_v22 }
 0x4ea   :  { %v1771_v14 = vadd.f32 1.0, %v4225_v33  ;;  %v1906_v24 = vsub.f32 3.0, %v5023_v54  ;;  %v1907_v21 = vsub.f32 3.0, %v5027_v22  ;;  %v5064_v53 = vadd.f32 -2.0, %v5023_v54 }
 0x4eb   :  { %v4227_v57 = vpop.eup %4226  ;;  %v1898_v62 = vmul.f32 %v1896_v49, %v1874_v20  ;;  %v1899_v16 = vmul.f32 %v1897_v61, %v1875_v31  ;;  %v1904_v15 = vmul.f32 %v5056_v41, %v1874_v20  ;;  %v1905_v46 = vmul.f32 %v5059_v17, %v1875_v31 }
 0x4ec   :  { %4228 = vrcp.f32 %v1771_v14  ;;  %v1772_v50 = vadd.f32 1.0, %v4227_v57  ;;  %v1908_v18 = vmul.f32 %v1906_v24, %v1876_v23  ;;  %v1909_v6 = vmul.f32 %v1907_v21, %v1877_v36 }
 0x4ed   :  { %v1900_v42 = vadd.f32 %v1898_v62, %v1894_v39  ;;  %v1901_v58 = vadd.f32 %v1899_v16, %v1895_v32  ;;  %v5069_v1 = vadd.f32 -2.0, %v5027_v22  ;;  %v1914_v45 = vmul.f32 %v5064_v53, %v1876_v23 }
 0x4ee   :  { %4230 = vrcp.f32 %v1772_v50  ;;  %v1910_v47 = vadd.f32 %v1908_v18, %v1904_v15  ;;  %v1911_v63 = vadd.f32 %v1909_v6, %v1905_v46  ;;  %v1916_v2 = vsub.f32 4.0, %v5023_v54 }
 0x4ef   :  { %v1915_v3 = vmul.f32 %v5069_v1, %v1877_v36  ;;  %v1917_v4 = vsub.f32 4.0, %v5027_v22  ;;  %v1992_v51 = vmul.f32 %v1900_v42, %v5023_v54  ;;  %v1993_v52 = vmul.f32 %v1901_v58, %v5027_v22 }
 0x4f0   :  { %v1918_v8 = vmul.f32 %v1916_v2, %v1878_v35  ;;  %v1994_v11 = vmul.f32 %v1910_v47, %v1906_v24  ;;  %v1995_v5 = vmul.f32 %v1911_v63, %v1907_v21  ;;  %v2000_v19 = vmul.f32 %v5056_v41, %v1910_v47 }
 0x4f1   :  { %v1919_v9 = vmul.f32 %v1917_v4, %v5049_v26  ;;  %v2001_v38 = vmul.f32 %v5059_v17, %v1911_v63  ;;  %vm1830_vm6 = vcmp.ge.f32.partialorder %v5023_v54, 5.0  ;;  %vm1831_vm7 = vcmp.ge.f32.partialorder %v5027_v22, 5.0 }
 0x4f2   :  { %v1920_v55 = vadd.f32 %v1918_v8, %v1914_v45  ;;  %v1996_v43 = vadd.f32 %v1994_v11, %v1992_v51  ;;  %v1997_v13 = vadd.f32 %v1995_v5, %v1993_v52  ;;  %v3277_v7 = vsel %vm1830_vm6, 1.0, %v4459_v0 }
 0x4f3   :  { %v1921_v10 = vadd.f32 %v1919_v9, %v1915_v3  ;;  %v3278_v56 = vsel %vm1831_vm7, 1.0, %v4459_v0  ;;  %v1880_v25 = vsub.f32 %v3275_v60, %v3277_v7  ;;  %v5085_v28 = vadd.f32 -3.0, %v5023_v54 }
 0x4f4   :  { %v1998_v29 = vmul.f32 0.5, %v1996_v43  ;;  %v1999_v30 = vmul.f32 0.5, %v1997_v13  ;;  %v2002_v27 = vmul.f32 %v1920_v55, %v1916_v2  ;;  %v1881_v59 = vsub.f32 %v3276_v44, %v3278_v56 }
 0x4f5   :  { %v2003_v48 = vmul.f32 %v1921_v10, %v1917_v4  ;;  %v5088_v20 = vadd.f32 -3.0, %v5027_v22  ;;  %v1924_v31 = vmul.f32 %v5085_v28, %v1878_v35  ;;  %v1926_v23 = vsub.f32 5.0, %v5023_v54 }
 0x4f6   :  { %v4229_v36 = vpop.eup %4228  ;;  %v2004_v39 = vadd.f32 %v2002_v27, %v2000_v19  ;;  %v2064_v32 = vmul.f32 %v1998_v29, %v5023_v54  ;;  %v2065_v60 = vmul.f32 %v1999_v30, %v5027_v22  ;;  %v1927_v33 = vsub.f32 5.0, %v5027_v22 }
 0x4f7   :  { %v5096_v49 = vmul.f32 %v4229_v36, %v5017_v12  ;;  %v2005_v44 = vadd.f32 %v2003_v48, %v2001_v38  ;;  %v1925_v61 = vmul.f32 %v5088_v20, %v5049_v26  ;;  %v1928_v14 = vmul.f32 %v1926_v23, %v1880_v25  ;;  %v4148_v38 = vld [vmem:[#allocation13] sm:$0xff]  }
 0x4f8   :  { %v4231_v24 = vpop.eup %4230  ;;  %v2006_v35 = vmul.f32 0.5, %v2004_v39  ;;  %v1929_v21 = vmul.f32 %v1927_v33, %v1881_v59  ;;  %v2008_v57 = vmul.f32 %v5064_v53, %v1920_v55  ;;  %v2009_v62 = vmul.f32 %v5069_v1, %v1921_v10 }
 0x4f9   :  { %v5103_v16 = vmul.f32 %v4231_v24, %v5021_v34  ;;  %v2007_v15 = vmul.f32 0.5, %v2005_v44  ;;  %v1930_v46 = vadd.f32 %v1928_v14, %v1924_v31  ;;  %vm1836_vm8 = vcmp.ge.f32.partialorder %v5023_v54, 6.0 }
 0x4fa   :  { %v2066_v12 = vmul.f32 %v2006_v35, %v1916_v2  ;;  %v1931_v50 = vadd.f32 %v1929_v21, %v1925_v61  ;;  %v2268_v18 = vmul.f32 %v5056_v41, %v2006_v35  ;;  %vm1837_vm9 = vcmp.ge.f32.partialorder %v5027_v22, 6.0 }
 0x4fb   :  { %v1779_v26 = vpack.c.bf16 %v5103_v16, %v5096_v49  ;;  %v2067_v6 = vmul.f32 %v2007_v15, %v1917_v4  ;;  %v2010_v42 = vmul.f32 %v1930_v46, %v1926_v23  ;;  %v2269_v58 = vmul.f32 %v5059_v17, %v2007_v15 }
 0x4fc   :  { %v2068_v45 = vadd.f32 %v2066_v12, %v2064_v32  ;;  %v2011_v34 = vmul.f32 %v1931_v50, %v1927_v33  ;;  %v3279_v47 = vsel %vm1836_vm8, 1.0, %v4459_v0  ;;  %v3280_v63 = vsel %vm1837_vm9, 1.0, %v4459_v0  ;;  %v4150_v12 = vld [vmem:[#allocation13 + $0x10] sm:$0xff]  }
 0x4fd   :  { %v2069_v3 = vadd.f32 %v2067_v6, %v2065_v60  ;;  %v2012_v2 = vadd.f32 %v2010_v42, %v2008_v57  ;;  %v1882_v51 = vsub.f32 %v3277_v7, %v3279_v47  ;;  %v1883_v52 = vsub.f32 %v3278_v56, %v3280_v63 }
 0x4fe   :  { %v2070_v41 = vmul.f32 0.33333334, %v2068_v45  ;;  %v2013_v8 = vadd.f32 %v2011_v34, %v2009_v62  ;;  %v5114_v11 = vadd.f32 -4.0, %v5023_v54  ;;  %v5117_v4 = vadd.f32 -4.0, %v5027_v22 }
 0x4ff   :  { %v2071_v5 = vmul.f32 0.33333334, %v2069_v3  ;;  %v2014_v17 = vmul.f32 0.5, %v2012_v2  ;;  %v1936_v19 = vsub.f32 6.0, %v5023_v54  ;;  %v1937_v9 = vsub.f32 6.0, %v5027_v22 }
 0x500   :  { %v2015_v55 = vmul.f32 0.5, %v2013_v8  ;;  %v1934_v43 = vmul.f32 %v5114_v11, %v1880_v25  ;;  %v1935_v13 = vmul.f32 %v5117_v4, %v1881_v59  ;;  %v2016_v7 = vmul.f32 %v5085_v28, %v1930_v46  ;;  %v4149_v25 = vld [vmem:[#allocation13 + $0x8] sm:$0xff]   ;;  %v4151_v8 = vld [vmem:[#allocation13 + $0x18] sm:$0xff]  }
 0x501   :  { %v2072_v10 = vpack.c.bf16 %v2071_v5, %v2070_v41  ;;  %v2270_v56 = vmul.f32 %v2014_v17, %v1926_v23  ;;  %v1938_v29 = vmul.f32 %v1936_v19, %v1882_v51  ;;  %v1939_v30 = vmul.f32 %v1937_v9, %v1883_v52 }
 0x502   :  { %v2271_v27 = vmul.f32 %v2015_v55, %v1927_v33  ;;  %v2017_v48 = vmul.f32 %v5088_v20, %v1931_v50  ;;  %v2385_v31 = vmul.f32 %v5064_v53, %v2014_v17  ;;  %v2386_v36 = vmul.f32 %v5069_v1, %v2015_v55 }
 0x503   :  { %3827 = vmatmul.mubr.bf16.vlgmr.msra.gmra.mrb[8].mxu0 %v2072_v10  ;;  %v2272_v39 = vadd.f32 %v2270_v56, %v2268_v18  ;;  %v1940_v32 = vadd.f32 %v1938_v29, %v1934_v43  ;;  %v1941_v60 = vadd.f32 %v1939_v30, %v1935_v13  ;;  %vm1842_vm10 = vcmp.ge.f32.partialorder %v5023_v54, 7.0 }
 0x504   :  { %3831 = vmatpush3.bf16.msra.mxu0 %v4148_v38  ;;  %3846 = vmatprep.mubr.msk.bf16.mxu0 %vm4460_vm0, %v4459_v0  ;;  %v2273_v59 = vadd.f32 %v2271_v27, %v2269_v58  ;;  %vm1843_vm11 = vcmp.ge.f32.partialorder %v5027_v22, 7.0  ;;  %v3281_v23 = vsel %vm1842_vm10, 1.0, %v4459_v0  ;;  %v5133_v53 = vadd.f32 -5.0, %v5023_v54 }
 0x505   :  { %3832 = vmatprep.subr.bf16.mxu0 %v4459_v0  ;;  %v5136_v1 = vmul.f32 0.33333334, %v2272_v39  ;;  %v2018_v33 = vmul.f32 %v1940_v32, %v1936_v19  ;;  %v2019_v44 = vmul.f32 %v1941_v60, %v1937_v9  ;;  %v3282_v61 = vsel %vm1843_vm11, 1.0, %v4459_v0 }
 0x506   :  { %v5139_v14 = vmul.f32 0.33333334, %v2273_v59  ;;  %v1884_v24 = vsub.f32 %v3279_v47, %v3281_v23  ;;  %v1885_v35 = vsub.f32 %v3280_v63, %v3282_v61  ;;  %v5142_v21 = vadd.f32 -5.0, %v5027_v22 }
 0x507   :  { %v2020_v57 = vadd.f32 %v2018_v33, %v2016_v7  ;;  %v2021_v62 = vadd.f32 %v2019_v44, %v2017_v48  ;;  %v1944_v15 = vmul.f32 %v5133_v53, %v1882_v51  ;;  %v1946_v46 = vsub.f32 7.0, %v5023_v54  ;;  %v4152_v48 = vld [vmem:[#allocation13 + $0x20] sm:$0xff]  }
 0x508   :  { %3833 = vmatpush3.bf16.msra.mxu0 %v4149_v25  ;;  %v2276_v50 = vpack.c.bf16 %v5139_v14, %v5136_v1  ;;  %v1945_v18 = vmul.f32 %v5142_v21, %v1883_v52  ;;  %v1947_v6 = vsub.f32 7.0, %v5027_v22  ;;  %v2024_v42 = vmul.f32 %v5114_v11, %v1940_v32  ;;  %v4169_v1 = vld [vmem:[#allocation13 + $0xe8] sm:$0xff]   ;;  %v4170_v14 = vld [vmem:[#allocation13 + $0xf0] sm:$0xff]  }
 0x509   :  { %3834 = vmatprep.subr.bf16.mxu0 %v4459_v0  ;;  %v2022_v58 = vmul.f32 0.5, %v2020_v57  ;;  %v2023_v45 = vmul.f32 0.5, %v2021_v62  ;;  %v1948_v34 = vmul.f32 %v1946_v46, %v1884_v24  ;;  %v2025_v47 = vmul.f32 %v5117_v4, %v1941_v60  ;;  %v4153_v62 = vld [vmem:[#allocation13 + $0x28] sm:$0xff]  }
 0x50a   :  { %v1949_v63 = vmul.f32 %v1947_v6, %v1885_v35  ;;  %vm1848_vm12 = vcmp.ge.f32.partialorder %v5023_v54, 8.0  ;;  %vm1849_vm13 = vcmp.ge.f32.partialorder %v5027_v22, 8.0  ;;  %v5156_v3 = vadd.f32 -6.0, %v5023_v54 }
 0x50b   :  { %v2387_v2 = vmul.f32 %v2022_v58, %v1936_v19  ;;  %v2388_v51 = vmul.f32 %v2023_v45, %v1937_v9  ;;  %v1950_v52 = vadd.f32 %v1948_v34, %v1944_v15  ;;  %v2502_v41 = vmul.f32 %v5085_v28, %v2022_v58 }
 0x50c   :  { %3835 = vmatpush3.bf16.msra.mxu0 %v4150_v12  ;;  %v1951_v5 = vadd.f32 %v1949_v63, %v1945_v18  ;;  %v2503_v17 = vmul.f32 %v5088_v20, %v2023_v45  ;;  %v3283_v38 = vsel %vm1848_vm12, 1.0, %v4459_v0  ;;  %v3284_v55 = vsel %vm1849_vm13, 1.0, %v4459_v0 }
 0x50d   :  { %3836 = vmatprep.subr.bf16.mxu0 %v4459_v0  ;;  %v2389_v43 = vadd.f32 %v2387_v2, %v2385_v31  ;;  %v2390_v13 = vadd.f32 %v2388_v51, %v2386_v36  ;;  %v2026_v7 = vmul.f32 %v1950_v52, %v1946_v46  ;;  %v1886_v10 = vsub.f32 %v3281_v23, %v3283_v38 }
 0x50e   :  { %v2027_v19 = vmul.f32 %v1951_v5, %v1947_v6  ;;  %v1887_v9 = vsub.f32 %v3282_v61, %v3284_v55  ;;  %v5164_v56 = vadd.f32 -6.0, %v5027_v22  ;;  %v1954_v28 = vmul.f32 %v5156_v3, %v1884_v24 }
 0x50f   :  { %v5167_v29 = vmul.f32 0.33333334, %v2389_v43  ;;  %v5169_v20 = vmul.f32 0.33333334, %v2390_v13  ;;  %v2028_v30 = vadd.f32 %v2026_v7, %v2024_v42  ;;  %v1956_v27 = vsub.f32 8.0, %v5023_v54 }
 0x510   :  { %3837 = vmatpush3.bf16.msra.mxu0 %v4151_v8  ;;  %v2029_v31 = vadd.f32 %v2027_v19, %v2025_v47  ;;  %v1955_v36 = vmul.f32 %v5164_v56, %v1885_v35  ;;  %v1957_v39 = vsub.f32 8.0, %v5027_v22  ;;  %v2032_v32 = vmul.f32 %v5133_v53, %v1950_v52 }
 0x511   :  { %3838 = vmatprep.subr.bf16.mxu0 %v4459_v0  ;;  %v2393_v60 = vpack.c.bf16 %v5169_v20, %v5167_v29  ;;  %v2030_v25 = vmul.f32 0.5, %v2028_v30  ;;  %v1958_v59 = vmul.f32 %v1956_v27, %v1886_v10  ;;  %v2033_v23 = vmul.f32 %v5142_v21, %v1951_v5  ;;  %v4177_v29 = vld [vmem:[#allocation13 + $0x128] sm:$0xff]   ;;  %v4178_v20 = vld [vmem:[#allocation13 + $0x130] sm:$0xff]  }
 0x512   :  { %v2031_v33 = vmul.f32 0.5, %v2029_v31  ;;  %v1959_v44 = vmul.f32 %v1957_v39, %v1887_v9  ;;  %vm1854_vm14 = vcmp.ge.f32.partialorder %v5023_v54, 9.0  ;;  %vm1855_vm15 = vcmp.ge.f32.partialorder %v5027_v22, 9.0 }
 0x513   :  { %v2504_v61 = vmul.f32 %v2030_v25, %v1946_v46  ;;  %v1960_v24 = vadd.f32 %v1958_v59, %v1954_v28  ;;  %v2619_v35 = vmul.f32 %v5114_v11, %v2030_v25  ;;  %v3285_v57 = vsel %vm1854_vm14, 1.0, %v4459_v0 }
 0x514   :  { %3839 = vmatpush3.bf16.msra.mxu0 %v4152_v48  ;;  %v2505_v15 = vmul.f32 %v2031_v33, %v1947_v6  ;;  %v1961_v12 = vadd.f32 %v1959_v44, %v1955_v36  ;;  %v2620_v18 = vmul.f32 %v5117_v4, %v2031_v33  ;;  %v3286_v42 = vsel %vm1855_vm15, 1.0, %v4459_v0 }
 0x515   :  { %3840 = vmatprep.subr.bf16.mxu0 %v4459_v0  ;;  %v2506_v58 = vadd.f32 %v2504_v61, %v2502_v41  ;;  %v2034_v45 = vmul.f32 %v1960_v24, %v1956_v27  ;;  %v1888_v34 = vsub.f32 %v3283_v38, %v3285_v57  ;;  %v1889_v47 = vsub.f32 %v3284_v55, %v3286_v42  ;;  %v4154_v41 = vld [vmem:[#allocation13 + $0x30] sm:$0xff]  }
 0x516   :  { %v2507_v46 = vadd.f32 %v2505_v15, %v2503_v17  ;;  %v2035_v63 = vmul.f32 %v1961_v12, %v1957_v39  ;;  %v5187_v11 = vadd.f32 -7.0, %v5023_v54  ;;  %v5190_v2 = vadd.f32 -7.0, %v5027_v22 }
 0x517   :  { %v5192_v6 = vmul.f32 0.33333334, %v2506_v58  ;;  %v2036_v51 = vadd.f32 %v2034_v45, %v2032_v32  ;;  %v1966_v4 = vsub.f32 9.0, %v5023_v54  ;;  %v1967_v52 = vsub.f32 9.0, %v5027_v22 }
 0x518   :  { %3841 = vmatpush3.bf16.msra.mxu0 %v4153_v62  ;;  %v5196_v8 = vmul.f32 0.33333334, %v2507_v46  ;;  %v2037_v5 = vadd.f32 %v2035_v63, %v2033_v23  ;;  %v1964_v17 = vmul.f32 %v5187_v11, %v1886_v10  ;;  %v1965_v38 = vmul.f32 %v5190_v2, %v1887_v9  ;;  %v4155_v9 = vld [vmem:[#allocation13 + $0x38] sm:$0xff]  }
 0x519   :  { %3842 = vmatprep.subr.bf16.mxu0 %v4459_v0  ;;  %v2038_v55 = vmul.f32 0.5, %v2036_v51  ;;  %v1968_v43 = vmul.f32 %v1966_v4, %v1888_v34  ;;  %v1969_v13 = vmul.f32 %v1967_v52, %v1889_v47  ;;  %v2040_v28 = vmul.f32 %v5156_v3, %v1960_v24 }
 0x51a   :  { %v2510_v7 = vpack.c.bf16 %v5196_v8, %v5192_v6  ;;  %v2039_v19 = vmul.f32 0.5, %v2037_v5  ;;  %vm1860_vm1 = vcmp.ge.f32.partialorder %v5023_v54, 10.0  ;;  %v2041_v10 = vmul.f32 %v5164_v56, %v1961_v12  ;;  %v4185_v6 = vld [vmem:[#allocation13 + $0x168] sm:$0xff]   ;;  %v4186_v8 = vld [vmem:[#allocation13 + $0x170] sm:$0xff]  }
 0x51b   :  { %v2621_v30 = vmul.f32 %v2038_v55, %v1956_v27  ;;  %v1970_v48 = vadd.f32 %v1968_v43, %v1964_v17  ;;  %v1971_v31 = vadd.f32 %v1969_v13, %v1965_v38  ;;  %v2736_v32 = vmul.f32 %v5133_v53, %v2038_v55 }
 0x51c   :  { %3843 = vmatpush3.bf16.msra.mxu0 %v4154_v41  ;;  %v2622_v36 = vmul.f32 %v2039_v19, %v1957_v39  ;;  %vm1861_vm2 = vcmp.ge.f32.partialorder %v5027_v22, 10.0  ;;  %v5209_v25 = vsel %vm1860_vm1, 1.0, %v4459_v0  ;;  %v3305_v53 = vadd.f32 -8.0, %v5023_v54 }
 0x51d   :  { %3844 = vmatprep.subr.bf16.mxu0 %v4459_v0  ;;  %v2623_v59 = vadd.f32 %v2621_v30, %v2619_v35  ;;  %v2042_v23 = vmul.f32 %v1970_v48, %v1966_v4  ;;  %v2043_v33 = vmul.f32 %v1971_v31, %v1967_v52  ;;  %v5213_v27 = vsel %vm1861_vm2, 1.0, %v4459_v0  ;;  %v4156_v35 = vld [vmem:[#allocation13 + $0x80] sm:$0xff]  }
 0x51e   :  { %v2624_v44 = vadd.f32 %v2622_v36, %v2620_v18  ;;  %v1890_v61 = vsub.f32 %v3285_v57, %v5209_v25  ;;  %v1891_v39 = vsub.f32 %v3286_v42, %v5213_v27  ;;  %v3306_v12 = vadd.f32 -8.0, %v5027_v22  ;;  %v4158_v36 = vld [vmem:[#allocation13 + $0x90] sm:$0xff]  }
 0x51f   :  { %v5218_v24 = vmul.f32 0.33333334, %v2623_v59  ;;  %v2044_v62 = vadd.f32 %v2042_v23, %v2040_v28  ;;  %v2045_v15 = vadd.f32 %v2043_v33, %v2041_v10  ;;  %v1974_v45 = vmul.f32 %v3305_v53, %v1888_v34 }
 0x520   :  { %3845 = vmatpush3.bf16.msra.mxu0 %v4155_v9  ;;  %v5221_v58 = vmul.f32 0.33333334, %v2624_v44  ;;  %v1976_v46 = vsub.f32 10.0, %v5023_v54  ;;  %v1977_v18 = vsub.f32 10.0, %v5027_v22  ;;  %v2737_v63 = vmul.f32 %v5142_v21, %v2039_v19  ;;  %v4157_v21 = vld [vmem:[#allocation13 + $0x88] sm:$0xff]  }
 0x521   :  { %3850 = vmatprep.subr.bf16.mxu0 %v4459_v0  ;;  %v2046_v57 = vmul.f32 0.5, %v2044_v62  ;;  %v2047_v42 = vmul.f32 0.5, %v2045_v15  ;;  %v1975_v51 = vmul.f32 %v3306_v12, %v1889_v47  ;;  %v2048_v38 = vmul.f32 %v5187_v11, %v1970_v48 }
 0x522   :  { %v2627_v41 = vpack.c.bf16 %v5221_v58, %v5218_v24  ;;  %v1978_v5 = vmul.f32 %v1976_v46, %v1890_v61  ;;  %v1979_v17 = vmul.f32 %v1977_v18, %v1891_v39  ;;  %v2049_v43 = vmul.f32 %v5190_v2, %v1971_v31  ;;  %v4193_v24 = vld [vmem:[#allocation13 + $0x1a8] sm:$0xff]   ;;  %v4194_v58 = vld [vmem:[#allocation13 + $0x1b0] sm:$0xff]  }
 0x523   :  { %3847 = vmatmul.mubr.bf16.vlgmr.msra.gmra.mrb[12].mxu0 %v1779_v26  ;;  %v2738_v34 = vmul.f32 %v2046_v57, %v1966_v4  ;;  %v2739_v55 = vmul.f32 %v2047_v42, %v1967_v52  ;;  %v2853_v13 = vmul.f32 %v5156_v3, %v2046_v57  ;;  %vm1866_vm3 = vcmp.ge.f32.partialorder %v5023_v54, 11.0 }
 0x524   :  { %3851 = vmatpush3.bf16.msra.mxu0 %v4156_v35  ;;  %3866 = vmatprep.mubr.msk.bf16.mxu0 %vm4460_vm0, %v4459_v0  ;;  %v1980_v47 = vadd.f32 %v1978_v5, %v1974_v45  ;;  %v1981_v19 = vadd.f32 %v1979_v17, %v1975_v51  ;;  %vm1867_vm4 = vcmp.ge.f32.partialorder %v5027_v22, 11.0  ;;  %v3289_v26 = vsel %vm1866_vm3, 1.0, %v4459_v0  ;;  %v4159_v5 = vld [vmem:[#allocation13 + $0x98] sm:$0xff]  }
 0x525   :  { %3852 = vmatprep.subr.bf16.mxu0 %v4459_v0  ;;  %v2740_v49 = vadd.f32 %v2738_v34, %v2736_v32  ;;  %v2741_v16 = vadd.f32 %v2739_v55, %v2737_v63  ;;  %v3290_v4 = vsel %vm1867_vm4, 1.0, %v4459_v0  ;;  %v1892_v28 = vsub.f32 %v5209_v25, %v3289_v26 }
 0x526   :  { %v2050_v3 = vmul.f32 %v1980_v47, %v1976_v46  ;;  %v2051_v52 = vmul.f32 %v1981_v19, %v1977_v18  ;;  %v1893_v30 = vsub.f32 %v5213_v27, %v3290_v4  ;;  %v3307_v10 = vadd.f32 -9.0, %v5023_v54 }
 0x527   :  { %v5244_v48 = vmul.f32 0.33333334, %v2740_v49  ;;  %v5246_v31 = vmul.f32 0.33333334, %v2741_v16  ;;  %v3308_v9 = vadd.f32 -9.0, %v5027_v22  ;;  %v1986_v23 = vsub.f32 11.0, %v5023_v54 }
 0x528   :  { %3853 = vmatpush3.bf16.msra.mxu0 %v4157_v21  ;;  %v2052_v32 = vadd.f32 %v2050_v3, %v2048_v38  ;;  %v2053_v59 = vadd.f32 %v2051_v52, %v2049_v43  ;;  %v1987_v33 = vsub.f32 11.0, %v5027_v22  ;;  %v2854_v27 = vmul.f32 %v5164_v56, %v2047_v42  ;;  %v4162_v3 = vld [vmem:[#allocation13 + $0xb0] sm:$0xff]  }
 0x529   :  { %3854 = vmatprep.subr.bf16.mxu0 %v4459_v0  ;;  %v2744_v25 = vpack.c.bf16 %v5246_v31, %v5244_v48  ;;  %v1984_v44 = vmul.f32 %v3307_v10, %v1890_v61  ;;  %v1985_v62 = vmul.f32 %v3308_v9, %v1891_v39  ;;  %v1988_v45 = vmul.f32 %v1986_v23, %v1892_v28  ;;  %v4160_v61 = vld [vmem:[#allocation13 + $0xa0] sm:$0xff]   ;;  %v4165_v10 = vld [vmem:[#allocation13 + $0xc8] sm:$0xff]   ;;  %v4166_v9 = vld [vmem:[#allocation13 + $0xd0] sm:$0xff]  }
 0x52a   :  { %v2054_v15 = vmul.f32 0.5, %v2052_v32  ;;  %v2055_v35 = vmul.f32 0.5, %v2053_v59  ;;  %v1989_v57 = vmul.f32 %v1987_v33, %v1893_v30  ;;  %v2056_v63 = vmul.f32 %v3305_v53, %v1980_v47  ;;  %v4164_v30 = vld [vmem:[#allocation13 + $0xc0] sm:$0xff]   ;;  %v4201_v48 = vld [vmem:[#allocation13 + $0x1e8] sm:$0xff]  }
 0x52b   :  { %v2057_v51 = vmul.f32 %v3306_v12, %v1981_v19  ;;  %v1990_v22 = vadd.f32 %v1988_v45, %v1984_v44  ;;  %v4161_v19 = vld [vmem:[#allocation13 + $0xa8] sm:$0xff]   ;;  %v4168_v32 = vld [vmem:[#allocation13 + $0xe0] sm:$0xff]   ;;  %v4183_v45 = vld [vmem:[#allocation13 + $0x158] sm:$0xff]  }
 0x52c   :  { %3855 = vmatpush3.bf16.msra.mxu0 %v4158_v36  ;;  %v2855_v54 = vmul.f32 %v2054_v15, %v1976_v46  ;;  %v2856_v17 = vmul.f32 %v2055_v35, %v1977_v18  ;;  %v1991_v38 = vadd.f32 %v1989_v57, %v1985_v62  ;;  %v2970_v46 = vmul.f32 %v5187_v11, %v2054_v15  ;;  %v4167_v36 = vld [vmem:[#allocation13 + $0xd8] sm:$0xff]   ;;  %v4172_v59 = vld [vmem:[#allocation13 + $0x100] sm:$0xff]   ;;  %v4181_v15 = vld [vmem:[#allocation13 + $0x148] sm:$0xff]  }
 0x52d   :  { %3856 = vmatprep.subr.bf16.mxu0 %v4459_v0  ;;  %v2058_v43 = vmul.f32 %v1990_v22, %v1986_v23  ;;  %v2971_v47 = vmul.f32 %v5190_v2, %v2055_v35  ;;  %v4163_v2 = vld [vmem:[#allocation13 + $0xb8] sm:$0xff]   ;;  %v4176_v44 = vld [vmem:[#allocation13 + $0x120] sm:$0xff]   ;;  %v4182_v35 = vld [vmem:[#allocation13 + $0x150] sm:$0xff]  }
 0x52e   :  { %v2857_v34 = vadd.f32 %v2855_v54, %v2853_v13  ;;  %v2858_v55 = vadd.f32 %v2856_v17, %v2854_v27  ;;  %v2059_v56 = vmul.f32 %v1991_v38, %v1987_v33  ;;  %v4175_v27 = vld [vmem:[#allocation13 + $0x118] sm:$0xff]   ;;  %v4180_v62 = vld [vmem:[#allocation13 + $0x140] sm:$0xff]   ;;  %v4197_v38 = vld [vmem:[#allocation13 + $0x1c8] sm:$0xff]  }
 0x52f   :  { %v2060_v53 = vadd.f32 %v2058_v43, %v2056_v63  ;;  %v4184_v57 = vld [vmem:[#allocation13 + $0x160] sm:$0xff]   ;;  %v4191_v54 = vld [vmem:[#allocation13 + $0x198] sm:$0xff]  }
 0x530   :  { %3857 = vmatpush3.bf16.msra.mxu0 %v4159_v5  ;;  %v5257_v39 = vmul.f32 0.33333334, %v2857_v34  ;;  %v5259_v42 = vmul.f32 0.33333334, %v2858_v55  ;;  %v2061_v12 = vadd.f32 %v2059_v56, %v2057_v51  ;;  %v4188_v63 = vld [vmem:[#allocation13 + $0x180] sm:$0xff]   ;;  %v4189_v51 = vld [vmem:[#allocation13 + $0x188] sm:$0xff]  }
 0x531   :  { %3858 = vmatprep.subr.bf16.mxu0 %v4459_v0  ;;  %v2062_v21 = vmul.f32 0.5, %v2060_v53  ;;  %v4190_v5 = vld [vmem:[#allocation13 + $0x190] sm:$0xff]   ;;  %v4192_v17 = vld [vmem:[#allocation13 + $0x1a0] sm:$0xff]   ;;  %v4199_v55 = vld [vmem:[#allocation13 + $0x1d8] sm:$0xff]  }
 0x532   :  { %v2861_v18 = vpack.c.bf16 %v5259_v42, %v5257_v39  ;;  %v2063_v13 = vmul.f32 0.5, %v2061_v12  ;;  %v4196_v22 = vld [vmem:[#allocation13 + $0x1c0] sm:$0xff]   ;;  %v4198_v34 = vld [vmem:[#allocation13 + $0x1d0] sm:$0xff]   ;;  %v4203_v12 = vld [vmem:[#allocation13 + $0x1f8] sm:$0xff]  }
 0x533   :  { %v2972_v49 = vmul.f32 %v2062_v21, %v1986_v23  ;;  %v4173_v23 = vld [vmem:[#allocation13 + $0x108] sm:$0xff]   ;;  %v4200_v43 = vld [vmem:[#allocation13 + $0x1e0] sm:$0xff]  }
 0x534   :  { %3859 = vmatpush3.bf16.msra.mxu0 %v4160_v61  ;;  %v2973_v16 = vmul.f32 %v2063_v13, %v1987_v33  ;;  %v4174_v33 = vld [vmem:[#allocation13 + $0x110] sm:$0xff]   ;;  %v4205_v21 = vld [vmem:[#allocation13 + $0x208] sm:$0xff]  }
 0x535   :  { %3860 = vmatprep.subr.bf16.mxu0 %v4459_v0  ;;  %v2974_v26 = vadd.f32 %v2972_v49, %v2970_v46  ;;  %v4202_v61 = vld [vmem:[#allocation13 + $0x1f0] sm:$0xff]   ;;  %v4204_v46 = vld [vmem:[#allocation13 + $0x200] sm:$0xff]   ;;  %v4209_v39 = vld [vmem:[#allocation13 + $0x228] sm:$0xff]  }
 0x536   :  { %v2975_v4 = vadd.f32 %v2973_v16, %v2971_v47  ;;  %v4206_v13 = vld [vmem:[#allocation13 + $0x210] sm:$0xff]   ;;  %v4207_v47 = vld [vmem:[#allocation13 + $0x218] sm:$0xff]  }
 0x537   :  { %v5267_v52 = vmul.f32 0.33333334, %v2974_v26  ;;  %v4210_v26 = vld [vmem:[#allocation13 + $0x230] sm:$0xff]  }
 0x538   :  { %3861 = vmatpush3.bf16.msra.mxu0 %v4161_v19  ;;  %v5269_v11 = vmul.f32 0.33333334, %v2975_v4  ;;  %v4208_v19 = vld [vmem:[#allocation13 + $0x220] sm:$0xff]  }
 0x539   :  { %3862 = vmatprep.subr.bf16.mxu0 %v4459_v0 }
 0x53a   :  { %v2978_v28 = vpack.c.bf16 %v5269_v11, %v5267_v52 }
 0x53c   :  { %3863 = vmatpush3.bf16.msra.mxu0 %v4162_v3 }
 0x53d   :  { %3864 = vmatprep.subr.bf16.mxu0 %v4459_v0 }
 0x540   :  { %3865 = vmatpush3.bf16.msra.mxu0 %v4163_v2  ;;  %v4211_v2 = vld [vmem:[#allocation13 + $0x238] sm:$0xff]  }
 0x541   :  { %3870 = vmatprep.subr.bf16.mxu0 %v4459_v0 }
 0x543   :  { %3867 = vmatmul.mubr.bf16.vlgmr.msra.gmra.mrb[16].mxu0 %v2276_v50  ;;  %v4171_v50 = vld [vmem:[#allocation13 + $0xf8] sm:$0xff]  }
 0x544   :  { %3871 = vmatpush3.bf16.msra.mxu0 %v4164_v30  ;;  %3886 = vmatprep.mubr.msk.bf16.mxu0 %vm4460_vm0, %v4459_v0 }
 0x545   :  { %3872 = vmatprep.subr.bf16.mxu0 %v4459_v0 }
 0x548   :  { %3873 = vmatpush3.bf16.msra.mxu0 %v4165_v10 }
 0x549   :  { %3874 = vmatprep.subr.bf16.mxu0 %v4459_v0 }
 0x54c   :  { %3875 = vmatpush3.bf16.msra.mxu0 %v4166_v9 }
 0x54d   :  { %3876 = vmatprep.subr.bf16.mxu0 %v4459_v0 }
 0x550   :  { %3877 = vmatpush3.bf16.msra.mxu0 %v4167_v36 }
 0x551   :  { %3878 = vmatprep.subr.bf16.mxu0 %v4459_v0 }
 0x554   :  { %3879 = vmatpush3.bf16.msra.mxu0 %v4168_v32 }
 0x555   :  { %3880 = vmatprep.subr.bf16.mxu0 %v4459_v0 }
 0x558   :  { %3881 = vmatpush3.bf16.msra.mxu0 %v4169_v1 }
 0x559   :  { %3882 = vmatprep.subr.bf16.mxu0 %v4459_v0 }
 0x55c   :  { %3883 = vmatpush3.bf16.msra.mxu0 %v4170_v14 }
 0x55d   :  { %3884 = vmatprep.subr.bf16.mxu0 %v4459_v0 }
 0x560   :  { %3885 = vmatpush3.bf16.msra.mxu0 %v4171_v50 }
 0x561   :  { %3890 = vmatprep.subr.bf16.mxu0 %v4459_v0 }
 0x563   :  { %3887 = vmatmul.mubr.bf16.vlgmr.msra.gmra.mrb[20].mxu0 %v2393_v60  ;;  %v4179_v60 = vld [vmem:[#allocation13 + $0x138] sm:$0xff]  }
 0x564   :  { %3891 = vmatpush3.bf16.msra.mxu0 %v4172_v59  ;;  %3906 = vmatprep.mubr.msk.bf16.mxu0 %vm4460_vm0, %v4459_v0 }
 0x565   :  { %3892 = vmatprep.subr.bf16.mxu0 %v4459_v0 }
 0x568   :  { %3893 = vmatpush3.bf16.msra.mxu0 %v4173_v23 }
 0x569   :  { %3894 = vmatprep.subr.bf16.mxu0 %v4459_v0 }
 0x56c   :  { %3895 = vmatpush3.bf16.msra.mxu0 %v4174_v33 }
 0x56d   :  { %3896 = vmatprep.subr.bf16.mxu0 %v4459_v0 }
 0x570   :  { %3897 = vmatpush3.bf16.msra.mxu0 %v4175_v27 }
 0x571   :  { %3898 = vmatprep.subr.bf16.mxu0 %v4459_v0 }
 0x574   :  { %3899 = vmatpush3.bf16.msra.mxu0 %v4176_v44 }
 0x575   :  { %3900 = vmatprep.subr.bf16.mxu0 %v4459_v0 }
 0x578   :  { %3901 = vmatpush3.bf16.msra.mxu0 %v4177_v29 }
 0x579   :  { %3902 = vmatprep.subr.bf16.mxu0 %v4459_v0 }
 0x57c   :  { %3903 = vmatpush3.bf16.msra.mxu0 %v4178_v20 }
 0x57d   :  { %3904 = vmatprep.subr.bf16.mxu0 %v4459_v0 }
 0x580   :  { %3905 = vmatpush3.bf16.msra.mxu0 %v4179_v60 }
 0x581   :  { %3910 = vmatprep.subr.bf16.mxu0 %v4459_v0 }
 0x583   :  { %3907 = vmatmul.mubr.bf16.vlgmr.msra.gmra.mrb[24].mxu0 %v2510_v7  ;;  %v4187_v7 = vld [vmem:[#allocation13 + $0x178] sm:$0xff]  }
 0x584   :  { %3911 = vmatpush3.bf16.msra.mxu0 %v4180_v62  ;;  %3926 = vmatprep.mubr.msk.bf16.mxu0 %vm4460_vm0, %v4459_v0 }
 0x585   :  { %3912 = vmatprep.subr.bf16.mxu0 %v4459_v0 }
 0x588   :  { %3913 = vmatpush3.bf16.msra.mxu0 %v4181_v15 }
 0x589   :  { %3914 = vmatprep.subr.bf16.mxu0 %v4459_v0 }
 0x58c   :  { %3915 = vmatpush3.bf16.msra.mxu0 %v4182_v35 }
 0x58d   :  { %3916 = vmatprep.subr.bf16.mxu0 %v4459_v0 }
 0x590   :  { %3917 = vmatpush3.bf16.msra.mxu0 %v4183_v45 }
 0x591   :  { %3918 = vmatprep.subr.bf16.mxu0 %v4459_v0 }
 0x594   :  { %3919 = vmatpush3.bf16.msra.mxu0 %v4184_v57 }
 0x595   :  { %3920 = vmatprep.subr.bf16.mxu0 %v4459_v0 }
 0x598   :  { %3921 = vmatpush3.bf16.msra.mxu0 %v4185_v6 }
 0x599   :  { %3922 = vmatprep.subr.bf16.mxu0 %v4459_v0 }
 0x59c   :  { %3923 = vmatpush3.bf16.msra.mxu0 %v4186_v8 }
 0x59d   :  { %3924 = vmatprep.subr.bf16.mxu0 %v4459_v0 }
 0x5a0   :  { %3925 = vmatpush3.bf16.msra.mxu0 %v4187_v7 }
 0x5a1   :  { %3930 = vmatprep.subr.bf16.mxu0 %v4459_v0 }
 0x5a3   :  { %3927 = vmatmul.mubr.bf16.vlgmr.msra.gmra.mrb[28].mxu0 %v2627_v41  ;;  %v4195_v41 = vld [vmem:[#allocation13 + $0x1b8] sm:$0xff]  }
 0x5a4   :  { %3931 = vmatpush3.bf16.msra.mxu0 %v4188_v63  ;;  %3946 = vmatprep.mubr.msk.bf16.mxu0 %vm4460_vm0, %v4459_v0 }
 0x5a5   :  { %3932 = vmatprep.subr.bf16.mxu0 %v4459_v0 }
 0x5a8   :  { %3933 = vmatpush3.bf16.msra.mxu0 %v4189_v51 }
 0x5a9   :  { %3934 = vmatprep.subr.bf16.mxu0 %v4459_v0 }
 0x5ac   :  { %3935 = vmatpush3.bf16.msra.mxu0 %v4190_v5 }
 0x5ad   :  { %3936 = vmatprep.subr.bf16.mxu0 %v4459_v0 }
 0x5b0   :  { %3937 = vmatpush3.bf16.msra.mxu0 %v4191_v54 }
 0x5b1   :  { %3938 = vmatprep.subr.bf16.mxu0 %v4459_v0 }
 0x5b4   :  { %3939 = vmatpush3.bf16.msra.mxu0 %v4192_v17 }
 0x5b5   :  { %3940 = vmatprep.subr.bf16.mxu0 %v4459_v0 }
 0x5b8   :  { %3941 = vmatpush3.bf16.msra.mxu0 %v4193_v24 }
 0x5b9   :  { %3942 = vmatprep.subr.bf16.mxu0 %v4459_v0 }
 0x5bc   :  { %3943 = vmatpush3.bf16.msra.mxu0 %v4194_v58 }
 0x5bd   :  { %3944 = vmatprep.subr.bf16.mxu0 %v4459_v0 }
 0x5c0   :  { %3945 = vmatpush3.bf16.msra.mxu0 %v4195_v41 }
 0x5c1   :  { %3950 = vmatprep.subr.bf16.mxu0 %v4459_v0 }
 0x5c3   :  { %3947 = vmatmul.mubr.bf16.vlgmr.msra.gmra.mrb[32].mxu0 %v2744_v25 }
 0x5c4   :  { %3951 = vmatpush3.bf16.msra.mxu0 %v4196_v22  ;;  %3966 = vmatprep.mubr.msk.bf16.mxu0 %vm4460_vm0, %v4459_v0 }
 0x5c5   :  { %3952 = vmatprep.subr.bf16.mxu0 %v4459_v0 }
 0x5c8   :  { %3953 = vmatpush3.bf16.msra.mxu0 %v4197_v38 }
 0x5c9   :  { %3954 = vmatprep.subr.bf16.mxu0 %v4459_v0 }
 0x5cc   :  { %3955 = vmatpush3.bf16.msra.mxu0 %v4198_v34 }
 0x5cd   :  { %3956 = vmatprep.subr.bf16.mxu0 %v4459_v0 }
 0x5d0   :  { %3957 = vmatpush3.bf16.msra.mxu0 %v4199_v55 }
 0x5d1   :  { %3958 = vmatprep.subr.bf16.mxu0 %v4459_v0 }
 0x5d4   :  { %3959 = vmatpush3.bf16.msra.mxu0 %v4200_v43 }
 0x5d5   :  { %3960 = vmatprep.subr.bf16.mxu0 %v4459_v0 }
 0x5d6   :  { %v2172_v31 = vpop.f32.mrb[8].mxu0 }
 0x5d7   :  { %v3828_v25 = vpop.f32.mrb[9].mxu0 }
 0x5d8   :  { %3961 = vmatpush3.bf16.msra.mxu0 %v4201_v48  ;;  %v2175_v56 = vpop.f32.mrb[10].mxu0 }
 0x5d9   :  { %v3829_v53 = vpop.f32.mrb[11].mxu0  ;;  %3962 = vmatprep.subr.bf16.mxu0 %v4459_v0 }
 0x5dc   :  { %3963 = vmatpush3.bf16.msra.mxu0 %v4202_v61 }
 0x5dd   :  { %3964 = vmatprep.subr.bf16.mxu0 %v4459_v0 }
 0x5e0   :  { %3965 = vmatpush3.bf16.msra.mxu0 %v4203_v12 }
 0x5e1   :  { %3970 = vmatprep.subr.bf16.mxu0 %v4459_v0 }
 0x5e3   :  { %3967 = vmatmul.mubr.bf16.vlgmr.msra.gmra.mrb[36].mxu0 %v2861_v18 }
 0x5e4   :  { %3971 = vmatpush3.bf16.msra.mxu0 %v4204_v46  ;;  %3986 = vmatprep.mubr.msk.bf16.mxu0 %vm4460_vm0, %v4459_v0 }
 0x5e5   :  { %3972 = vmatprep.subr.bf16.mxu0 %v4459_v0 }
 0x5e8   :  { %3973 = vmatpush3.bf16.msra.mxu0 %v4205_v21 }
 0x5e9   :  { %3974 = vmatprep.subr.bf16.mxu0 %v4459_v0 }
 0x5ec   :  { %3975 = vmatpush3.bf16.msra.mxu0 %v4206_v13 }
 0x5ed   :  { %3976 = vmatprep.subr.bf16.mxu0 %v4459_v0 }
 0x5f0   :  { %3977 = vmatpush3.bf16.msra.mxu0 %v4207_v47 }
 0x5f1   :  { %3978 = vmatprep.subr.bf16.mxu0 %v4459_v0 }
 0x5f4   :  { %3979 = vmatpush3.bf16.msra.mxu0 %v4208_v19 }
 0x5f5   :  { %3980 = vmatprep.subr.bf16.mxu0 %v4459_v0 }
 0x5f6   :  { %v2261_v42 = vpop.f32.mrb[12].mxu0 }
 0x5f7   :  { %v2262_v18 = vadd.f32 %v2261_v42, %v2172_v31  ;;  %v3848_v49 = vpop.f32.mrb[13].mxu0 }
 0x5f8   :  { %v2264_v16 = vpop.f32.mrb[14].mxu0  ;;  %3981 = vmatpush3.bf16.msra.mxu0 %v4209_v39 }
 0x5f9   :  { %v2265_v4 = vadd.f32 %v2264_v16, %v2175_v56  ;;  %v3849_v3 = vpop.f32.mrb[15].mxu0  ;;  %3982 = vmatprep.subr.bf16.mxu0 %v4459_v0 }
 0x5fc   :  { %3983 = vmatpush3.bf16.msra.mxu0 %v4210_v26 }
 0x5fd   :  { %3984 = vmatprep.subr.bf16.mxu0 %v4459_v0 }
 0x600   :  { %3985 = vmatpush3.bf16.msra.mxu0 %v4211_v2 }
 0x603   :  { %3987 = vmatmul.mubr.bf16.vlgmr.msra.gmra.mrb[40].mxu0 %v2978_v28 }
 0x616   :  { %v2376_v30 = vpop.f32.mrb[16].mxu0 }
 0x617   :  { %v2383_v10 = vadd.f32 %v2376_v30, %v2262_v18  ;;  %v3868_v9 = vpop.f32.mrb[17].mxu0 }
 0x618   :  { %v2379_v36 = vpop.f32.mrb[18].mxu0 }
 0x619   :  { %v2384_v32 = vadd.f32 %v2379_v36, %v2265_v4  ;;  %v3869_v1 = vpop.f32.mrb[19].mxu0 }
 0x636   :  { %v2493_v14 = vpop.f32.mrb[20].mxu0 }
 0x637   :  { %v2500_v50 = vadd.f32 %v2493_v14, %v2383_v10  ;;  %v3888_v59 = vpop.f32.mrb[21].mxu0 }
 0x638   :  { %v2496_v23 = vpop.f32.mrb[22].mxu0 }
 0x639   :  { %v2501_v33 = vadd.f32 %v2496_v23, %v2384_v32  ;;  %v3889_v27 = vpop.f32.mrb[23].mxu0 }
 0x656   :  { %v2610_v44 = vpop.f32.mrb[24].mxu0 }
 0x657   :  { %v2617_v29 = vadd.f32 %v2610_v44, %v2500_v50  ;;  %v3908_v0 = vpop.f32.mrb[25].mxu0 }
 0x658   :  { %v2613_v20 = vpop.f32.mrb[26].mxu0 }
 0x659   :  { %v2618_v60 = vadd.f32 %v2613_v20, %v2501_v33  ;;  %v3909_v62 = vpop.f32.mrb[27].mxu0 }
 0x65a   :  { %4401 = shalt.err (!%p4398_p4)
}
 0x65b   :  { %s4402_s15 = scalar_lea.hbm %s5400_s12, 256 }
 0x65c   :  { %p4403_p5 = scmp.ne.s32.totalorder %s5400_s12, %s4402_s15  ;;  %p4406_p6 = scmp.lt.u32.totalorder %s4402_s15, %s5400_s12 }
 0x65e   :  { %p4408_p7 = pnand %p4406_p6, %p4403_p5 }
 0x660   :  { %4411 = shalt.err (!%p4408_p7)
}
 0x661   :  { %3118 = dma.vmem_to_hbm [thread:$0]  %s3113_s1, 256, %s5400_s12, [#allocation16], %s4447_s13, %s4447_s13, %s4448_s14  }
 0x662   :  { %s4464_s12 = smov [#allocation14]  }
 0x663   :  { %s3100_s23 = sshll.u32 %s4464_s12, 4  ;;  %s3101_s23 = int_to_ptr.vmem [resolvable:$true] %s3100_s23 }
 0x664   :  { %s4412_s9 = scalar_lea.vmem %s3101_s23, 256  ;;  %p4417_p9 = scmp.lt.s32.totalorder %s3101_s23, %s3101_s23 }
 0x665   :  { %p4413_p8 = scmp.ne.s32.totalorder %s3101_s23, %s4412_s9  ;;  %p4418_p10 = scmp.lt.s32.totalorder %s4412_s9, %s4412_s9 }
 0x667   :  { %p4419_p11 = por %p4418_p10, %p4417_p9 }
 0x669   :  { %p4420_p12 = pnand %p4419_p11, %p4413_p8 }
 0x676   :  { %v2727_v52 = vpop.f32.mrb[28].mxu0 }
 0x677   :  { %v2734_v11 = vadd.f32 %v2727_v52, %v2617_v29  ;;  %v3928_v28 = vpop.f32.mrb[29].mxu0 }
 0x678   :  { %v2730_v15 = vpop.f32.mrb[30].mxu0 }
 0x679   :  { %v2735_v35 = vadd.f32 %v2730_v15, %v2618_v60  ;;  %v3929_v45 = vpop.f32.mrb[31].mxu0 }
 0x696   :  { %v2844_v57 = vpop.f32.mrb[32].mxu0 }
 0x697   :  { %v2851_v6 = vadd.f32 %v2844_v57, %v2734_v11  ;;  %v3948_v8 = vpop.f32.mrb[33].mxu0 }
 0x698   :  { %v2847_v7 = vpop.f32.mrb[34].mxu0 }
 0x699   :  { %v2852_v63 = vadd.f32 %v2847_v7, %v2735_v35  ;;  %v3949_v51 = vpop.f32.mrb[35].mxu0 }
 0x6b6   :  { %v2961_v5 = vpop.f32.mrb[36].mxu0 }
 0x6b7   :  { %v2968_v54 = vadd.f32 %v2961_v5, %v2851_v6  ;;  %v3968_v17 = vpop.f32.mrb[37].mxu0 }
 0x6b8   :  { %v2964_v24 = vpop.f32.mrb[38].mxu0 }
 0x6b9   :  { %v2969_v58 = vadd.f32 %v2964_v24, %v2852_v63  ;;  %v3969_v41 = vpop.f32.mrb[39].mxu0 }
 0x6d6   :  { %v3078_v22 = vpop.f32.mrb[40].mxu0 }
 0x6d7   :  { %v3085_v38 = vadd.f32 %v3078_v22, %v2968_v54  ;;  %v3988_v34 = vpop.f32.mrb[41].mxu0 }
 0x6d8   :  { %v3081_v55 = vpop.f32.mrb[42].mxu0 }
 0x6d9   :  { %v3087_v43 = vadd.f32 %v4707_v37, %v3085_v38  ;;  %v3086_v48 = vadd.f32 %v3081_v55, %v2969_v58  ;;  %v3989_v31 = vpop.f32.mrb[43].mxu0 }
 0x6db   :  { %4232 = vtanh.f32 %v3087_v43  ;;  %v3088_v25 = vadd.f32 %v4713_v40, %v3086_v48 }
 0x6dd   :  { %4234 = vtanh.f32 %v3088_v25 }
 0x6e5   :  { %v4233_v56 = vpop.eup %4232 }
 0x6e6   :  { %3091 = vst [vmem:[#allocation14] sm:$0xff] %v4233_v56 }
 0x6e7   :  { %v4235_v61 = vpop.eup %4234 }
 0x6e8   :  { %3092 = vst [vmem:[#allocation14 + $0x8] sm:$0xff] %v4235_v61 }
 0x6e9   :  { %4423 = shalt.err (!%p4420_p12)
}
 0x6ea   :  { %s4424_s27 = scalar_lea.hbm %s5399_s11, 256 }
 0x6eb   :  { %p4425_p13 = scmp.ne.s32.totalorder %s5399_s11, %s4424_s27  ;;  %p4428_p0 = scmp.lt.u32.totalorder %s4424_s27, %s5399_s11 }
 0x6ed   :  { %p4430_p1 = pnand %p4428_p0, %p4425_p13 }
 0x6ef   :  { %4433 = shalt.err (!%p4430_p1)
}
 0x6f0   :  { %3106 = dma.vmem_to_hbm [thread:$0]  %s3101_s23, 256, %s5399_s11, [#allocation4], %s4447_s13, %s4447_s13, %s4448_s14  }
 0x6f1   :  { %4442 = dma.done.wait [#allocation4], 256  }
 0x6f2   :  { %4443 = vsyncadd [#allocation4], 4294967040 }
 0x6f3   :  { %4444 = dma.done.wait [#allocation16], 256  }
 0x6f4   :  { %4445 = vsyncadd [#allocation16], 4294967040 }
 0x6f5   :  { %3125 = vsyncpa [#allocation3], 1 }
 0x6f6   :  { %3126 = vsyncpa [#allocation6], 1 }
 0x6f7   :  { %3127 = vsyncpa [#allocation9], 1 }
 0x6f8   :  { %3128 = vsyncpa [#allocation12], 1 }
 0x6f9   :  { %3129 = vsyncpa [#allocation4], 1 }
 0x6fa   :  { %3130 = vsyncpa [#allocation16], 1 }

</bundles_post_ra>
